<compile_context>
chip_gen: v7x
topology: tpu7x:2x2x1
jax: 0.10.0
libtpu: 0.0.40
codegen_flags: <defaults>
</compile_context>

<pallas_src>
import functools

import jax
import jax.numpy as jnp
from jax.experimental import pallas as pl
from jax.experimental.pallas import tpu as pltpu

default_cfg = {
    'VGG11': [64, 'M', 128, 'M', 256, 256, 'M', 512, 512, 'M', 512, 512, 'M'],
    'VGG13': [64, 64, 'M', 128, 128, 'M', 256, 256, 'M', 512, 512, 'M', 512, 512, 'M'],
    'VGG16': [64, 64, 'M', 128, 128, 'M', 256, 256, 256, 'M', 512, 512, 512, 'M',
              512, 512, 512, 'M'],
    'VGG19': [64, 64, 'M', 128, 128, 'M', 256, 256, 256, 256, 'M',
              512, 512, 512, 512, 'M', 512, 512, 512, 512, 'M'],
}

_BF = jnp.bfloat16
_COUT_TILE = 256

_CompilerParams = getattr(pltpu, "CompilerParams",
                          getattr(pltpu, "TPUCompilerParams", None))


def _round_up(x, m):
  return ((x + m - 1) // m) * m


_VMEM_CACHE = None


def _vmem_limit():
  """Chip-aware scoped-VMEM budget: ~48 MiB on v7x (64 MiB physical), ~96 MiB on
  v5e/v6e (128 MiB physical)."""
  global _VMEM_CACHE
  if _VMEM_CACHE is None:
    try:
      cap = int(pltpu.get_tpu_info().vmem_capacity_bytes)
    except Exception:
      cap = 64 * 1024 * 1024
    _VMEM_CACHE = (96 if cap >= 100 * 1024 * 1024 else 48) * 1024 * 1024
  return _VMEM_CACHE


def _cparams(dims, vmem):
  if _CompilerParams is None:
    return None
  return _CompilerParams(dimension_semantics=dims, vmem_limit_bytes=vmem)


# ---------------------------------------------------------------------------
# Pallas kernels
# ---------------------------------------------------------------------------

def _conv_kernel(x_ref, w_ref, b_ref, m_ref, o_ref, *, offsets, rows):
  """3x3 conv (BN-scale folded) + bias + ReLU on one image band.

  x_ref: (1, band_in, K) flat activation/patches for the band (row pitch P);
  w_ref: (T, K, Ct); b_ref: (1, Ct); m_ref: (rows, 1) column mask;
  o_ref: (1, rows, Ct).  Every tap is a statically-offset contiguous row slice.
  """
  ct = o_ref.shape[-1]
  acc = jnp.zeros((rows, ct), jnp.float32)
  for t, off in enumerate(offsets):
    acc = acc + jnp.dot(x_ref[0, off:off + rows, :], w_ref[t],
                        preferred_element_type=jnp.float32)
  y = jnp.maximum(acc + b_ref[...], 0.0) * m_ref[...]
  o_ref[0] = y.astype(o_ref.dtype)


def _conv_pool_kernel(xe_ref, xo_ref, w_ref, b_ref, m_ref, o_ref, *,
                      offsets, rb, ph):
  """Conv + bias + ReLU with the following 2x2/stride-2 max-pool fused in.

  xe_ref / xo_ref hold the patches of the even / odd output columns (pitch ph),
  so column pooling is an elementwise max of the two conv results; row pooling
  uses only layout-preserving reshapes (ph is a multiple of 16).
  o_ref: (1, (rb//2)*ph, Ct).
  """
  rows = rb * ph
  ct = o_ref.shape[-1]
  bias = b_ref[...]

  def stream(x_ref):
    acc = jnp.zeros((rows, ct), jnp.float32)
    for t, off in enumerate(offsets):
      acc = acc + jnp.dot(x_ref[0, off:off + rows, :], w_ref[t],
                          preferred_element_type=jnp.float32)
    return jnp.maximum(acc + bias, 0.0)

  colmax = jnp.maximum(stream(xe_ref), stream(xo_ref))          # (rb*ph, Ct)
  z = colmax.reshape(rb // 2, 2 * ph, ct)                       # layout-preserving
  rowmax = jnp.maximum(z[:, :ph, :], z[:, ph:, :]).reshape((rb // 2) * ph, ct)
  o_ref[0] = (rowmax * m_ref[...]).astype(o_ref.dtype)


def _maxpool_kernel(x_ref, o_ref):
  """2x2/stride-2 max pool; x_ref is (4, mt, C) holding the 4 window elements."""
  o_ref[...] = jnp.maximum(jnp.maximum(x_ref[0], x_ref[1]),
                           jnp.maximum(x_ref[2], x_ref[3]))


def _linear_kernel(x_ref, w_ref, b_ref, o_ref):
  """Classifier: (N, F) @ (F, Kpad) + (1, Kpad); Kpad is 128-lane padded."""
  o_ref[...] = (jnp.dot(x_ref[...], w_ref[...],
                        preferred_element_type=jnp.float32)
                + b_ref[...]).astype(o_ref.dtype)


# ---------------------------------------------------------------------------
# Wrapper-side layout plumbing (XLA only)
# ---------------------------------------------------------------------------

def _patches_full(xp, h, w, c0, s):
  """Full 3x3 im2col (small-Cin first-layer path): (N, H, w//s, 9*Cin)."""
  w_out = w // s
  parts = [xp[:, dy:dy + h, c0 + dx: c0 + dx + s * (w_out - 1) + 1: s, :]
           for dy in range(3) for dx in range(3)]
  return jnp.concatenate(parts, axis=-1)


def _patches_dx(xp, w, c0, s):
  """dx-fused patches (keeps all H+2 padded rows): (N, H+2, w//s, 3*Cin)."""
  w_out = w // s
  parts = [xp[:, :, c0 + dx: c0 + dx + s * (w_out - 1) + 1: s, :]
           for dx in range(3)]
  return jnp.concatenate(parts, axis=-1)


def _pitch_flatten(p4, pitch):
  """(N, R, w_out, K) -> (N, R*pitch, K): columns zero-padded to a 16-aligned pitch."""
  n, rws, w_out, k = p4.shape
  if pitch != w_out:
    p4 = jnp.pad(p4, ((0, 0), (0, 0), (0, pitch - w_out), (0, 0)))
  return p4.reshape(n, rws * pitch, k)


def _col_mask(rows, pitch, w_valid):
  """(rows, 1) f32 mask zeroing the pitch-padding garbage columns."""
  col = jnp.arange(rows, dtype=jnp.int32) % pitch
  return (col < w_valid).astype(jnp.float32).reshape(rows, 1)


def _bands(flat, nb, step, band_in):
  """Split (N, R, K) into nb overlapping horizontal bands -> (N*nb, band_in, K)."""
  n, r, k = flat.shape
  if nb == 1 and band_in == r:
    return flat
  parts = [flat[:, i * step: i * step + band_in, :] for i in range(nb)]
  return jnp.stack(parts, axis=1).reshape(n * nb, band_in, k)


def _pick_rb(h, pitch, in_bytes_row, acc_bytes_row, halo, budget_in, budget_acc,
             need_even):
  """Largest per-band image-row count dividing H that fits the VMEM budget."""
  cands = [rb for rb in range(1, h + 1)
           if h % rb == 0 and (not need_even or rb % 2 == 0)]
  fits = [rb for rb in cands
          if (rb + halo) * pitch * in_bytes_row <= budget_in
          and rb * pitch * acc_bytes_row <= budget_acc]
  return max(fits) if fits else min(cands)


def _row_tile(m, cap=2048):
  if m <= cap:
    return m
  for t in range(cap, 7, -1):
    if m % t == 0 and t % 8 == 0:
      return t
  return m


# ---------------------------------------------------------------------------
# Layer wrappers
# ---------------------------------------------------------------------------

def conv_bn_relu(x_nhwc, w_hwio, bn_scale, bn_bias, *, fuse_pool):
  """Conv3x3(s1,p1) + folded BN + ReLU (+ optional fused 2x2 max-pool).

  Returns (compact NHWC activation, pooled_flag).
  """
  n, h, w, cin = x_nhwc.shape
  cout = w_hwio.shape[-1]
  xb = x_nhwc.astype(_BF)
  w_folded = (w_hwio * bn_scale.reshape(1, 1, 1, cout)).astype(_BF)
  bias2 = bn_bias.reshape(1, cout).astype(jnp.float32)

  small_cin = cin * 9 <= 128
  ct = min(cout, _COUT_TILE)
  assert cout % ct == 0
  vmem = _vmem_limit()
  budget = vmem // 12                      # per-stream input block / f32 acc budget
  cparams = _cparams(("parallel", "parallel"), vmem)

  do_fuse = fuse_pool and h % 2 == 0 and w % 2 == 0 and cin < 256

  if do_fuse:
    ph = _round_up(w // 2, 16)
    xp = jnp.pad(xb, ((0, 0), (1, 1), (1, 1), (0, 0)))
    if small_cin:
      pe, po = _patches_full(xp, h, w, 0, 2), _patches_full(xp, h, w, 1, 2)
      w_taps = w_folded.reshape(1, 9 * cin, cout)
      offsets, halo, k_in = (0,), 0, 9 * cin
    else:
      pe, po = _patches_dx(xp, w, 0, 2), _patches_dx(xp, w, 1, 2)
      w_taps = w_folded.reshape(3, 3 * cin, cout)
      offsets, halo, k_in = (0, ph, 2 * ph), 2, 3 * cin
    ef, of_ = _pitch_flatten(pe, ph), _pitch_flatten(po, ph)
    rb = _pick_rb(h, ph, 2 * _round_up(k_in, 128), 4 * ct, halo,
                  budget, budget, need_even=True)
    nb = h // rb
    band_in, step = (rb + halo) * ph, rb * ph
    eb, ob = _bands(ef, nb, step, band_in), _bands(of_, nb, step, band_in)
    rows_out = (rb // 2) * ph
    mask = _col_mask(rows_out, ph, w // 2)
    kernel = functools.partial(_conv_pool_kernel, offsets=offsets, rb=rb, ph=ph)
    x_spec = pl.BlockSpec((1, band_in, k_in), lambda j, b: (b, 0, 0))
    out = pl.pallas_call(
        kernel,
        grid=(cout // ct, n * nb),
        in_specs=[x_spec, x_spec,
                  pl.BlockSpec((len(offsets), k_in, ct), lambda j, b: (0, 0, j)),
                  pl.BlockSpec((1, ct), lambda j, b: (0, j)),
                  pl.BlockSpec((rows_out, 1), lambda j, b: (0, 0))],
        out_specs=pl.BlockSpec((1, rows_out, ct), lambda j, b: (b, 0, j)),
        out_shape=jax.ShapeDtypeStruct((n * nb, rows_out, cout), _BF),
        compiler_params=cparams,
    )(eb, ob, w_taps, bias2, mask)
    out = out.reshape(n, h // 2, ph, cout)[:, :, : w // 2, :]
    return out, True

  # ----- unfused conv -----
  if small_cin:
    p = _round_up(w, 16)
    xp = jnp.pad(xb, ((0, 0), (1, 1), (1, 1), (0, 0)))
    flat = _pitch_flatten(_patches_full(xp, h, w, 0, 1), p)
    w_taps = w_folded.reshape(1, 9 * cin, cout)
    offsets, halo, extra, k_in = (0,), 0, 0, 9 * cin
  elif cin < 256:
    p = _round_up(w, 16)
    xp = jnp.pad(xb, ((0, 0), (1, 1), (1, 1), (0, 0)))
    flat = _pitch_flatten(_patches_dx(xp, w, 0, 1), p)
    w_taps = w_folded.reshape(3, 3 * cin, cout)
    offsets, halo, extra, k_in = (0, p, 2 * p), 2, 0, 3 * cin
  else:
    # Cin >= 256: no im2col duplication -- pass the padded activation once and
    # handle all 9 taps as row-offset K=Cin matmuls in-kernel.
    p = _round_up(w + 2, 16)
    xp = jnp.pad(xb, ((0, 0), (1, 2), (1, p - w - 1), (0, 0)))
    flat = xp.reshape(n, (h + 3) * p, cin)
    w_taps = w_folded.reshape(9, cin, cout)
    offsets = tuple(dy * p + dx for dy in range(3) for dx in range(3))
    halo, extra, k_in = 2, 2, cin

  rb = _pick_rb(h, p, 2 * _round_up(k_in, 128), 4 * ct, halo,
                budget, budget, need_even=False)
  nb = h // rb
  band_in, step = (rb + halo) * p + extra, rb * p
  xbands = _bands(flat, nb, step, band_in)
  rows_out = rb * p
  mask = _col_mask(rows_out, p, w)
  kernel = functools.partial(_conv_kernel, offsets=offsets, rows=rows_out)
  out = pl.pallas_call(
      kernel,
      grid=(cout // ct, n * nb),
      in_specs=[pl.BlockSpec((1, band_in, k_in), lambda j, b: (b, 0, 0)),
                pl.BlockSpec((len(offsets), k_in, ct), lambda j, b: (0, 0, j)),
                pl.BlockSpec((1, ct), lambda j, b: (0, j)),
                pl.BlockSpec((rows_out, 1), lambda j, b: (0, 0))],
      out_specs=pl.BlockSpec((1, rows_out, ct), lambda j, b: (b, 0, j)),
      out_shape=jax.ShapeDtypeStruct((n * nb, rows_out, cout), _BF),
      compiler_params=cparams,
  )(xbands, w_taps, bias2, mask)
  out = out.reshape(n, h, p, cout)[:, :, :w, :]
  return out, False


def maxpool2x2(x_nhwc):
  """Standalone tiled 2x2/stride-2 max pool (no transpose staging: four
  strided views are passed straight to an elementwise-max kernel)."""
  n, h, w, c = x_nhwc.shape
  assert h % 2 == 0 and w % 2 == 0
  ho, wo = h // 2, w // 2
  m = n * ho * wo
  views = [x_nhwc[:, dy::2, dx::2, :].reshape(m, c)
           for dy in (0, 1) for dx in (0, 1)]
  xr = jnp.stack(views, axis=0)                       # (4, m, c)
  mt = _row_tile(m)
  out = pl.pallas_call(
      _maxpool_kernel,
      grid=(m // mt,),
      in_specs=[pl.BlockSpec((4, mt, c), lambda i: (0, i, 0))],
      out_specs=pl.BlockSpec((mt, c), lambda i: (i, 0)),
      out_shape=jax.ShapeDtypeStruct((m, c), x_nhwc.dtype),
      compiler_params=_cparams(("parallel",), _vmem_limit()),
  )(xr)
  return out.reshape(n, ho, wo, c)


def linear(x, w, b):
  """Classifier head; output padded to 128 lanes for unmasked stores."""
  n = x.shape[0]
  k = w.shape[1]
  kp = _round_up(max(k, 128), 128)
  wp = jnp.pad(w.astype(_BF), ((0, 0), (0, kp - k)))
  bp = jnp.pad(b.astype(jnp.float32), (0, kp - k)).reshape(1, kp)
  out = pl.pallas_call(
      _linear_kernel,
      out_shape=jax.ShapeDtypeStruct((n, kp), jnp.float32),
  )(x.astype(_BF), wp, bp)
  return out[:, :k]


# ---------------------------------------------------------------------------
# Parameter init (deterministic, synthetic)
# ---------------------------------------------------------------------------

def init_vgg_params(key, cfg, num_classes=10):
  feats = []
  in_c = 3
  for v in cfg:
    if v == 'M':
      continue
    key, k1, k2, k3, k4, k5 = jax.random.split(key, 6)
    fan_in = in_c * 9
    feats.append(dict(
        w=jax.random.normal(k1, (3, 3, in_c, v), jnp.float32) * (2.0 / fan_in) ** 0.5,
        skeleton=jnp.ones((v, 3, 3), jnp.float32),   # FilterStripe.FilterSkeleton
        gamma=1.0 + 0.1 * jax.random.normal(k2, (v,), jnp.float32),
        beta=0.1 * jax.random.normal(k3, (v,), jnp.float32),
        running_mean=0.1 * jax.random.normal(k4, (v,), jnp.float32),
        running_var=1.0 + 0.1 * jax.random.uniform(k5, (v,), jnp.float32),
    ))
    in_c = v
  key, kw, kb = jax.random.split(key, 3)
  classifier = dict(
      w=jax.random.normal(kw, (512, num_classes), jnp.float32) * (1.0 / 512.0) ** 0.5,
      b=0.01 * jax.random.normal(kb, (num_classes,), jnp.float32),
  )
  return dict(features=feats, classifier=classifier)


# ---------------------------------------------------------------------------
# Forward pass (mirrors VGG.forward)
# ---------------------------------------------------------------------------

def vgg_forward(params, x_nchw, cfg):
  x = jnp.transpose(x_nchw, (0, 2, 3, 1)).astype(jnp.float32)   # NCHW -> NHWC
  eps = 1e-5
  li = 0
  i = 0
  while i < len(cfg):
    v = cfg[i]
    if v == 'M':
      x = maxpool2x2(x)
      i += 1
      continue
    p = params['features'][li]
    # FilterStripe: weight * FilterSkeleton ((Cout,3,3), ones at init)
    skel = jnp.transpose(p['skeleton'], (1, 2, 0))[:, :, None, :]  # (3,3,1,Cout)
    w_eff = p['w'] * skel
    scale = p['gamma'] / jnp.sqrt(p['running_var'] + eps)
    bias = p['beta'] - p['running_mean'] * scale
    next_is_pool = (i + 1 < len(cfg)) and cfg[i + 1] == 'M'
    x, pooled = conv_bn_relu(x, w_eff, scale, bias, fuse_pool=next_is_pool)
    li += 1
    i += 1
    if pooled:
      i += 1            # the following 'M' was fused into the conv epilogue
  # nn.AvgPool2d(kernel_size=1, stride=1) is the identity -> no-op.
  n = x.shape[0]
  x = jnp.transpose(x, (0, 3, 1, 2)).reshape(n, -1)   # flatten in NCHW order
  return linear(x, params['classifier']['w'], params['classifier']['b'])


if __name__ == "__main__":
  # Small VGG-style cfg (same structure as the defaults, scaled down).  The
  # last conv stage has 512 channels and the final spatial size is 1x1 so the
  # flattened feature size matches Linear(512, num_classes).  This cfg
  # exercises the fused-pool path (small & mid Cin), the unfused dx-fused
  # path, the Cin>=256 no-im2col path, the standalone pool and the classifier.
  cfg = [16, 'M', 32, 32, 'M', 256, 'M', 512, 'M']
  num_classes = 10

  key = jax.random.PRNGKey(0)
  key, kx = jax.random.split(key)
  x = jax.random.normal(kx, (2, 3, 16, 16), jnp.float32)   # NCHW, like PyTorch
  params = init_vgg_params(key, cfg, num_classes=num_classes)

  fwd = jax.jit(lambda p, xi: vgg_forward(p, xi, cfg))
  logits = jax.block_until_ready(fwd(params, x))

  assert logits.shape == (2, num_classes), logits.shape
  assert bool(jnp.all(jnp.isfinite(logits)))
  print("KERNEL_OK")
</pallas_src>

<mosaic_0001>
module attributes {stable_mosaic.version = 11 : i64} {
  func.func @_conv_pool_kernel(%arg0: i32, %arg1: i32, %arg2: memref<1x256x27xbf16, #tpu.memory_space<vmem>>, %arg3: memref<1x256x27xbf16, #tpu.memory_space<vmem>>, %arg4: memref<1x27x16xbf16, #tpu.memory_space<vmem>>, %arg5: memref<1x16xf32, #tpu.memory_space<vmem>>, %arg6: memref<128x1xf32, #tpu.memory_space<vmem>>, %arg7: memref<1x128x16xbf16, #tpu.memory_space<vmem>>) attributes {dimension_semantics = [#tpu.dimension_semantics<parallel>, #tpu.dimension_semantics<parallel>], iteration_bounds = array<i64: 1, 2>, scalar_prefetch = 0 : i64, scratch_operands = 0 : i64, tpu.core_type = #tpu.core_type<tc>, window_params = [{transform_indices = @transform_0, window_bounds = array<i64: 1, 256, 27>}, {transform_indices = @transform_1, window_bounds = array<i64: 1, 256, 27>}, {transform_indices = @transform_2, window_bounds = array<i64: 1, 27, 16>}, {transform_indices = @transform_3, window_bounds = array<i64: 1, 16>}, {pipeline_mode = #tpu.pipeline_mode<synchronous>, transform_indices = @transform_4, window_bounds = array<i64: 128, 1>}, {transform_indices = @transform_5, window_bounds = array<i64: 1, 128, 16>}]} {
    %c0 = arith.constant 0 : index
    %c0_0 = arith.constant 0 : index
    %0 = vector.load %arg5[%c0, %c0_0] : memref<1x16xf32, #tpu.memory_space<vmem>>, vector<1x16xf32>
    %cst = arith.constant 0.000000e+00 : f32
    %1 = vector.broadcast %cst : f32 to vector<256x16xf32>
    %c0_1 = arith.constant 0 : index
    %c0_2 = arith.constant 0 : index
    %c0_3 = arith.constant 0 : index
    %2 = vector.load %arg2[%c0_1, %c0_2, %c0_3] : memref<1x256x27xbf16, #tpu.memory_space<vmem>>, vector<1x256x27xbf16>
    %3 = vector.shape_cast %2 : vector<1x256x27xbf16> to vector<256x27xbf16>
    %c0_4 = arith.constant 0 : index
    %c0_5 = arith.constant 0 : index
    %c0_6 = arith.constant 0 : index
    %4 = vector.load %arg4[%c0_4, %c0_5, %c0_6] : memref<1x27x16xbf16, #tpu.memory_space<vmem>>, vector<1x27x16xbf16>
    %5 = vector.shape_cast %4 : vector<1x27x16xbf16> to vector<27x16xbf16>
    %cst_7 = arith.constant dense<0.000000e+00> : vector<256x16xf32>
    %6 = tpu.matmul %3, %5, %cst_7 {dimension_numbers = #tpu.dot_dimension_numbers<[1], [0], [0], [1], [0, 0, 1, 1], [], []>} : vector<256x27xbf16>, vector<27x16xbf16>, vector<256x16xf32> -> vector<256x16xf32>
    %7 = arith.addf %1, %6 : vector<256x16xf32>
    %8 = vector.broadcast %0 : vector<1x16xf32> to vector<256x16xf32>
    %9 = arith.addf %7, %8 : vector<256x16xf32>
    %cst_8 = arith.constant 0.000000e+00 : f32
    %10 = vector.broadcast %cst_8 : f32 to vector<256x16xf32>
    %11 = arith.maximumf %9, %10 : vector<256x16xf32>
    %cst_9 = arith.constant 0.000000e+00 : f32
    %12 = vector.broadcast %cst_9 : f32 to vector<256x16xf32>
    %c0_10 = arith.constant 0 : index
    %c0_11 = arith.constant 0 : index
    %c0_12 = arith.constant 0 : index
    %13 = vector.load %arg3[%c0_10, %c0_11, %c0_12] : memref<1x256x27xbf16, #tpu.memory_space<vmem>>, vector<1x256x27xbf16>
    %14 = vector.shape_cast %13 : vector<1x256x27xbf16> to vector<256x27xbf16>
    %c0_13 = arith.constant 0 : index
    %c0_14 = arith.constant 0 : index
    %c0_15 = arith.constant 0 : index
    %15 = vector.load %arg4[%c0_13, %c0_14, %c0_15] : memref<1x27x16xbf16, #tpu.memory_space<vmem>>, vector<1x27x16xbf16>
    %16 = vector.shape_cast %15 : vector<1x27x16xbf16> to vector<27x16xbf16>
    %cst_16 = arith.constant dense<0.000000e+00> : vector<256x16xf32>
    %17 = tpu.matmul %14, %16, %cst_16 {dimension_numbers = #tpu.dot_dimension_numbers<[1], [0], [0], [1], [0, 0, 1, 1], [], []>} : vector<256x27xbf16>, vector<27x16xbf16>, vector<256x16xf32> -> vector<256x16xf32>
    %18 = arith.addf %12, %17 : vector<256x16xf32>
    %19 = vector.broadcast %0 : vector<1x16xf32> to vector<256x16xf32>
    %20 = arith.addf %18, %19 : vector<256x16xf32>
    %cst_17 = arith.constant 0.000000e+00 : f32
    %21 = vector.broadcast %cst_17 : f32 to vector<256x16xf32>
    %22 = arith.maximumf %20, %21 : vector<256x16xf32>
    %23 = arith.maximumf %11, %22 : vector<256x16xf32>
    %24 = vector.shape_cast %23 : vector<256x16xf32> to vector<8x32x16xf32>
    %25 = vector.extract_strided_slice %24 {offsets = [0, 0, 0], sizes = [8, 16, 16], strides = [1, 1, 1]} : vector<8x32x16xf32> to vector<8x16x16xf32>
    %26 = vector.extract_strided_slice %24 {offsets = [0, 16, 0], sizes = [8, 16, 16], strides = [1, 1, 1]} : vector<8x32x16xf32> to vector<8x16x16xf32>
    %27 = arith.maximumf %25, %26 : vector<8x16x16xf32>
    %28 = vector.shape_cast %27 : vector<8x16x16xf32> to vector<128x16xf32>
    %c0_18 = arith.constant 0 : index
    %c0_19 = arith.constant 0 : index
    %29 = vector.load %arg6[%c0_18, %c0_19] : memref<128x1xf32, #tpu.memory_space<vmem>>, vector<128x1xf32>
    %30 = vector.broadcast %29 : vector<128x1xf32> to vector<128x16xf32>
    %31 = arith.mulf %28, %30 : vector<128x16xf32>
    %32 = arith.truncf %31 : vector<128x16xf32> to vector<128x16xbf16>
    %c0_20 = arith.constant 0 : index
    %c0_21 = arith.constant 0 : index
    %c0_22 = arith.constant 0 : index
    %33 = vector.load %arg7[%c0_20, %c0_21, %c0_22] : memref<1x128x16xbf16, #tpu.memory_space<vmem>>, vector<1x128x16xbf16>
    %34 = vector.shape_cast %33 : vector<1x128x16xbf16> to vector<128x16xbf16>
    %35 = vector.shape_cast %32 : vector<128x16xbf16> to vector<1x128x16xbf16>
    tpu.vector_store %arg7[%c0_20, %c0_21, %c0_22], %35 {strides = array<i32>} : memref<1x128x16xbf16, #tpu.memory_space<vmem>>, vector<1x128x16xbf16>,
    return
  }
  func.func @transform_0(%arg0: i32, %arg1: i32) -> (i32, i32, i32) {
    %c0_i32 = arith.constant 0 : i32
    %c0_i32_0 = arith.constant 0 : i32
    %c0_i32_1 = arith.constant 0 : i32
    return %arg1, %c0_i32, %c0_i32_0 : i32, i32, i32
  }
  func.func @transform_1(%arg0: i32, %arg1: i32) -> (i32, i32, i32) {
    %c0_i32 = arith.constant 0 : i32
    %c0_i32_0 = arith.constant 0 : i32
    %c0_i32_1 = arith.constant 0 : i32
    return %arg1, %c0_i32, %c0_i32_0 : i32, i32, i32
  }
  func.func @transform_2(%arg0: i32, %arg1: i32) -> (i32, i32, i32) {
    %c0_i32 = arith.constant 0 : i32
    %c0_i32_0 = arith.constant 0 : i32
    %c0_i32_1 = arith.constant 0 : i32
    return %c0_i32, %c0_i32_0, %arg0 : i32, i32, i32
  }
  func.func @transform_3(%arg0: i32, %arg1: i32) -> (i32, i32) {
    %c0_i32 = arith.constant 0 : i32
    %c0_i32_0 = arith.constant 0 : i32
    return %c0_i32, %arg0 : i32, i32
  }
  func.func @transform_4(%arg0: i32, %arg1: i32) -> (i32, i32) {
    %c0_i32 = arith.constant 0 : i32
    %c0_i32_0 = arith.constant 0 : i32
    %c0_i32_1 = arith.constant 0 : i32
    return %c0_i32, %c0_i32_0 : i32, i32
  }
  func.func @transform_5(%arg0: i32, %arg1: i32) -> (i32, i32, i32) {
    %c0_i32 = arith.constant 0 : i32
    %c0_i32_0 = arith.constant 0 : i32
    return %arg1, %c0_i32, %arg0 : i32, i32, i32
  }
}

module attributes {stable_mosaic.version = 11 : i64} {
  func.func @_conv_kernel(%arg0: i32, %arg1: i32, %arg2: memref<1x160x48xbf16, #tpu.memory_space<vmem>>, %arg3: memref<3x48x32xbf16, #tpu.memory_space<vmem>>, %arg4: memref<1x32xf32, #tpu.memory_space<vmem>>, %arg5: memref<128x1xf32, #tpu.memory_space<vmem>>, %arg6: memref<1x128x32xbf16, #tpu.memory_space<vmem>>) attributes {dimension_semantics = [#tpu.dimension_semantics<parallel>, #tpu.dimension_semantics<parallel>], iteration_bounds = array<i64: 1, 2>, scalar_prefetch = 0 : i64, scratch_operands = 0 : i64, tpu.core_type = #tpu.core_type<tc>, window_params = [{transform_indices = @transform_0, window_bounds = array<i64: 1, 160, 48>}, {transform_indices = @transform_1, window_bounds = array<i64: 3, 48, 32>}, {transform_indices = @transform_2, window_bounds = array<i64: 1, 32>}, {pipeline_mode = #tpu.pipeline_mode<synchronous>, transform_indices = @transform_3, window_bounds = array<i64: 128, 1>}, {transform_indices = @transform_4, window_bounds = array<i64: 1, 128, 32>}]} {
    %cst = arith.constant 0.000000e+00 : f32
    %0 = vector.broadcast %cst : f32 to vector<128x32xf32>
    %c0 = arith.constant 0 : index
    %c0_0 = arith.constant 0 : index
    %c0_1 = arith.constant 0 : index
    %1 = vector.load %arg2[%c0, %c0_0, %c0_1] : memref<1x160x48xbf16, #tpu.memory_space<vmem>>, vector<1x128x48xbf16>
    %2 = vector.shape_cast %1 : vector<1x128x48xbf16> to vector<128x48xbf16>
    %c0_2 = arith.constant 0 : index
    %c0_3 = arith.constant 0 : index
    %c0_4 = arith.constant 0 : index
    %3 = vector.load %arg3[%c0_2, %c0_3, %c0_4] : memref<3x48x32xbf16, #tpu.memory_space<vmem>>, vector<1x48x32xbf16>
    %4 = vector.shape_cast %3 : vector<1x48x32xbf16> to vector<48x32xbf16>
    %cst_5 = arith.constant dense<0.000000e+00> : vector<128x32xf32>
    %5 = tpu.matmul %2, %4, %cst_5 {dimension_numbers = #tpu.dot_dimension_numbers<[1], [0], [0], [1], [0, 0, 1, 1], [], []>} : vector<128x48xbf16>, vector<48x32xbf16>, vector<128x32xf32> -> vector<128x32xf32>
    %6 = arith.addf %0, %5 : vector<128x32xf32>
    %c0_6 = arith.constant 0 : index
    %c16 = arith.constant 16 : index
    %c0_7 = arith.constant 0 : index
    %7 = vector.load %arg2[%c0_6, %c16, %c0_7] : memref<1x160x48xbf16, #tpu.memory_space<vmem>>, vector<1x128x48xbf16>
    %8 = vector.shape_cast %7 : vector<1x128x48xbf16> to vector<128x48xbf16>
    %c1 = arith.constant 1 : index
    %c0_8 = arith.constant 0 : index
    %c0_9 = arith.constant 0 : index
    %9 = vector.load %arg3[%c1, %c0_8, %c0_9] : memref<3x48x32xbf16, #tpu.memory_space<vmem>>, vector<1x48x32xbf16>
    %10 = vector.shape_cast %9 : vector<1x48x32xbf16> to vector<48x32xbf16>
    %cst_10 = arith.constant dense<0.000000e+00> : vector<128x32xf32>
    %11 = tpu.matmul %8, %10, %cst_10 {dimension_numbers = #tpu.dot_dimension_numbers<[1], [0], [0], [1], [0, 0, 1, 1], [], []>} : vector<128x48xbf16>, vector<48x32xbf16>, vector<128x32xf32> -> vector<128x32xf32>
    %12 = arith.addf %6, %11 : vector<128x32xf32>
    %c0_11 = arith.constant 0 : index
    %c32 = arith.constant 32 : index
    %c0_12 = arith.constant 0 : index
    %13 = vector.load %arg2[%c0_11, %c32, %c0_12] : memref<1x160x48xbf16, #tpu.memory_space<vmem>>, vector<1x128x48xbf16>
    %14 = vector.shape_cast %13 : vector<1x128x48xbf16> to vector<128x48xbf16>
    %c2 = arith.constant 2 : index
    %c0_13 = arith.constant 0 : index
    %c0_14 = arith.constant 0 : index
    %15 = vector.load %arg3[%c2, %c0_13, %c0_14] : memref<3x48x32xbf16, #tpu.memory_space<vmem>>, vector<1x48x32xbf16>
    %16 = vector.shape_cast %15 : vector<1x48x32xbf16> to vector<48x32xbf16>
    %cst_15 = arith.constant dense<0.000000e+00> : vector<128x32xf32>
    %17 = tpu.matmul %14, %16, %cst_15 {dimension_numbers = #tpu.dot_dimension_numbers<[1], [0], [0], [1], [0, 0, 1, 1], [], []>} : vector<128x48xbf16>, vector<48x32xbf16>, vector<128x32xf32> -> vector<128x32xf32>
    %18 = arith.addf %12, %17 : vector<128x32xf32>
    %c0_16 = arith.constant 0 : index
    %c0_17 = arith.constant 0 : index
    %19 = vector.load %arg4[%c0_16, %c0_17] : memref<1x32xf32, #tpu.memory_space<vmem>>, vector<1x32xf32>
    %20 = vector.broadcast %19 : vector<1x32xf32> to vector<128x32xf32>
    %21 = arith.addf %18, %20 : vector<128x32xf32>
    %cst_18 = arith.constant 0.000000e+00 : f32
    %22 = vector.broadcast %cst_18 : f32 to vector<128x32xf32>
    %23 = arith.maximumf %21, %22 : vector<128x32xf32>
    %c0_19 = arith.constant 0 : index
    %c0_20 = arith.constant 0 : index
    %24 = vector.load %arg5[%c0_19, %c0_20] : memref<128x1xf32, #tpu.memory_space<vmem>>, vector<128x1xf32>
    %25 = vector.broadcast %24 : vector<128x1xf32> to vector<128x32xf32>
    %26 = arith.mulf %23, %25 : vector<128x32xf32>
    %27 = arith.truncf %26 : vector<128x32xf32> to vector<128x32xbf16>
    %c0_21 = arith.constant 0 : index
    %c0_22 = arith.constant 0 : index
    %c0_23 = arith.constant 0 : index
    %28 = vector.load %arg6[%c0_21, %c0_22, %c0_23] : memref<1x128x32xbf16, #tpu.memory_space<vmem>>, vector<1x128x32xbf16>
    %29 = vector.shape_cast %28 : vector<1x128x32xbf16> to vector<128x32xbf16>
    %30 = vector.shape_cast %27 : vector<128x32xbf16> to vector<1x128x32xbf16>
    tpu.vector_store %arg6[%c0_21, %c0_22, %c0_23], %30 {strides = array<i32>} : memref<1x128x32xbf16, #tpu.memory_space<vmem>>, vector<1x128x32xbf16>,
    return
  }
  func.func @transform_0(%arg0: i32, %arg1: i32) -> (i32, i32, i32) {
    %c0_i32 = arith.constant 0 : i32
    %c0_i32_0 = arith.constant 0 : i32
    %c0_i32_1 = arith.constant 0 : i32
    return %arg1, %c0_i32, %c0_i32_0 : i32, i32, i32
  }
  func.func @transform_1(%arg0: i32, %arg1: i32) -> (i32, i32, i32) {
    %c0_i32 = arith.constant 0 : i32
    %c0_i32_0 = arith.constant 0 : i32
    %c0_i32_1 = arith.constant 0 : i32
    return %c0_i32, %c0_i32_0, %arg0 : i32, i32, i32
  }
  func.func @transform_2(%arg0: i32, %arg1: i32) -> (i32, i32) {
    %c0_i32 = arith.constant 0 : i32
    %c0_i32_0 = arith.constant 0 : i32
    return %c0_i32, %arg0 : i32, i32
  }
  func.func @transform_3(%arg0: i32, %arg1: i32) -> (i32, i32) {
    %c0_i32 = arith.constant 0 : i32
    %c0_i32_0 = arith.constant 0 : i32
    %c0_i32_1 = arith.constant 0 : i32
    return %c0_i32, %c0_i32_0 : i32, i32
  }
  func.func @transform_4(%arg0: i32, %arg1: i32) -> (i32, i32, i32) {
    %c0_i32 = arith.constant 0 : i32
    %c0_i32_0 = arith.constant 0 : i32
    return %arg1, %c0_i32, %arg0 : i32, i32, i32
  }
}

module attributes {stable_mosaic.version = 11 : i64} {
  func.func @_conv_pool_kernel(%arg0: i32, %arg1: i32, %arg2: memref<1x160x96xbf16, #tpu.memory_space<vmem>>, %arg3: memref<1x160x96xbf16, #tpu.memory_space<vmem>>, %arg4: memref<3x96x32xbf16, #tpu.memory_space<vmem>>, %arg5: memref<1x32xf32, #tpu.memory_space<vmem>>, %arg6: memref<64x1xf32, #tpu.memory_space<vmem>>, %arg7: memref<1x64x32xbf16, #tpu.memory_space<vmem>>) attributes {dimension_semantics = [#tpu.dimension_semantics<parallel>, #tpu.dimension_semantics<parallel>], iteration_bounds = array<i64: 1, 2>, scalar_prefetch = 0 : i64, scratch_operands = 0 : i64, tpu.core_type = #tpu.core_type<tc>, window_params = [{transform_indices = @transform_0, window_bounds = array<i64: 1, 160, 96>}, {transform_indices = @transform_1, window_bounds = array<i64: 1, 160, 96>}, {transform_indices = @transform_2, window_bounds = array<i64: 3, 96, 32>}, {transform_indices = @transform_3, window_bounds = array<i64: 1, 32>}, {pipeline_mode = #tpu.pipeline_mode<synchronous>, transform_indices = @transform_4, window_bounds = array<i64: 64, 1>}, {transform_indices = @transform_5, window_bounds = array<i64: 1, 64, 32>}]} {
    %c0 = arith.constant 0 : index
    %c0_0 = arith.constant 0 : index
    %0 = vector.load %arg5[%c0, %c0_0] : memref<1x32xf32, #tpu.memory_space<vmem>>, vector<1x32xf32>
    %cst = arith.constant 0.000000e+00 : f32
    %1 = vector.broadcast %cst : f32 to vector<128x32xf32>
    %c0_1 = arith.constant 0 : index
    %c0_2 = arith.constant 0 : index
    %c0_3 = arith.constant 0 : index
    %2 = vector.load %arg2[%c0_1, %c0_2, %c0_3] : memref<1x160x96xbf16, #tpu.memory_space<vmem>>, vector<1x128x96xbf16>
    %3 = vector.shape_cast %2 : vector<1x128x96xbf16> to vector<128x96xbf16>
    %c0_4 = arith.constant 0 : index
    %c0_5 = arith.constant 0 : index
    %c0_6 = arith.constant 0 : index
    %4 = vector.load %arg4[%c0_4, %c0_5, %c0_6] : memref<3x96x32xbf16, #tpu.memory_space<vmem>>, vector<1x96x32xbf16>
    %5 = vector.shape_cast %4 : vector<1x96x32xbf16> to vector<96x32xbf16>
    %cst_7 = arith.constant dense<0.000000e+00> : vector<128x32xf32>
    %6 = tpu.matmul %3, %5, %cst_7 {dimension_numbers = #tpu.dot_dimension_numbers<[1], [0], [0], [1], [0, 0, 1, 1], [], []>} : vector<128x96xbf16>, vector<96x32xbf16>, vector<128x32xf32> -> vector<128x32xf32>
    %7 = arith.addf %1, %6 : vector<128x32xf32>
    %c0_8 = arith.constant 0 : index
    %c16 = arith.constant 16 : index
    %c0_9 = arith.constant 0 : index
    %8 = vector.load %arg2[%c0_8, %c16, %c0_9] : memref<1x160x96xbf16, #tpu.memory_space<vmem>>, vector<1x128x96xbf16>
    %9 = vector.shape_cast %8 : vector<1x128x96xbf16> to vector<128x96xbf16>
    %c1 = arith.constant 1 : index
    %c0_10 = arith.constant 0 : index
    %c0_11 = arith.constant 0 : index
    %10 = vector.load %arg4[%c1, %c0_10, %c0_11] : memref<3x96x32xbf16, #tpu.memory_space<vmem>>, vector<1x96x32xbf16>
    %11 = vector.shape_cast %10 : vector<1x96x32xbf16> to vector<96x32xbf16>
    %cst_12 = arith.constant dense<0.000000e+00> : vector<128x32xf32>
    %12 = tpu.matmul %9, %11, %cst_12 {dimension_numbers = #tpu.dot_dimension_numbers<[1], [0], [0], [1], [0, 0, 1, 1], [], []>} : vector<128x96xbf16>, vector<96x32xbf16>, vector<128x32xf32> -> vector<128x32xf32>
    %13 = arith.addf %7, %12 : vector<128x32xf32>
    %c0_13 = arith.constant 0 : index
    %c32 = arith.constant 32 : index
    %c0_14 = arith.constant 0 : index
    %14 = vector.load %arg2[%c0_13, %c32, %c0_14] : memref<1x160x96xbf16, #tpu.memory_space<vmem>>, vector<1x128x96xbf16>
    %15 = vector.shape_cast %14 : vector<1x128x96xbf16> to vector<128x96xbf16>
    %c2 = arith.constant 2 : index
    %c0_15 = arith.constant 0 : index
    %c0_16 = arith.constant 0 : index
    %16 = vector.load %arg4[%c2, %c0_15, %c0_16] : memref<3x96x32xbf16, #tpu.memory_space<vmem>>, vector<1x96x32xbf16>
    %17 = vector.shape_cast %16 : vector<1x96x32xbf16> to vector<96x32xbf16>
    %cst_17 = arith.constant dense<0.000000e+00> : vector<128x32xf32>
    %18 = tpu.matmul %15, %17, %cst_17 {dimension_numbers = #tpu.dot_dimension_numbers<[1], [0], [0], [1], [0, 0, 1, 1], [], []>} : vector<128x96xbf16>, vector<96x32xbf16>, vector<128x32xf32> -> vector<128x32xf32>
    %19 = arith.addf %13, %18 : vector<128x32xf32>
    %20 = vector.broadcast %0 : vector<1x32xf32> to vector<128x32xf32>
    %21 = arith.addf %19, %20 : vector<128x32xf32>
    %cst_18 = arith.constant 0.000000e+00 : f32
    %22 = vector.broadcast %cst_18 : f32 to vector<128x32xf32>
    %23 = arith.maximumf %21, %22 : vector<128x32xf32>
    %cst_19 = arith.constant 0.000000e+00 : f32
    %24 = vector.broadcast %cst_19 : f32 to vector<128x32xf32>
    %c0_20 = arith.constant 0 : index
    %c0_21 = arith.constant 0 : index
    %c0_22 = arith.constant 0 : index
    %25 = vector.load %arg3[%c0_20, %c0_21, %c0_22] : memref<1x160x96xbf16, #tpu.memory_space<vmem>>, vector<1x128x96xbf16>
    %26 = vector.shape_cast %25 : vector<1x128x96xbf16> to vector<128x96xbf16>
    %c0_23 = arith.constant 0 : index
    %c0_24 = arith.constant 0 : index
    %c0_25 = arith.constant 0 : index
    %27 = vector.load %arg4[%c0_23, %c0_24, %c0_25] : memref<3x96x32xbf16, #tpu.memory_space<vmem>>, vector<1x96x32xbf16>
    %28 = vector.shape_cast %27 : vector<1x96x32xbf16> to vector<96x32xbf16>
    %cst_26 = arith.constant dense<0.000000e+00> : vector<128x32xf32>
    %29 = tpu.matmul %26, %28, %cst_26 {dimension_numbers = #tpu.dot_dimension_numbers<[1], [0], [0], [1], [0, 0, 1, 1], [], []>} : vector<128x96xbf16>, vector<96x32xbf16>, vector<128x32xf32> -> vector<128x32xf32>
    %30 = arith.addf %24, %29 : vector<128x32xf32>
    %c0_27 = arith.constant 0 : index
    %c16_28 = arith.constant 16 : index
    %c0_29 = arith.constant 0 : index
    %31 = vector.load %arg3[%c0_27, %c16_28, %c0_29] : memref<1x160x96xbf16, #tpu.memory_space<vmem>>, vector<1x128x96xbf16>
    %32 = vector.shape_cast %31 : vector<1x128x96xbf16> to vector<128x96xbf16>
    %c1_30 = arith.constant 1 : index
    %c0_31 = arith.constant 0 : index
    %c0_32 = arith.constant 0 : index
    %33 = vector.load %arg4[%c1_30, %c0_31, %c0_32] : memref<3x96x32xbf16, #tpu.memory_space<vmem>>, vector<1x96x32xbf16>
    %34 = vector.shape_cast %33 : vector<1x96x32xbf16> to vector<96x32xbf16>
    %cst_33 = arith.constant dense<0.000000e+00> : vector<128x32xf32>
    %35 = tpu.matmul %32, %34, %cst_33 {dimension_numbers = #tpu.dot_dimension_numbers<[1], [0], [0], [1], [0, 0, 1, 1], [], []>} : vector<128x96xbf16>, vector<96x32xbf16>, vector<128x32xf32> -> vector<128x32xf32>
    %36 = arith.addf %30, %35 : vector<128x32xf32>
    %c0_34 = arith.constant 0 : index
    %c32_35 = arith.constant 32 : index
    %c0_36 = arith.constant 0 : index
    %37 = vector.load %arg3[%c0_34, %c32_35, %c0_36] : memref<1x160x96xbf16, #tpu.memory_space<vmem>>, vector<1x128x96xbf16>
    %38 = vector.shape_cast %37 : vector<1x128x96xbf16> to vector<128x96xbf16>
    %c2_37 = arith.constant 2 : index
    %c0_38 = arith.constant 0 : index
    %c0_39 = arith.constant 0 : index
    %39 = vector.load %arg4[%c2_37, %c0_38, %c0_39] : memref<3x96x32xbf16, #tpu.memory_space<vmem>>, vector<1x96x32xbf16>
    %40 = vector.shape_cast %39 : vector<1x96x32xbf16> to vector<96x32xbf16>
    %cst_40 = arith.constant dense<0.000000e+00> : vector<128x32xf32>
    %41 = tpu.matmul %38, %40, %cst_40 {dimension_numbers = #tpu.dot_dimension_numbers<[1], [0], [0], [1], [0, 0, 1, 1], [], []>} : vector<128x96xbf16>, vector<96x32xbf16>, vector<128x32xf32> -> vector<128x32xf32>
    %42 = arith.addf %36, %41 : vector<128x32xf32>
    %43 = vector.broadcast %0 : vector<1x32xf32> to vector<128x32xf32>
    %44 = arith.addf %42, %43 : vector<128x32xf32>
    %cst_41 = arith.constant 0.000000e+00 : f32
    %45 = vector.broadcast %cst_41 : f32 to vector<128x32xf32>
    %46 = arith.maximumf %44, %45 : vector<128x32xf32>
    %47 = arith.maximumf %23, %46 : vector<128x32xf32>
    %48 = vector.shape_cast %47 : vector<128x32xf32> to vector<4x32x32xf32>
    %49 = vector.extract_strided_slice %48 {offsets = [0, 0, 0], sizes = [4, 16, 32], strides = [1, 1, 1]} : vector<4x32x32xf32> to vector<4x16x32xf32>
    %50 = vector.extract_strided_slice %48 {offsets = [0, 16, 0], sizes = [4, 16, 32], strides = [1, 1, 1]} : vector<4x32x32xf32> to vector<4x16x32xf32>
    %51 = arith.maximumf %49, %50 : vector<4x16x32xf32>
    %52 = vector.shape_cast %51 : vector<4x16x32xf32> to vector<64x32xf32>
    %c0_42 = arith.constant 0 : index
    %c0_43 = arith.constant 0 : index
    %53 = vector.load %arg6[%c0_42, %c0_43] : memref<64x1xf32, #tpu.memory_space<vmem>>, vector<64x1xf32>
    %54 = vector.broadcast %53 : vector<64x1xf32> to vector<64x32xf32>
    %55 = arith.mulf %52, %54 : vector<64x32xf32>
    %56 = arith.truncf %55 : vector<64x32xf32> to vector<64x32xbf16>
    %c0_44 = arith.constant 0 : index
    %c0_45 = arith.constant 0 : index
    %c0_46 = arith.constant 0 : index
    %57 = vector.load %arg7[%c0_44, %c0_45, %c0_46] : memref<1x64x32xbf16, #tpu.memory_space<vmem>>, vector<1x64x32xbf16>
    %58 = vector.shape_cast %57 : vector<1x64x32xbf16> to vector<64x32xbf16>
    %59 = vector.shape_cast %56 : vector<64x32xbf16> to vector<1x64x32xbf16>
    tpu.vector_store %arg7[%c0_44, %c0_45, %c0_46], %59 {strides = array<i32>} : memref<1x64x32xbf16, #tpu.memory_space<vmem>>, vector<1x64x32xbf16>,
    return
  }
  func.func @transform_0(%arg0: i32, %arg1: i32) -> (i32, i32, i32) {
    %c0_i32 = arith.constant 0 : i32
    %c0_i32_0 = arith.constant 0 : i32
    %c0_i32_1 = arith.constant 0 : i32
    return %arg1, %c0_i32, %c0_i32_0 : i32, i32, i32
  }
  func.func @transform_1(%arg0: i32, %arg1: i32) -> (i32, i32, i32) {
    %c0_i32 = arith.constant 0 : i32
    %c0_i32_0 = arith.constant 0 : i32
    %c0_i32_1 = arith.constant 0 : i32
    return %arg1, %c0_i32, %c0_i32_0 : i32, i32, i32
  }
  func.func @transform_2(%arg0: i32, %arg1: i32) -> (i32, i32, i32) {
    %c0_i32 = arith.constant 0 : i32
    %c0_i32_0 = arith.constant 0 : i32
    %c0_i32_1 = arith.constant 0 : i32
    return %c0_i32, %c0_i32_0, %arg0 : i32, i32, i32
  }
  func.func @transform_3(%arg0: i32, %arg1: i32) -> (i32, i32) {
    %c0_i32 = arith.constant 0 : i32
    %c0_i32_0 = arith.constant 0 : i32
    return %c0_i32, %arg0 : i32, i32
  }
  func.func @transform_4(%arg0: i32, %arg1: i32) -> (i32, i32) {
    %c0_i32 = arith.constant 0 : i32
    %c0_i32_0 = arith.constant 0 : i32
    %c0_i32_1 = arith.constant 0 : i32
    return %c0_i32, %c0_i32_0 : i32, i32
  }
  func.func @transform_5(%arg0: i32, %arg1: i32) -> (i32, i32, i32) {
    %c0_i32 = arith.constant 0 : i32
    %c0_i32_0 = arith.constant 0 : i32
    return %arg1, %c0_i32, %arg0 : i32, i32, i32
  }
}

module attributes {stable_mosaic.version = 11 : i64} {
  func.func @_conv_pool_kernel(%arg0: i32, %arg1: i32, %arg2: memref<1x96x96xbf16, #tpu.memory_space<vmem>>, %arg3: memref<1x96x96xbf16, #tpu.memory_space<vmem>>, %arg4: memref<3x96x256xbf16, #tpu.memory_space<vmem>>, %arg5: memref<1x256xf32, #tpu.memory_space<vmem>>, %arg6: memref<32x1xf32, #tpu.memory_space<vmem>>, %arg7: memref<1x32x256xbf16, #tpu.memory_space<vmem>>) attributes {dimension_semantics = [#tpu.dimension_semantics<parallel>, #tpu.dimension_semantics<parallel>], iteration_bounds = array<i64: 1, 2>, scalar_prefetch = 0 : i64, scratch_operands = 0 : i64, tpu.core_type = #tpu.core_type<tc>, window_params = [{transform_indices = @transform_0, window_bounds = array<i64: 1, 96, 96>}, {transform_indices = @transform_1, window_bounds = array<i64: 1, 96, 96>}, {transform_indices = @transform_2, window_bounds = array<i64: 3, 96, 256>}, {transform_indices = @transform_3, window_bounds = array<i64: 1, 256>}, {pipeline_mode = #tpu.pipeline_mode<synchronous>, transform_indices = @transform_4, window_bounds = array<i64: 32, 1>}, {transform_indices = @transform_5, window_bounds = array<i64: 1, 32, 256>}]} {
    %c0 = arith.constant 0 : index
    %c0_0 = arith.constant 0 : index
    %0 = vector.load %arg5[%c0, %c0_0] : memref<1x256xf32, #tpu.memory_space<vmem>>, vector<1x256xf32>
    %cst = arith.constant 0.000000e+00 : f32
    %1 = vector.broadcast %cst : f32 to vector<64x256xf32>
    %c0_1 = arith.constant 0 : index
    %c0_2 = arith.constant 0 : index
    %c0_3 = arith.constant 0 : index
    %2 = vector.load %arg2[%c0_1, %c0_2, %c0_3] : memref<1x96x96xbf16, #tpu.memory_space<vmem>>, vector<1x64x96xbf16>
    %3 = vector.shape_cast %2 : vector<1x64x96xbf16> to vector<64x96xbf16>
    %c0_4 = arith.constant 0 : index
    %c0_5 = arith.constant 0 : index
    %c0_6 = arith.constant 0 : index
    %4 = vector.load %arg4[%c0_4, %c0_5, %c0_6] : memref<3x96x256xbf16, #tpu.memory_space<vmem>>, vector<1x96x256xbf16>
    %5 = vector.shape_cast %4 : vector<1x96x256xbf16> to vector<96x256xbf16>
    %cst_7 = arith.constant dense<0.000000e+00> : vector<64x256xf32>
    %6 = tpu.matmul %3, %5, %cst_7 {dimension_numbers = #tpu.dot_dimension_numbers<[1], [0], [0], [1], [0, 0, 1, 1], [], []>} : vector<64x96xbf16>, vector<96x256xbf16>, vector<64x256xf32> -> vector<64x256xf32>
    %7 = arith.addf %1, %6 : vector<64x256xf32>
    %c0_8 = arith.constant 0 : index
    %c16 = arith.constant 16 : index
    %c0_9 = arith.constant 0 : index
    %8 = vector.load %arg2[%c0_8, %c16, %c0_9] : memref<1x96x96xbf16, #tpu.memory_space<vmem>>, vector<1x64x96xbf16>
    %9 = vector.shape_cast %8 : vector<1x64x96xbf16> to vector<64x96xbf16>
    %c1 = arith.constant 1 : index
    %c0_10 = arith.constant 0 : index
    %c0_11 = arith.constant 0 : index
    %10 = vector.load %arg4[%c1, %c0_10, %c0_11] : memref<3x96x256xbf16, #tpu.memory_space<vmem>>, vector<1x96x256xbf16>
    %11 = vector.shape_cast %10 : vector<1x96x256xbf16> to vector<96x256xbf16>
    %cst_12 = arith.constant dense<0.000000e+00> : vector<64x256xf32>
    %12 = tpu.matmul %9, %11, %cst_12 {dimension_numbers = #tpu.dot_dimension_numbers<[1], [0], [0], [1], [0, 0, 1, 1], [], []>} : vector<64x96xbf16>, vector<96x256xbf16>, vector<64x256xf32> -> vector<64x256xf32>
    %13 = arith.addf %7, %12 : vector<64x256xf32>
    %c0_13 = arith.constant 0 : index
    %c32 = arith.constant 32 : index
    %c0_14 = arith.constant 0 : index
    %14 = vector.load %arg2[%c0_13, %c32, %c0_14] : memref<1x96x96xbf16, #tpu.memory_space<vmem>>, vector<1x64x96xbf16>
    %15 = vector.shape_cast %14 : vector<1x64x96xbf16> to vector<64x96xbf16>
    %c2 = arith.constant 2 : index
    %c0_15 = arith.constant 0 : index
    %c0_16 = arith.constant 0 : index
    %16 = vector.load %arg4[%c2, %c0_15, %c0_16] : memref<3x96x256xbf16, #tpu.memory_space<vmem>>, vector<1x96x256xbf16>
    %17 = vector.shape_cast %16 : vector<1x96x256xbf16> to vector<96x256xbf16>
    %cst_17 = arith.constant dense<0.000000e+00> : vector<64x256xf32>
    %18 = tpu.matmul %15, %17, %cst_17 {dimension_numbers = #tpu.dot_dimension_numbers<[1], [0], [0], [1], [0, 0, 1, 1], [], []>} : vector<64x96xbf16>, vector<96x256xbf16>, vector<64x256xf32> -> vector<64x256xf32>
    %19 = arith.addf %13, %18 : vector<64x256xf32>
    %20 = vector.broadcast %0 : vector<1x256xf32> to vector<64x256xf32>
    %21 = arith.addf %19, %20 : vector<64x256xf32>
    %cst_18 = arith.constant 0.000000e+00 : f32
    %22 = vector.broadcast %cst_18 : f32 to vector<64x256xf32>
    %23 = arith.maximumf %21, %22 : vector<64x256xf32>
    %cst_19 = arith.constant 0.000000e+00 : f32
    %24 = vector.broadcast %cst_19 : f32 to vector<64x256xf32>
    %c0_20 = arith.constant 0 : index
    %c0_21 = arith.constant 0 : index
    %c0_22 = arith.constant 0 : index
    %25 = vector.load %arg3[%c0_20, %c0_21, %c0_22] : memref<1x96x96xbf16, #tpu.memory_space<vmem>>, vector<1x64x96xbf16>
    %26 = vector.shape_cast %25 : vector<1x64x96xbf16> to vector<64x96xbf16>
    %c0_23 = arith.constant 0 : index
    %c0_24 = arith.constant 0 : index
    %c0_25 = arith.constant 0 : index
    %27 = vector.load %arg4[%c0_23, %c0_24, %c0_25] : memref<3x96x256xbf16, #tpu.memory_space<vmem>>, vector<1x96x256xbf16>
    %28 = vector.shape_cast %27 : vector<1x96x256xbf16> to vector<96x256xbf16>
    %cst_26 = arith.constant dense<0.000000e+00> : vector<64x256xf32>
    %29 = tpu.matmul %26, %28, %cst_26 {dimension_numbers = #tpu.dot_dimension_numbers<[1], [0], [0], [1], [0, 0, 1, 1], [], []>} : vector<64x96xbf16>, vector<96x256xbf16>, vector<64x256xf32> -> vector<64x256xf32>
    %30 = arith.addf %24, %29 : vector<64x256xf32>
    %c0_27 = arith.constant 0 : index
    %c16_28 = arith.constant 16 : index
    %c0_29 = arith.constant 0 : index
    %31 = vector.load %arg3[%c0_27, %c16_28, %c0_29] : memref<1x96x96xbf16, #tpu.memory_space<vmem>>, vector<1x64x96xbf16>
    %32 = vector.shape_cast %31 : vector<1x64x96xbf16> to vector<64x96xbf16>
    %c1_30 = arith.constant 1 : index
    %c0_31 = arith.constant 0 : index
    %c0_32 = arith.constant 0 : index
    %33 = vector.load %arg4[%c1_30, %c0_31, %c0_32] : memref<3x96x256xbf16, #tpu.memory_space<vmem>>, vector<1x96x256xbf16>
    %34 = vector.shape_cast %33 : vector<1x96x256xbf16> to vector<96x256xbf16>
    %cst_33 = arith.constant dense<0.000000e+00> : vector<64x256xf32>
    %35 = tpu.matmul %32, %34, %cst_33 {dimension_numbers = #tpu.dot_dimension_numbers<[1], [0], [0], [1], [0, 0, 1, 1], [], []>} : vector<64x96xbf16>, vector<96x256xbf16>, vector<64x256xf32> -> vector<64x256xf32>
    %36 = arith.addf %30, %35 : vector<64x256xf32>
    %c0_34 = arith.constant 0 : index
    %c32_35 = arith.constant 32 : index
    %c0_36 = arith.constant 0 : index
    %37 = vector.load %arg3[%c0_34, %c32_35, %c0_36] : memref<1x96x96xbf16, #tpu.memory_space<vmem>>, vector<1x64x96xbf16>
    %38 = vector.shape_cast %37 : vector<1x64x96xbf16> to vector<64x96xbf16>
    %c2_37 = arith.constant 2 : index
    %c0_38 = arith.constant 0 : index
    %c0_39 = arith.constant 0 : index
    %39 = vector.load %arg4[%c2_37, %c0_38, %c0_39] : memref<3x96x256xbf16, #tpu.memory_space<vmem>>, vector<1x96x256xbf16>
    %40 = vector.shape_cast %39 : vector<1x96x256xbf16> to vector<96x256xbf16>
    %cst_40 = arith.constant dense<0.000000e+00> : vector<64x256xf32>
    %41 = tpu.matmul %38, %40, %cst_40 {dimension_numbers = #tpu.dot_dimension_numbers<[1], [0], [0], [1], [0, 0, 1, 1], [], []>} : vector<64x96xbf16>, vector<96x256xbf16>, vector<64x256xf32> -> vector<64x256xf32>
    %42 = arith.addf %36, %41 : vector<64x256xf32>
    %43 = vector.broadcast %0 : vector<1x256xf32> to vector<64x256xf32>
    %44 = arith.addf %42, %43 : vector<64x256xf32>
    %cst_41 = arith.constant 0.000000e+00 : f32
    %45 = vector.broadcast %cst_41 : f32 to vector<64x256xf32>
    %46 = arith.maximumf %44, %45 : vector<64x256xf32>
    %47 = arith.maximumf %23, %46 : vector<64x256xf32>
    %48 = vector.shape_cast %47 : vector<64x256xf32> to vector<2x32x256xf32>
    %49 = vector.extract_strided_slice %48 {offsets = [0, 0, 0], sizes = [2, 16, 256], strides = [1, 1, 1]} : vector<2x32x256xf32> to vector<2x16x256xf32>
    %50 = vector.extract_strided_slice %48 {offsets = [0, 16, 0], sizes = [2, 16, 256], strides = [1, 1, 1]} : vector<2x32x256xf32> to vector<2x16x256xf32>
    %51 = arith.maximumf %49, %50 : vector<2x16x256xf32>
    %52 = vector.shape_cast %51 : vector<2x16x256xf32> to vector<32x256xf32>
    %c0_42 = arith.constant 0 : index
    %c0_43 = arith.constant 0 : index
    %53 = vector.load %arg6[%c0_42, %c0_43] : memref<32x1xf32, #tpu.memory_space<vmem>>, vector<32x1xf32>
    %54 = vector.broadcast %53 : vector<32x1xf32> to vector<32x256xf32>
    %55 = arith.mulf %52, %54 : vector<32x256xf32>
    %56 = arith.truncf %55 : vector<32x256xf32> to vector<32x256xbf16>
    %c0_44 = arith.constant 0 : index
    %c0_45 = arith.constant 0 : index
    %c0_46 = arith.constant 0 : index
    %57 = vector.load %arg7[%c0_44, %c0_45, %c0_46] : memref<1x32x256xbf16, #tpu.memory_space<vmem>>, vector<1x32x256xbf16>
    %58 = vector.shape_cast %57 : vector<1x32x256xbf16> to vector<32x256xbf16>
    %59 = vector.shape_cast %56 : vector<32x256xbf16> to vector<1x32x256xbf16>
    tpu.vector_store %arg7[%c0_44, %c0_45, %c0_46], %59 {strides = array<i32>} : memref<1x32x256xbf16, #tpu.memory_space<vmem>>, vector<1x32x256xbf16>,
    return
  }
  func.func @transform_0(%arg0: i32, %arg1: i32) -> (i32, i32, i32) {
    %c0_i32 = arith.constant 0 : i32
    %c0_i32_0 = arith.constant 0 : i32
    %c0_i32_1 = arith.constant 0 : i32
    return %arg1, %c0_i32, %c0_i32_0 : i32, i32, i32
  }
  func.func @transform_1(%arg0: i32, %arg1: i32) -> (i32, i32, i32) {
    %c0_i32 = arith.constant 0 : i32
    %c0_i32_0 = arith.constant 0 : i32
    %c0_i32_1 = arith.constant 0 : i32
    return %arg1, %c0_i32, %c0_i32_0 : i32, i32, i32
  }
  func.func @transform_2(%arg0: i32, %arg1: i32) -> (i32, i32, i32) {
    %c0_i32 = arith.constant 0 : i32
    %c0_i32_0 = arith.constant 0 : i32
    %c0_i32_1 = arith.constant 0 : i32
    return %c0_i32, %c0_i32_0, %arg0 : i32, i32, i32
  }
  func.func @transform_3(%arg0: i32, %arg1: i32) -> (i32, i32) {
    %c0_i32 = arith.constant 0 : i32
    %c0_i32_0 = arith.constant 0 : i32
    return %c0_i32, %arg0 : i32, i32
  }
  func.func @transform_4(%arg0: i32, %arg1: i32) -> (i32, i32) {
    %c0_i32 = arith.constant 0 : i32
    %c0_i32_0 = arith.constant 0 : i32
    %c0_i32_1 = arith.constant 0 : i32
    return %c0_i32, %c0_i32_0 : i32, i32
  }
  func.func @transform_5(%arg0: i32, %arg1: i32) -> (i32, i32, i32) {
    %c0_i32 = arith.constant 0 : i32
    %c0_i32_0 = arith.constant 0 : i32
    return %arg1, %c0_i32, %arg0 : i32, i32, i32
  }
}

module attributes {stable_mosaic.version = 11 : i64} {
  func.func @_conv_kernel(%arg0: i32, %arg1: i32, %arg2: memref<1x66x256xbf16, #tpu.memory_space<vmem>>, %arg3: memref<9x256x256xbf16, #tpu.memory_space<vmem>>, %arg4: memref<1x256xf32, #tpu.memory_space<vmem>>, %arg5: memref<32x1xf32, #tpu.memory_space<vmem>>, %arg6: memref<1x32x256xbf16, #tpu.memory_space<vmem>>) attributes {dimension_semantics = [#tpu.dimension_semantics<parallel>, #tpu.dimension_semantics<parallel>], iteration_bounds = array<i64: 2, 2>, scalar_prefetch = 0 : i64, scratch_operands = 0 : i64, tpu.core_type = #tpu.core_type<tc>, window_params = [{transform_indices = @transform_0, window_bounds = array<i64: 1, 66, 256>}, {transform_indices = @transform_1, window_bounds = array<i64: 9, 256, 256>}, {transform_indices = @transform_2, window_bounds = array<i64: 1, 256>}, {pipeline_mode = #tpu.pipeline_mode<synchronous>, transform_indices = @transform_3, window_bounds = array<i64: 32, 1>}, {transform_indices = @transform_4, window_bounds = array<i64: 1, 32, 256>}]} {
    %cst = arith.constant 0.000000e+00 : f32
    %0 = vector.broadcast %cst : f32 to vector<32x256xf32>
    %c0 = arith.constant 0 : index
    %c0_0 = arith.constant 0 : index
    %c0_1 = arith.constant 0 : index
    %1 = vector.load %arg2[%c0, %c0_0, %c0_1] : memref<1x66x256xbf16, #tpu.memory_space<vmem>>, vector<1x32x256xbf16>
    %2 = vector.shape_cast %1 : vector<1x32x256xbf16> to vector<32x256xbf16>
    %c0_2 = arith.constant 0 : index
    %c0_3 = arith.constant 0 : index
    %c0_4 = arith.constant 0 : index
    %3 = vector.load %arg3[%c0_2, %c0_3, %c0_4] : memref<9x256x256xbf16, #tpu.memory_space<vmem>>, vector<1x256x256xbf16>
    %4 = vector.shape_cast %3 : vector<1x256x256xbf16> to vector<256x256xbf16>
    %cst_5 = arith.constant dense<0.000000e+00> : vector<32x256xf32>
    %5 = tpu.matmul %2, %4, %cst_5 {dimension_numbers = #tpu.dot_dimension_numbers<[1], [0], [0], [1], [0, 0, 1, 1], [], []>} : vector<32x256xbf16>, vector<256x256xbf16>, vector<32x256xf32> -> vector<32x256xf32>
    %6 = arith.addf %0, %5 : vector<32x256xf32>
    %c0_6 = arith.constant 0 : index
    %c1 = arith.constant 1 : index
    %c0_7 = arith.constant 0 : index
    %7 = vector.load %arg2[%c0_6, %c1, %c0_7] : memref<1x66x256xbf16, #tpu.memory_space<vmem>>, vector<1x32x256xbf16>
    %8 = vector.shape_cast %7 : vector<1x32x256xbf16> to vector<32x256xbf16>
    %c1_8 = arith.constant 1 : index
    %c0_9 = arith.constant 0 : index
    %c0_10 = arith.constant 0 : index
    %9 = vector.load %arg3[%c1_8, %c0_9, %c0_10] : memref<9x256x256xbf16, #tpu.memory_space<vmem>>, vector<1x256x256xbf16>
    %10 = vector.shape_cast %9 : vector<1x256x256xbf16> to vector<256x256xbf16>
    %cst_11 = arith.constant dense<0.000000e+00> : vector<32x256xf32>
    %11 = tpu.matmul %8, %10, %cst_11 {dimension_numbers = #tpu.dot_dimension_numbers<[1], [0], [0], [1], [0, 0, 1, 1], [], []>} : vector<32x256xbf16>, vector<256x256xbf16>, vector<32x256xf32> -> vector<32x256xf32>
    %12 = arith.addf %6, %11 : vector<32x256xf32>
    %c0_12 = arith.constant 0 : index
    %c2 = arith.constant 2 : index
    %c0_13 = arith.constant 0 : index
    %13 = vector.load %arg2[%c0_12, %c2, %c0_13] : memref<1x66x256xbf16, #tpu.memory_space<vmem>>, vector<1x32x256xbf16>
    %14 = vector.shape_cast %13 : vector<1x32x256xbf16> to vector<32x256xbf16>
    %c2_14 = arith.constant 2 : index
    %c0_15 = arith.constant 0 : index
    %c0_16 = arith.constant 0 : index
    %15 = vector.load %arg3[%c2_14, %c0_15, %c0_16] : memref<9x256x256xbf16, #tpu.memory_space<vmem>>, vector<1x256x256xbf16>
    %16 = vector.shape_cast %15 : vector<1x256x256xbf16> to vector<256x256xbf16>
    %cst_17 = arith.constant dense<0.000000e+00> : vector<32x256xf32>
    %17 = tpu.matmul %14, %16, %cst_17 {dimension_numbers = #tpu.dot_dimension_numbers<[1], [0], [0], [1], [0, 0, 1, 1], [], []>} : vector<32x256xbf16>, vector<256x256xbf16>, vector<32x256xf32> -> vector<32x256xf32>
    %18 = arith.addf %12, %17 : vector<32x256xf32>
    %c0_18 = arith.constant 0 : index
    %c16 = arith.constant 16 : index
    %c0_19 = arith.constant 0 : index
    %19 = vector.load %arg2[%c0_18, %c16, %c0_19] : memref<1x66x256xbf16, #tpu.memory_space<vmem>>, vector<1x32x256xbf16>
    %20 = vector.shape_cast %19 : vector<1x32x256xbf16> to vector<32x256xbf16>
    %c3 = arith.constant 3 : index
    %c0_20 = arith.constant 0 : index
    %c0_21 = arith.constant 0 : index
    %21 = vector.load %arg3[%c3, %c0_20, %c0_21] : memref<9x256x256xbf16, #tpu.memory_space<vmem>>, vector<1x256x256xbf16>
    %22 = vector.shape_cast %21 : vector<1x256x256xbf16> to vector<256x256xbf16>
    %cst_22 = arith.constant dense<0.000000e+00> : vector<32x256xf32>
    %23 = tpu.matmul %20, %22, %cst_22 {dimension_numbers = #tpu.dot_dimension_numbers<[1], [0], [0], [1], [0, 0, 1, 1], [], []>} : vector<32x256xbf16>, vector<256x256xbf16>, vector<32x256xf32> -> vector<32x256xf32>
    %24 = arith.addf %18, %23 : vector<32x256xf32>
    %c0_23 = arith.constant 0 : index
    %c17 = arith.constant 17 : index
    %c0_24 = arith.constant 0 : index
    %25 = vector.load %arg2[%c0_23, %c17, %c0_24] : memref<1x66x256xbf16, #tpu.memory_space<vmem>>, vector<1x32x256xbf16>
    %26 = vector.shape_cast %25 : vector<1x32x256xbf16> to vector<32x256xbf16>
    %c4 = arith.constant 4 : index
    %c0_25 = arith.constant 0 : index
    %c0_26 = arith.constant 0 : index
    %27 = vector.load %arg3[%c4, %c0_25, %c0_26] : memref<9x256x256xbf16, #tpu.memory_space<vmem>>, vector<1x256x256xbf16>
    %28 = vector.shape_cast %27 : vector<1x256x256xbf16> to vector<256x256xbf16>
    %cst_27 = arith.constant dense<0.000000e+00> : vector<32x256xf32>
    %29 = tpu.matmul %26, %28, %cst_27 {dimension_numbers = #tpu.dot_dimension_numbers<[1], [0], [0], [1], [0, 0, 1, 1], [], []>} : vector<32x256xbf16>, vector<256x256xbf16>, vector<32x256xf32> -> vector<32x256xf32>
    %30 = arith.addf %24, %29 : vector<32x256xf32>
    %c0_28 = arith.constant 0 : index
    %c18 = arith.constant 18 : index
    %c0_29 = arith.constant 0 : index
    %31 = vector.load %arg2[%c0_28, %c18, %c0_29] : memref<1x66x256xbf16, #tpu.memory_space<vmem>>, vector<1x32x256xbf16>
    %32 = vector.shape_cast %31 : vector<1x32x256xbf16> to vector<32x256xbf16>
    %c5 = arith.constant 5 : index
    %c0_30 = arith.constant 0 : index
    %c0_31 = arith.constant 0 : index
    %33 = vector.load %arg3[%c5, %c0_30, %c0_31] : memref<9x256x256xbf16, #tpu.memory_space<vmem>>, vector<1x256x256xbf16>
    %34 = vector.shape_cast %33 : vector<1x256x256xbf16> to vector<256x256xbf16>
    %cst_32 = arith.constant dense<0.000000e+00> : vector<32x256xf32>
    %35 = tpu.matmul %32, %34, %cst_32 {dimension_numbers = #tpu.dot_dimension_numbers<[1], [0], [0], [1], [0, 0, 1, 1], [], []>} : vector<32x256xbf16>, vector<256x256xbf16>, vector<32x256xf32> -> vector<32x256xf32>
    %36 = arith.addf %30, %35 : vector<32x256xf32>
    %c0_33 = arith.constant 0 : index
    %c32 = arith.constant 32 : index
    %c0_34 = arith.constant 0 : index
    %37 = vector.load %arg2[%c0_33, %c32, %c0_34] : memref<1x66x256xbf16, #tpu.memory_space<vmem>>, vector<1x32x256xbf16>
    %38 = vector.shape_cast %37 : vector<1x32x256xbf16> to vector<32x256xbf16>
    %c6 = arith.constant 6 : index
    %c0_35 = arith.constant 0 : index
    %c0_36 = arith.constant 0 : index
    %39 = vector.load %arg3[%c6, %c0_35, %c0_36] : memref<9x256x256xbf16, #tpu.memory_space<vmem>>, vector<1x256x256xbf16>
    %40 = vector.shape_cast %39 : vector<1x256x256xbf16> to vector<256x256xbf16>
    %cst_37 = arith.constant dense<0.000000e+00> : vector<32x256xf32>
    %41 = tpu.matmul %38, %40, %cst_37 {dimension_numbers = #tpu.dot_dimension_numbers<[1], [0], [0], [1], [0, 0, 1, 1], [], []>} : vector<32x256xbf16>, vector<256x256xbf16>, vector<32x256xf32> -> vector<32x256xf32>
    %42 = arith.addf %36, %41 : vector<32x256xf32>
    %c0_38 = arith.constant 0 : index
    %c33 = arith.constant 33 : index
    %c0_39 = arith.constant 0 : index
    %43 = vector.load %arg2[%c0_38, %c33, %c0_39] : memref<1x66x256xbf16, #tpu.memory_space<vmem>>, vector<1x32x256xbf16>
    %44 = vector.shape_cast %43 : vector<1x32x256xbf16> to vector<32x256xbf16>
    %c7 = arith.constant 7 : index
    %c0_40 = arith.constant 0 : index
    %c0_41 = arith.constant 0 : index
    %45 = vector.load %arg3[%c7, %c0_40, %c0_41] : memref<9x256x256xbf16, #tpu.memory_space<vmem>>, vector<1x256x256xbf16>
    %46 = vector.shape_cast %45 : vector<1x256x256xbf16> to vector<256x256xbf16>
    %cst_42 = arith.constant dense<0.000000e+00> : vector<32x256xf32>
    %47 = tpu.matmul %44, %46, %cst_42 {dimension_numbers = #tpu.dot_dimension_numbers<[1], [0], [0], [1], [0, 0, 1, 1], [], []>} : vector<32x256xbf16>, vector<256x256xbf16>, vector<32x256xf32> -> vector<32x256xf32>
    %48 = arith.addf %42, %47 : vector<32x256xf32>
    %c0_43 = arith.constant 0 : index
    %c34 = arith.constant 34 : index
    %c0_44 = arith.constant 0 : index
    %49 = vector.load %arg2[%c0_43, %c34, %c0_44] : memref<1x66x256xbf16, #tpu.memory_space<vmem>>, vector<1x32x256xbf16>
    %50 = vector.shape_cast %49 : vector<1x32x256xbf16> to vector<32x256xbf16>
    %c8 = arith.constant 8 : index
    %c0_45 = arith.constant 0 : index
    %c0_46 = arith.constant 0 : index
    %51 = vector.load %arg3[%c8, %c0_45, %c0_46] : memref<9x256x256xbf16, #tpu.memory_space<vmem>>, vector<1x256x256xbf16>
    %52 = vector.shape_cast %51 : vector<1x256x256xbf16> to vector<256x256xbf16>
    %cst_47 = arith.constant dense<0.000000e+00> : vector<32x256xf32>
    %53 = tpu.matmul %50, %52, %cst_47 {dimension_numbers = #tpu.dot_dimension_numbers<[1], [0], [0], [1], [0, 0, 1, 1], [], []>} : vector<32x256xbf16>, vector<256x256xbf16>, vector<32x256xf32> -> vector<32x256xf32>
    %54 = arith.addf %48, %53 : vector<32x256xf32>
    %c0_48 = arith.constant 0 : index
    %c0_49 = arith.constant 0 : index
    %55 = vector.load %arg4[%c0_48, %c0_49] : memref<1x256xf32, #tpu.memory_space<vmem>>, vector<1x256xf32>
    %56 = vector.broadcast %55 : vector<1x256xf32> to vector<32x256xf32>
    %57 = arith.addf %54, %56 : vector<32x256xf32>
    %cst_50 = arith.constant 0.000000e+00 : f32
    %58 = vector.broadcast %cst_50 : f32 to vector<32x256xf32>
    %59 = arith.maximumf %57, %58 : vector<32x256xf32>
    %c0_51 = arith.constant 0 : index
    %c0_52 = arith.constant 0 : index
    %60 = vector.load %arg5[%c0_51, %c0_52] : memref<32x1xf32, #tpu.memory_space<vmem>>, vector<32x1xf32>
    %61 = vector.broadcast %60 : vector<32x1xf32> to vector<32x256xf32>
    %62 = arith.mulf %59, %61 : vector<32x256xf32>
    %63 = arith.truncf %62 : vector<32x256xf32> to vector<32x256xbf16>
    %c0_53 = arith.constant 0 : index
    %c0_54 = arith.constant 0 : index
    %c0_55 = arith.constant 0 : index
    %64 = vector.load %arg6[%c0_53, %c0_54, %c0_55] : memref<1x32x256xbf16, #tpu.memory_space<vmem>>, vector<1x32x256xbf16>
    %65 = vector.shape_cast %64 : vector<1x32x256xbf16> to vector<32x256xbf16>
    %66 = vector.shape_cast %63 : vector<32x256xbf16> to vector<1x32x256xbf16>
    tpu.vector_store %arg6[%c0_53, %c0_54, %c0_55], %66 {strides = array<i32>} : memref<1x32x256xbf16, #tpu.memory_space<vmem>>, vector<1x32x256xbf16>,
    return
  }
  func.func @transform_0(%arg0: i32, %arg1: i32) -> (i32, i32, i32) {
    %c0_i32 = arith.constant 0 : i32
    %c0_i32_0 = arith.constant 0 : i32
    %c0_i32_1 = arith.constant 0 : i32
    return %arg1, %c0_i32, %c0_i32_0 : i32, i32, i32
  }
  func.func @transform_1(%arg0: i32, %arg1: i32) -> (i32, i32, i32) {
    %c0_i32 = arith.constant 0 : i32
    %c0_i32_0 = arith.constant 0 : i32
    %c0_i32_1 = arith.constant 0 : i32
    return %c0_i32, %c0_i32_0, %arg0 : i32, i32, i32
  }
  func.func @transform_2(%arg0: i32, %arg1: i32) -> (i32, i32) {
    %c0_i32 = arith.constant 0 : i32
    %c0_i32_0 = arith.constant 0 : i32
    return %c0_i32, %arg0 : i32, i32
  }
  func.func @transform_3(%arg0: i32, %arg1: i32) -> (i32, i32) {
    %c0_i32 = arith.constant 0 : i32
    %c0_i32_0 = arith.constant 0 : i32
    %c0_i32_1 = arith.constant 0 : i32
    return %c0_i32, %c0_i32_0 : i32, i32
  }
  func.func @transform_4(%arg0: i32, %arg1: i32) -> (i32, i32, i32) {
    %c0_i32 = arith.constant 0 : i32
    %c0_i32_0 = arith.constant 0 : i32
    return %arg1, %c0_i32, %arg0 : i32, i32, i32
  }
}

module attributes {stable_mosaic.version = 11 : i64} {
  func.func @_maxpool_kernel(%arg0: i32, %arg1: memref<4x2x512xbf16, #tpu.memory_space<vmem>>, %arg2: memref<2x512xbf16, #tpu.memory_space<vmem>>) attributes {dimension_semantics = [#tpu.dimension_semantics<parallel>], iteration_bounds = array<i64: 1>, scalar_prefetch = 0 : i64, scratch_operands = 0 : i64, tpu.core_type = #tpu.core_type<tc>, window_params = [{transform_indices = @transform_0, window_bounds = array<i64: 4, 2, 512>}, {transform_indices = @transform_1, window_bounds = array<i64: 2, 512>}]} {
    %c0 = arith.constant 0 : index
    %c0_0 = arith.constant 0 : index
    %c0_1 = arith.constant 0 : index
    %0 = vector.load %arg1[%c0, %c0_0, %c0_1] : memref<4x2x512xbf16, #tpu.memory_space<vmem>>, vector<1x2x512xbf16>
    %1 = vector.shape_cast %0 : vector<1x2x512xbf16> to vector<2x512xbf16>
    %c1 = arith.constant 1 : index
    %c0_2 = arith.constant 0 : index
    %c0_3 = arith.constant 0 : index
    %2 = vector.load %arg1[%c1, %c0_2, %c0_3] : memref<4x2x512xbf16, #tpu.memory_space<vmem>>, vector<1x2x512xbf16>
    %3 = vector.shape_cast %2 : vector<1x2x512xbf16> to vector<2x512xbf16>
    %4 = arith.maximumf %1, %3 : vector<2x512xbf16>
    %c2 = arith.constant 2 : index
    %c0_4 = arith.constant 0 : index
    %c0_5 = arith.constant 0 : index
    %5 = vector.load %arg1[%c2, %c0_4, %c0_5] : memref<4x2x512xbf16, #tpu.memory_space<vmem>>, vector<1x2x512xbf16>
    %6 = vector.shape_cast %5 : vector<1x2x512xbf16> to vector<2x512xbf16>
    %c3 = arith.constant 3 : index
    %c0_6 = arith.constant 0 : index
    %c0_7 = arith.constant 0 : index
    %7 = vector.load %arg1[%c3, %c0_6, %c0_7] : memref<4x2x512xbf16, #tpu.memory_space<vmem>>, vector<1x2x512xbf16>
    %8 = vector.shape_cast %7 : vector<1x2x512xbf16> to vector<2x512xbf16>
    %9 = arith.maximumf %6, %8 : vector<2x512xbf16>
    %10 = arith.maximumf %4, %9 : vector<2x512xbf16>
    %c0_8 = arith.constant 0 : index
    %c0_9 = arith.constant 0 : index
    %11 = vector.load %arg2[%c0_8, %c0_9] : memref<2x512xbf16, #tpu.memory_space<vmem>>, vector<2x512xbf16>
    tpu.vector_store %arg2[%c0_8, %c0_9], %10 {strides = array<i32>} : memref<2x512xbf16, #tpu.memory_space<vmem>>, vector<2x512xbf16>,
    return
  }
  func.func @transform_0(%arg0: i32) -> (i32, i32, i32) {
    %c0_i32 = arith.constant 0 : i32
    %c0_i32_0 = arith.constant 0 : i32
    %c0_i32_1 = arith.constant 0 : i32
    return %c0_i32, %arg0, %c0_i32_0 : i32, i32, i32
  }
  func.func @transform_1(%arg0: i32) -> (i32, i32) {
    %c0_i32 = arith.constant 0 : i32
    %c0_i32_0 = arith.constant 0 : i32
    return %arg0, %c0_i32 : i32, i32
  }
}

module attributes {stable_mosaic.version = 11 : i64} {
  func.func @_linear_kernel(%arg0: memref<2x512xbf16, #tpu.memory_space<vmem>>, %arg1: memref<512x128xbf16, #tpu.memory_space<vmem>>, %arg2: memref<1x128xf32, #tpu.memory_space<vmem>>, %arg3: memref<2x128xf32, #tpu.memory_space<vmem>>) attributes {dimension_semantics = [], scalar_prefetch = 0 : i64, scratch_operands = 0 : i64, tpu.core_type = #tpu.core_type<tc>} {
    %c0 = arith.constant 0 : index
    %c0_0 = arith.constant 0 : index
    %0 = vector.load %arg0[%c0, %c0_0] : memref<2x512xbf16, #tpu.memory_space<vmem>>, vector<2x512xbf16>
    %c0_1 = arith.constant 0 : index
    %c0_2 = arith.constant 0 : index
    %1 = vector.load %arg1[%c0_1, %c0_2] : memref<512x128xbf16, #tpu.memory_space<vmem>>, vector<512x128xbf16>
    %cst = arith.constant dense<0.000000e+00> : vector<2x128xf32>
    %2 = tpu.matmul %0, %1, %cst {dimension_numbers = #tpu.dot_dimension_numbers<[1], [0], [0], [1], [0, 0, 1, 1], [], []>} : vector<2x512xbf16>, vector<512x128xbf16>, vector<2x128xf32> -> vector<2x128xf32>
    %c0_3 = arith.constant 0 : index
    %c0_4 = arith.constant 0 : index
    %3 = vector.load %arg2[%c0_3, %c0_4] : memref<1x128xf32, #tpu.memory_space<vmem>>, vector<1x128xf32>
    %4 = vector.broadcast %3 : vector<1x128xf32> to vector<2x128xf32>
    %5 = arith.addf %2, %4 : vector<2x128xf32>
    %c0_5 = arith.constant 0 : index
    %c0_6 = arith.constant 0 : index
    %6 = vector.load %arg3[%c0_5, %c0_6] : memref<2x128xf32, #tpu.memory_space<vmem>>, vector<2x128xf32>
    tpu.vector_store %arg3[%c0_5, %c0_6], %5 {strides = array<i32>} : memref<2x128xf32, #tpu.memory_space<vmem>>, vector<2x128xf32>,
    return
  }
}

</mosaic_0001>

<bundles_post_ra>
// kernel: _lambda_.7
= control target key start
LH: loop header
LB: loop body
LE: loop exit
PB: predicated region body
PF: predicated region fallthrough
CT: control target
= control target key end

     0   :  { %s1734_s18 = smov 0   ;;  %s1736_s19 = smov 0   ;;  %s1999_s0 = inlined_call_operand.vmem [shape: bf16[2,256,27], index: 0, kind: input, shape index: {}]   ;;  %s2000_s1 = inlined_call_operand.vmem [shape: bf16[2,256,27], index: 1, kind: input, shape index: {}]   ;;  %s2001_s2 = inlined_call_operand.vmem [shape: bf16[1,27,16], index: 2, kind: input, shape index: {}]   ;;  %s2002_s3 = inlined_call_operand.vmem [shape: f32[1,16], index: 3, kind: input, shape index: {}]   ;;  %s2003_s4 = inlined_call_operand.vmem [shape: f32[128,1], index: 4, kind: input, shape index: {}]   ;;  %s2004_s5 = inlined_call_operand.vmem [shape: bf16[2,128,16], index: 5, kind: output, shape index: {}]  }
   0x1   :  { %s1738_s20 = smov 0  }
   0x2 LB: > { %s24_s21 = sadd.s32 1, %s1696_s19  ;;  %p1397_p0 = scmp.ge.s32.totalorder %s1700_s20, 1  ;;  %s1700_s20 = sphi %s1738_s20, %s15_s20   ;;  %s1696_s19 = sphi %s1736_s19, %s2006_s19   ;;  %s1692_s18 = sphi %s1734_s18, %s2005_s18  }
   0x3   : > { %p25_p1 = scmp.ge.s32.totalorder %s24_s21, 2  ;;  %p228_p2 = scmp.lt.s32.totalorder %s1700_s20, 3 }
   0x5   : > { %s2008_s21 = smov (%p25_p1, %s24_s21), 0  ;;  %p229_p3 = pnand %p1397_p0, %p228_p2 }
   0x6   : > { %v1644_v0 = vld [vmem:[%s2001_s2] sm:$0xff] (!%p229_p3)   ;;  %vm480_vm0 = vcmask (!%p229_p3), 1044480   ;;  %v1645_v1 = vld [vmem:[%s2001_s2 + $0x8] sm:$0x3f] (!%p229_p3)   ;;  %vm481_vm1 = vcmask (!%p229_p3), 1045504   ;;  %p271_p4 = scmp.lt.s32.totalorder (!%p229_p3), %s1692_s18, 1 }
   0x7   : > { %232 = sbr.rel (%p229_p3) target bundleno = 305 (0x131), region = 40  ;;  %1544 = vmatprep.subr.bf16.mxu0 (!%p229_p3), %v1644_v0  ;;  %1580 = vmatprep.subr.bf16.mxu1 (!%p229_p3), %v1644_v0  ;;  %v1081_v2 = vld [vmem:[%s2003_s4] sm:$0xff] (!%p229_p3)  ;;  %v1702_v3 = vmov (!%p229_p3), 65535   ;;  %v1083_v5 = vld [vmem:[%s2003_s4 + $0x10] sm:$0xff] (!%p229_p3)  ;;  %v1703_v7 = vmov (!%p229_p3), 0   ;;  %v1082_v9 = vld [vmem:[%s2003_s4 + $0x8] sm:$0xff] (!%p229_p3) }
   0x8   : > { %1545 = vmatpush3.bf16.msra.mxu0 (!%p229_p3), %v1644_v0  ;;  %1581 = vmatpush3.bf16.msra.mxu1 (!%p229_p3), %v1644_v0  ;;  %v482_v4 = vsel (!%p229_p3), %vm480_vm0, 4294967295, %v1702_v3  ;;  %v1084_v10 = vld [vmem:[%s2003_s4 + $0x18] sm:$0xff] (!%p229_p3)  ;;  %vm431_vm2 = vcmask (!%p229_p3), 220160   ;;  %v1086_v12 = vld [vmem:[%s2003_s4 + $0x28] sm:$0xff] (!%p229_p3)  ;;  %v1085_v14 = vld [vmem:[%s2003_s4 + $0x20] sm:$0xff] (!%p229_p3)  ;;  %vm1257_vm3 = vcmask (!%p229_p3), 125952  }
   0x9   : > { %v483_v6 = vsel (!%p229_p3), %vm481_vm1, %v482_v4, 0  ;;  %1642 = vset.pattern.permute.xlu0 (!%p229_p3), %v1703_v7  ;;  %1643 = vset.pattern.permute.xlu1 (!%p229_p3), %v1703_v7  ;;  %v1088_v18 = vld [vmem:[%s2003_s4 + $0x38] sm:$0xff] (!%p229_p3)  ;;  %v1087_v20 = vld [vmem:[%s2003_s4 + $0x30] sm:$0xff] (!%p229_p3)  ;;  %v1090_v25 = vld [vmem:[%s2003_s4 + $0x48] sm:$0xff] (!%p229_p3) }
   0xa   : > { %v485_v8 = vand.u32 (!%p229_p3), %v1645_v1, %v483_v6  ;;  %1099 = vperm.xlu0 (!%p229_p3), %1642, %v1081_v2   ;;  %1109 = vperm.xlu1 (!%p229_p3), %1643, %v1083_v5   ;;  %v1089_v26 = vld [vmem:[%s2003_s4 + $0x40] sm:$0xff] (!%p229_p3)  ;;  %v1092_v27 = vld [vmem:[%s2003_s4 + $0x58] sm:$0xff] (!%p229_p3)  ;;  %v1091_v28 = vld [vmem:[%s2003_s4 + $0x50] sm:$0xff] (!%p229_p3) }
   0xb   : > { %v1094_v33 = vld [vmem:[%s2003_s4 + $0x68] sm:$0xff] (!%p229_p3)  ;;  %v1093_v34 = vld [vmem:[%s2003_s4 + $0x60] sm:$0xff] (!%p229_p3)  ;;  %v1096_v35 = vld [vmem:[%s2003_s4 + $0x78] sm:$0xff] (!%p229_p3) }
   0xc   : > { %1546 = vmatprep.subr.bf16.mxu0 (!%p229_p3), %v485_v8  ;;  %1582 = vmatprep.subr.bf16.mxu1 (!%p229_p3), %v485_v8  ;;  %v1095_v36 = vld [vmem:[%s2003_s4 + $0x70] sm:$0xff] (!%p229_p3)  ;;  %v1886_v55 = vld [vmem:[%s2002_s3] ss:$0 sm:$0xff] (!%p229_p3) }
   0xd   : > { %1547 = vmatpush3.bf16.msra.mxu0 (!%p229_p3), %v485_v8  ;;  %1583 = vmatpush3.bf16.msra.mxu1 (!%p229_p3), %v485_v8 }
   0xe   : > { %s2010_s18 = smov (!%p271_p4, %s1692_s18), 1  ;;  %1104 = vperm.xlu0 %1642, %v1082_v9   ;;  %1114 = vperm.xlu1 %1643, %v1084_v10  }
   0xf   : > { %s1489_s30 = sshll.u32 %s2010_s18, 7 }
  0x10   : > { %s1776_s12 = scalar_lea.vmem %s1999_s0, %s1489_s30  ;;  %s1781_s15 = scalar_lea.vmem %s2000_s1, %s1489_s30 }
  0x11   : > { %v1646_v11 = vld [vmem:[%s1776_s12] sm:$0xff]   ;;  %v1648_v15 = vld [vmem:[%s1776_s12 + $0x8] sm:$0xff]   ;;  %v1650_v17 = vld [vmem:[%s1776_s12 + $0x10] sm:$0xff]  }
  0x12   : > { %v1647_v13 = vld [vmem:[%s1781_s15] sm:$0xff]   ;;  %1548 = vmatprep.mubr.msk.bf16.mxu0 %vm431_vm2, %v1646_v11  ;;  %v1649_v16 = vld [vmem:[%s1781_s15 + $0x8] sm:$0xff]   ;;  %v1651_v19 = vld [vmem:[%s1781_s15 + $0x10] sm:$0xff]   ;;  %1124 = vperm.xlu1 %1643, %v1086_v12  }
  0x13   : > { %1584 = vmatprep.mubr.msk.bf16.mxu1 %vm431_vm2, %v1647_v13  ;;  %1549 = vmatmul.mubr.msk.bf16.vlgmr.msra.gmra.mrb[0].mxu0 %vm431_vm2, %v1648_v15  ;;  %v1652_v21 = vld [vmem:[%s1776_s12 + $0x18] sm:$0xff]   ;;  %v1654_v23 = vld [vmem:[%s1776_s12 + $0x20] sm:$0xff]   ;;  %v1656_v29 = vld [vmem:[%s1776_s12 + $0x28] sm:$0xff]  }
  0x14   : > { %1585 = vmatmul.mubr.msk.bf16.vlgmr.msra.gmra.mrb[0].mxu1 %vm431_vm2, %v1649_v16  ;;  %1552 = vmatprep.mubr.msk.bf16.mxu0 %vm431_vm2, %v1650_v17  ;;  %v1653_v22 = vld [vmem:[%s1781_s15 + $0x18] sm:$0xff]   ;;  %v1655_v24 = vld [vmem:[%s1781_s15 + $0x20] sm:$0xff]   ;;  %v1657_v30 = vld [vmem:[%s1781_s15 + $0x28] sm:$0xff]  }
  0x15   : > { %1119 = vperm.xlu0 %1642, %v1085_v14   ;;  %1588 = vmatprep.mubr.msk.bf16.mxu1 %vm431_vm2, %v1651_v19  ;;  %v1658_v31 = vld [vmem:[%s1776_s12 + $0x30] sm:$0xff]   ;;  %v1660_v37 = vld [vmem:[%s1776_s12 + $0x38] sm:$0xff]   ;;  %v1662_v39 = vld [vmem:[%s1776_s12 + $0x40] sm:$0xff]  }
  0x16   : > { %1134 = vperm.xlu1 %1643, %v1088_v18   ;;  %v1659_v32 = vld [vmem:[%s1781_s15 + $0x30] sm:$0xff]   ;;  %v1661_v38 = vld [vmem:[%s1781_s15 + $0x38] sm:$0xff]   ;;  %v1663_v40 = vld [vmem:[%s1781_s15 + $0x40] sm:$0xff]  }
  0x17   : > { %v1664_v41 = vld [vmem:[%s1776_s12 + $0x48] sm:$0xff]   ;;  %v1666_v43 = vld [vmem:[%s1776_s12 + $0x50] sm:$0xff]   ;;  %v1668_v45 = vld [vmem:[%s1776_s12 + $0x58] sm:$0xff]  }
  0x18   : > { %v1665_v42 = vld [vmem:[%s1781_s15 + $0x48] sm:$0xff]   ;;  %v1667_v44 = vld [vmem:[%s1781_s15 + $0x50] sm:$0xff]   ;;  %v1669_v46 = vld [vmem:[%s1781_s15 + $0x58] sm:$0xff]  }
  0x19   : > { %1129 = vperm.xlu0 %1642, %v1087_v20   ;;  %v1670_v47 = vld [vmem:[%s1776_s12 + $0x60] sm:$0xff]   ;;  %v1672_v49 = vld [vmem:[%s1776_s12 + $0x68] sm:$0xff]   ;;  %v1674_v51 = vld [vmem:[%s1776_s12 + $0x70] sm:$0xff]  }
  0x1a   : > { %1144 = vperm.xlu1 %1643, %v1090_v25   ;;  %v1671_v48 = vld [vmem:[%s1781_s15 + $0x60] sm:$0xff]   ;;  %v1673_v50 = vld [vmem:[%s1781_s15 + $0x68] sm:$0xff]   ;;  %v1675_v52 = vld [vmem:[%s1781_s15 + $0x70] sm:$0xff]  }
  0x1b   : > { %1553 = vmatmul.mubr.msk.bf16.gmra.mrb[4].mxu0 %vm431_vm2, %v1652_v21  ;;  %v1676_v53 = vld [vmem:[%s1776_s12 + $0x78] sm:$0xff]   ;;  %s1491_s12 = sshll.u32 %s2010_s18, 6 }
  0x1c   : > { %1589 = vmatmul.mubr.msk.bf16.gmra.mrb[4].mxu1 %vm431_vm2, %v1653_v22  ;;  %1556 = vmatprep.mubr.msk.bf16.mxu0 %vm431_vm2, %v1654_v23  ;;  %v1677_v54 = vld [vmem:[%s1781_s15 + $0x78] sm:$0xff]   ;;  %s1905_s27 = scalar_lea.vmem %s2004_s5, %s1491_s12 }
  0x1d   : > { %1592 = vmatprep.mubr.msk.bf16.mxu1 %vm431_vm2, %v1655_v24  ;;  %1139 = vperm.xlu0 %1642, %v1089_v26  }
  0x1e   : > { %1154 = vperm.xlu1 %1643, %v1092_v27  }
  0x21   : > { %1149 = vperm.xlu0 %1642, %v1091_v28  }
  0x22   : > { %1164 = vperm.xlu1 %1643, %v1094_v33  }
  0x23   : > { %1557 = vmatmul.mubr.msk.bf16.gmra.mrb[8].mxu0 %vm431_vm2, %v1656_v29 }
  0x24   : > { %1593 = vmatmul.mubr.msk.bf16.gmra.mrb[8].mxu1 %vm431_vm2, %v1657_v30  ;;  %1560 = vmatprep.mubr.msk.bf16.mxu0 %vm431_vm2, %v1658_v31 }
  0x25   : > { %1596 = vmatprep.mubr.msk.bf16.mxu1 %vm431_vm2, %v1659_v32  ;;  %1159 = vperm.xlu0 %1642, %v1093_v34  }
  0x26   : > { %1174 = vperm.xlu1 %1643, %v1096_v35  }
  0x29   : > { %1169 = vperm.xlu0 %1642, %v1095_v36  }
  0x2b   : > { %1561 = vmatmul.mubr.msk.bf16.gmra.mrb[12].mxu0 %vm431_vm2, %v1660_v37 }
  0x2c   : > { %1597 = vmatmul.mubr.msk.bf16.gmra.mrb[12].mxu1 %vm431_vm2, %v1661_v38  ;;  %1564 = vmatprep.mubr.msk.bf16.mxu0 %vm431_vm2, %v1662_v39 }
  0x2d   : > { %1600 = vmatprep.mubr.msk.bf16.mxu1 %vm431_vm2, %v1663_v40 }
  0x33   : > { %1565 = vmatmul.mubr.msk.bf16.gmra.mrb[16].mxu0 %vm431_vm2, %v1664_v41 }
  0x34   : > { %1601 = vmatmul.mubr.msk.bf16.gmra.mrb[16].mxu1 %vm431_vm2, %v1665_v42  ;;  %1568 = vmatprep.mubr.msk.bf16.mxu0 %vm431_vm2, %v1666_v43 }
  0x35   : > { %1604 = vmatprep.mubr.msk.bf16.mxu1 %vm431_vm2, %v1667_v44 }
  0x3b   : > { %1569 = vmatmul.mubr.msk.bf16.gmra.mrb[20].mxu0 %vm431_vm2, %v1668_v45 }
  0x3c   : > { %1605 = vmatmul.mubr.msk.bf16.gmra.mrb[20].mxu1 %vm431_vm2, %v1669_v46  ;;  %1572 = vmatprep.mubr.msk.bf16.mxu0 %vm431_vm2, %v1670_v47 }
  0x3d   : > { %1608 = vmatprep.mubr.msk.bf16.mxu1 %vm431_vm2, %v1671_v48 }
  0x43   : > { %1573 = vmatmul.mubr.msk.bf16.gmra.mrb[24].mxu0 %vm431_vm2, %v1672_v49 }
  0x44   : > { %1609 = vmatmul.mubr.msk.bf16.gmra.mrb[24].mxu1 %vm431_vm2, %v1673_v50  ;;  %1576 = vmatprep.mubr.msk.bf16.mxu0 %vm431_vm2, %v1674_v51 }
  0x45   : > { %1612 = vmatprep.mubr.msk.bf16.mxu1 %vm431_vm2, %v1675_v52 }
  0x4b   : > { %1577 = vmatmul.mubr.msk.bf16.gmra.mrb[28].mxu0 %vm431_vm2, %v1676_v53 }
  0x4c   : > { %1613 = vmatmul.mubr.msk.bf16.gmra.mrb[28].mxu1 %vm431_vm2, %v1677_v54 }
  0x89   : > { %v1100_v57 = vpop.permute.xlu0 %1099  ;;  %v1110_v51 = vpop.permute.xlu1 %1109 }
  0x8d   : > { %v1105_v21 = vpop.permute.xlu0 %1104 }
  0xe6   : > { %v1550_v56 = vpop.f32.mrb[0].mxu0 }
  0xe7   : > { %v530_v58 = vadd.f32 %v1550_v56, %v1886_v55  ;;  %v1586_v59 = vpop.f32.mrb[0].mxu1  ;;  %v521_v60 = vpop.f32.mrb[1].mxu0 }
  0xe8   : > { %v883_v61 = vadd.f32 %v1586_v59, %v1886_v55  ;;  %v522_v62 = vadd.f32 %v1886_v55, %v521_v60  ;;  %v874_v63 = vpop.f32.mrb[1].mxu1  ;;  %v1551_v0 = vpop.f32.mrb[2].mxu0 }
  0xe9   : > { %v650_v1 = vmax.f32 %v530_v58, 0.0  ;;  %v875_v2 = vadd.f32 %v1886_v55, %v874_v63  ;;  %v533_v3 = vadd.f32 %v1551_v0, %v1886_v55  ;;  %v1587_v4 = vpop.f32.mrb[2].mxu1  ;;  %v524_v5 = vpop.f32.mrb[3].mxu0 }
  0xea   : > { %v1003_v6 = vmax.f32 %v883_v61, 0.0  ;;  %v648_v7 = vmax.f32 %v522_v62, 0.0  ;;  %v886_v8 = vadd.f32 %v1587_v4, %v1886_v55  ;;  %v525_v9 = vadd.f32 %v1886_v55, %v524_v5  ;;  %v877_v10 = vpop.f32.mrb[3].mxu1 }
  0xeb   : > { %v1001_v11 = vmax.f32 %v875_v2, 0.0  ;;  %v651_v12 = vmax.f32 %v533_v3, 0.0  ;;  %v878_v13 = vadd.f32 %v1886_v55, %v877_v10 }
  0xec   : > { %v1035_v14 = vmax.f32 %v650_v1, %v1003_v6  ;;  %v1004_v15 = vmax.f32 %v886_v8, 0.0  ;;  %v649_v16 = vmax.f32 %v525_v9, 0.0 }
  0xed   : > { %v1033_v17 = vmax.f32 %v648_v7, %v1001_v11  ;;  %v1002_v18 = vmax.f32 %v878_v13, 0.0 }
  0xee   : > { %v1036_v19 = vmax.f32 %v651_v12, %v1004_v15  ;;  %v1554_v20 = vpop.f32.mrb[4].mxu0  ;;  %v1115_v15 = vpop.permute.xlu1 %1114 }
  0xef   : > { %v1034_v22 = vmax.f32 %v649_v16, %v1002_v18  ;;  %v1065_v23 = vmax.f32 %v1033_v17, %v1035_v14  ;;  %v546_v24 = vadd.f32 %v1554_v20, %v1886_v55  ;;  %v1590_v25 = vpop.f32.mrb[4].mxu1  ;;  %v537_v26 = vpop.f32.mrb[5].mxu0 }
  0xf0   : > { %v899_v27 = vadd.f32 %v1590_v25, %v1886_v55  ;;  %v538_v28 = vadd.f32 %v1886_v55, %v537_v26  ;;  %v890_v29 = vpop.f32.mrb[5].mxu1  ;;  %v1555_v30 = vpop.f32.mrb[6].mxu0 }
  0xf1   : > { %v1177_v31 = vmul.f32 %v1100_v57, %v1065_v23  ;;  %v654_v32 = vmax.f32 %v546_v24, 0.0  ;;  %v891_v33 = vadd.f32 %v1886_v55, %v890_v29  ;;  %v549_v34 = vadd.f32 %v1555_v30, %v1886_v55  ;;  %v1591_v35 = vpop.f32.mrb[6].mxu1  ;;  %v540_v36 = vpop.f32.mrb[7].mxu0 }
  0xf2   : > { %v1007_v37 = vmax.f32 %v899_v27, 0.0  ;;  %v652_v38 = vmax.f32 %v538_v28, 0.0  ;;  %v902_v39 = vadd.f32 %v1591_v35, %v1886_v55  ;;  %v1066_v40 = vmax.f32 %v1034_v22, %v1036_v19  ;;  %v893_v41 = vpop.f32.mrb[7].mxu1  ;;  %v1120_v27 = vpop.permute.xlu0 %1119 }
  0xf3   : > { %v1492_v42 = vpack.c.bf16 %v1177_v31, %v1177_v31  ;;  %v1005_v43 = vmax.f32 %v891_v33, 0.0  ;;  %v655_v44 = vmax.f32 %v549_v34, 0.0  ;;  %v541_v45 = vadd.f32 %v1886_v55, %v540_v36 }
  0xf4   : > { %v1039_v46 = vmax.f32 %v654_v32, %v1007_v37  ;;  %v1008_v47 = vmax.f32 %v902_v39, 0.0  ;;  %v1178_v48 = vmul.f32 %v1105_v21, %v1066_v40  ;;  %v894_v49 = vadd.f32 %v1886_v55, %v893_v41 }
  0xf5   : > { %1258 = vst.msk [vmem:[%s1905_s27] sm:$0xf] %vm1257_vm3, %v1492_v42  ;;  %v1037_v50 = vmax.f32 %v652_v38, %v1005_v43  ;;  %v653_v52 = vmax.f32 %v541_v45, 0.0 }
  0xf6   : > { %v1040_v53 = vmax.f32 %v655_v44, %v1008_v47  ;;  %v1493_v54 = vpack.c.bf16 %v1178_v48, %v1178_v48  ;;  %v1006_v56 = vmax.f32 %v894_v49, 0.0  ;;  %v1558_v57 = vpop.f32.mrb[8].mxu0 }
  0xf7   : > { %v1067_v58 = vmax.f32 %v1037_v50, %v1039_v46  ;;  %v562_v59 = vadd.f32 %v1558_v57, %v1886_v55  ;;  %v1594_v60 = vpop.f32.mrb[8].mxu1  ;;  %v553_v61 = vpop.f32.mrb[9].mxu0 }
  0xf8   : > { %1259 = vst.msk [vmem:[%s1905_s27 + $0x4] sm:$0xf] %vm1257_vm3, %v1493_v54  ;;  %v1038_v62 = vmax.f32 %v653_v52, %v1006_v56  ;;  %v915_v63 = vadd.f32 %v1594_v60, %v1886_v55  ;;  %v554_v0 = vadd.f32 %v1886_v55, %v553_v61  ;;  %v906_v1 = vpop.f32.mrb[9].mxu1  ;;  %v1559_v2 = vpop.f32.mrb[10].mxu0 }
  0xf9   : > { %v1179_v3 = vmul.f32 %v1110_v51, %v1067_v58  ;;  %v658_v4 = vmax.f32 %v562_v59, 0.0  ;;  %v907_v5 = vadd.f32 %v1886_v55, %v906_v1  ;;  %v565_v6 = vadd.f32 %v1559_v2, %v1886_v55  ;;  %v1595_v7 = vpop.f32.mrb[10].mxu1  ;;  %v556_v8 = vpop.f32.mrb[11].mxu0 }
  0xfa   : > { %v1068_v9 = vmax.f32 %v1038_v62, %v1040_v53  ;;  %v1011_v10 = vmax.f32 %v915_v63, 0.0  ;;  %v656_v11 = vmax.f32 %v554_v0, 0.0  ;;  %v918_v12 = vadd.f32 %v1595_v7, %v1886_v55  ;;  %v909_v13 = vpop.f32.mrb[11].mxu1  ;;  %v1125_v50 = vpop.permute.xlu1 %1124 }
  0xfb   : > { %v1494_v14 = vpack.c.bf16 %v1179_v3, %v1179_v3  ;;  %v1009_v16 = vmax.f32 %v907_v5, 0.0  ;;  %v659_v17 = vmax.f32 %v565_v6, 0.0  ;;  %v557_v18 = vadd.f32 %v1886_v55, %v556_v8  ;;  %v1130_v63 = vpop.permute.xlu0 %1129 }
  0xfc   : > { %v1180_v19 = vmul.f32 %v1115_v15, %v1068_v9  ;;  %v1043_v20 = vmax.f32 %v658_v4, %v1011_v10  ;;  %v1012_v21 = vmax.f32 %v918_v12, 0.0  ;;  %v910_v22 = vadd.f32 %v1886_v55, %v909_v13 }
  0xfd   : > { %1260 = vst.msk [vmem:[%s1905_s27 + $0x8] sm:$0xf] %vm1257_vm3, %v1494_v14  ;;  %v1041_v23 = vmax.f32 %v656_v11, %v1009_v16  ;;  %v657_v24 = vmax.f32 %v557_v18, 0.0 }
  0xfe   : > { %v1495_v25 = vpack.c.bf16 %v1180_v19, %v1180_v19  ;;  %v1044_v26 = vmax.f32 %v659_v17, %v1012_v21  ;;  %v1010_v28 = vmax.f32 %v910_v22, 0.0  ;;  %v1562_v29 = vpop.f32.mrb[12].mxu0 }
  0xff   : > { %v1069_v30 = vmax.f32 %v1041_v23, %v1043_v20  ;;  %v578_v31 = vadd.f32 %v1562_v29, %v1886_v55  ;;  %v1598_v32 = vpop.f32.mrb[12].mxu1  ;;  %v569_v33 = vpop.f32.mrb[13].mxu0 }
 0x100   : > { %1261 = vst.msk [vmem:[%s1905_s27 + $0xc] sm:$0xf] %vm1257_vm3, %v1495_v25  ;;  %v1042_v34 = vmax.f32 %v657_v24, %v1010_v28  ;;  %v931_v35 = vadd.f32 %v1598_v32, %v1886_v55  ;;  %v570_v36 = vadd.f32 %v1886_v55, %v569_v33  ;;  %v922_v37 = vpop.f32.mrb[13].mxu1  ;;  %v1563_v38 = vpop.f32.mrb[14].mxu0 }
 0x101   : > { %v1181_v39 = vmul.f32 %v1120_v27, %v1069_v30  ;;  %v662_v40 = vmax.f32 %v578_v31, 0.0  ;;  %v923_v41 = vadd.f32 %v1886_v55, %v922_v37  ;;  %v581_v42 = vadd.f32 %v1563_v38, %v1886_v55  ;;  %v1599_v43 = vpop.f32.mrb[14].mxu1  ;;  %v572_v44 = vpop.f32.mrb[15].mxu0 }
 0x102   : > { %v1070_v45 = vmax.f32 %v1042_v34, %v1044_v26  ;;  %v1015_v46 = vmax.f32 %v931_v35, 0.0  ;;  %v660_v47 = vmax.f32 %v570_v36, 0.0  ;;  %v934_v48 = vadd.f32 %v1599_v43, %v1886_v55  ;;  %v925_v49 = vpop.f32.mrb[15].mxu1  ;;  %v1135_v23 = vpop.permute.xlu1 %1134 }
 0x103   : > { %v1496_v51 = vpack.c.bf16 %v1181_v39, %v1181_v39  ;;  %v1013_v52 = vmax.f32 %v923_v41, 0.0  ;;  %v663_v53 = vmax.f32 %v581_v42, 0.0  ;;  %v573_v54 = vadd.f32 %v1886_v55, %v572_v44  ;;  %v1140_v34 = vpop.permute.xlu0 %1139 }
 0x104   : > { %v1182_v56 = vmul.f32 %v1125_v50, %v1070_v45  ;;  %v1047_v57 = vmax.f32 %v662_v40, %v1015_v46  ;;  %v1016_v58 = vmax.f32 %v934_v48, 0.0  ;;  %v926_v59 = vadd.f32 %v1886_v55, %v925_v49 }
 0x105   : > { %1262 = vst.msk [vmem:[%s1905_s27 + $0x10] sm:$0xf] %vm1257_vm3, %v1496_v51  ;;  %v1045_v60 = vmax.f32 %v660_v47, %v1013_v52  ;;  %v661_v61 = vmax.f32 %v573_v54, 0.0 }
 0x106   : > { %v1497_v62 = vpack.c.bf16 %v1182_v56, %v1182_v56  ;;  %v1048_v0 = vmax.f32 %v663_v53, %v1016_v58  ;;  %v1014_v1 = vmax.f32 %v926_v59, 0.0  ;;  %v1566_v2 = vpop.f32.mrb[16].mxu0 }
 0x107   : > { %v1071_v3 = vmax.f32 %v1045_v60, %v1047_v57  ;;  %v594_v4 = vadd.f32 %v1566_v2, %v1886_v55  ;;  %v1602_v5 = vpop.f32.mrb[16].mxu1  ;;  %v585_v6 = vpop.f32.mrb[17].mxu0 }
 0x108   : > { %1263 = vst.msk [vmem:[%s1905_s27 + $0x14] sm:$0xf] %vm1257_vm3, %v1497_v62  ;;  %v1046_v7 = vmax.f32 %v661_v61, %v1014_v1  ;;  %v947_v8 = vadd.f32 %v1602_v5, %v1886_v55  ;;  %v586_v9 = vadd.f32 %v1886_v55, %v585_v6  ;;  %v938_v10 = vpop.f32.mrb[17].mxu1  ;;  %v1567_v11 = vpop.f32.mrb[18].mxu0 }
 0x109   : > { %v1183_v12 = vmul.f32 %v1130_v63, %v1071_v3  ;;  %v666_v13 = vmax.f32 %v594_v4, 0.0  ;;  %v939_v14 = vadd.f32 %v1886_v55, %v938_v10  ;;  %v597_v15 = vadd.f32 %v1567_v11, %v1886_v55  ;;  %v1603_v16 = vpop.f32.mrb[18].mxu1  ;;  %v588_v17 = vpop.f32.mrb[19].mxu0 }
 0x10a   : > { %v1072_v18 = vmax.f32 %v1046_v7, %v1048_v0  ;;  %v1019_v19 = vmax.f32 %v947_v8, 0.0  ;;  %v664_v20 = vmax.f32 %v586_v9, 0.0  ;;  %v950_v21 = vadd.f32 %v1603_v16, %v1886_v55  ;;  %v941_v22 = vpop.f32.mrb[19].mxu1  ;;  %v1145_v60 = vpop.permute.xlu1 %1144 }
 0x10b   : > { %v1498_v24 = vpack.c.bf16 %v1183_v12, %v1183_v12  ;;  %v1017_v25 = vmax.f32 %v939_v14, 0.0  ;;  %v667_v26 = vmax.f32 %v597_v15, 0.0  ;;  %v589_v27 = vadd.f32 %v1886_v55, %v588_v17  ;;  %v1150_v7 = vpop.permute.xlu0 %1149 }
 0x10c   : > { %v1184_v28 = vmul.f32 %v1135_v23, %v1072_v18  ;;  %v1051_v29 = vmax.f32 %v666_v13, %v1019_v19  ;;  %v1020_v30 = vmax.f32 %v950_v21, 0.0  ;;  %v942_v31 = vadd.f32 %v1886_v55, %v941_v22 }
 0x10d   : > { %1264 = vst.msk [vmem:[%s1905_s27 + $0x18] sm:$0xf] %vm1257_vm3, %v1498_v24  ;;  %v1049_v32 = vmax.f32 %v664_v20, %v1017_v25  ;;  %v665_v33 = vmax.f32 %v589_v27, 0.0 }
 0x10e   : > { %v1499_v35 = vpack.c.bf16 %v1184_v28, %v1184_v28  ;;  %v1052_v36 = vmax.f32 %v667_v26, %v1020_v30  ;;  %v1018_v37 = vmax.f32 %v942_v31, 0.0  ;;  %v1570_v38 = vpop.f32.mrb[20].mxu0 }
 0x10f   : > { %v1073_v39 = vmax.f32 %v1049_v32, %v1051_v29  ;;  %v610_v40 = vadd.f32 %v1570_v38, %v1886_v55  ;;  %v1606_v41 = vpop.f32.mrb[20].mxu1  ;;  %v601_v42 = vpop.f32.mrb[21].mxu0 }
 0x110   : > { %1265 = vst.msk [vmem:[%s1905_s27 + $0x1c] sm:$0xf] %vm1257_vm3, %v1499_v35  ;;  %v1050_v43 = vmax.f32 %v665_v33, %v1018_v37  ;;  %v963_v44 = vadd.f32 %v1606_v41, %v1886_v55  ;;  %v602_v45 = vadd.f32 %v1886_v55, %v601_v42  ;;  %v954_v46 = vpop.f32.mrb[21].mxu1  ;;  %v1571_v47 = vpop.f32.mrb[22].mxu0 }
 0x111   : > { %v1185_v48 = vmul.f32 %v1140_v34, %v1073_v39  ;;  %v670_v49 = vmax.f32 %v610_v40, 0.0  ;;  %v955_v50 = vadd.f32 %v1886_v55, %v954_v46  ;;  %v613_v51 = vadd.f32 %v1571_v47, %v1886_v55  ;;  %v1607_v52 = vpop.f32.mrb[22].mxu1  ;;  %v604_v53 = vpop.f32.mrb[23].mxu0 }
 0x112   : > { %v1074_v54 = vmax.f32 %v1050_v43, %v1052_v36  ;;  %v1023_v56 = vmax.f32 %v963_v44, 0.0  ;;  %v668_v57 = vmax.f32 %v602_v45, 0.0  ;;  %v966_v58 = vadd.f32 %v1607_v52, %v1886_v55  ;;  %v957_v59 = vpop.f32.mrb[23].mxu1  ;;  %v1155_v32 = vpop.permute.xlu1 %1154 }
 0x113   : > { %v1500_v61 = vpack.c.bf16 %v1185_v48, %v1185_v48  ;;  %v1021_v62 = vmax.f32 %v955_v50, 0.0  ;;  %v671_v63 = vmax.f32 %v613_v51, 0.0  ;;  %v605_v0 = vadd.f32 %v1886_v55, %v604_v53  ;;  %v1160_v43 = vpop.permute.xlu0 %1159 }
 0x114   : > { %v1186_v1 = vmul.f32 %v1145_v60, %v1074_v54  ;;  %v1055_v2 = vmax.f32 %v670_v49, %v1023_v56  ;;  %v1024_v3 = vmax.f32 %v966_v58, 0.0  ;;  %v958_v4 = vadd.f32 %v1886_v55, %v957_v59 }
 0x115   : > { %1266 = vst.msk [vmem:[%s1905_s27 + $0x20] sm:$0xf] %vm1257_vm3, %v1500_v61  ;;  %v1053_v5 = vmax.f32 %v668_v57, %v1021_v62  ;;  %v669_v6 = vmax.f32 %v605_v0, 0.0 }
 0x116   : > { %v1501_v8 = vpack.c.bf16 %v1186_v1, %v1186_v1  ;;  %v1056_v9 = vmax.f32 %v671_v63, %v1024_v3  ;;  %v1022_v10 = vmax.f32 %v958_v4, 0.0  ;;  %v1574_v11 = vpop.f32.mrb[24].mxu0 }
 0x117   : > { %v1075_v12 = vmax.f32 %v1053_v5, %v1055_v2  ;;  %v626_v13 = vadd.f32 %v1574_v11, %v1886_v55  ;;  %v1610_v14 = vpop.f32.mrb[24].mxu1  ;;  %v617_v15 = vpop.f32.mrb[25].mxu0 }
 0x118   : > { %1267 = vst.msk [vmem:[%s1905_s27 + $0x24] sm:$0xf] %vm1257_vm3, %v1501_v8  ;;  %v1054_v16 = vmax.f32 %v669_v6, %v1022_v10  ;;  %v979_v17 = vadd.f32 %v1610_v14, %v1886_v55  ;;  %v618_v18 = vadd.f32 %v1886_v55, %v617_v15  ;;  %v970_v19 = vpop.f32.mrb[25].mxu1  ;;  %v1575_v20 = vpop.f32.mrb[26].mxu0 }
 0x119   : > { %v1187_v21 = vmul.f32 %v1150_v7, %v1075_v12  ;;  %v674_v22 = vmax.f32 %v626_v13, 0.0  ;;  %v971_v23 = vadd.f32 %v1886_v55, %v970_v19  ;;  %v629_v24 = vadd.f32 %v1575_v20, %v1886_v55  ;;  %v1611_v25 = vpop.f32.mrb[26].mxu1  ;;  %v620_v26 = vpop.f32.mrb[27].mxu0 }
 0x11a   : > { %v1076_v27 = vmax.f32 %v1054_v16, %v1056_v9  ;;  %v1027_v28 = vmax.f32 %v979_v17, 0.0  ;;  %v672_v29 = vmax.f32 %v618_v18, 0.0  ;;  %v982_v30 = vadd.f32 %v1611_v25, %v1886_v55  ;;  %v973_v31 = vpop.f32.mrb[27].mxu1  ;;  %v1165_v5 = vpop.permute.xlu1 %1164 }
 0x11b   : > { %v1502_v33 = vpack.c.bf16 %v1187_v21, %v1187_v21  ;;  %v1025_v34 = vmax.f32 %v971_v23, 0.0  ;;  %v675_v35 = vmax.f32 %v629_v24, 0.0  ;;  %v621_v36 = vadd.f32 %v1886_v55, %v620_v26  ;;  %v1170_v20 = vpop.permute.xlu0 %1169 }
 0x11c   : > { %v1188_v37 = vmul.f32 %v1155_v32, %v1076_v27  ;;  %v1059_v38 = vmax.f32 %v674_v22, %v1027_v28  ;;  %v1028_v39 = vmax.f32 %v982_v30, 0.0  ;;  %v974_v40 = vadd.f32 %v1886_v55, %v973_v31 }
 0x11d   : > { %1268 = vst.msk [vmem:[%s1905_s27 + $0x28] sm:$0xf] %vm1257_vm3, %v1502_v33  ;;  %v1057_v41 = vmax.f32 %v672_v29, %v1025_v34  ;;  %v673_v42 = vmax.f32 %v621_v36, 0.0 }
 0x11e   : > { %v1503_v44 = vpack.c.bf16 %v1188_v37, %v1188_v37  ;;  %v1060_v45 = vmax.f32 %v675_v35, %v1028_v39  ;;  %v1026_v46 = vmax.f32 %v974_v40, 0.0  ;;  %v1578_v47 = vpop.f32.mrb[28].mxu0  ;;  %v1175_v24 = vpop.permute.xlu1 %1174 }
 0x11f   : > { %v1077_v48 = vmax.f32 %v1057_v41, %v1059_v38  ;;  %v642_v49 = vadd.f32 %v1578_v47, %v1886_v55  ;;  %v1614_v50 = vpop.f32.mrb[28].mxu1  ;;  %v633_v51 = vpop.f32.mrb[29].mxu0 }
 0x120   : > { %1269 = vst.msk [vmem:[%s1905_s27 + $0x2c] sm:$0xf] %vm1257_vm3, %v1503_v44  ;;  %v1058_v52 = vmax.f32 %v673_v42, %v1026_v46  ;;  %v995_v53 = vadd.f32 %v1614_v50, %v1886_v55  ;;  %v634_v54 = vadd.f32 %v1886_v55, %v633_v51  ;;  %v986_v56 = vpop.f32.mrb[29].mxu1  ;;  %v1579_v57 = vpop.f32.mrb[30].mxu0 }
 0x121   : > { %v1189_v58 = vmul.f32 %v1160_v43, %v1077_v48  ;;  %v678_v59 = vmax.f32 %v642_v49, 0.0  ;;  %v987_v60 = vadd.f32 %v1886_v55, %v986_v56  ;;  %v645_v61 = vadd.f32 %v1579_v57, %v1886_v55  ;;  %v1615_v62 = vpop.f32.mrb[30].mxu1  ;;  %v636_v63 = vpop.f32.mrb[31].mxu0 }
 0x122   : > { %v1078_v0 = vmax.f32 %v1058_v52, %v1060_v45  ;;  %v1031_v1 = vmax.f32 %v995_v53, 0.0  ;;  %v676_v2 = vmax.f32 %v634_v54, 0.0  ;;  %v998_v3 = vadd.f32 %v1615_v62, %v1886_v55  ;;  %v989_v4 = vpop.f32.mrb[31].mxu1 }
 0x123   : > { %v1504_v6 = vpack.c.bf16 %v1189_v58, %v1189_v58  ;;  %v1029_v7 = vmax.f32 %v987_v60, 0.0  ;;  %v679_v8 = vmax.f32 %v645_v61, 0.0  ;;  %v637_v9 = vadd.f32 %v1886_v55, %v636_v63 }
 0x124   : > { %v1190_v10 = vmul.f32 %v1165_v5, %v1078_v0  ;;  %v1063_v11 = vmax.f32 %v678_v59, %v1031_v1  ;;  %v1032_v12 = vmax.f32 %v998_v3, 0.0  ;;  %v990_v13 = vadd.f32 %v1886_v55, %v989_v4 }
 0x125   : > { %1270 = vst.msk [vmem:[%s1905_s27 + $0x30] sm:$0xf] %vm1257_vm3, %v1504_v6  ;;  %v1061_v14 = vmax.f32 %v676_v2, %v1029_v7  ;;  %v677_v15 = vmax.f32 %v637_v9, 0.0 }
 0x126   : > { %v1505_v16 = vpack.c.bf16 %v1190_v10, %v1190_v10  ;;  %v1064_v17 = vmax.f32 %v679_v8, %v1032_v12  ;;  %v1030_v18 = vmax.f32 %v990_v13, 0.0 }
 0x127   : > { %v1079_v19 = vmax.f32 %v1061_v14, %v1063_v11 }
 0x128   : > { %1271 = vst.msk [vmem:[%s1905_s27 + $0x34] sm:$0xf] %vm1257_vm3, %v1505_v16  ;;  %v1062_v21 = vmax.f32 %v677_v15, %v1030_v18 }
 0x129   : > { %v1191_v22 = vmul.f32 %v1170_v20, %v1079_v19 }
 0x12a   : > { %v1080_v23 = vmax.f32 %v1062_v21, %v1064_v17 }
 0x12b   : > { %v1506_v25 = vpack.c.bf16 %v1191_v22, %v1191_v22 }
 0x12c   : > { %v1192_v26 = vmul.f32 %v1175_v24, %v1080_v23 }
 0x12d   : > { %1272 = vst.msk [vmem:[%s1905_s27 + $0x38] sm:$0xf] %vm1257_vm3, %v1506_v25 }
 0x12e   : > { %v1507_v55 = vpack.c.bf16 %v1192_v26, %v1192_v26 }
 0x130   : > { %1273 = vst.msk [vmem:[%s1905_s27 + $0x3c] sm:$0xf] %vm1257_vm3, %v1507_v55 }
 0x131 PF: > { %s15_s20 = sadd.s32 1, %s1700_s20   ;;  %s2005_s18 = smov %s1696_s19 }
 0x132   : > { %p12_p5 = scmp.ge.s32.totalorder %s15_s20, 4   ;;  %s2006_s19 = smov %s2008_s21 }
 0x134   :  { %14 = sbr.rel (!%p12_p5) target bundleno = 2 (0x2), region = 79 }

// kernel: _lambda_.8
= control target key start
LH: loop header
LB: loop body
LE: loop exit
PB: predicated region body
PF: predicated region fallthrough
CT: control target
= control target key end

     0   :  { %s1488_s15 = smov 0   ;;  %s1490_s16 = smov 0   ;;  %s1707_s0 = inlined_call_operand.vmem [shape: bf16[2,160,48], index: 0, kind: input, shape index: {}]   ;;  %s1708_s1 = inlined_call_operand.vmem [shape: bf16[3,48,32], index: 1, kind: input, shape index: {}]   ;;  %s1709_s2 = inlined_call_operand.vmem [shape: f32[1,32], index: 2, kind: input, shape index: {}]   ;;  %s1710_s3 = inlined_call_operand.vmem [shape: f32[128,1], index: 3, kind: input, shape index: {}]   ;;  %s1711_s4 = inlined_call_operand.vmem [shape: bf16[2,128,32], index: 4, kind: output, shape index: {}]  }
   0x1   :  { %s1492_s17 = smov 0  }
   0x2 LB: > { %s23_s18 = sadd.s32 1, %s1456_s16  ;;  %p1145_p0 = scmp.ge.s32.totalorder %s1460_s17, 1  ;;  %s1460_s17 = sphi %s1492_s17, %s14_s17   ;;  %s1456_s16 = sphi %s1490_s16, %s1713_s16   ;;  %s1452_s15 = sphi %s1488_s15, %s1712_s15  }
   0x3   : > { %p24_p1 = scmp.ge.s32.totalorder %s23_s18, 2  ;;  %p193_p2 = scmp.lt.s32.totalorder %s1460_s17, 3 }
   0x5   : > { %s1715_s18 = smov (%p24_p1, %s23_s18), 0  ;;  %p194_p3 = pnand %p1145_p0, %p193_p2 }
   0x6   : > { %v1412_v0 = vld [vmem:[%s1708_s1 + $0x18] sm:$0xff] (!%p194_p3)   ;;  %p229_p4 = scmp.lt.s32.totalorder (!%p194_p3), %s1452_s15, 1  ;;  %v1413_v1 = vld [vmem:[%s1708_s1] sm:$0xff] (!%p194_p3)   ;;  %v1415_v3 = vld [vmem:[%s1708_s1 + $0x8] sm:$0xff] (!%p194_p3)   ;;  %v1462_v6 = vmov (!%p194_p3), 0   ;;  %vm339_vm0 = vcmask (!%p194_p3), 392192  }
   0x7   : > { %197 = sbr.rel (%p194_p3) target bundleno = 286 (0x11e), region = 36  ;;  %1280 = vmatprep.subr.bf16.mxu1 (!%p194_p3), %v1412_v0  ;;  %v1414_v2 = vld [vmem:[%s1708_s1 + $0x20] sm:$0xff] (!%p194_p3)   ;;  %1302 = vmatprep.subr.bf16.mxu0 (!%p194_p3), %v1413_v1  ;;  %v1416_v4 = vld [vmem:[%s1708_s1 + $0x28] sm:$0xff] (!%p194_p3)   ;;  %v1417_v5 = vld [vmem:[%s1708_s1 + $0x10] sm:$0xff] (!%p194_p3)   ;;  %vm1017_vm1 = vcmask (!%p194_p3), 257024  }
   0x8   : > { %1281 = vmatpush3.bf16.msra.mxu1 (!%p194_p3), %v1412_v0  ;;  %1303 = vmatpush3.bf16.msra.mxu0 (!%p194_p3), %v1413_v1  ;;  %v1421_v9 = vld [vmem:[%s1708_s1 + $0x30] sm:$0xff] (!%p194_p3)   ;;  %v1422_v12 = vld [vmem:[%s1708_s1 + $0x38] sm:$0xff] (!%p194_p3)   ;;  %v1425_v13 = vld [vmem:[%s1708_s1 + $0x40] sm:$0xff] (!%p194_p3)  }
   0x9   : > { %1282 = vmatprep.subr.bf16.mxu1 (!%p194_p3), %v1414_v2  ;;  %1304 = vmatprep.subr.bf16.mxu0 (!%p194_p3), %v1415_v3  ;;  %v843_v18 = vld [vmem:[%s1710_s3 + $0x10] sm:$0xff] (!%p194_p3)  ;;  %v841_v19 = vld [vmem:[%s1710_s3] sm:$0xff] (!%p194_p3)  ;;  %v844_v23 = vld [vmem:[%s1710_s3 + $0x18] sm:$0xff] (!%p194_p3) }
   0xa   : > { %1411 = vset.pattern.permute.xlu1 (!%p194_p3), %v1462_v6  ;;  %1410 = vset.pattern.permute.xlu0 (!%p194_p3), %v1462_v6  ;;  %v842_v24 = vld [vmem:[%s1710_s3 + $0x8] sm:$0xff] (!%p194_p3)  ;;  %v845_v27 = vld [vmem:[%s1710_s3 + $0x20] sm:$0xff] (!%p194_p3)  ;;  %v848_v30 = vld [vmem:[%s1710_s3 + $0x38] sm:$0xff] (!%p194_p3) }
   0xb   : > { %869 = vperm.xlu1 (!%p194_p3), %1411, %v843_v18   ;;  %859 = vperm.xlu0 (!%p194_p3), %1410, %v841_v19   ;;  %v846_v25 = vld [vmem:[%s1710_s3 + $0x28] sm:$0xff] (!%p194_p3)  ;;  %v847_v31 = vld [vmem:[%s1710_s3 + $0x30] sm:$0xff] (!%p194_p3)  ;;  %v849_v33 = vld [vmem:[%s1710_s3 + $0x40] sm:$0xff] (!%p194_p3) }
   0xc   : > { %1283 = vmatpush3.bf16.msra.mxu1 (!%p194_p3), %v1414_v2  ;;  %1305 = vmatpush3.bf16.msra.mxu0 (!%p194_p3), %v1415_v3  ;;  %v850_v32 = vld [vmem:[%s1710_s3 + $0x48] sm:$0xff] (!%p194_p3)  ;;  %v852_v36 = vld [vmem:[%s1710_s3 + $0x58] sm:$0xff] (!%p194_p3)  ;;  %v851_v37 = vld [vmem:[%s1710_s3 + $0x50] sm:$0xff] (!%p194_p3) }
   0xd   : > { %1284 = vmatprep.subr.bf16.mxu1 (!%p194_p3), %v1416_v4  ;;  %1306 = vmatprep.subr.bf16.mxu0 (!%p194_p3), %v1417_v5  ;;  %v854_v38 = vld [vmem:[%s1710_s3 + $0x68] sm:$0xff] (!%p194_p3)  ;;  %v853_v39 = vld [vmem:[%s1710_s3 + $0x60] sm:$0xff] (!%p194_p3)  ;;  %v856_v41 = vld [vmem:[%s1710_s3 + $0x78] sm:$0xff] (!%p194_p3) }
   0xe   : > { %s1717_s15 = smov (!%p229_p4, %s1452_s15), 1  ;;  %v855_v42 = vld [vmem:[%s1710_s3 + $0x70] sm:$0xff]  ;;  %v1635_v58 = vld [vmem:[%s1709_s2] ss:$0 sm:$0xff] }
   0xf   : > { %s1384_s29 = smul.u32 80, %s1717_s15  ;;  %874 = vperm.xlu1 %1411, %v844_v23   ;;  %864 = vperm.xlu0 %1410, %v842_v24   ;;  %s1230_s5 = sshll.u32 %s1717_s15, 6 }
  0x10   : > { %1285 = vmatpush3.bf16.msra.mxu1 %v1416_v4  ;;  %1307 = vmatpush3.bf16.msra.mxu0 %v1417_v5  ;;  %s1647_s9 = scalar_lea.vmem %s1711_s4, %s1230_s5 }
  0x11   : > { %s1530_s8 = scalar_lea.vmem %s1707_s0, %s1384_s29  ;;  %1346 = vmatprep.subr.bf16.mxu1 %v1413_v1  ;;  %1324 = vmatprep.subr.bf16.mxu0 %v1421_v9 }
  0x12   : > { %v1418_v7 = vld [vmem:[%s1530_s8 + $0x8] sm:$0xff]   ;;  %v1419_v8 = vld [vmem:[%s1530_s8] sm:$0xff]   ;;  %v1420_v10 = vld [vmem:[%s1530_s8 + $0x10] sm:$0xff]  }
  0x13   : > { %1286 = vmatprep.mubr.msk.bf16.mxu1 %vm339_vm0, %v1418_v7  ;;  %1308 = vmatprep.mubr.msk.bf16.mxu0 %vm339_vm0, %v1419_v8  ;;  %v1423_v11 = vld [vmem:[%s1530_s8 + $0x18] sm:$0xff]   ;;  %v1424_v14 = vld [vmem:[%s1530_s8 + $0x20] sm:$0xff]   ;;  %v1426_v15 = vld [vmem:[%s1530_s8 + $0x28] sm:$0xff]  }
  0x14   : > { %1287 = vmatmul.mubr.msk.bf16.vlgmr.msra.gmra.mrb[0].mxu1 %vm339_vm0, %v1420_v10  ;;  %1309 = vmatmul.mubr.msk.bf16.vlgmr.msra.gmra.mrb[0].mxu0 %vm339_vm0, %v1418_v7  ;;  %v1427_v16 = vld [vmem:[%s1530_s8 + $0x10] sm:$0xff]   ;;  %v1429_v20 = vld [vmem:[%s1530_s8 + $0x18] sm:$0xff]   ;;  %v1431_v22 = vld [vmem:[%s1530_s8 + $0x20] sm:$0xff]  }
  0x15   : > { %1349 = vmatpush3.bf16.msra.mxu1 %v1413_v1  ;;  %1325 = vmatpush3.bf16.msra.mxu0 %v1421_v9  ;;  %v1428_v17 = vld [vmem:[%s1530_s8 + $0x30] sm:$0xff]   ;;  %v1430_v21 = vld [vmem:[%s1530_s8 + $0x38] sm:$0xff]   ;;  %v1432_v26 = vld [vmem:[%s1530_s8 + $0x40] sm:$0xff]  }
  0x16   : > { %1290 = vmatprep.mubr.msk.bf16.mxu1 %vm339_vm0, %v1423_v11  ;;  %1326 = vmatprep.subr.bf16.mxu0 %v1422_v12  ;;  %v1433_v28 = vld [vmem:[%s1530_s8 + $0x28] sm:$0xff]   ;;  %v1434_v29 = vld [vmem:[%s1530_s8 + $0x30] sm:$0xff]   ;;  %v1435_v34 = vld [vmem:[%s1530_s8 + $0x38] sm:$0xff]  }
  0x17   : > { %1312 = vmatprep.mubr.msk.bf16.mxu0 %vm339_vm0, %v1420_v10  ;;  %1347 = vmatprep.subr.bf16.mxu1 %v1415_v3  ;;  %v1436_v35 = vld [vmem:[%s1530_s8 + $0x40] sm:$0xff]   ;;  %v1437_v40 = vld [vmem:[%s1530_s8 + $0x48] sm:$0xff]  }
  0x18   : > { %884 = vperm.xlu1 %1411, %v846_v25   ;;  %879 = vperm.xlu0 %1410, %v845_v27  }
  0x19   : > { %1350 = vmatpush3.bf16.msra.mxu1 %v1415_v3  ;;  %1327 = vmatpush3.bf16.msra.mxu0 %v1422_v12 }
  0x1a   : > { %1348 = vmatprep.subr.bf16.mxu1 %v1417_v5  ;;  %1328 = vmatprep.subr.bf16.mxu0 %v1425_v13 }
  0x1c   : > { %1291 = vmatmul.mubr.msk.bf16.gmra.mrb[4].mxu1 %vm339_vm0, %v1424_v14  ;;  %1313 = vmatmul.mubr.msk.bf16.gmra.mrb[4].mxu0 %vm339_vm0, %v1423_v11 }
  0x1d   : > { %1294 = vmatprep.mubr.msk.bf16.mxu1 %vm339_vm0, %v1426_v15  ;;  %1329 = vmatpush3.bf16.msra.mxu0 %v1425_v13 }
  0x1e   : > { %1330 = vmatprep.mubr.msk.bf16.mxu0 %vm339_vm0, %v1427_v16  ;;  %1351 = vmatpush3.bf16.msra.mxu1 %v1417_v5 }
  0x1f   : > { %894 = vperm.xlu1 %1411, %v848_v30   ;;  %889 = vperm.xlu0 %1410, %v847_v31  }
  0x23   : > { %904 = vperm.xlu1 %1411, %v850_v32   ;;  %899 = vperm.xlu0 %1410, %v849_v33  }
  0x24   : > { %1295 = vmatmul.mubr.msk.bf16.gmra.mrb[8].mxu1 %vm339_vm0, %v1428_v17  ;;  %1331 = vmatmul.mubr.msk.bf16.vlgmr.msra.gmra.mrb[0].mxu0 %vm339_vm0, %v1429_v20 }
  0x25   : > { %1298 = vmatprep.mubr.msk.bf16.mxu1 %vm339_vm0, %v1430_v21  ;;  %1334 = vmatprep.mubr.msk.bf16.mxu0 %vm339_vm0, %v1431_v22 }
  0x27   : > { %914 = vperm.xlu1 %1411, %v852_v36   ;;  %909 = vperm.xlu0 %1410, %v851_v37  }
  0x2b   : > { %924 = vperm.xlu1 %1411, %v854_v38   ;;  %919 = vperm.xlu0 %1410, %v853_v39  }
  0x2c   : > { %1299 = vmatmul.mubr.msk.bf16.gmra.mrb[12].mxu1 %vm339_vm0, %v1432_v26  ;;  %1335 = vmatmul.mubr.msk.bf16.gmra.mrb[4].mxu0 %vm339_vm0, %v1433_v28 }
  0x2d   : > { %1316 = vmatprep.mubr.msk.bf16.mxu1 %vm339_vm0, %v1424_v14  ;;  %1338 = vmatprep.mubr.msk.bf16.mxu0 %vm339_vm0, %v1434_v29 }
  0x2f   : > { %934 = vperm.xlu1 %1411, %v856_v41   ;;  %929 = vperm.xlu0 %1410, %v855_v42  }
  0x34   : > { %1317 = vmatmul.mubr.msk.bf16.vlgmr.msra.gmra.mrb[8].mxu1 %vm339_vm0, %v1426_v15  ;;  %1339 = vmatmul.mubr.msk.bf16.gmra.mrb[8].mxu0 %vm339_vm0, %v1435_v34 }
  0x35   : > { %1320 = vmatprep.mubr.msk.bf16.mxu1 %vm339_vm0, %v1428_v17  ;;  %1342 = vmatprep.mubr.msk.bf16.mxu0 %vm339_vm0, %v1436_v35 }
  0x3c   : > { %1321 = vmatmul.mubr.msk.bf16.gmra.mrb[12].mxu1 %vm339_vm0, %v1430_v21  ;;  %1343 = vmatmul.mubr.msk.bf16.gmra.mrb[12].mxu0 %vm339_vm0, %v1437_v40 }
  0x8a   : > { %v870_v44 = vpop.permute.xlu1 %869  ;;  %v860_v46 = vpop.permute.xlu0 %859 }
  0x8e   : > { %v875_v49 = vpop.permute.xlu1 %874  ;;  %v865_v50 = vpop.permute.xlu0 %864 }
  0x97   : > { %v1630_v55 = vpop.permute.xlu1 %884  ;;  %v880_v56 = vpop.permute.xlu0 %879 }
  0x9e   : > { %v895_v61 = vpop.permute.xlu1 %894  ;;  %v890_v0 = vpop.permute.xlu0 %889 }
  0xa2   : > { %v1642_v12 = vpop.permute.xlu1 %904  ;;  %v1649_v16 = vpop.permute.xlu0 %899 }
  0xa6   : > { %v915_v34 = vpop.permute.xlu1 %914  ;;  %v910_v37 = vpop.permute.xlu0 %909 }
  0xe7   : > { %v1288_v43 = vpop.f32.mrb[0].mxu1 }
  0xe8   : > { %v398_v45 = vpop.f32.mrb[1].mxu1 }
  0xe9   : > { %v1289_v47 = vpop.f32.mrb[2].mxu1 }
  0xea   : > { %v401_v48 = vpop.f32.mrb[3].mxu1 }
  0xef   : > { %v1292_v51 = vpop.f32.mrb[4].mxu1 }
  0xf0   : > { %v414_v52 = vpop.f32.mrb[5].mxu1 }
  0xf1   : > { %v1293_v53 = vpop.f32.mrb[6].mxu1 }
  0xf2   : > { %v417_v54 = vpop.f32.mrb[7].mxu1 }
  0xf7   : > { %v1332_v57 = vpop.f32.mrb[0].mxu0 }
  0xf8   : > { %v1352_v59 = vadd.f32 %v1332_v57, %v1288_v43  ;;  %v723_v60 = vpop.f32.mrb[1].mxu0 }
  0xf9   : > { %v1353_v62 = vadd.f32 %v723_v60, %v398_v45  ;;  %v1333_v63 = vpop.f32.mrb[2].mxu0 }
  0xfa   : > { %v811_v1 = vadd.f32 %v1352_v59, %v1635_v58  ;;  %v1354_v2 = vadd.f32 %v1333_v63, %v1289_v47  ;;  %v726_v3 = vpop.f32.mrb[3].mxu0 }
  0xfb   : > { %v809_v4 = vadd.f32 %v1353_v62, %v1635_v58  ;;  %v1355_v5 = vadd.f32 %v726_v3, %v401_v48 }
  0xfc   : > { %v827_v6 = vmax.f32 %v811_v1, 0.0  ;;  %v812_v7 = vadd.f32 %v1354_v2, %v1635_v58  ;;  %v925_v1 = vpop.permute.xlu1 %924 }
  0xfd   : > { %v825_v8 = vmax.f32 %v809_v4, 0.0  ;;  %v810_v9 = vadd.f32 %v1355_v5, %v1635_v58  ;;  %v920_v4 = vpop.permute.xlu0 %919 }
  0xfe   : > { %v939_v10 = vmul.f32 %v870_v44, %v827_v6  ;;  %v828_v11 = vmax.f32 %v812_v7, 0.0 }
  0xff   : > { %v937_v13 = vmul.f32 %v860_v46, %v825_v8  ;;  %v826_v14 = vmax.f32 %v810_v9, 0.0  ;;  %v1336_v15 = vpop.f32.mrb[4].mxu0 }
 0x100   : > { %v1233_v17 = vpack.c.bf16 %v939_v10, %v939_v10  ;;  %v940_v18 = vmul.f32 %v875_v49, %v828_v11  ;;  %v1356_v19 = vadd.f32 %v1336_v15, %v1292_v51  ;;  %v739_v20 = vpop.f32.mrb[5].mxu0 }
 0x101   : > { %v1231_v21 = vpack.c.bf16 %v937_v13, %v937_v13  ;;  %v938_v22 = vmul.f32 %v865_v50, %v826_v14  ;;  %v1357_v23 = vadd.f32 %v739_v20, %v414_v52  ;;  %v1337_v24 = vpop.f32.mrb[6].mxu0 }
 0x102   : > { %1020 = vst.msk [vmem:[%s1647_s9 + $0x8] sm:$0xf] %vm1017_vm1, %v1233_v17  ;;  %v1234_v25 = vpack.c.bf16 %v940_v18, %v940_v18  ;;  %v815_v26 = vadd.f32 %v1356_v19, %v1635_v58  ;;  %v1358_v27 = vadd.f32 %v1337_v24, %v1293_v53  ;;  %v742_v28 = vpop.f32.mrb[7].mxu0 }
 0x103   : > { %1018 = vst.msk [vmem:[%s1647_s9] sm:$0xf] %vm1017_vm1, %v1231_v21  ;;  %v1232_v29 = vpack.c.bf16 %v938_v22, %v938_v22  ;;  %v813_v30 = vadd.f32 %v1357_v23, %v1635_v58  ;;  %v1359_v31 = vadd.f32 %v742_v28, %v417_v54 }
 0x104   : > { %1021 = vst.msk [vmem:[%s1647_s9 + $0xc] sm:$0xf] %vm1017_vm1, %v1234_v25  ;;  %v831_v32 = vmax.f32 %v815_v26, 0.0  ;;  %v816_v33 = vadd.f32 %v1358_v27, %v1635_v58 }
 0x105   : > { %1019 = vst.msk [vmem:[%s1647_s9 + $0x4] sm:$0xf] %vm1017_vm1, %v1232_v29  ;;  %v829_v35 = vmax.f32 %v813_v30, 0.0  ;;  %v814_v36 = vadd.f32 %v1359_v31, %v1635_v58  ;;  %v930_v31 = vpop.permute.xlu0 %929 }
 0x106   : > { %v943_v38 = vmul.f32 %v890_v0, %v831_v32  ;;  %v832_v39 = vmax.f32 %v816_v33, 0.0 }
 0x107   : > { %v1318_v40 = vpop.f32.mrb[8].mxu1  ;;  %v941_v41 = vmul.f32 %v880_v56, %v829_v35  ;;  %v830_v42 = vmax.f32 %v814_v36, 0.0  ;;  %v1340_v43 = vpop.f32.mrb[8].mxu0 }
 0x108   : > { %v553_v44 = vpop.f32.mrb[9].mxu1  ;;  %v1237_v45 = vpack.c.bf16 %v943_v38, %v943_v38  ;;  %v944_v46 = vmul.f32 %v895_v61, %v832_v39  ;;  %v1360_v47 = vadd.f32 %v1340_v43, %v1318_v40  ;;  %v755_v48 = vpop.f32.mrb[9].mxu0 }
 0x109   : > { %v1319_v49 = vpop.f32.mrb[10].mxu1  ;;  %v1235_v50 = vpack.c.bf16 %v941_v41, %v941_v41  ;;  %v942_v51 = vmul.f32 %v1630_v55, %v830_v42  ;;  %v1361_v52 = vadd.f32 %v755_v48, %v553_v44  ;;  %v1341_v53 = vpop.f32.mrb[10].mxu0 }
 0x10a   : > { %v556_v54 = vpop.f32.mrb[11].mxu1  ;;  %1024 = vst.msk [vmem:[%s1647_s9 + $0x18] sm:$0xf] %vm1017_vm1, %v1237_v45  ;;  %v1238_v56 = vpack.c.bf16 %v944_v46, %v944_v46  ;;  %v819_v57 = vadd.f32 %v1360_v47, %v1635_v58  ;;  %v1362_v59 = vadd.f32 %v1341_v53, %v1319_v49  ;;  %v758_v60 = vpop.f32.mrb[11].mxu0 }
 0x10b   : > { %1022 = vst.msk [vmem:[%s1647_s9 + $0x10] sm:$0xf] %vm1017_vm1, %v1235_v50  ;;  %v1236_v61 = vpack.c.bf16 %v942_v51, %v942_v51  ;;  %v817_v62 = vadd.f32 %v1361_v52, %v1635_v58  ;;  %v1363_v63 = vadd.f32 %v758_v60, %v556_v54  ;;  %v935_v36 = vpop.permute.xlu1 %934 }
 0x10c   : > { %1025 = vst.msk [vmem:[%s1647_s9 + $0x1c] sm:$0xf] %vm1017_vm1, %v1238_v56  ;;  %v835_v55 = vmax.f32 %v819_v57, 0.0  ;;  %v820_v0 = vadd.f32 %v1362_v59, %v1635_v58 }
 0x10d   : > { %1023 = vst.msk [vmem:[%s1647_s9 + $0x14] sm:$0xf] %vm1017_vm1, %v1236_v61  ;;  %v833_v2 = vmax.f32 %v817_v62, 0.0  ;;  %v818_v3 = vadd.f32 %v1363_v63, %v1635_v58 }
 0x10e   : > { %v947_v5 = vmul.f32 %v910_v37, %v835_v55  ;;  %v836_v6 = vmax.f32 %v820_v0, 0.0 }
 0x10f   : > { %v1322_v7 = vpop.f32.mrb[12].mxu1  ;;  %v945_v8 = vmul.f32 %v1649_v16, %v833_v2  ;;  %v834_v9 = vmax.f32 %v818_v3, 0.0  ;;  %v1344_v10 = vpop.f32.mrb[12].mxu0 }
 0x110   : > { %v569_v11 = vpop.f32.mrb[13].mxu1  ;;  %v1241_v13 = vpack.c.bf16 %v947_v5, %v947_v5  ;;  %v948_v14 = vmul.f32 %v915_v34, %v836_v6  ;;  %v1364_v15 = vadd.f32 %v1344_v10, %v1322_v7  ;;  %v771_v17 = vpop.f32.mrb[13].mxu0 }
 0x111   : > { %v1323_v18 = vpop.f32.mrb[14].mxu1  ;;  %v1239_v19 = vpack.c.bf16 %v945_v8, %v945_v8  ;;  %v946_v20 = vmul.f32 %v1642_v12, %v834_v9  ;;  %v1365_v21 = vadd.f32 %v771_v17, %v569_v11  ;;  %v1345_v22 = vpop.f32.mrb[14].mxu0 }
 0x112   : > { %v572_v23 = vpop.f32.mrb[15].mxu1  ;;  %1028 = vst.msk [vmem:[%s1647_s9 + $0x28] sm:$0xf] %vm1017_vm1, %v1241_v13  ;;  %v1242_v16 = vpack.c.bf16 %v948_v14, %v948_v14  ;;  %v823_v24 = vadd.f32 %v1364_v15, %v1635_v58  ;;  %v1366_v25 = vadd.f32 %v1345_v22, %v1323_v18  ;;  %v774_v26 = vpop.f32.mrb[15].mxu0 }
 0x113   : > { %1026 = vst.msk [vmem:[%s1647_s9 + $0x20] sm:$0xf] %vm1017_vm1, %v1239_v19  ;;  %v1240_v27 = vpack.c.bf16 %v946_v20, %v946_v20  ;;  %v821_v28 = vadd.f32 %v1365_v21, %v1635_v58  ;;  %v1367_v29 = vadd.f32 %v774_v26, %v572_v23 }
 0x114   : > { %1029 = vst.msk [vmem:[%s1647_s9 + $0x2c] sm:$0xf] %vm1017_vm1, %v1242_v16  ;;  %v839_v12 = vmax.f32 %v823_v24, 0.0  ;;  %v824_v30 = vadd.f32 %v1366_v25, %v1635_v58 }
 0x115   : > { %1027 = vst.msk [vmem:[%s1647_s9 + $0x24] sm:$0xf] %vm1017_vm1, %v1240_v27  ;;  %v837_v32 = vmax.f32 %v821_v28, 0.0  ;;  %v822_v33 = vadd.f32 %v1367_v29, %v1635_v58 }
 0x116   : > { %v951_v34 = vmul.f32 %v930_v31, %v839_v12  ;;  %v840_v35 = vmax.f32 %v824_v30, 0.0 }
 0x117   : > { %v949_v37 = vmul.f32 %v920_v4, %v837_v32  ;;  %v838_v38 = vmax.f32 %v822_v33, 0.0 }
 0x118   : > { %v1245_v39 = vpack.c.bf16 %v951_v34, %v951_v34  ;;  %v952_v40 = vmul.f32 %v935_v36, %v840_v35 }
 0x119   : > { %v1243_v41 = vpack.c.bf16 %v949_v37, %v949_v37  ;;  %v950_v42 = vmul.f32 %v925_v1, %v838_v38 }
 0x11a   : > { %1032 = vst.msk [vmem:[%s1647_s9 + $0x38] sm:$0xf] %vm1017_vm1, %v1245_v39  ;;  %v1246_v43 = vpack.c.bf16 %v952_v40, %v952_v40 }
 0x11b   : > { %1030 = vst.msk [vmem:[%s1647_s9 + $0x30] sm:$0xf] %vm1017_vm1, %v1243_v41  ;;  %v1244_v44 = vpack.c.bf16 %v950_v42, %v950_v42 }
 0x11c   : > { %1033 = vst.msk [vmem:[%s1647_s9 + $0x3c] sm:$0xf] %vm1017_vm1, %v1246_v43 }
 0x11d   : > { %1031 = vst.msk [vmem:[%s1647_s9 + $0x34] sm:$0xf] %vm1017_vm1, %v1244_v44 }
 0x11e PF: > { %s14_s17 = sadd.s32 1, %s1460_s17   ;;  %s1712_s15 = smov %s1456_s16 }
 0x11f   : > { %p11_p5 = scmp.ge.s32.totalorder %s14_s17, 4   ;;  %s1713_s16 = smov %s1715_s18 }
 0x121   :  { %13 = sbr.rel (!%p11_p5) target bundleno = 2 (0x2), region = 74 }

// kernel: _lambda_.10
= control target key start
LH: loop header
LB: loop body
LE: loop exit
PB: predicated region body
PF: predicated region fallthrough
CT: control target
= control target key end

     0   :  { %s1802_s18 = smov 0   ;;  %s1804_s19 = smov 0   ;;  %s2103_s0 = inlined_call_operand.vmem [shape: bf16[2,96,96], index: 0, kind: input, shape index: {}]   ;;  %s2104_s1 = inlined_call_operand.vmem [shape: bf16[2,96,96], index: 1, kind: input, shape index: {}]   ;;  %s2105_s2 = inlined_call_operand.vmem [shape: bf16[3,96,256], index: 2, kind: input, shape index: {}]   ;;  %s2106_s3 = inlined_call_operand.vmem [shape: f32[1,256], index: 3, kind: input, shape index: {}]   ;;  %s2107_s4 = inlined_call_operand.vmem [shape: f32[32,1], index: 4, kind: input, shape index: {}]   ;;  %s2108_s5 = inlined_call_operand.vmem [shape: bf16[2,32,256], index: 5, kind: output, shape index: {}]  }
   0x1   :  { %s1806_s20 = smov 0  }
   0x2 LB: > { %s24_s21 = sadd.s32 1, %s1765_s19  ;;  %p1465_p0 = scmp.ge.s32.totalorder %s1769_s20, 1  ;;  %s1769_s20 = sphi %s1806_s20, %s15_s20   ;;  %s1765_s19 = sphi %s1804_s19, %s2110_s19   ;;  %s1761_s18 = sphi %s1802_s18, %s2109_s18  }
   0x3   : > { %p25_p1 = scmp.ge.s32.totalorder %s24_s21, 2  ;;  %p232_p2 = scmp.lt.s32.totalorder %s1769_s20, 3 }
   0x5   : > { %s2112_s21 = smov (%p25_p1, %s24_s21), 0  ;;  %p233_p3 = pnand %p1465_p0, %p232_p2 }
   0x6   : > { %v1675_v0 = vld [vmem:[%s2105_s2 + $0x64] ss:$8 sps:$4 sm:$0xff] (!%p233_p3)   ;;  %p278_p4 = scmp.lt.s32.totalorder (!%p233_p3), %s1761_s18, 1  ;;  %v1677_v1 = vld [vmem:[%s2105_s2 + $0x60] ss:$8 sps:$4 sm:$0xff] (!%p233_p3)   ;;  %v1771_v2 = vmov (!%p233_p3), 0   ;;  %v856_v59 = vlaneseq (!%p233_p3) }
   0x7   : > { %236 = sbr.rel (%p233_p3) target bundleno = 348 (0x15c), region = 40  ;;  %471 = vmatprep.mubr.bf16.mxu0 (!%p233_p3), %v1771_v2  ;;  %972 = vmatprep.mubr.bf16.mxu1 (!%p233_p3), %v1771_v2  ;;  %v1678_v3 = vld [vmem:[%s2105_s2 + $0x74] ss:$8 sps:$4 sm:$0xff] (!%p233_p3)   ;;  %v1680_v4 = vld [vmem:[%s2105_s2 + $0x70] ss:$8 sps:$4 sm:$0xff] (!%p233_p3)   ;;  %vm426_vm0 = vcmask (!%p233_p3), 785408  }
   0x8   : > { %439 = vmatprep.subr.bf16.mxu0 (!%p233_p3), %v1675_v0  ;;  %940 = vmatprep.subr.bf16.mxu1 (!%p233_p3), %v1675_v0  ;;  %v1681_v5 = vld [vmem:[%s2105_s2 + $0x84] ss:$8 sps:$4 sm:$0xff] (!%p233_p3)   ;;  %v1683_v6 = vld [vmem:[%s2105_s2 + $0x80] ss:$8 sps:$4 sm:$0xff] (!%p233_p3)   ;;  %v1684_v7 = vld [vmem:[%s2105_s2 + $0x94] ss:$8 sps:$4 sm:$0xff] (!%p233_p3)  }
   0x9   : > { %440 = vmatpush1.bf16.msra.mxu0 (!%p233_p3), %v1677_v1  ;;  %941 = vmatpush1.bf16.msra.mxu1 (!%p233_p3), %v1677_v1  ;;  %v1686_v8 = vld [vmem:[%s2105_s2 + $0x90] ss:$8 sps:$4 sm:$0xff] (!%p233_p3)   ;;  %v1687_v9 = vld [vmem:[%s2105_s2 + $0xa4] ss:$8 sps:$4 sm:$0xff] (!%p233_p3)   ;;  %v1689_v10 = vld [vmem:[%s2105_s2 + $0xa0] ss:$8 sps:$4 sm:$0xff] (!%p233_p3)  }
   0xa   : > { %441 = vmatprep.subr.bf16.mxu0 (!%p233_p3), %v1678_v3  ;;  %942 = vmatprep.subr.bf16.mxu1 (!%p233_p3), %v1678_v3  ;;  %v1690_v11 = vld [vmem:[%s2105_s2 + $0xb4] ss:$8 sps:$4 sm:$0xff] (!%p233_p3)   ;;  %v1692_v12 = vld [vmem:[%s2105_s2 + $0xb0] ss:$8 sps:$4 sm:$0xff] (!%p233_p3)   ;;  %v1696_v13 = vld [vmem:[%s2105_s2 + $0x4] ss:$8 sps:$4 sm:$0xff] (!%p233_p3)  }
   0xb   : > { %1673 = vset.pattern.permute.xlu0 (!%p233_p3), %v1771_v2  ;;  %1674 = vset.pattern.permute.xlu1 (!%p233_p3), %v1771_v2  ;;  %v1694_v16 = vld [vmem:[%s2105_s2] ss:$8 sps:$4 sm:$0xff] (!%p233_p3)   ;;  %v1700_v17 = vld [vmem:[%s2105_s2 + $0x14] ss:$8 sps:$4 sm:$0xff] (!%p233_p3)   ;;  %v1698_v18 = vld [vmem:[%s2105_s2 + $0x10] ss:$8 sps:$4 sm:$0xff] (!%p233_p3)  }
   0xc   : > { %v1705_v19 = vld [vmem:[%s2105_s2 + $0x24] ss:$8 sps:$4 sm:$0xff] (!%p233_p3)   ;;  %v1703_v22 = vld [vmem:[%s2105_s2 + $0x20] ss:$8 sps:$4 sm:$0xff] (!%p233_p3)   ;;  %v1709_v23 = vld [vmem:[%s2105_s2 + $0x34] ss:$8 sps:$4 sm:$0xff] (!%p233_p3)  }
   0xd   : > { %442 = vmatpush1.bf16.msra.mxu0 (!%p233_p3), %v1680_v4  ;;  %943 = vmatpush1.bf16.msra.mxu1 (!%p233_p3), %v1680_v4  ;;  %v1707_v24 = vld [vmem:[%s2105_s2 + $0x30] ss:$8 sps:$4 sm:$0xff] (!%p233_p3)   ;;  %v1713_v25 = vld [vmem:[%s2105_s2 + $0x44] ss:$8 sps:$4 sm:$0xff] (!%p233_p3)   ;;  %v1711_v28 = vld [vmem:[%s2105_s2 + $0x40] ss:$8 sps:$4 sm:$0xff] (!%p233_p3)  }
   0xe   : > { %s2114_s18 = smov (!%p278_p4, %s1761_s18), 1  ;;  %443 = vmatprep.subr.bf16.mxu0 %v1681_v5  ;;  %944 = vmatprep.subr.bf16.mxu1 %v1681_v5  ;;  %v1718_v29 = vld [vmem:[%s2105_s2 + $0x54] ss:$8 sps:$4 sm:$0xff]   ;;  %v1716_v30 = vld [vmem:[%s2105_s2 + $0x50] ss:$8 sps:$4 sm:$0xff]   ;;  %v1279_v31 = vld [vmem:[%s2107_s4] sm:$0xff] }
   0xf   : > { %s1647_s7 = smul.u32 48, %s2114_s18  ;;  %v1281_v32 = vld [vmem:[%s2107_s4 + $0x10] sm:$0xff]  ;;  %v1722_v33 = vld [vmem:[%s2105_s2 + $0xc4] ss:$8 sps:$4 sm:$0xff]   ;;  %1285 = vperm.xlu0 %1673, %v1279_v31   ;;  %v1282_v37 = vld [vmem:[%s2107_s4 + $0x18] sm:$0xff]  ;;  %v857_v60 = vshrl.u32 %v856_v59, 7 }
  0x10   : > { %1295 = vperm.xlu1 %1674, %v1281_v32   ;;  %v1280_v36 = vld [vmem:[%s2107_s4 + $0x8] sm:$0xff]  ;;  %v1726_v41 = vld [vmem:[%s2105_s2 + $0xd4] ss:$8 sps:$4 sm:$0xff]   ;;  %v1724_v42 = vld [vmem:[%s2105_s2 + $0xd0] ss:$8 sps:$4 sm:$0xff]  }
  0x11   : > { %s1848_s12 = scalar_lea.vmem %s2103_s0, %s1647_s7  ;;  %s1856_s17 = scalar_lea.vmem %s2104_s1, %s1647_s7  ;;  %444 = vmatpush1.bf16.msra.mxu0 %v1683_v6  ;;  %945 = vmatpush1.bf16.msra.mxu1 %v1683_v6  ;;  %v1720_v40 = vld [vmem:[%s2105_s2 + $0xc0] ss:$8 sps:$4 sm:$0xff]   ;;  %v1729_v43 = vld [vmem:[%s2105_s2 + $0xe4] ss:$8 sps:$4 sm:$0xff]   ;;  %v1732_v45 = vld [vmem:[%s2105_s2 + $0xf4] ss:$8 sps:$4 sm:$0xff]  }
  0x12   : > { %445 = vmatprep.subr.bf16.mxu0 %v1684_v7  ;;  %946 = vmatprep.subr.bf16.mxu1 %v1684_v7  ;;  %v1877_v14 = vld [vmem:[%s1848_s12 + $0x8] sm:$0xff]   ;;  %v1901_v20 = vld [vmem:[%s1848_s12 + $0x10] sm:$0xff]   ;;  %v1925_v26 = vld [vmem:[%s1848_s12 + $0x18] sm:$0xff]   ;;  %v858_v61 = vsub.s32 0, %v857_v60  ;;  %v862_v63 = vsub.s32 1, %v857_v60 }
  0x13   : > { %v1880_v15 = vld [vmem:[%s1856_s17 + $0x8] sm:$0xff]   ;;  %v1904_v21 = vld [vmem:[%s1856_s17 + $0x10] sm:$0xff]   ;;  %v1928_v27 = vld [vmem:[%s1856_s17 + $0x18] sm:$0xff]   ;;  %1290 = vperm.xlu0 %1673, %v1280_v36  }
  0x14   : > { %v1714_v34 = vld [vmem:[%s1848_s12 + $0x20] sm:$0xff]   ;;  %1300 = vperm.xlu1 %1674, %v1282_v37   ;;  %v1730_v46 = vld [vmem:[%s2105_s2 + $0xf0] ss:$8 sps:$4 sm:$0xff]   ;;  %v1738_v49 = vld [vmem:[%s2105_s2 + $0x114] ss:$8 sps:$4 sm:$0xff]  }
  0x15   : > { %446 = vmatpush1.bf16.msra.mxu0 %v1686_v8  ;;  %947 = vmatpush1.bf16.msra.mxu1 %v1686_v8  ;;  %v1715_v35 = vld [vmem:[%s1856_s17 + $0x20] sm:$0xff]   ;;  %v1736_v50 = vld [vmem:[%s2105_s2 + $0x110] ss:$8 sps:$4 sm:$0xff]   ;;  %v1745_v57 = vld [vmem:[%s1848_s12 + $0x28] sm:$0xff]  }
  0x16   : > { %447 = vmatprep.subr.bf16.mxu0 %v1687_v9  ;;  %948 = vmatprep.subr.bf16.mxu1 %v1687_v9  ;;  %v1719_v38 = vld [vmem:[%s1848_s12] sm:$0xff]   ;;  %v1739_v51 = vld [vmem:[%s1848_s12 + $0x10] sm:$0xff]   ;;  %v1741_v53 = vld [vmem:[%s1848_s12 + $0x18] sm:$0xff]  }
  0x17   : > { %v1723_v39 = vld [vmem:[%s1856_s17] sm:$0xff]   ;;  %v1740_v52 = vld [vmem:[%s1856_s17 + $0x10] sm:$0xff]   ;;  %v1742_v54 = vld [vmem:[%s1856_s17 + $0x18] sm:$0xff]  }
  0x18   : > { %v1727_v44 = vld [vmem:[%s2105_s2 + $0xe0] ss:$8 sps:$4 sm:$0xff]   ;;  %v1735_v47 = vld [vmem:[%s2105_s2 + $0x104] ss:$8 sps:$4 sm:$0xff]  }
  0x19   : > { %448 = vmatpush1.bf16.msra.mxu0 %v1689_v10  ;;  %949 = vmatpush1.bf16.msra.mxu1 %v1689_v10  ;;  %v1733_v48 = vld [vmem:[%s2105_s2 + $0x100] ss:$8 sps:$4 sm:$0xff]  }
  0x1a   : > { %449 = vmatprep.subr.bf16.mxu0 %v1690_v11  ;;  %950 = vmatprep.subr.bf16.mxu1 %v1690_v11  ;;  %v1743_v55 = vld [vmem:[%s1848_s12 + $0x20] sm:$0xff]   ;;  %v1746_v58 = vld [vmem:[%s1856_s17 + $0x28] sm:$0xff]   ;;  %s1578_s12 = sshll.u32 %s2114_s18, 5 }
  0x1b   : > { %v1744_v56 = vld [vmem:[%s1856_s17 + $0x20] sm:$0xff]   ;;  %s2076_s8 = scalar_lea.vmem %s2108_s5, %s1578_s12 }
  0x1c   : > { %v310_v62 = vld [vmem:[%s2106_s3] sm:$0x3] }
  0x1d   : > { %450 = vmatpush1.bf16.msra.mxu0 %v1692_v12  ;;  %951 = vmatpush1.bf16.msra.mxu1 %v1692_v12  ;;  %v2048_v0 = vrot.slane %v310_v62, %v858_v61  ;;  %v2050_v1 = vrot.slane %v310_v62, %v862_v63 }
  0x1e   : > { %580 = vmatprep.subr.bf16.mxu0 %v1696_v13  ;;  %1021 = vmatprep.subr.bf16.mxu1 %v1696_v13 }
  0x20   : > { %1498 = vmatmul.mubr.msk.bf16.vlgmr.msra.gmra.mrb[0].mxu0 %vm426_vm0, %v1877_v14  ;;  %1555 = vmatmul.mubr.msk.bf16.vlgmr.msra.gmra.mrb[0].mxu1 %vm426_vm0, %v1880_v15 }
  0x21   : > { %581 = vmatpush1.bf16.msra.mxu0 %v1694_v16  ;;  %1022 = vmatpush1.bf16.msra.mxu1 %v1694_v16 }
  0x22   : > { %582 = vmatprep.subr.bf16.mxu0 %v1700_v17  ;;  %1023 = vmatprep.subr.bf16.mxu1 %v1700_v17 }
  0x23   : > { %481 = vmatprep.mubr.bf16.mxu0 %v1771_v2  ;;  %982 = vmatprep.mubr.bf16.mxu1 %v1771_v2 }
  0x25   : > { %583 = vmatpush1.bf16.msra.mxu0 %v1698_v18  ;;  %1024 = vmatpush1.bf16.msra.mxu1 %v1698_v18 }
  0x26   : > { %584 = vmatprep.subr.bf16.mxu0 %v1705_v19  ;;  %1025 = vmatprep.subr.bf16.mxu1 %v1705_v19 }
  0x28   : > { %1499 = vmatmul.mubr.msk.bf16.gmra.mrb[4].mxu0 %vm426_vm0, %v1901_v20  ;;  %1556 = vmatmul.mubr.msk.bf16.gmra.mrb[4].mxu1 %vm426_vm0, %v1904_v21 }
  0x29   : > { %585 = vmatpush1.bf16.msra.mxu0 %v1703_v22  ;;  %1026 = vmatpush1.bf16.msra.mxu1 %v1703_v22 }
  0x2a   : > { %491 = vmatprep.mubr.bf16.mxu0 %v1771_v2  ;;  %992 = vmatprep.mubr.bf16.mxu1 %v1771_v2 }
  0x2b   : > { %586 = vmatprep.subr.bf16.mxu0 %v1709_v23  ;;  %1027 = vmatprep.subr.bf16.mxu1 %v1709_v23 }
  0x2d   : > { %587 = vmatpush1.bf16.msra.mxu0 %v1707_v24  ;;  %1028 = vmatpush1.bf16.msra.mxu1 %v1707_v24 }
  0x2e   : > { %588 = vmatprep.subr.bf16.mxu0 %v1713_v25  ;;  %1029 = vmatprep.subr.bf16.mxu1 %v1713_v25 }
  0x30   : > { %1500 = vmatmul.mubr.msk.bf16.gmra.mrb[8].mxu0 %vm426_vm0, %v1925_v26  ;;  %1557 = vmatmul.mubr.msk.bf16.gmra.mrb[8].mxu1 %vm426_vm0, %v1928_v27 }
  0x31   : > { %501 = vmatprep.mubr.bf16.mxu0 %v1771_v2  ;;  %589 = vmatpush1.bf16.msra.mxu0 %v1711_v28 }
  0x32   : > { %1002 = vmatprep.mubr.bf16.mxu1 %v1771_v2  ;;  %1030 = vmatpush1.bf16.msra.mxu1 %v1711_v28 }
  0x33   : > { %590 = vmatprep.subr.bf16.mxu0 %v1718_v29  ;;  %1031 = vmatprep.subr.bf16.mxu1 %v1718_v29 }
  0x35   : > { %591 = vmatpush1.bf16.msra.mxu0 %v1716_v30 }
  0x36   : > { %1032 = vmatpush1.bf16.msra.mxu1 %v1716_v30  ;;  %766 = vmatprep.subr.bf16.mxu0 %v1722_v33 }
  0x37   : > { %1134 = vmatprep.subr.bf16.mxu1 %v1722_v33 }
  0x38   : > { %1501 = vmatmul.mubr.msk.bf16.gmra.mrb[12].mxu0 %vm426_vm0, %v1714_v34  ;;  %1558 = vmatmul.mubr.msk.bf16.gmra.mrb[12].mxu1 %vm426_vm0, %v1715_v35 }
  0x39   : > { %612 = vmatprep.mubr.bf16.mxu0 %v1771_v2  ;;  %1053 = vmatprep.mubr.bf16.mxu1 %v1771_v2 }
  0x40   : > { %1515 = vmatmul.mubr.msk.bf16.vlgmr.msra.gmra.mrb[0].mxu0 %vm426_vm0, %v1719_v38  ;;  %1560 = vmatmul.mubr.msk.bf16.vlgmr.msra.gmra.mrb[0].mxu1 %vm426_vm0, %v1723_v39 }
  0x41   : > { %767 = vmatpush1.bf16.msra.mxu0 %v1720_v40  ;;  %1135 = vmatpush1.bf16.msra.mxu1 %v1720_v40 }
  0x42   : > { %768 = vmatprep.subr.bf16.mxu0 %v1726_v41  ;;  %1136 = vmatprep.subr.bf16.mxu1 %v1726_v41 }
  0x43   : > { %622 = vmatprep.mubr.bf16.mxu0 %v1771_v2  ;;  %1063 = vmatprep.mubr.bf16.mxu1 %v1771_v2 }
  0x45   : > { %769 = vmatpush1.bf16.msra.mxu0 %v1724_v42  ;;  %1137 = vmatpush1.bf16.msra.mxu1 %v1724_v42 }
  0x46   : > { %770 = vmatprep.subr.bf16.mxu0 %v1729_v43  ;;  %1138 = vmatprep.subr.bf16.mxu1 %v1729_v43 }
  0x48   : > { %1516 = vmatmul.mubr.msk.bf16.gmra.mrb[4].mxu0 %vm426_vm0, %v1877_v14  ;;  %1561 = vmatmul.mubr.msk.bf16.gmra.mrb[4].mxu1 %vm426_vm0, %v1880_v15 }
  0x49   : > { %771 = vmatpush1.bf16.msra.mxu0 %v1727_v44  ;;  %1139 = vmatpush1.bf16.msra.mxu1 %v1727_v44 }
  0x4a   : > { %632 = vmatprep.mubr.bf16.mxu0 %v1771_v2  ;;  %1073 = vmatprep.mubr.bf16.mxu1 %v1771_v2 }
  0x4b   : > { %772 = vmatprep.subr.bf16.mxu0 %v1732_v45  ;;  %1140 = vmatprep.subr.bf16.mxu1 %v1732_v45 }
  0x4d   : > { %773 = vmatpush1.bf16.msra.mxu0 %v1730_v46  ;;  %1141 = vmatpush1.bf16.msra.mxu1 %v1730_v46 }
  0x4e   : > { %774 = vmatprep.subr.bf16.mxu0 %v1735_v47  ;;  %1142 = vmatprep.subr.bf16.mxu1 %v1735_v47 }
  0x50   : > { %1517 = vmatmul.mubr.msk.bf16.gmra.mrb[8].mxu0 %vm426_vm0, %v1901_v20  ;;  %1562 = vmatmul.mubr.msk.bf16.gmra.mrb[8].mxu1 %vm426_vm0, %v1904_v21 }
  0x51   : > { %642 = vmatprep.mubr.bf16.mxu0 %v1771_v2  ;;  %775 = vmatpush1.bf16.msra.mxu0 %v1733_v48 }
  0x52   : > { %1083 = vmatprep.mubr.bf16.mxu1 %v1771_v2  ;;  %1143 = vmatpush1.bf16.msra.mxu1 %v1733_v48 }
  0x53   : > { %776 = vmatprep.subr.bf16.mxu0 %v1738_v49  ;;  %1144 = vmatprep.subr.bf16.mxu1 %v1738_v49 }
  0x55   : > { %777 = vmatpush1.bf16.msra.mxu0 %v1736_v50 }
  0x56   : > { %1145 = vmatpush1.bf16.msra.mxu1 %v1736_v50 }
  0x58   : > { %1518 = vmatmul.mubr.msk.bf16.gmra.mrb[12].mxu0 %vm426_vm0, %v1925_v26  ;;  %1563 = vmatmul.mubr.msk.bf16.gmra.mrb[12].mxu1 %vm426_vm0, %v1928_v27 }
  0x59   : > { %798 = vmatprep.mubr.bf16.mxu0 %v1771_v2  ;;  %1166 = vmatprep.mubr.bf16.mxu1 %v1771_v2 }
  0x60   : > { %1547 = vmatmul.mubr.msk.bf16.vlgmr.msra.gmra.mrb[0].mxu0 %vm426_vm0, %v1739_v51  ;;  %1568 = vmatmul.mubr.msk.bf16.vlgmr.msra.gmra.mrb[0].mxu1 %vm426_vm0, %v1740_v52 }
  0x61   : > { %808 = vmatprep.mubr.bf16.mxu0 %v1771_v2  ;;  %1176 = vmatprep.mubr.bf16.mxu1 %v1771_v2 }
  0x68   : > { %1548 = vmatmul.mubr.msk.bf16.gmra.mrb[4].mxu0 %vm426_vm0, %v1741_v53  ;;  %1569 = vmatmul.mubr.msk.bf16.gmra.mrb[4].mxu1 %vm426_vm0, %v1742_v54 }
  0x69   : > { %818 = vmatprep.mubr.bf16.mxu0 %v1771_v2  ;;  %1186 = vmatprep.mubr.bf16.mxu1 %v1771_v2 }
  0x70   : > { %1549 = vmatmul.mubr.msk.bf16.gmra.mrb[8].mxu0 %vm426_vm0, %v1743_v55  ;;  %1570 = vmatmul.mubr.msk.bf16.gmra.mrb[8].mxu1 %vm426_vm0, %v1744_v56 }
  0x71   : > { %828 = vmatprep.mubr.bf16.mxu0 %v1771_v2  ;;  %1196 = vmatprep.mubr.bf16.mxu1 %v1771_v2 }
  0x78   : > { %1550 = vmatmul.mubr.msk.bf16.gmra.mrb[12].mxu0 %vm426_vm0, %v1745_v57  ;;  %1571 = vmatmul.mubr.msk.bf16.gmra.mrb[12].mxu1 %vm426_vm0, %v1746_v58 }
  0x8e   : > { %v1286_v29 = vpop.permute.xlu0 %1285 }
  0x92   : > { %v1291_v59 = vpop.permute.xlu0 %1290 }
 0x133   : > { %v800_v3 = vpop.f32.mrb[0].mxu0  ;;  %v1168_v2 = vpop.f32.mrb[0].mxu1 }
 0x134   : > { %v866_v4 = vadd.f32 %v2048_v0, %v800_v3  ;;  %v1223_v5 = vadd.f32 %v1168_v2, %v2048_v0  ;;  %v802_v6 = vpop.f32.mrb[1].mxu0  ;;  %v1170_v7 = vpop.f32.mrb[1].mxu1 }
 0x135   : > { %v867_v8 = vadd.f32 %v2050_v1, %v802_v6  ;;  %v1224_v9 = vadd.f32 %v1170_v7, %v2050_v1  ;;  %v804_v10 = vpop.f32.mrb[2].mxu0  ;;  %v1172_v11 = vpop.f32.mrb[2].mxu1 }
 0x136   : > { %v882_v12 = vmax.f32 %v866_v4, 0.0  ;;  %v1239_v13 = vmax.f32 %v1223_v5, 0.0  ;;  %v868_v14 = vadd.f32 %v2048_v0, %v804_v10  ;;  %v1225_v15 = vadd.f32 %v1172_v11, %v2048_v0  ;;  %v806_v16 = vpop.f32.mrb[3].mxu0  ;;  %v1174_v17 = vpop.f32.mrb[3].mxu1 }
 0x137   : > { %v883_v18 = vmax.f32 %v867_v8, 0.0  ;;  %v1240_v19 = vmax.f32 %v1224_v9, 0.0  ;;  %v869_v20 = vadd.f32 %v2050_v1, %v806_v16  ;;  %v1226_v21 = vadd.f32 %v1174_v17, %v2050_v1 }
 0x138   : > { %v1255_v22 = vmax.f32 %v882_v12, %v1239_v13  ;;  %v884_v23 = vmax.f32 %v868_v14, 0.0  ;;  %v1241_v24 = vmax.f32 %v1225_v15, 0.0 }
 0x139   : > { %v1256_v25 = vmax.f32 %v883_v18, %v1240_v19  ;;  %v885_v26 = vmax.f32 %v869_v20, 0.0  ;;  %v1242_v27 = vmax.f32 %v1226_v21, 0.0 }
 0x13a   : > { %v1257_v28 = vmax.f32 %v884_v23, %v1241_v24 }
 0x13b   : > { %v1258_v30 = vmax.f32 %v885_v26, %v1242_v27  ;;  %v810_v31 = vpop.f32.mrb[4].mxu0  ;;  %v1178_v32 = vpop.f32.mrb[4].mxu1 }
 0x13c   : > { %v870_v33 = vadd.f32 %v2048_v0, %v810_v31  ;;  %v1227_v34 = vadd.f32 %v1178_v32, %v2048_v0  ;;  %v812_v35 = vpop.f32.mrb[5].mxu0  ;;  %v1180_v36 = vpop.f32.mrb[5].mxu1 }
 0x13d   : > { %v871_v37 = vadd.f32 %v2050_v1, %v812_v35  ;;  %v1228_v38 = vadd.f32 %v1180_v36, %v2050_v1  ;;  %v814_v39 = vpop.f32.mrb[6].mxu0  ;;  %v1182_v40 = vpop.f32.mrb[6].mxu1 }
 0x13e   : > { %v886_v41 = vmax.f32 %v870_v33, 0.0  ;;  %v1243_v42 = vmax.f32 %v1227_v34, 0.0  ;;  %v872_v43 = vadd.f32 %v2048_v0, %v814_v39  ;;  %v1229_v44 = vadd.f32 %v1182_v40, %v2048_v0  ;;  %v816_v45 = vpop.f32.mrb[7].mxu0  ;;  %v1184_v46 = vpop.f32.mrb[7].mxu1 }
 0x13f   : > { %v887_v47 = vmax.f32 %v871_v37, 0.0  ;;  %v1244_v48 = vmax.f32 %v1228_v38, 0.0  ;;  %v873_v49 = vadd.f32 %v2050_v1, %v816_v45  ;;  %v1230_v50 = vadd.f32 %v1184_v46, %v2050_v1 }
 0x140   : > { %v1259_v51 = vmax.f32 %v886_v41, %v1243_v42  ;;  %v888_v52 = vmax.f32 %v872_v43, 0.0  ;;  %v1245_v53 = vmax.f32 %v1229_v44, 0.0 }
 0x141   : > { %v1260_v54 = vmax.f32 %v887_v47, %v1244_v48  ;;  %v889_v55 = vmax.f32 %v873_v49, 0.0  ;;  %v1246_v56 = vmax.f32 %v1230_v50, 0.0 }
 0x142   : > { %v1261_v57 = vmax.f32 %v888_v52, %v1245_v53  ;;  %v1271_v58 = vmax.f32 %v1255_v22, %v1259_v51 }
 0x143   : > { %v1262_v60 = vmax.f32 %v889_v55, %v1246_v56  ;;  %v1272_v61 = vmax.f32 %v1256_v25, %v1260_v54  ;;  %v820_v62 = vpop.f32.mrb[8].mxu0  ;;  %v1188_v63 = vpop.f32.mrb[8].mxu1 }
 0x144   : > { %v1303_v3 = vmul.f32 %v1286_v29, %v1271_v58  ;;  %v874_v2 = vadd.f32 %v2048_v0, %v820_v62  ;;  %v1231_v4 = vadd.f32 %v1188_v63, %v2048_v0  ;;  %v822_v5 = vpop.f32.mrb[9].mxu0  ;;  %v1190_v6 = vpop.f32.mrb[9].mxu1  ;;  %v1273_v7 = vmax.f32 %v1257_v28, %v1261_v57 }
 0x145   : > { %v1304_v8 = vmul.f32 %v1286_v29, %v1272_v61  ;;  %v875_v9 = vadd.f32 %v2050_v1, %v822_v5  ;;  %v1232_v10 = vadd.f32 %v1190_v6, %v2050_v1  ;;  %v1274_v11 = vmax.f32 %v1258_v30, %v1262_v60  ;;  %v824_v12 = vpop.f32.mrb[10].mxu0  ;;  %v1192_v13 = vpop.f32.mrb[10].mxu1 }
 0x146   : > { %v890_v14 = vmax.f32 %v874_v2, 0.0  ;;  %v1247_v15 = vmax.f32 %v1231_v4, 0.0  ;;  %v1305_v16 = vmul.f32 %v1291_v59, %v1273_v7  ;;  %v876_v17 = vadd.f32 %v2048_v0, %v824_v12  ;;  %v826_v18 = vpop.f32.mrb[11].mxu0  ;;  %v1194_v19 = vpop.f32.mrb[11].mxu1 }
 0x147   : > { %v1579_v20 = vpack.c.bf16 %v1304_v8, %v1303_v3  ;;  %v891_v21 = vmax.f32 %v875_v9, 0.0  ;;  %v1248_v22 = vmax.f32 %v1232_v10, 0.0  ;;  %v1306_v23 = vmul.f32 %v1291_v59, %v1274_v11  ;;  %v1296_v56 = vpop.permute.xlu1 %1295 }
 0x148   : > { %v1263_v24 = vmax.f32 %v890_v14, %v1247_v15  ;;  %v892_v25 = vmax.f32 %v876_v17, 0.0  ;;  %v1233_v26 = vadd.f32 %v1192_v13, %v2048_v0  ;;  %v877_v27 = vadd.f32 %v2050_v1, %v826_v18 }
 0x149   : > { %1335 = vst [vmem:[%s2076_s8] sm:$0xff] %v1579_v20  ;;  %v1264_v28 = vmax.f32 %v891_v21, %v1248_v22  ;;  %v1580_v29 = vpack.c.bf16 %v1306_v23, %v1305_v16  ;;  %v1234_v30 = vadd.f32 %v1194_v19, %v2050_v1 }
 0x14a   : > { %v1249_v31 = vmax.f32 %v1233_v26, 0.0  ;;  %v893_v32 = vmax.f32 %v877_v27, 0.0 }
 0x14b   : > { %1336 = vst [vmem:[%s2076_s8 + $0x8] sm:$0xff] %v1580_v29  ;;  %v1250_v33 = vmax.f32 %v1234_v30, 0.0  ;;  %v830_v34 = vpop.f32.mrb[12].mxu0  ;;  %v1198_v35 = vpop.f32.mrb[12].mxu1 }
 0x14c   : > { %v1265_v36 = vmax.f32 %v892_v25, %v1249_v31  ;;  %v878_v37 = vadd.f32 %v2048_v0, %v830_v34  ;;  %v1235_v38 = vadd.f32 %v1198_v35, %v2048_v0  ;;  %v832_v39 = vpop.f32.mrb[13].mxu0  ;;  %v1200_v40 = vpop.f32.mrb[13].mxu1 }
 0x14d   : > { %v1266_v41 = vmax.f32 %v893_v32, %v1250_v33  ;;  %v879_v42 = vadd.f32 %v2050_v1, %v832_v39  ;;  %v1236_v43 = vadd.f32 %v1200_v40, %v2050_v1  ;;  %v834_v44 = vpop.f32.mrb[14].mxu0  ;;  %v1202_v45 = vpop.f32.mrb[14].mxu1 }
 0x14e   : > { %v894_v46 = vmax.f32 %v878_v37, 0.0  ;;  %v1251_v47 = vmax.f32 %v1235_v38, 0.0  ;;  %v880_v48 = vadd.f32 %v2048_v0, %v834_v44  ;;  %v1237_v49 = vadd.f32 %v1202_v45, %v2048_v0  ;;  %v836_v50 = vpop.f32.mrb[15].mxu0  ;;  %v1204_v51 = vpop.f32.mrb[15].mxu1 }
 0x14f   : > { %v895_v52 = vmax.f32 %v879_v42, 0.0  ;;  %v1252_v53 = vmax.f32 %v1236_v43, 0.0  ;;  %v881_v54 = vadd.f32 %v2050_v1, %v836_v50  ;;  %v1238_v55 = vadd.f32 %v1204_v51, %v2050_v1  ;;  %v1301_v7 = vpop.permute.xlu1 %1300 }
 0x150   : > { %v1267_v57 = vmax.f32 %v894_v46, %v1251_v47  ;;  %v896_v58 = vmax.f32 %v880_v48, 0.0  ;;  %v1253_v59 = vmax.f32 %v1237_v49, 0.0 }
 0x151   : > { %v1268_v60 = vmax.f32 %v895_v52, %v1252_v53  ;;  %v897_v61 = vmax.f32 %v881_v54, 0.0  ;;  %v1254_v62 = vmax.f32 %v1238_v55, 0.0 }
 0x152   : > { %v1269_v63 = vmax.f32 %v896_v58, %v1253_v59  ;;  %v1275_v3 = vmax.f32 %v1263_v24, %v1267_v57 }
 0x153   : > { %v1270_v0 = vmax.f32 %v897_v61, %v1254_v62  ;;  %v1276_v2 = vmax.f32 %v1264_v28, %v1268_v60 }
 0x154   : > { %v1307_v4 = vmul.f32 %v1296_v56, %v1275_v3  ;;  %v1277_v5 = vmax.f32 %v1265_v36, %v1269_v63 }
 0x155   : > { %v1308_v6 = vmul.f32 %v1296_v56, %v1276_v2  ;;  %v1278_v8 = vmax.f32 %v1266_v41, %v1270_v0 }
 0x156   : > { %v1309_v9 = vmul.f32 %v1301_v7, %v1277_v5 }
 0x157   : > { %v1581_v1 = vpack.c.bf16 %v1308_v6, %v1307_v4  ;;  %v1310_v10 = vmul.f32 %v1301_v7, %v1278_v8 }
 0x159   : > { %1337 = vst [vmem:[%s2076_s8 + $0x10] sm:$0xff] %v1581_v1  ;;  %v1582_v11 = vpack.c.bf16 %v1310_v10, %v1309_v9 }
 0x15b   : > { %1338 = vst [vmem:[%s2076_s8 + $0x18] sm:$0xff] %v1582_v11 }
 0x15c PF: > { %s15_s20 = sadd.s32 1, %s1769_s20   ;;  %s2109_s18 = smov %s1765_s19 }
 0x15d   : > { %p12_p5 = scmp.ge.s32.totalorder %s15_s20, 4   ;;  %s2110_s19 = smov %s2112_s21 }
 0x15f   :  { %14 = sbr.rel (!%p12_p5) target bundleno = 2 (0x2), region = 81 }

// kernel: _lambda_.9
= control target key start
LH: loop header
LB: loop body
LE: loop exit
PB: predicated region body
PF: predicated region fallthrough
CT: control target
= control target key end

     0   :  { %s2313_s18 = smov 0   ;;  %s2315_s19 = smov 0   ;;  %s2628_s0 = inlined_call_operand.vmem [shape: bf16[2,160,96], index: 0, kind: input, shape index: {}]   ;;  %s2629_s1 = inlined_call_operand.vmem [shape: bf16[2,160,96], index: 1, kind: input, shape index: {}]   ;;  %s2630_s2 = inlined_call_operand.vmem [shape: bf16[3,96,32], index: 2, kind: input, shape index: {}]   ;;  %s2631_s3 = inlined_call_operand.vmem [shape: f32[1,32], index: 3, kind: input, shape index: {}]   ;;  %s2632_s4 = inlined_call_operand.vmem [shape: f32[64,1], index: 4, kind: input, shape index: {}]   ;;  %s2633_s5 = inlined_call_operand.vmem [shape: bf16[2,64,32], index: 5, kind: output, shape index: {}]  }
   0x1   :  { %s2317_s20 = smov 0  }
   0x2 LB: > { %s24_s21 = sadd.s32 1, %s2276_s19  ;;  %p1713_p0 = scmp.ge.s32.totalorder %s2280_s20, 1  ;;  %s2280_s20 = sphi %s2317_s20, %s15_s20   ;;  %s2276_s19 = sphi %s2315_s19, %s2635_s19   ;;  %s2272_s18 = sphi %s2313_s18, %s2634_s18  }
   0x3   : > { %p25_p1 = scmp.ge.s32.totalorder %s24_s21, 2  ;;  %p228_p2 = scmp.lt.s32.totalorder %s2280_s20, 3 }
   0x5   : > { %s2637_s21 = smov (%p25_p1, %s24_s21), 0  ;;  %p229_p3 = pnand %p1713_p0, %p228_p2 }
   0x6   : > { %v2206_v0 = vld [vmem:[%s2630_s2 + $0x30] sm:$0xff] (!%p229_p3)   ;;  %p271_p4 = scmp.lt.s32.totalorder (!%p229_p3), %s2272_s18, 1  ;;  %v2207_v1 = vld [vmem:[%s2630_s2 + $0x38] sm:$0xff] (!%p229_p3)   ;;  %v2208_v2 = vld [vmem:[%s2630_s2 + $0x40] sm:$0xff] (!%p229_p3)   ;;  %v2282_v3 = vmov (!%p229_p3), 0   ;;  %vm417_vm0 = vcmask (!%p229_p3), 785408  }
   0x7   : > { %232 = sbr.rel (%p229_p3) target bundleno = 349 (0x15d), region = 40  ;;  %1946 = vmatprep.subr.bf16.mxu0 (!%p229_p3), %v2206_v0  ;;  %2030 = vmatprep.subr.bf16.mxu1 (!%p229_p3), %v2206_v0  ;;  %v2209_v4 = vld [vmem:[%s2630_s2 + $0x48] sm:$0xff] (!%p229_p3)   ;;  %v2210_v7 = vld [vmem:[%s2630_s2 + $0x50] sm:$0xff] (!%p229_p3)   ;;  %v2211_v8 = vld [vmem:[%s2630_s2 + $0x58] sm:$0xff] (!%p229_p3)   ;;  %vm1581_vm1 = vcmask (!%p229_p3), 257024  }
   0x8   : > { %1947 = vmatpush3.bf16.msra.mxu0 (!%p229_p3), %v2206_v0  ;;  %2031 = vmatpush3.bf16.msra.mxu1 (!%p229_p3), %v2206_v0  ;;  %v2215_v9 = vld [vmem:[%s2630_s2] sm:$0xff] (!%p229_p3)   ;;  %v2217_v12 = vld [vmem:[%s2630_s2 + $0x8] sm:$0xff] (!%p229_p3)   ;;  %v2222_v15 = vld [vmem:[%s2630_s2 + $0x10] sm:$0xff] (!%p229_p3)  }
   0x9   : > { %1948 = vmatprep.subr.bf16.mxu0 (!%p229_p3), %v2207_v1  ;;  %2032 = vmatprep.subr.bf16.mxu1 (!%p229_p3), %v2207_v1  ;;  %v2226_v20 = vld [vmem:[%s2630_s2 + $0x18] sm:$0xff] (!%p229_p3)   ;;  %v2228_v21 = vld [vmem:[%s2630_s2 + $0x20] sm:$0xff] (!%p229_p3)   ;;  %v2233_v26 = vld [vmem:[%s2630_s2 + $0x28] sm:$0xff] (!%p229_p3)  }
   0xa   : > { %2204 = vset.pattern.permute.xlu0 (!%p229_p3), %v2282_v3  ;;  %2205 = vset.pattern.permute.xlu1 (!%p229_p3), %v2282_v3  ;;  %v2236_v28 = vld [vmem:[%s2630_s2 + $0x60] sm:$0xff] (!%p229_p3)   ;;  %v1495_v33 = vld [vmem:[%s2632_s4 + $0x10] sm:$0xff] (!%p229_p3)  ;;  %v1494_v34 = vld [vmem:[%s2632_s4 + $0x8] sm:$0xff] (!%p229_p3) }
   0xb   : > { %v1493_v32 = vld [vmem:[%s2632_s4] sm:$0xff] (!%p229_p3)  ;;  %1513 = vperm.xlu1 (!%p229_p3), %2205, %v1495_v33   ;;  %v1496_v35 = vld [vmem:[%s2632_s4 + $0x18] sm:$0xff] (!%p229_p3)  ;;  %v2237_v36 = vld [vmem:[%s2630_s2 + $0x68] sm:$0xff] (!%p229_p3)  }
   0xc   : > { %1949 = vmatpush3.bf16.msra.mxu0 (!%p229_p3), %v2207_v1  ;;  %2033 = vmatpush3.bf16.msra.mxu1 (!%p229_p3), %v2207_v1  ;;  %v1498_v37 = vld [vmem:[%s2632_s4 + $0x28] sm:$0xff] (!%p229_p3)  ;;  %v1497_v38 = vld [vmem:[%s2632_s4 + $0x20] sm:$0xff] (!%p229_p3)  ;;  %v2238_v39 = vld [vmem:[%s2630_s2 + $0x70] sm:$0xff] (!%p229_p3)  }
   0xd   : > { %1950 = vmatprep.subr.bf16.mxu0 (!%p229_p3), %v2208_v2  ;;  %2034 = vmatprep.subr.bf16.mxu1 (!%p229_p3), %v2208_v2  ;;  %v2239_v40 = vld [vmem:[%s2630_s2 + $0x78] sm:$0xff] (!%p229_p3)   ;;  %v1499_v42 = vld [vmem:[%s2632_s4 + $0x30] sm:$0xff] (!%p229_p3)  ;;  %v2240_v43 = vld [vmem:[%s2630_s2 + $0x80] sm:$0xff] (!%p229_p3)  }
   0xe   : > { %s2639_s18 = smov (!%p271_p4, %s2272_s18), 1  ;;  %1503 = vperm.xlu0 %2204, %v1493_v32   ;;  %v1500_v41 = vld [vmem:[%s2632_s4 + $0x38] sm:$0xff]  ;;  %v2241_v44 = vld [vmem:[%s2630_s2 + $0x88] sm:$0xff]   ;;  %v2563_v61 = vld [vmem:[%s2631_s3] ss:$0 sm:$0xff] }
   0xf   : > { %s2178_s28 = smul.u32 80, %s2639_s18  ;;  %1518 = vperm.xlu1 %2205, %v1496_v35  }
  0x10   : > { %1951 = vmatpush3.bf16.msra.mxu0 %v2208_v2  ;;  %2035 = vmatpush3.bf16.msra.mxu1 %v2208_v2 }
  0x11   : > { %s2349_s8 = scalar_lea.vmem %s2628_s0, %s2178_s28  ;;  %s2354_s11 = scalar_lea.vmem %s2629_s1, %s2178_s28  ;;  %1952 = vmatprep.subr.bf16.mxu0 %v2209_v4  ;;  %2036 = vmatprep.subr.bf16.mxu1 %v2209_v4 }
  0x12   : > { %v2357_v5 = vld [vmem:[%s2349_s8 + $0x8] sm:$0xff]   ;;  %v2376_v10 = vld [vmem:[%s2349_s8 + $0x10] sm:$0xff]   ;;  %v2385_v13 = vld [vmem:[%s2349_s8 + $0x18] sm:$0xff]   ;;  %1508 = vperm.xlu0 %2204, %v1494_v34  }
  0x13   : > { %v2360_v6 = vld [vmem:[%s2354_s11 + $0x8] sm:$0xff]   ;;  %1958 = vmatprep.mubr.msk.bf16.mxu0 %vm417_vm0, %v2357_v5  ;;  %v2379_v11 = vld [vmem:[%s2354_s11 + $0x10] sm:$0xff]   ;;  %v2388_v14 = vld [vmem:[%s2354_s11 + $0x18] sm:$0xff]   ;;  %1528 = vperm.xlu1 %2205, %v1498_v37  }
  0x14   : > { %2042 = vmatprep.mubr.msk.bf16.mxu1 %vm417_vm0, %v2360_v6  ;;  %1953 = vmatpush3.bf16.msra.mxu0 %v2209_v4  ;;  %v2402_v16 = vld [vmem:[%s2349_s8 + $0x20] sm:$0xff]   ;;  %v2408_v18 = vld [vmem:[%s2349_s8 + $0x28] sm:$0xff]   ;;  %v2428_v22 = vld [vmem:[%s2349_s8 + $0x30] sm:$0xff]  }
  0x15   : > { %2037 = vmatpush3.bf16.msra.mxu1 %v2209_v4  ;;  %1954 = vmatprep.subr.bf16.mxu0 %v2210_v7  ;;  %v2405_v17 = vld [vmem:[%s2354_s11 + $0x20] sm:$0xff]   ;;  %v2411_v19 = vld [vmem:[%s2354_s11 + $0x28] sm:$0xff]   ;;  %v2431_v23 = vld [vmem:[%s2354_s11 + $0x30] sm:$0xff]  }
  0x16   : > { %2038 = vmatprep.subr.bf16.mxu1 %v2210_v7  ;;  %v2434_v24 = vld [vmem:[%s2349_s8 + $0x38] sm:$0xff]   ;;  %v2231_v27 = vld [vmem:[%s2349_s8 + $0x40] sm:$0xff]   ;;  %1523 = vperm.xlu0 %2204, %v1497_v38   ;;  %v2242_v45 = vld [vmem:[%s2349_s8 + $0x10] sm:$0xff]  }
  0x17   : > { %v2437_v25 = vld [vmem:[%s2354_s11 + $0x38] sm:$0xff]   ;;  %v2232_v29 = vld [vmem:[%s2354_s11 + $0x40] sm:$0xff]   ;;  %1538 = vperm.xlu1 %2205, %v1500_v41   ;;  %v2243_v46 = vld [vmem:[%s2354_s11 + $0x10] sm:$0xff]  }
  0x18   : > { %1955 = vmatpush3.bf16.msra.mxu0 %v2210_v7  ;;  %v2234_v30 = vld [vmem:[%s2349_s8] sm:$0xff]   ;;  %v2244_v47 = vld [vmem:[%s2349_s8 + $0x18] sm:$0xff]   ;;  %v2248_v51 = vld [vmem:[%s2349_s8 + $0x28] sm:$0xff]  }
  0x19   : > { %2039 = vmatpush3.bf16.msra.mxu1 %v2210_v7  ;;  %1956 = vmatprep.subr.bf16.mxu0 %v2211_v8  ;;  %v2235_v31 = vld [vmem:[%s2354_s11] sm:$0xff]   ;;  %v2245_v48 = vld [vmem:[%s2354_s11 + $0x18] sm:$0xff]   ;;  %v2249_v52 = vld [vmem:[%s2354_s11 + $0x28] sm:$0xff]  }
  0x1a   : > { %2040 = vmatprep.subr.bf16.mxu1 %v2211_v8  ;;  %1533 = vperm.xlu0 %2204, %v1499_v42   ;;  %v2246_v49 = vld [vmem:[%s2349_s8 + $0x20] sm:$0xff]   ;;  %v2250_v53 = vld [vmem:[%s2349_s8 + $0x30] sm:$0xff]   ;;  %v2252_v55 = vld [vmem:[%s2349_s8 + $0x38] sm:$0xff]  }
  0x1b   : > { %v2247_v50 = vld [vmem:[%s2354_s11 + $0x20] sm:$0xff]   ;;  %v2251_v54 = vld [vmem:[%s2354_s11 + $0x30] sm:$0xff]   ;;  %v2253_v56 = vld [vmem:[%s2354_s11 + $0x38] sm:$0xff]  }
  0x1c   : > { %1957 = vmatpush3.bf16.msra.mxu0 %v2211_v8  ;;  %v2254_v57 = vld [vmem:[%s2349_s8 + $0x40] sm:$0xff]   ;;  %v2256_v59 = vld [vmem:[%s2349_s8 + $0x48] sm:$0xff]   ;;  %s1853_s8 = sshll.u32 %s2639_s18, 5 }
  0x1d   : > { %2041 = vmatpush3.bf16.msra.mxu1 %v2211_v8  ;;  %1974 = vmatprep.subr.bf16.mxu0 %v2215_v9  ;;  %v2255_v58 = vld [vmem:[%s2354_s11 + $0x40] sm:$0xff]   ;;  %v2257_v60 = vld [vmem:[%s2354_s11 + $0x48] sm:$0xff]   ;;  %s2581_s24 = scalar_lea.vmem %s2633_s5, %s1853_s8 }
  0x1e   : > { %2058 = vmatprep.subr.bf16.mxu1 %v2215_v9 }
  0x1f   : > { %1959 = vmatmul.mubr.msk.bf16.vlgmr.msra.gmra.mrb[0].mxu0 %vm417_vm0, %v2376_v10 }
  0x20   : > { %2043 = vmatmul.mubr.msk.bf16.vlgmr.msra.gmra.mrb[0].mxu1 %vm417_vm0, %v2379_v11  ;;  %1975 = vmatpush3.bf16.msra.mxu0 %v2215_v9 }
  0x21   : > { %2059 = vmatpush3.bf16.msra.mxu1 %v2215_v9  ;;  %1976 = vmatprep.subr.bf16.mxu0 %v2217_v12 }
  0x22   : > { %2060 = vmatprep.subr.bf16.mxu1 %v2217_v12  ;;  %1962 = vmatprep.mubr.msk.bf16.mxu0 %vm417_vm0, %v2385_v13 }
  0x23   : > { %2046 = vmatprep.mubr.msk.bf16.mxu1 %vm417_vm0, %v2388_v14 }
  0x24   : > { %1977 = vmatpush3.bf16.msra.mxu0 %v2217_v12 }
  0x25   : > { %2061 = vmatpush3.bf16.msra.mxu1 %v2217_v12  ;;  %1978 = vmatprep.subr.bf16.mxu0 %v2222_v15 }
  0x26   : > { %2062 = vmatprep.subr.bf16.mxu1 %v2222_v15 }
  0x27   : > { %1963 = vmatmul.mubr.msk.bf16.gmra.mrb[4].mxu0 %vm417_vm0, %v2402_v16 }
  0x28   : > { %2047 = vmatmul.mubr.msk.bf16.gmra.mrb[4].mxu1 %vm417_vm0, %v2405_v17  ;;  %1979 = vmatpush3.bf16.msra.mxu0 %v2222_v15 }
  0x29   : > { %2063 = vmatpush3.bf16.msra.mxu1 %v2222_v15  ;;  %1966 = vmatprep.mubr.msk.bf16.mxu0 %vm417_vm0, %v2408_v18 }
  0x2a   : > { %2050 = vmatprep.mubr.msk.bf16.mxu1 %vm417_vm0, %v2411_v19  ;;  %1980 = vmatprep.subr.bf16.mxu0 %v2226_v20 }
  0x2b   : > { %2064 = vmatprep.subr.bf16.mxu1 %v2226_v20 }
  0x2c   : > { %1981 = vmatpush3.bf16.msra.mxu0 %v2226_v20 }
  0x2d   : > { %2065 = vmatpush3.bf16.msra.mxu1 %v2226_v20  ;;  %1982 = vmatprep.subr.bf16.mxu0 %v2228_v21 }
  0x2e   : > { %2066 = vmatprep.subr.bf16.mxu1 %v2228_v21 }
  0x2f   : > { %1967 = vmatmul.mubr.msk.bf16.gmra.mrb[8].mxu0 %vm417_vm0, %v2428_v22 }
  0x30   : > { %2051 = vmatmul.mubr.msk.bf16.gmra.mrb[8].mxu1 %vm417_vm0, %v2431_v23  ;;  %1970 = vmatprep.mubr.msk.bf16.mxu0 %vm417_vm0, %v2434_v24 }
  0x31   : > { %1983 = vmatpush3.bf16.msra.mxu0 %v2228_v21  ;;  %2054 = vmatprep.mubr.msk.bf16.mxu1 %vm417_vm0, %v2437_v25 }
  0x32   : > { %2067 = vmatpush3.bf16.msra.mxu1 %v2228_v21  ;;  %1984 = vmatprep.subr.bf16.mxu0 %v2233_v26 }
  0x33   : > { %2068 = vmatprep.subr.bf16.mxu1 %v2233_v26 }
  0x35   : > { %1985 = vmatpush3.bf16.msra.mxu0 %v2233_v26 }
  0x36   : > { %2069 = vmatpush3.bf16.msra.mxu1 %v2233_v26  ;;  %2002 = vmatprep.subr.bf16.mxu0 %v2236_v28 }
  0x37   : > { %2086 = vmatprep.subr.bf16.mxu1 %v2236_v28  ;;  %1971 = vmatmul.mubr.msk.bf16.gmra.mrb[12].mxu0 %vm417_vm0, %v2231_v27 }
  0x38   : > { %2055 = vmatmul.mubr.msk.bf16.gmra.mrb[12].mxu1 %vm417_vm0, %v2232_v29  ;;  %1986 = vmatprep.mubr.msk.bf16.mxu0 %vm417_vm0, %v2234_v30 }
  0x39   : > { %2070 = vmatprep.mubr.msk.bf16.mxu1 %vm417_vm0, %v2235_v31 }
  0x3f   : > { %1987 = vmatmul.mubr.msk.bf16.vlgmr.msra.gmra.mrb[0].mxu0 %vm417_vm0, %v2357_v5 }
  0x40   : > { %2071 = vmatmul.mubr.msk.bf16.vlgmr.msra.gmra.mrb[0].mxu1 %vm417_vm0, %v2360_v6  ;;  %2003 = vmatpush3.bf16.msra.mxu0 %v2236_v28 }
  0x41   : > { %2087 = vmatpush3.bf16.msra.mxu1 %v2236_v28  ;;  %2004 = vmatprep.subr.bf16.mxu0 %v2237_v36 }
  0x42   : > { %2088 = vmatprep.subr.bf16.mxu1 %v2237_v36  ;;  %1990 = vmatprep.mubr.msk.bf16.mxu0 %vm417_vm0, %v2376_v10 }
  0x43   : > { %2074 = vmatprep.mubr.msk.bf16.mxu1 %vm417_vm0, %v2379_v11 }
  0x44   : > { %2005 = vmatpush3.bf16.msra.mxu0 %v2237_v36 }
  0x45   : > { %2089 = vmatpush3.bf16.msra.mxu1 %v2237_v36  ;;  %2006 = vmatprep.subr.bf16.mxu0 %v2238_v39 }
  0x46   : > { %2090 = vmatprep.subr.bf16.mxu1 %v2238_v39 }
  0x47   : > { %1991 = vmatmul.mubr.msk.bf16.gmra.mrb[4].mxu0 %vm417_vm0, %v2385_v13 }
  0x48   : > { %2075 = vmatmul.mubr.msk.bf16.gmra.mrb[4].mxu1 %vm417_vm0, %v2388_v14  ;;  %2007 = vmatpush3.bf16.msra.mxu0 %v2238_v39 }
  0x49   : > { %2091 = vmatpush3.bf16.msra.mxu1 %v2238_v39  ;;  %1994 = vmatprep.mubr.msk.bf16.mxu0 %vm417_vm0, %v2402_v16 }
  0x4a   : > { %2078 = vmatprep.mubr.msk.bf16.mxu1 %vm417_vm0, %v2405_v17  ;;  %2008 = vmatprep.subr.bf16.mxu0 %v2239_v40 }
  0x4b   : > { %2092 = vmatprep.subr.bf16.mxu1 %v2239_v40 }
  0x4c   : > { %2009 = vmatpush3.bf16.msra.mxu0 %v2239_v40 }
  0x4d   : > { %2093 = vmatpush3.bf16.msra.mxu1 %v2239_v40  ;;  %2010 = vmatprep.subr.bf16.mxu0 %v2240_v43 }
  0x4e   : > { %2094 = vmatprep.subr.bf16.mxu1 %v2240_v43 }
  0x4f   : > { %1995 = vmatmul.mubr.msk.bf16.gmra.mrb[8].mxu0 %vm417_vm0, %v2408_v18 }
  0x50   : > { %2079 = vmatmul.mubr.msk.bf16.gmra.mrb[8].mxu1 %vm417_vm0, %v2411_v19  ;;  %1998 = vmatprep.mubr.msk.bf16.mxu0 %vm417_vm0, %v2428_v22 }
  0x51   : > { %2011 = vmatpush3.bf16.msra.mxu0 %v2240_v43  ;;  %2082 = vmatprep.mubr.msk.bf16.mxu1 %vm417_vm0, %v2431_v23 }
  0x52   : > { %2095 = vmatpush3.bf16.msra.mxu1 %v2240_v43  ;;  %2012 = vmatprep.subr.bf16.mxu0 %v2241_v44 }
  0x53   : > { %2096 = vmatprep.subr.bf16.mxu1 %v2241_v44 }
  0x55   : > { %2013 = vmatpush3.bf16.msra.mxu0 %v2241_v44 }
  0x56   : > { %2097 = vmatpush3.bf16.msra.mxu1 %v2241_v44 }
  0x57   : > { %1999 = vmatmul.mubr.msk.bf16.gmra.mrb[12].mxu0 %vm417_vm0, %v2434_v24 }
  0x58   : > { %2083 = vmatmul.mubr.msk.bf16.gmra.mrb[12].mxu1 %vm417_vm0, %v2437_v25  ;;  %2014 = vmatprep.mubr.msk.bf16.mxu0 %vm417_vm0, %v2242_v45 }
  0x59   : > { %2098 = vmatprep.mubr.msk.bf16.mxu1 %vm417_vm0, %v2243_v46 }
  0x5f   : > { %2015 = vmatmul.mubr.msk.bf16.vlgmr.msra.gmra.mrb[0].mxu0 %vm417_vm0, %v2244_v47 }
  0x60   : > { %2099 = vmatmul.mubr.msk.bf16.vlgmr.msra.gmra.mrb[0].mxu1 %vm417_vm0, %v2245_v48  ;;  %2018 = vmatprep.mubr.msk.bf16.mxu0 %vm417_vm0, %v2246_v49 }
  0x61   : > { %2102 = vmatprep.mubr.msk.bf16.mxu1 %vm417_vm0, %v2247_v50 }
  0x67   : > { %2019 = vmatmul.mubr.msk.bf16.gmra.mrb[4].mxu0 %vm417_vm0, %v2248_v51 }
  0x68   : > { %2103 = vmatmul.mubr.msk.bf16.gmra.mrb[4].mxu1 %vm417_vm0, %v2249_v52  ;;  %2022 = vmatprep.mubr.msk.bf16.mxu0 %vm417_vm0, %v2250_v53 }
  0x69   : > { %2106 = vmatprep.mubr.msk.bf16.mxu1 %vm417_vm0, %v2251_v54 }
  0x6f   : > { %2023 = vmatmul.mubr.msk.bf16.gmra.mrb[8].mxu0 %vm417_vm0, %v2252_v55 }
  0x70   : > { %2107 = vmatmul.mubr.msk.bf16.gmra.mrb[8].mxu1 %vm417_vm0, %v2253_v56  ;;  %2026 = vmatprep.mubr.msk.bf16.mxu0 %vm417_vm0, %v2254_v57 }
  0x71   : > { %2110 = vmatprep.mubr.msk.bf16.mxu1 %vm417_vm0, %v2255_v58 }
  0x77   : > { %2027 = vmatmul.mubr.msk.bf16.gmra.mrb[12].mxu0 %vm417_vm0, %v2256_v59 }
  0x78   : > { %2111 = vmatmul.mubr.msk.bf16.gmra.mrb[12].mxu1 %vm417_vm0, %v2257_v60 }
  0x8a   : > { %v1514_v60 = vpop.permute.xlu1 %1513 }
  0x8d   : > { %v1504_v62 = vpop.permute.xlu0 %1503 }
  0x91   : > { %v1509_v26 = vpop.permute.xlu0 %1508 }
 0x132   : > { %v2016_v63 = vpop.f32.mrb[0].mxu0 }
 0x133   : > { %v2100_v0 = vpop.f32.mrb[0].mxu1  ;;  %v930_v1 = vadd.f32 %v2016_v63, %v2563_v61  ;;  %v843_v3 = vpop.f32.mrb[1].mxu0 }
 0x134   : > { %v1439_v2 = vadd.f32 %v2100_v0, %v2563_v61  ;;  %v1358_v4 = vpop.f32.mrb[1].mxu1  ;;  %v928_v5 = vadd.f32 %v2563_v61, %v843_v3  ;;  %v2017_v7 = vpop.f32.mrb[2].mxu0 }
 0x135   : > { %v1437_v6 = vadd.f32 %v2563_v61, %v1358_v4  ;;  %v2101_v8 = vpop.f32.mrb[2].mxu1  ;;  %v946_v9 = vmax.f32 %v930_v1, 0.0  ;;  %v931_v11 = vadd.f32 %v2017_v7, %v2563_v61  ;;  %v846_v13 = vpop.f32.mrb[3].mxu0 }
 0x136   : > { %v1455_v10 = vmax.f32 %v1439_v2, 0.0  ;;  %v1440_v12 = vadd.f32 %v2101_v8, %v2563_v61  ;;  %v1361_v14 = vpop.f32.mrb[3].mxu1  ;;  %v944_v15 = vmax.f32 %v928_v5, 0.0  ;;  %v929_v17 = vadd.f32 %v2563_v61, %v846_v13 }
 0x137   : > { %v1453_v16 = vmax.f32 %v1437_v6, 0.0  ;;  %v1438_v18 = vadd.f32 %v2563_v61, %v1361_v14  ;;  %v947_v20 = vmax.f32 %v931_v11, 0.0 }
 0x138   : > { %v1471_v19 = vmax.f32 %v946_v9, %v1455_v10  ;;  %v1456_v21 = vmax.f32 %v1440_v12, 0.0  ;;  %v945_v23 = vmax.f32 %v929_v17, 0.0 }
 0x139   : > { %v1469_v22 = vmax.f32 %v944_v15, %v1453_v16  ;;  %v1454_v24 = vmax.f32 %v1438_v18, 0.0 }
 0x13a   : > { %v1472_v25 = vmax.f32 %v947_v20, %v1456_v21  ;;  %v2020_v29 = vpop.f32.mrb[4].mxu0 }
 0x13b   : > { %v1470_v27 = vmax.f32 %v945_v23, %v1454_v24  ;;  %v1485_v28 = vmax.f32 %v1469_v22, %v1471_v19  ;;  %v2104_v30 = vpop.f32.mrb[4].mxu1  ;;  %v934_v31 = vadd.f32 %v2020_v29, %v2563_v61  ;;  %v859_v33 = vpop.f32.mrb[5].mxu0 }
 0x13c   : > { %v1443_v32 = vadd.f32 %v2104_v30, %v2563_v61  ;;  %v1374_v34 = vpop.f32.mrb[5].mxu1  ;;  %v932_v36 = vadd.f32 %v2563_v61, %v859_v33  ;;  %v2021_v38 = vpop.f32.mrb[6].mxu0 }
 0x13d   : > { %v1541_v35 = vmul.f32 %v1504_v62, %v1485_v28  ;;  %v1441_v37 = vadd.f32 %v2563_v61, %v1374_v34  ;;  %v2105_v39 = vpop.f32.mrb[6].mxu1  ;;  %v1486_v40 = vmax.f32 %v1470_v27, %v1472_v25  ;;  %v950_v41 = vmax.f32 %v934_v31, 0.0  ;;  %v862_v45 = vpop.f32.mrb[7].mxu0 }
 0x13e   : > { %v1459_v42 = vmax.f32 %v1443_v32, 0.0  ;;  %v935_v43 = vadd.f32 %v2021_v38, %v2563_v61  ;;  %v1444_v44 = vadd.f32 %v2105_v39, %v2563_v61  ;;  %v1377_v46 = vpop.f32.mrb[7].mxu1  ;;  %v948_v48 = vmax.f32 %v932_v36, 0.0  ;;  %v1519_v22 = vpop.permute.xlu1 %1518 }
 0x13f   : > { %v1854_v47 = vpack.c.bf16 %v1541_v35, %v1541_v35  ;;  %v1457_v49 = vmax.f32 %v1441_v37, 0.0  ;;  %v1542_v50 = vmul.f32 %v1509_v26, %v1486_v40  ;;  %v933_v54 = vadd.f32 %v2563_v61, %v862_v45  ;;  %v1524_v32 = vpop.permute.xlu0 %1523 }
 0x140   : > { %v1475_v51 = vmax.f32 %v950_v41, %v1459_v42  ;;  %v951_v52 = vmax.f32 %v935_v43, 0.0  ;;  %v1460_v53 = vmax.f32 %v1444_v44, 0.0  ;;  %v1442_v57 = vadd.f32 %v2563_v61, %v1377_v46 }
 0x141   : > { %1582 = vst.msk [vmem:[%s2581_s24] sm:$0xf] %vm1581_vm1, %v1854_v47  ;;  %v1473_v55 = vmax.f32 %v948_v48, %v1457_v49  ;;  %v1855_v56 = vpack.c.bf16 %v1542_v50, %v1542_v50  ;;  %v949_v59 = vmax.f32 %v933_v54, 0.0 }
 0x142   : > { %v1476_v58 = vmax.f32 %v951_v52, %v1460_v53  ;;  %v1458_v62 = vmax.f32 %v1442_v57, 0.0  ;;  %v2024_v0 = vpop.f32.mrb[8].mxu0 }
 0x143   : > { %1583 = vst.msk [vmem:[%s2581_s24 + $0x4] sm:$0xf] %vm1581_vm1, %v1855_v56  ;;  %v1487_v63 = vmax.f32 %v1473_v55, %v1475_v51  ;;  %v2108_v1 = vpop.f32.mrb[8].mxu1  ;;  %v938_v2 = vadd.f32 %v2024_v0, %v2563_v61  ;;  %v875_v4 = vpop.f32.mrb[9].mxu0 }
 0x144   : > { %v1447_v3 = vadd.f32 %v2108_v1, %v2563_v61  ;;  %v1390_v5 = vpop.f32.mrb[9].mxu1  ;;  %v1474_v6 = vmax.f32 %v949_v59, %v1458_v62  ;;  %v936_v8 = vadd.f32 %v2563_v61, %v875_v4  ;;  %v2025_v10 = vpop.f32.mrb[10].mxu0 }
 0x145   : > { %v1543_v7 = vmul.f32 %v1514_v60, %v1487_v63  ;;  %v1445_v9 = vadd.f32 %v2563_v61, %v1390_v5  ;;  %v2109_v11 = vpop.f32.mrb[10].mxu1  ;;  %v954_v12 = vmax.f32 %v938_v2, 0.0  ;;  %v939_v14 = vadd.f32 %v2025_v10, %v2563_v61  ;;  %v878_v16 = vpop.f32.mrb[11].mxu0 }
 0x146   : > { %v1463_v13 = vmax.f32 %v1447_v3, 0.0  ;;  %v1448_v15 = vadd.f32 %v2109_v11, %v2563_v61  ;;  %v1393_v17 = vpop.f32.mrb[11].mxu1  ;;  %v1488_v19 = vmax.f32 %v1474_v6, %v1476_v58  ;;  %v952_v20 = vmax.f32 %v936_v8, 0.0  ;;  %v1529_v58 = vpop.permute.xlu1 %1528 }
 0x147   : > { %v1856_v18 = vpack.c.bf16 %v1543_v7, %v1543_v7  ;;  %v1461_v21 = vmax.f32 %v1445_v9, 0.0  ;;  %v955_v24 = vmax.f32 %v939_v14, 0.0  ;;  %v937_v26 = vadd.f32 %v2563_v61, %v878_v16  ;;  %v1534_v8 = vpop.permute.xlu0 %1533 }
 0x148   : > { %v1479_v23 = vmax.f32 %v954_v12, %v1463_v13  ;;  %v1464_v25 = vmax.f32 %v1448_v15, 0.0  ;;  %v1544_v27 = vmul.f32 %v1519_v22, %v1488_v19  ;;  %v1446_v29 = vadd.f32 %v2563_v61, %v1393_v17 }
 0x149   : > { %1584 = vst.msk [vmem:[%s2581_s24 + $0x8] sm:$0xf] %vm1581_vm1, %v1856_v18  ;;  %v1477_v28 = vmax.f32 %v952_v20, %v1461_v21  ;;  %v953_v31 = vmax.f32 %v937_v26, 0.0 }
 0x14a   : > { %v1480_v30 = vmax.f32 %v955_v24, %v1464_v25  ;;  %v1857_v33 = vpack.c.bf16 %v1544_v27, %v1544_v27  ;;  %v1462_v34 = vmax.f32 %v1446_v29, 0.0  ;;  %v2028_v36 = vpop.f32.mrb[12].mxu0  ;;  %v1539_v13 = vpop.permute.xlu1 %1538 }
 0x14b   : > { %v1489_v35 = vmax.f32 %v1477_v28, %v1479_v23  ;;  %v2112_v37 = vpop.f32.mrb[12].mxu1  ;;  %v942_v38 = vadd.f32 %v2028_v36, %v2563_v61  ;;  %v891_v40 = vpop.f32.mrb[13].mxu0 }
 0x14c   : > { %v1451_v39 = vadd.f32 %v2112_v37, %v2563_v61  ;;  %v1406_v41 = vpop.f32.mrb[13].mxu1  ;;  %1585 = vst.msk [vmem:[%s2581_s24 + $0xc] sm:$0xf] %vm1581_vm1, %v1857_v33  ;;  %v1478_v42 = vmax.f32 %v953_v31, %v1462_v34  ;;  %v940_v44 = vadd.f32 %v2563_v61, %v891_v40  ;;  %v2029_v46 = vpop.f32.mrb[14].mxu0 }
 0x14d   : > { %v1545_v43 = vmul.f32 %v1524_v32, %v1489_v35  ;;  %v1449_v45 = vadd.f32 %v2563_v61, %v1406_v41  ;;  %v2113_v47 = vpop.f32.mrb[14].mxu1  ;;  %v958_v48 = vmax.f32 %v942_v38, 0.0  ;;  %v943_v50 = vadd.f32 %v2029_v46, %v2563_v61  ;;  %v894_v52 = vpop.f32.mrb[15].mxu0 }
 0x14e   : > { %v1467_v49 = vmax.f32 %v1451_v39, 0.0  ;;  %v1452_v51 = vadd.f32 %v2113_v47, %v2563_v61  ;;  %v1409_v53 = vpop.f32.mrb[15].mxu1  ;;  %v1490_v54 = vmax.f32 %v1478_v42, %v1480_v30  ;;  %v956_v56 = vmax.f32 %v940_v44, 0.0 }
 0x14f   : > { %v1858_v55 = vpack.c.bf16 %v1545_v43, %v1545_v43  ;;  %v1465_v57 = vmax.f32 %v1449_v45, 0.0  ;;  %v959_v60 = vmax.f32 %v943_v50, 0.0  ;;  %v941_v63 = vadd.f32 %v2563_v61, %v894_v52 }
 0x150   : > { %v1483_v59 = vmax.f32 %v958_v48, %v1467_v49  ;;  %v1468_v62 = vmax.f32 %v1452_v51, 0.0  ;;  %v1546_v0 = vmul.f32 %v1529_v58, %v1490_v54  ;;  %v1450_v2 = vadd.f32 %v2563_v61, %v1409_v53 }
 0x151   : > { %1586 = vst.msk [vmem:[%s2581_s24 + $0x10] sm:$0xf] %vm1581_vm1, %v1858_v55  ;;  %v1481_v1 = vmax.f32 %v956_v56, %v1465_v57  ;;  %v957_v4 = vmax.f32 %v941_v63, 0.0 }
 0x152   : > { %v1484_v3 = vmax.f32 %v959_v60, %v1468_v62  ;;  %v1859_v5 = vpack.c.bf16 %v1546_v0, %v1546_v0  ;;  %v1466_v7 = vmax.f32 %v1450_v2, 0.0 }
 0x153   : > { %v1491_v6 = vmax.f32 %v1481_v1, %v1483_v59 }
 0x154   : > { %1587 = vst.msk [vmem:[%s2581_s24 + $0x14] sm:$0xf] %vm1581_vm1, %v1859_v5  ;;  %v1482_v10 = vmax.f32 %v957_v4, %v1466_v7 }
 0x155   : > { %v1547_v9 = vmul.f32 %v1534_v8, %v1491_v6 }
 0x156   : > { %v1492_v12 = vmax.f32 %v1482_v10, %v1484_v3 }
 0x157   : > { %v1860_v11 = vpack.c.bf16 %v1547_v9, %v1547_v9 }
 0x158   : > { %v1548_v14 = vmul.f32 %v1539_v13, %v1492_v12 }
 0x159   : > { %1588 = vst.msk [vmem:[%s2581_s24 + $0x18] sm:$0xf] %vm1581_vm1, %v1860_v11 }
 0x15a   : > { %v1861_v15 = vpack.c.bf16 %v1548_v14, %v1548_v14 }
 0x15c   : > { %1589 = vst.msk [vmem:[%s2581_s24 + $0x1c] sm:$0xf] %vm1581_vm1, %v1861_v15 }
 0x15d PF: > { %s15_s20 = sadd.s32 1, %s2280_s20   ;;  %s2634_s18 = smov %s2276_s19 }
 0x15e   : > { %p12_p5 = scmp.ge.s32.totalorder %s15_s20, 4   ;;  %s2635_s19 = smov %s2637_s21 }
 0x160   :  { %14 = sbr.rel (!%p12_p5) target bundleno = 2 (0x2), region = 81 }

// kernel: _lambda_.12
= control target key start
LH: loop header
LB: loop body
LE: loop exit
PB: predicated region body
PF: predicated region fallthrough
CT: control target
= control target key end

     0   :  { %s51_s0 = inlined_call_operand.vmem [shape: bf16[4,2,512], index: 0, kind: input, shape index: {}]   ;;  %s52_s1 = inlined_call_operand.vmem [shape: bf16[2,512], index: 1, kind: output, shape index: {}]  }
   0x1   :  { %v8_v0 = vld [vmem:[%s51_s0] sm:$0xf]  ;;  %v23_v1 = vld [vmem:[%s51_s0 + $0x4] sm:$0xf]  ;;  %v24_v2 = vld [vmem:[%s51_s0 + $0x8] sm:$0xf] }
   0x2   :  { %v11_v3 = vmax.bf16 %v23_v1, %v8_v0  ;;  %v25_v4 = vld [vmem:[%s51_s0 + $0xc] sm:$0xf] }
   0x3   :  { %v16_v5 = vmax.bf16 %v25_v4, %v24_v2 }
   0x5   :  { %v17_v6 = vmax.bf16 %v16_v5, %v11_v3 }
   0x7   :  { %18 = vst [vmem:[%s52_s1] sm:$0xf] %v17_v6 }

// kernel: _lambda_.13
= control target key start
LH: loop header
LB: loop body
LE: loop exit
PB: predicated region body
PF: predicated region fallthrough
CT: control target
= control target key end

     0   :  { %v100_v30 = vlaneseq  ;;  %v540_v34 = vmov 1966171168   ;;  %s676_s0 = inlined_call_operand.vmem [shape: bf16[2,512], index: 0, kind: input, shape index: {}]   ;;  %s677_s1 = inlined_call_operand.vmem [shape: bf16[512,128], index: 1, kind: input, shape index: {}]   ;;  %s678_s2 = inlined_call_operand.vmem [shape: f32[1,128], index: 2, kind: input, shape index: {}]   ;;  %s679_s3 = inlined_call_operand.hbm [shape: f32[2,128], index: 3, kind: output, shape index: {}]  }
   0x1   :  { %v484_v0 = vld [vmem:[%s677_s1 + $0x40] sm:$0xff]   ;;  %v488_v4 = vld [vmem:[%s677_s1 + $0x48] sm:$0xff]   ;;  %v492_v8 = vld [vmem:[%s677_s1 + $0x50] sm:$0xff]   ;;  %v98_v35 = vunpack.c.l.s4 %v540_v34 }
   0x2   :  { %v485_v1 = vld [vmem:[%s677_s1 + $0xc0] sm:$0xff]   ;;  %438 = vmatprep.subr.bf16.mxu0 %v484_v0  ;;  %v489_v5 = vld [vmem:[%s677_s1 + $0xc8] sm:$0xff]   ;;  %v493_v9 = vld [vmem:[%s677_s1 + $0xd0] sm:$0xff]   ;;  %v101_v36 = vshrl.u32 %v100_v30, 7 }
   0x3   :  { %v486_v2 = vld [vmem:[%s677_s1] sm:$0xff]   ;;  %460 = vmatprep.subr.bf16.mxu1 %v485_v1  ;;  %v490_v6 = vld [vmem:[%s677_s1 + $0x8] sm:$0xff]   ;;  %v494_v10 = vld [vmem:[%s677_s1 + $0x10] sm:$0xff]  }
   0x4   :  { %v487_v3 = vld [vmem:[%s677_s1 + $0x80] sm:$0xff]   ;;  %439 = vmatpush3.bf16.msra.mxu0 %v486_v2  ;;  %v491_v7 = vld [vmem:[%s677_s1 + $0x88] sm:$0xff]   ;;  %v495_v11 = vld [vmem:[%s677_s1 + $0x90] sm:$0xff]  }
   0x5   :  { %461 = vmatpush3.bf16.msra.mxu1 %v487_v3  ;;  %440 = vmatprep.subr.bf16.mxu0 %v488_v4  ;;  %v496_v12 = vld [vmem:[%s677_s1 + $0x58] sm:$0xff]   ;;  %v500_v16 = vld [vmem:[%s677_s1 + $0x60] sm:$0xff]   ;;  %v504_v20 = vld [vmem:[%s677_s1 + $0x68] sm:$0xff]  }
   0x6   :  { %462 = vmatprep.subr.bf16.mxu1 %v489_v5  ;;  %v497_v13 = vld [vmem:[%s677_s1 + $0xd8] sm:$0xff]   ;;  %v501_v17 = vld [vmem:[%s677_s1 + $0xe0] sm:$0xff]   ;;  %v505_v21 = vld [vmem:[%s677_s1 + $0xe8] sm:$0xff]  }
   0x7   :  { %v498_v14 = vld [vmem:[%s677_s1 + $0x18] sm:$0xff]   ;;  %v502_v18 = vld [vmem:[%s677_s1 + $0x20] sm:$0xff]   ;;  %v506_v22 = vld [vmem:[%s677_s1 + $0x28] sm:$0xff]  }
   0x8   :  { %441 = vmatpush3.bf16.msra.mxu0 %v490_v6  ;;  %v499_v15 = vld [vmem:[%s677_s1 + $0x98] sm:$0xff]   ;;  %v503_v19 = vld [vmem:[%s677_s1 + $0xa0] sm:$0xff]   ;;  %v507_v23 = vld [vmem:[%s677_s1 + $0xa8] sm:$0xff]  }
   0x9   :  { %463 = vmatpush3.bf16.msra.mxu1 %v491_v7  ;;  %442 = vmatprep.subr.bf16.mxu0 %v492_v8  ;;  %v508_v24 = vld [vmem:[%s677_s1 + $0x70] sm:$0xff]   ;;  %v512_v28 = vld [vmem:[%s677_s1 + $0x78] sm:$0xff]   ;;  %v405_v33 = vld.sshfl [vmem:[%s676_s0] sm:$0x33 pattern:$0x75316420] }
   0xa   :  { %464 = vmatprep.subr.bf16.mxu1 %v493_v9  ;;  %v509_v25 = vld [vmem:[%s677_s1 + $0xf0] sm:$0xff]   ;;  %v513_v29 = vld [vmem:[%s677_s1 + $0xf8] sm:$0xff]  }
   0xb   :  { %v510_v26 = vld [vmem:[%s677_s1 + $0x30] sm:$0xff]   ;;  %v514_v31 = vld [vmem:[%s677_s1 + $0x38] sm:$0xff]  }
   0xc   :  { %443 = vmatpush3.bf16.msra.mxu0 %v494_v10  ;;  %v511_v27 = vld [vmem:[%s677_s1 + $0xb0] sm:$0xff]   ;;  %v515_v32 = vld [vmem:[%s677_s1 + $0xb8] sm:$0xff]  }
   0xd   :  { %465 = vmatpush3.bf16.msra.mxu1 %v495_v11  ;;  %444 = vmatprep.subr.bf16.mxu0 %v496_v12 }
   0xe   :  { %466 = vmatprep.subr.bf16.mxu1 %v497_v13 }
  0x10   :  { %445 = vmatpush3.bf16.msra.mxu0 %v498_v14 }
  0x11   :  { %467 = vmatpush3.bf16.msra.mxu1 %v499_v15  ;;  %446 = vmatprep.subr.bf16.mxu0 %v500_v16 }
  0x12   :  { %468 = vmatprep.subr.bf16.mxu1 %v501_v17 }
  0x14   :  { %447 = vmatpush3.bf16.msra.mxu0 %v502_v18 }
  0x15   :  { %469 = vmatpush3.bf16.msra.mxu1 %v503_v19  ;;  %448 = vmatprep.subr.bf16.mxu0 %v504_v20 }
  0x16   :  { %470 = vmatprep.subr.bf16.mxu1 %v505_v21 }
  0x18   :  { %449 = vmatpush3.bf16.msra.mxu0 %v506_v22 }
  0x19   :  { %471 = vmatpush3.bf16.msra.mxu1 %v507_v23  ;;  %450 = vmatprep.subr.bf16.mxu0 %v508_v24 }
  0x1a   :  { %472 = vmatprep.subr.bf16.mxu1 %v509_v25 }
  0x1c   :  { %451 = vmatpush3.bf16.msra.mxu0 %v510_v26 }
  0x1d   :  { %473 = vmatpush3.bf16.msra.mxu1 %v511_v27  ;;  %452 = vmatprep.subr.bf16.mxu0 %v512_v28 }
  0x1e   :  { %474 = vmatprep.subr.bf16.mxu1 %v513_v29 }
  0x20   :  { %453 = vmatpush3.bf16.msra.mxu0 %v514_v31 }
  0x21   :  { %475 = vmatpush3.bf16.msra.mxu1 %v515_v32 }
  0x22   :  { %8 = vsyncpa [#allocation3], 0  ;;  %v96_v37 = vcombine.high %v405_v33, %v405_v33  ;;  %v99_v38 = vunpack.c.0.s8 %v98_v35  ;;  %v404_v45 = vld [vmem:[%s678_s2] ss:$0 sm:$0xff]  ;;  %s541_s0 = smov [#allocation2]  }
  0x23   :  { %s396_s25 = sshll.u32 %s541_s0, 4  ;;  %s397_s25 = int_to_ptr.vmem [resolvable:$true] %s396_s25 }
  0x24   :  { %v102_v39 = vsub.s32 %v99_v38, %v101_v36  ;;  %s516_s26 = scalar_lea.vmem %s397_s25, 32  ;;  %p521_p1 = scmp.lt.s32.totalorder %s397_s25, %s397_s25 }
  0x25   :  { %p517_p0 = scmp.ne.s32.totalorder %s397_s25, %s516_s26  ;;  %p522_p2 = scmp.lt.s32.totalorder %s516_s26, %s516_s26 }
  0x26   :  { %v110_v40 = vrot.slane %v96_v37, %v102_v39  ;;  %v103_v41 = vrot.slane %v405_v33, %v102_v39 }
  0x27   :  { %p523_p3 = por %p522_p2, %p521_p1 }
  0x28   :  { %341 = vmatprep.mubr.bf16.mxu0 %v110_v40  ;;  %v112_v42 = vcombine.high %v110_v40, %v110_v40  ;;  %v111_v43 = vcombine.high %v103_v41, %v103_v41 }
  0x29   :  { %342 = vmatmul.mubr.bf16.vlgmr.msra.gmra.mrb[0].mxu0 %v103_v41  ;;  %p524_p4 = pnand %p523_p3, %p517_p0 }
  0x2a   :  { %381 = vmatprep.mubr.bf16.mxu1 %v112_v42 }
  0x2b   :  { %382 = vmatmul.mubr.bf16.vlgmr.msra.gmra.mrb[0].mxu1 %v111_v43 }
  0xfc   :  { %v454_v44 = vpop.f32.mrb[0].mxu0 }
  0xfd   :  { %v455_v46 = vpop.f32.mrb[1].mxu0 }
  0xfe   :  { %v476_v47 = vpop.f32.mrb[0].mxu1  ;;  %v456_v48 = vadd.f32 %v455_v46, %v454_v44  ;;  %v457_v49 = vpop.f32.mrb[2].mxu0 }
  0xff   :  { %v477_v50 = vpop.f32.mrb[1].mxu1  ;;  %v458_v51 = vpop.f32.mrb[3].mxu0 }
 0x100   :  { %v344_v52 = vadd.f32 %v456_v48, %v404_v45  ;;  %v478_v53 = vadd.f32 %v477_v50, %v476_v47  ;;  %v479_v54 = vpop.f32.mrb[2].mxu1 }
 0x101   :  { %v480_v55 = vpop.f32.mrb[3].mxu1 }
 0x102   :  { %v384_v56 = vadd.f32 %v478_v53, %v344_v52 }
 0x104   :  { %389 = vst [vmem:[#allocation2] sm:$0x3] %v384_v56 }
 0x105   :  { %527 = shalt.err (!%p524_p4)
}
 0x106   :  { %s528_s28 = scalar_lea.hbm %s679_s3, 32 }
 0x107   :  { %p529_p5 = scmp.ne.s32.totalorder %s679_s3, %s528_s28  ;;  %p532_p6 = scmp.lt.u32.totalorder %s528_s28, %s679_s3 }
 0x109   :  { %p534_p7 = pnand %p532_p6, %p529_p5 }
 0x10b   :  { %537 = shalt.err (!%p534_p7)
}
 0x10c   :  { %399 = dma.vmem_to_hbm [thread:$0]  %s397_s25, 32, %s679_s3, [#allocation3]  }
 0x10d   :  { %538 = dma.done.wait [#allocation3], 32  }
 0x10e   :  { %539 = vsyncadd [#allocation3], 4294967264 }
 0x10f   :  { %403 = vsyncpa [#allocation3], 1 }

// kernel: _lambda_.11
= control target key start
LH: loop header
LB: loop body
LE: loop exit
PB: predicated region body
PF: predicated region fallthrough
CT: control target
= control target key end

     0   :  { %s5593_s15 = smov 0   ;;  %s5595_s16 = smov 0   ;;  %s6804_s0 = inlined_call_operand.vmem [shape: bf16[2,66,256], index: 0, kind: input, shape index: {}]   ;;  %s6805_s1 = inlined_call_operand.vmem [shape: bf16[9,256,512], index: 1, kind: input, shape index: {}]   ;;  %s6806_s2 = inlined_call_operand.vmem [shape: f32[1,512], index: 2, kind: input, shape index: {}]   ;;  %s6807_s3 = inlined_call_operand.vmem [shape: f32[32,1], index: 3, kind: input, shape index: {}]   ;;  %s6808_s4 = inlined_call_operand.vmem [shape: bf16[2,32,512], index: 4, kind: output, shape index: {}]  }
   0x1   :  { %s5597_s17 = smov 0   ;;  %s5599_s18 = smov 0  }
   0x2   :  { %s5601_s19 = smov 0   ;;  %s5603_s20 = smov 0  }
   0x3   :  { %s5605_s21 = smov 0   ;;  %s5607_s22 = smov 0  }
   0x4   :  { %s5609_s23 = smov 0  }
   0x5 LB: > { %s23_s24 = sadd.s32 1, %s5557_s21  ;;  %s26_s25 = sadd.s32 1, %s5561_s22  ;;  %s5565_s23 = sphi %s5609_s23, %s14_s23   ;;  %s5561_s22 = sphi %s5607_s22, %s6818_s22   ;;  %s5557_s21 = sphi %s5605_s21, %s6817_s21   ;;  %s5553_s20 = sphi %s5603_s20, %s6816_s20   ;;  %s5549_s19 = sphi %s5601_s19, %s6815_s19   ;;  %s5545_s18 = sphi %s5599_s18, %s6814_s18   ;;  %s5541_s17 = sphi %s5597_s17, %s6813_s17   ;;  %s5537_s16 = sphi %s5595_s16, %s6812_s16   ;;  %s5533_s15 = sphi %s5593_s15, %s6811_s15  }
   0x6   : > { %p24_p0 = scmp.ge.s32.totalorder %s23_s24, 2  ;;  %p66_p1 = scmp.ne.s32.totalorder %s5545_s18, %s5541_s17 }
   0x7   : > { %s4259_s26 = sadd.s32 4294967295, %s5565_s23   ;;  %p67_p2 = scmp.eq.s32.totalorder %s5565_s23, 0 }
   0x8   : > { %s6820_s24 = smov (%p24_p0, %s23_s24), 0  ;;  %s6822_s25 = smov (!%p24_p0, %s26_s25), %s5561_s22 }
   0x9   : > { %p28_p3 = scmp.ge.s32.totalorder %s6822_s25, 2  ;;  %s129_s27 = ssub.s32 %s5557_s21, %s6820_s24 }
   0xa   : > { %p5649_p4 = por %p67_p2, %p66_p1  ;;  %p144_p5 = scmp.ne.s32.totalorder %s5537_s16, %s5533_s15 }
   0xb   : > { %s6824_s25 = smov (%p28_p3, %s6822_s25), 0  ;;  %s59_s29 = sadd.s32 1, %s5545_s18 }
   0xc   : > { %p145_p6 = scmp.eq.s32.totalorder %s4259_s26, 3  ;;  %s56_s30 = ssub.s32 %s5561_s22, %s6824_s25 }
   0xd   : > { %s134_s5 = sadd.s32 1, %s5537_s16  ;;  %p57_p7 = scmp.eq.s32.totalorder %s56_s30, 0 }
   0xe   : > { %s131_s6 = sor.u32 %s129_s27, %s56_s30  ;;  %p5661_p9 = por %p145_p6, %p144_p5 }
   0xf   : > { %p132_p8 = scmp.eq.s32.totalorder %s131_s6, 0  ;;  %p4262_p10 = scmp.ge.s32.totalorder %s5565_s23, 4 }
  0x10   : > { %s5666_s8 = scalar_select %p57_p7, %s5545_s18, %s59_s29  }
  0x11   : > { %s5669_s9 = scalar_select %p132_p8, %s5537_s16, %s134_s5  }
  0x12   : > { %170 = sbr.rel (%p4262_p10) target bundleno = 173 (0xad), region = 20 }
  0x19   : > { %181 = sbr.rel (!%p5649_p4) target bundleno = 173 (0xad), region = 28  ;;  %s183_s10 = sand.u32 (%p5649_p4), 1, %s5545_s18  }
  0x1a   : > { %s4855_s11 = sshll.u32 (%p5649_p4), %s5561_s22, 3  ;;  %s4956_s12 = smul.u32 (%p5649_p4), 2304, %s183_s10 }
  0x1b   : > { %s5679_s26 = scalar_lea.vmem (%p5649_p4), %s6805_s1, %s4855_s11 }
  0x1c   : > { %v790_v0 = vld [vmem:[%s5679_s26] sm:$0xff] (%p5649_p4)  ;;  %v792_v1 = vld [vmem:[%s5679_s26 + $0x10] sm:$0xff] (%p5649_p4)  ;;  %s5687_s27 = scalar_lea.vmem (%p5649_p4), [#allocation2], %s4956_s12 }
  0x1d   : > { %v794_v2 = vld [vmem:[%s5679_s26 + $0x20] sm:$0xff] (%p5649_p4)  ;;  %v796_v3 = vld [vmem:[%s5679_s26 + $0x30] sm:$0xff] (%p5649_p4)  ;;  %791 = vst [vmem:[%s5687_s27] sm:$0xff] (%p5649_p4), %v790_v0  ;;  %793 = vst [vmem:[%s5687_s27 + $0x8] sm:$0xff] (%p5649_p4), %v792_v1 }
  0x1e   : > { %v798_v4 = vld [vmem:[%s5679_s26 + $0x40] sm:$0xff] (%p5649_p4)  ;;  %v800_v5 = vld [vmem:[%s5679_s26 + $0x50] sm:$0xff] (%p5649_p4)  ;;  %795 = vst [vmem:[%s5687_s27 + $0x10] sm:$0xff] (%p5649_p4), %v794_v2  ;;  %797 = vst [vmem:[%s5687_s27 + $0x18] sm:$0xff] (%p5649_p4), %v796_v3 }
  0x1f   : > { %799 = vst [vmem:[%s5687_s27 + $0x20] sm:$0xff] (%p5649_p4), %v798_v4  ;;  %801 = vst [vmem:[%s5687_s27 + $0x28] sm:$0xff] (%p5649_p4), %v800_v5  ;;  %v802_v6 = vld [vmem:[%s5679_s26 + $0x60] sm:$0xff] (%p5649_p4)  ;;  %v804_v7 = vld [vmem:[%s5679_s26 + $0x70] sm:$0xff] (%p5649_p4) }
  0x20   : > { %v806_v8 = vld [vmem:[%s5679_s26 + $0x80] sm:$0xff]  ;;  %803 = vst [vmem:[%s5687_s27 + $0x30] sm:$0xff] %v802_v6  ;;  %805 = vst [vmem:[%s5687_s27 + $0x38] sm:$0xff] %v804_v7  ;;  %v808_v9 = vld [vmem:[%s5679_s26 + $0x90] sm:$0xff] }
  0x21   : > { %807 = vst [vmem:[%s5687_s27 + $0x40] sm:$0xff] %v806_v8  ;;  %v810_v10 = vld [vmem:[%s5679_s26 + $0xa0] sm:$0xff]  ;;  %v812_v11 = vld [vmem:[%s5679_s26 + $0xb0] sm:$0xff]  ;;  %809 = vst [vmem:[%s5687_s27 + $0x48] sm:$0xff] %v808_v9 }
  0x22   : > { %811 = vst [vmem:[%s5687_s27 + $0x50] sm:$0xff] %v810_v10  ;;  %813 = vst [vmem:[%s5687_s27 + $0x58] sm:$0xff] %v812_v11  ;;  %v814_v12 = vld [vmem:[%s5679_s26 + $0xc0] sm:$0xff]  ;;  %v816_v13 = vld [vmem:[%s5679_s26 + $0xd0] sm:$0xff] }
  0x23   : > { %v818_v14 = vld [vmem:[%s5679_s26 + $0xe0] sm:$0xff]  ;;  %815 = vst [vmem:[%s5687_s27 + $0x60] sm:$0xff] %v814_v12  ;;  %817 = vst [vmem:[%s5687_s27 + $0x68] sm:$0xff] %v816_v13  ;;  %v820_v15 = vld [vmem:[%s5679_s26 + $0xf0] sm:$0xff] }
  0x24   : > { %819 = vst [vmem:[%s5687_s27 + $0x70] sm:$0xff] %v818_v14  ;;  %v822_v16 = vld [vmem:[%s5679_s26 + $0x100] sm:$0xff]  ;;  %v824_v17 = vld [vmem:[%s5679_s26 + $0x110] sm:$0xff]  ;;  %821 = vst [vmem:[%s5687_s27 + $0x78] sm:$0xff] %v820_v15 }
  0x25   : > { %823 = vst [vmem:[%s5687_s27 + $0x80] sm:$0xff] %v822_v16  ;;  %825 = vst [vmem:[%s5687_s27 + $0x88] sm:$0xff] %v824_v17  ;;  %v826_v18 = vld [vmem:[%s5679_s26 + $0x120] sm:$0xff]  ;;  %v828_v19 = vld [vmem:[%s5679_s26 + $0x130] sm:$0xff] }
  0x26   : > { %v830_v20 = vld [vmem:[%s5679_s26 + $0x140] sm:$0xff]  ;;  %827 = vst [vmem:[%s5687_s27 + $0x90] sm:$0xff] %v826_v18  ;;  %829 = vst [vmem:[%s5687_s27 + $0x98] sm:$0xff] %v828_v19  ;;  %v832_v21 = vld [vmem:[%s5679_s26 + $0x150] sm:$0xff] }
  0x27   : > { %831 = vst [vmem:[%s5687_s27 + $0xa0] sm:$0xff] %v830_v20  ;;  %v834_v22 = vld [vmem:[%s5679_s26 + $0x160] sm:$0xff]  ;;  %v836_v23 = vld [vmem:[%s5679_s26 + $0x170] sm:$0xff]  ;;  %833 = vst [vmem:[%s5687_s27 + $0xa8] sm:$0xff] %v832_v21 }
  0x28   : > { %835 = vst [vmem:[%s5687_s27 + $0xb0] sm:$0xff] %v834_v22  ;;  %837 = vst [vmem:[%s5687_s27 + $0xb8] sm:$0xff] %v836_v23  ;;  %v838_v24 = vld [vmem:[%s5679_s26 + $0x180] sm:$0xff]  ;;  %v840_v25 = vld [vmem:[%s5679_s26 + $0x190] sm:$0xff] }
  0x29   : > { %v842_v26 = vld [vmem:[%s5679_s26 + $0x1a0] sm:$0xff]  ;;  %839 = vst [vmem:[%s5687_s27 + $0xc0] sm:$0xff] %v838_v24  ;;  %841 = vst [vmem:[%s5687_s27 + $0xc8] sm:$0xff] %v840_v25  ;;  %v844_v27 = vld [vmem:[%s5679_s26 + $0x1b0] sm:$0xff] }
  0x2a   : > { %843 = vst [vmem:[%s5687_s27 + $0xd0] sm:$0xff] %v842_v26  ;;  %v846_v28 = vld [vmem:[%s5679_s26 + $0x1c0] sm:$0xff]  ;;  %v848_v29 = vld [vmem:[%s5679_s26 + $0x1d0] sm:$0xff]  ;;  %845 = vst [vmem:[%s5687_s27 + $0xd8] sm:$0xff] %v844_v27 }
  0x2b   : > { %847 = vst [vmem:[%s5687_s27 + $0xe0] sm:$0xff] %v846_v28  ;;  %849 = vst [vmem:[%s5687_s27 + $0xe8] sm:$0xff] %v848_v29  ;;  %v850_v30 = vld [vmem:[%s5679_s26 + $0x1e0] sm:$0xff]  ;;  %v852_v31 = vld [vmem:[%s5679_s26 + $0x1f0] sm:$0xff] }
  0x2c   : > { %v854_v32 = vld [vmem:[%s5679_s26 + $0x200] sm:$0xff]  ;;  %851 = vst [vmem:[%s5687_s27 + $0xf0] sm:$0xff] %v850_v30  ;;  %853 = vst [vmem:[%s5687_s27 + $0xf8] sm:$0xff] %v852_v31  ;;  %v856_v33 = vld [vmem:[%s5679_s26 + $0x210] sm:$0xff] }
  0x2d   : > { %855 = vst [vmem:[%s5687_s27 + $0x100] sm:$0xff] %v854_v32  ;;  %v858_v34 = vld [vmem:[%s5679_s26 + $0x220] sm:$0xff]  ;;  %v860_v35 = vld [vmem:[%s5679_s26 + $0x230] sm:$0xff]  ;;  %857 = vst [vmem:[%s5687_s27 + $0x108] sm:$0xff] %v856_v33 }
  0x2e   : > { %859 = vst [vmem:[%s5687_s27 + $0x110] sm:$0xff] %v858_v34  ;;  %861 = vst [vmem:[%s5687_s27 + $0x118] sm:$0xff] %v860_v35  ;;  %v862_v36 = vld [vmem:[%s5679_s26 + $0x240] sm:$0xff]  ;;  %v864_v37 = vld [vmem:[%s5679_s26 + $0x250] sm:$0xff] }
  0x2f   : > { %v866_v38 = vld [vmem:[%s5679_s26 + $0x260] sm:$0xff]  ;;  %863 = vst [vmem:[%s5687_s27 + $0x120] sm:$0xff] %v862_v36  ;;  %865 = vst [vmem:[%s5687_s27 + $0x128] sm:$0xff] %v864_v37  ;;  %v868_v39 = vld [vmem:[%s5679_s26 + $0x270] sm:$0xff] }
  0x30   : > { %867 = vst [vmem:[%s5687_s27 + $0x130] sm:$0xff] %v866_v38  ;;  %v870_v40 = vld [vmem:[%s5679_s26 + $0x280] sm:$0xff]  ;;  %v872_v41 = vld [vmem:[%s5679_s26 + $0x290] sm:$0xff]  ;;  %869 = vst [vmem:[%s5687_s27 + $0x138] sm:$0xff] %v868_v39 }
  0x31   : > { %871 = vst [vmem:[%s5687_s27 + $0x140] sm:$0xff] %v870_v40  ;;  %873 = vst [vmem:[%s5687_s27 + $0x148] sm:$0xff] %v872_v41  ;;  %v874_v42 = vld [vmem:[%s5679_s26 + $0x2a0] sm:$0xff]  ;;  %v876_v43 = vld [vmem:[%s5679_s26 + $0x2b0] sm:$0xff] }
  0x32   : > { %v878_v44 = vld [vmem:[%s5679_s26 + $0x2c0] sm:$0xff]  ;;  %875 = vst [vmem:[%s5687_s27 + $0x150] sm:$0xff] %v874_v42  ;;  %877 = vst [vmem:[%s5687_s27 + $0x158] sm:$0xff] %v876_v43  ;;  %v880_v45 = vld [vmem:[%s5679_s26 + $0x2d0] sm:$0xff] }
  0x33   : > { %879 = vst [vmem:[%s5687_s27 + $0x160] sm:$0xff] %v878_v44  ;;  %v882_v46 = vld [vmem:[%s5679_s26 + $0x2e0] sm:$0xff]  ;;  %v884_v47 = vld [vmem:[%s5679_s26 + $0x2f0] sm:$0xff]  ;;  %881 = vst [vmem:[%s5687_s27 + $0x168] sm:$0xff] %v880_v45 }
  0x34   : > { %883 = vst [vmem:[%s5687_s27 + $0x170] sm:$0xff] %v882_v46  ;;  %885 = vst [vmem:[%s5687_s27 + $0x178] sm:$0xff] %v884_v47  ;;  %v886_v48 = vld [vmem:[%s5679_s26 + $0x300] sm:$0xff]  ;;  %v888_v49 = vld [vmem:[%s5679_s26 + $0x310] sm:$0xff] }
  0x35   : > { %v890_v50 = vld [vmem:[%s5679_s26 + $0x320] sm:$0xff]  ;;  %887 = vst [vmem:[%s5687_s27 + $0x180] sm:$0xff] %v886_v48  ;;  %889 = vst [vmem:[%s5687_s27 + $0x188] sm:$0xff] %v888_v49  ;;  %v892_v51 = vld [vmem:[%s5679_s26 + $0x330] sm:$0xff] }
  0x36   : > { %891 = vst [vmem:[%s5687_s27 + $0x190] sm:$0xff] %v890_v50  ;;  %v894_v52 = vld [vmem:[%s5679_s26 + $0x340] sm:$0xff]  ;;  %v896_v53 = vld [vmem:[%s5679_s26 + $0x350] sm:$0xff]  ;;  %893 = vst [vmem:[%s5687_s27 + $0x198] sm:$0xff] %v892_v51 }
  0x37   : > { %895 = vst [vmem:[%s5687_s27 + $0x1a0] sm:$0xff] %v894_v52  ;;  %897 = vst [vmem:[%s5687_s27 + $0x1a8] sm:$0xff] %v896_v53  ;;  %v898_v54 = vld [vmem:[%s5679_s26 + $0x360] sm:$0xff]  ;;  %v900_v55 = vld [vmem:[%s5679_s26 + $0x370] sm:$0xff] }
  0x38   : > { %v902_v56 = vld [vmem:[%s5679_s26 + $0x380] sm:$0xff]  ;;  %899 = vst [vmem:[%s5687_s27 + $0x1b0] sm:$0xff] %v898_v54  ;;  %901 = vst [vmem:[%s5687_s27 + $0x1b8] sm:$0xff] %v900_v55  ;;  %v904_v57 = vld [vmem:[%s5679_s26 + $0x390] sm:$0xff] }
  0x39   : > { %903 = vst [vmem:[%s5687_s27 + $0x1c0] sm:$0xff] %v902_v56  ;;  %v906_v58 = vld [vmem:[%s5679_s26 + $0x3a0] sm:$0xff]  ;;  %v908_v59 = vld [vmem:[%s5679_s26 + $0x3b0] sm:$0xff]  ;;  %905 = vst [vmem:[%s5687_s27 + $0x1c8] sm:$0xff] %v904_v57 }
  0x3a   : > { %907 = vst [vmem:[%s5687_s27 + $0x1d0] sm:$0xff] %v906_v58  ;;  %909 = vst [vmem:[%s5687_s27 + $0x1d8] sm:$0xff] %v908_v59  ;;  %v910_v60 = vld [vmem:[%s5679_s26 + $0x3c0] sm:$0xff]  ;;  %v912_v61 = vld [vmem:[%s5679_s26 + $0x3d0] sm:$0xff] }
  0x3b   : > { %v914_v62 = vld [vmem:[%s5679_s26 + $0x3e0] sm:$0xff]  ;;  %911 = vst [vmem:[%s5687_s27 + $0x1e0] sm:$0xff] %v910_v60  ;;  %913 = vst [vmem:[%s5687_s27 + $0x1e8] sm:$0xff] %v912_v61  ;;  %v916_v63 = vld [vmem:[%s5679_s26 + $0x3f0] sm:$0xff] }
  0x3c   : > { %915 = vst [vmem:[%s5687_s27 + $0x1f0] sm:$0xff] %v914_v62  ;;  %v918_v0 = vld [vmem:[%s5679_s26 + $0x400] sm:$0xff]  ;;  %v920_v1 = vld [vmem:[%s5679_s26 + $0x410] sm:$0xff]  ;;  %917 = vst [vmem:[%s5687_s27 + $0x1f8] sm:$0xff] %v916_v63 }
  0x3d   : > { %919 = vst [vmem:[%s5687_s27 + $0x200] sm:$0xff] %v918_v0  ;;  %921 = vst [vmem:[%s5687_s27 + $0x208] sm:$0xff] %v920_v1  ;;  %v922_v2 = vld [vmem:[%s5679_s26 + $0x420] sm:$0xff]  ;;  %v924_v3 = vld [vmem:[%s5679_s26 + $0x430] sm:$0xff] }
  0x3e   : > { %v926_v4 = vld [vmem:[%s5679_s26 + $0x440] sm:$0xff]  ;;  %923 = vst [vmem:[%s5687_s27 + $0x210] sm:$0xff] %v922_v2  ;;  %925 = vst [vmem:[%s5687_s27 + $0x218] sm:$0xff] %v924_v3  ;;  %v928_v5 = vld [vmem:[%s5679_s26 + $0x450] sm:$0xff] }
  0x3f   : > { %927 = vst [vmem:[%s5687_s27 + $0x220] sm:$0xff] %v926_v4  ;;  %v930_v6 = vld [vmem:[%s5679_s26 + $0x460] sm:$0xff]  ;;  %v932_v7 = vld [vmem:[%s5679_s26 + $0x470] sm:$0xff]  ;;  %929 = vst [vmem:[%s5687_s27 + $0x228] sm:$0xff] %v928_v5 }
  0x40   : > { %931 = vst [vmem:[%s5687_s27 + $0x230] sm:$0xff] %v930_v6  ;;  %933 = vst [vmem:[%s5687_s27 + $0x238] sm:$0xff] %v932_v7  ;;  %v934_v8 = vld [vmem:[%s5679_s26 + $0x480] sm:$0xff]  ;;  %v936_v9 = vld [vmem:[%s5679_s26 + $0x490] sm:$0xff] }
  0x41   : > { %v938_v10 = vld [vmem:[%s5679_s26 + $0x4a0] sm:$0xff]  ;;  %935 = vst [vmem:[%s5687_s27 + $0x240] sm:$0xff] %v934_v8  ;;  %937 = vst [vmem:[%s5687_s27 + $0x248] sm:$0xff] %v936_v9  ;;  %v940_v11 = vld [vmem:[%s5679_s26 + $0x4b0] sm:$0xff] }
  0x42   : > { %939 = vst [vmem:[%s5687_s27 + $0x250] sm:$0xff] %v938_v10  ;;  %v942_v12 = vld [vmem:[%s5679_s26 + $0x4c0] sm:$0xff]  ;;  %v944_v13 = vld [vmem:[%s5679_s26 + $0x4d0] sm:$0xff]  ;;  %941 = vst [vmem:[%s5687_s27 + $0x258] sm:$0xff] %v940_v11 }
  0x43   : > { %943 = vst [vmem:[%s5687_s27 + $0x260] sm:$0xff] %v942_v12  ;;  %945 = vst [vmem:[%s5687_s27 + $0x268] sm:$0xff] %v944_v13  ;;  %v946_v14 = vld [vmem:[%s5679_s26 + $0x4e0] sm:$0xff]  ;;  %v948_v15 = vld [vmem:[%s5679_s26 + $0x4f0] sm:$0xff] }
  0x44   : > { %v950_v16 = vld [vmem:[%s5679_s26 + $0x500] sm:$0xff]  ;;  %947 = vst [vmem:[%s5687_s27 + $0x270] sm:$0xff] %v946_v14  ;;  %949 = vst [vmem:[%s5687_s27 + $0x278] sm:$0xff] %v948_v15  ;;  %v952_v17 = vld [vmem:[%s5679_s26 + $0x510] sm:$0xff] }
  0x45   : > { %951 = vst [vmem:[%s5687_s27 + $0x280] sm:$0xff] %v950_v16  ;;  %v954_v18 = vld [vmem:[%s5679_s26 + $0x520] sm:$0xff]  ;;  %v956_v19 = vld [vmem:[%s5679_s26 + $0x530] sm:$0xff]  ;;  %953 = vst [vmem:[%s5687_s27 + $0x288] sm:$0xff] %v952_v17 }
  0x46   : > { %955 = vst [vmem:[%s5687_s27 + $0x290] sm:$0xff] %v954_v18  ;;  %957 = vst [vmem:[%s5687_s27 + $0x298] sm:$0xff] %v956_v19  ;;  %v958_v20 = vld [vmem:[%s5679_s26 + $0x540] sm:$0xff]  ;;  %v960_v21 = vld [vmem:[%s5679_s26 + $0x550] sm:$0xff] }
  0x47   : > { %v962_v22 = vld [vmem:[%s5679_s26 + $0x560] sm:$0xff]  ;;  %959 = vst [vmem:[%s5687_s27 + $0x2a0] sm:$0xff] %v958_v20  ;;  %961 = vst [vmem:[%s5687_s27 + $0x2a8] sm:$0xff] %v960_v21  ;;  %v964_v23 = vld [vmem:[%s5679_s26 + $0x570] sm:$0xff] }
  0x48   : > { %963 = vst [vmem:[%s5687_s27 + $0x2b0] sm:$0xff] %v962_v22  ;;  %v966_v24 = vld [vmem:[%s5679_s26 + $0x580] sm:$0xff]  ;;  %v968_v25 = vld [vmem:[%s5679_s26 + $0x590] sm:$0xff]  ;;  %965 = vst [vmem:[%s5687_s27 + $0x2b8] sm:$0xff] %v964_v23 }
  0x49   : > { %967 = vst [vmem:[%s5687_s27 + $0x2c0] sm:$0xff] %v966_v24  ;;  %969 = vst [vmem:[%s5687_s27 + $0x2c8] sm:$0xff] %v968_v25  ;;  %v970_v26 = vld [vmem:[%s5679_s26 + $0x5a0] sm:$0xff]  ;;  %v972_v27 = vld [vmem:[%s5679_s26 + $0x5b0] sm:$0xff] }
  0x4a   : > { %v974_v28 = vld [vmem:[%s5679_s26 + $0x5c0] sm:$0xff]  ;;  %971 = vst [vmem:[%s5687_s27 + $0x2d0] sm:$0xff] %v970_v26  ;;  %973 = vst [vmem:[%s5687_s27 + $0x2d8] sm:$0xff] %v972_v27  ;;  %v976_v29 = vld [vmem:[%s5679_s26 + $0x5d0] sm:$0xff] }
  0x4b   : > { %975 = vst [vmem:[%s5687_s27 + $0x2e0] sm:$0xff] %v974_v28  ;;  %v978_v30 = vld [vmem:[%s5679_s26 + $0x5e0] sm:$0xff]  ;;  %v980_v31 = vld [vmem:[%s5679_s26 + $0x5f0] sm:$0xff]  ;;  %977 = vst [vmem:[%s5687_s27 + $0x2e8] sm:$0xff] %v976_v29 }
  0x4c   : > { %979 = vst [vmem:[%s5687_s27 + $0x2f0] sm:$0xff] %v978_v30  ;;  %981 = vst [vmem:[%s5687_s27 + $0x2f8] sm:$0xff] %v980_v31  ;;  %v982_v32 = vld [vmem:[%s5679_s26 + $0x600] sm:$0xff]  ;;  %v984_v33 = vld [vmem:[%s5679_s26 + $0x610] sm:$0xff] }
  0x4d   : > { %v986_v34 = vld [vmem:[%s5679_s26 + $0x620] sm:$0xff]  ;;  %983 = vst [vmem:[%s5687_s27 + $0x300] sm:$0xff] %v982_v32  ;;  %985 = vst [vmem:[%s5687_s27 + $0x308] sm:$0xff] %v984_v33  ;;  %v988_v35 = vld [vmem:[%s5679_s26 + $0x630] sm:$0xff] }
  0x4e   : > { %987 = vst [vmem:[%s5687_s27 + $0x310] sm:$0xff] %v986_v34  ;;  %v990_v36 = vld [vmem:[%s5679_s26 + $0x640] sm:$0xff]  ;;  %v992_v37 = vld [vmem:[%s5679_s26 + $0x650] sm:$0xff]  ;;  %989 = vst [vmem:[%s5687_s27 + $0x318] sm:$0xff] %v988_v35 }
  0x4f   : > { %991 = vst [vmem:[%s5687_s27 + $0x320] sm:$0xff] %v990_v36  ;;  %993 = vst [vmem:[%s5687_s27 + $0x328] sm:$0xff] %v992_v37  ;;  %v994_v38 = vld [vmem:[%s5679_s26 + $0x660] sm:$0xff]  ;;  %v996_v39 = vld [vmem:[%s5679_s26 + $0x670] sm:$0xff] }
  0x50   : > { %v998_v40 = vld [vmem:[%s5679_s26 + $0x680] sm:$0xff]  ;;  %995 = vst [vmem:[%s5687_s27 + $0x330] sm:$0xff] %v994_v38  ;;  %997 = vst [vmem:[%s5687_s27 + $0x338] sm:$0xff] %v996_v39  ;;  %v1000_v41 = vld [vmem:[%s5679_s26 + $0x690] sm:$0xff] }
  0x51   : > { %999 = vst [vmem:[%s5687_s27 + $0x340] sm:$0xff] %v998_v40  ;;  %v1002_v42 = vld [vmem:[%s5679_s26 + $0x6a0] sm:$0xff]  ;;  %v1004_v43 = vld [vmem:[%s5679_s26 + $0x6b0] sm:$0xff]  ;;  %1001 = vst [vmem:[%s5687_s27 + $0x348] sm:$0xff] %v1000_v41 }
  0x52   : > { %1003 = vst [vmem:[%s5687_s27 + $0x350] sm:$0xff] %v1002_v42  ;;  %1005 = vst [vmem:[%s5687_s27 + $0x358] sm:$0xff] %v1004_v43  ;;  %v1006_v44 = vld [vmem:[%s5679_s26 + $0x6c0] sm:$0xff]  ;;  %v1008_v45 = vld [vmem:[%s5679_s26 + $0x6d0] sm:$0xff] }
  0x53   : > { %v1010_v46 = vld [vmem:[%s5679_s26 + $0x6e0] sm:$0xff]  ;;  %1007 = vst [vmem:[%s5687_s27 + $0x360] sm:$0xff] %v1006_v44  ;;  %1009 = vst [vmem:[%s5687_s27 + $0x368] sm:$0xff] %v1008_v45  ;;  %v1012_v47 = vld [vmem:[%s5679_s26 + $0x6f0] sm:$0xff] }
  0x54   : > { %1011 = vst [vmem:[%s5687_s27 + $0x370] sm:$0xff] %v1010_v46  ;;  %v1014_v48 = vld [vmem:[%s5679_s26 + $0x700] sm:$0xff]  ;;  %v1016_v49 = vld [vmem:[%s5679_s26 + $0x710] sm:$0xff]  ;;  %1013 = vst [vmem:[%s5687_s27 + $0x378] sm:$0xff] %v1012_v47 }
  0x55   : > { %1015 = vst [vmem:[%s5687_s27 + $0x380] sm:$0xff] %v1014_v48  ;;  %1017 = vst [vmem:[%s5687_s27 + $0x388] sm:$0xff] %v1016_v49  ;;  %v1018_v50 = vld [vmem:[%s5679_s26 + $0x720] sm:$0xff]  ;;  %v1020_v51 = vld [vmem:[%s5679_s26 + $0x730] sm:$0xff] }
  0x56   : > { %v1022_v52 = vld [vmem:[%s5679_s26 + $0x740] sm:$0xff]  ;;  %1019 = vst [vmem:[%s5687_s27 + $0x390] sm:$0xff] %v1018_v50  ;;  %1021 = vst [vmem:[%s5687_s27 + $0x398] sm:$0xff] %v1020_v51  ;;  %v1024_v53 = vld [vmem:[%s5679_s26 + $0x750] sm:$0xff] }
  0x57   : > { %1023 = vst [vmem:[%s5687_s27 + $0x3a0] sm:$0xff] %v1022_v52  ;;  %v1026_v54 = vld [vmem:[%s5679_s26 + $0x760] sm:$0xff]  ;;  %v1028_v55 = vld [vmem:[%s5679_s26 + $0x770] sm:$0xff]  ;;  %1025 = vst [vmem:[%s5687_s27 + $0x3a8] sm:$0xff] %v1024_v53 }
  0x58   : > { %1027 = vst [vmem:[%s5687_s27 + $0x3b0] sm:$0xff] %v1026_v54  ;;  %1029 = vst [vmem:[%s5687_s27 + $0x3b8] sm:$0xff] %v1028_v55  ;;  %v1030_v56 = vld [vmem:[%s5679_s26 + $0x780] sm:$0xff]  ;;  %v1032_v57 = vld [vmem:[%s5679_s26 + $0x790] sm:$0xff] }
  0x59   : > { %v1034_v58 = vld [vmem:[%s5679_s26 + $0x7a0] sm:$0xff]  ;;  %1031 = vst [vmem:[%s5687_s27 + $0x3c0] sm:$0xff] %v1030_v56  ;;  %1033 = vst [vmem:[%s5687_s27 + $0x3c8] sm:$0xff] %v1032_v57  ;;  %v1036_v59 = vld [vmem:[%s5679_s26 + $0x7b0] sm:$0xff] }
  0x5a   : > { %1035 = vst [vmem:[%s5687_s27 + $0x3d0] sm:$0xff] %v1034_v58  ;;  %v1038_v60 = vld [vmem:[%s5679_s26 + $0x7c0] sm:$0xff]  ;;  %v1040_v61 = vld [vmem:[%s5679_s26 + $0x7d0] sm:$0xff]  ;;  %1037 = vst [vmem:[%s5687_s27 + $0x3d8] sm:$0xff] %v1036_v59 }
  0x5b   : > { %1039 = vst [vmem:[%s5687_s27 + $0x3e0] sm:$0xff] %v1038_v60  ;;  %1041 = vst [vmem:[%s5687_s27 + $0x3e8] sm:$0xff] %v1040_v61  ;;  %v1042_v62 = vld [vmem:[%s5679_s26 + $0x7e0] sm:$0xff]  ;;  %v1044_v63 = vld [vmem:[%s5679_s26 + $0x7f0] sm:$0xff] }
  0x5c   : > { %v1046_v0 = vld [vmem:[%s5679_s26 + $0x800] sm:$0xff]  ;;  %1043 = vst [vmem:[%s5687_s27 + $0x3f0] sm:$0xff] %v1042_v62  ;;  %1045 = vst [vmem:[%s5687_s27 + $0x3f8] sm:$0xff] %v1044_v63  ;;  %v1048_v1 = vld [vmem:[%s5679_s26 + $0x810] sm:$0xff] }
  0x5d   : > { %1047 = vst [vmem:[%s5687_s27 + $0x400] sm:$0xff] %v1046_v0  ;;  %v1050_v2 = vld [vmem:[%s5679_s26 + $0x820] sm:$0xff]  ;;  %v1052_v3 = vld [vmem:[%s5679_s26 + $0x830] sm:$0xff]  ;;  %1049 = vst [vmem:[%s5687_s27 + $0x408] sm:$0xff] %v1048_v1 }
  0x5e   : > { %1051 = vst [vmem:[%s5687_s27 + $0x410] sm:$0xff] %v1050_v2  ;;  %1053 = vst [vmem:[%s5687_s27 + $0x418] sm:$0xff] %v1052_v3  ;;  %v1054_v4 = vld [vmem:[%s5679_s26 + $0x840] sm:$0xff]  ;;  %v1056_v5 = vld [vmem:[%s5679_s26 + $0x850] sm:$0xff] }
  0x5f   : > { %v1058_v6 = vld [vmem:[%s5679_s26 + $0x860] sm:$0xff]  ;;  %1055 = vst [vmem:[%s5687_s27 + $0x420] sm:$0xff] %v1054_v4  ;;  %1057 = vst [vmem:[%s5687_s27 + $0x428] sm:$0xff] %v1056_v5  ;;  %v1060_v7 = vld [vmem:[%s5679_s26 + $0x870] sm:$0xff] }
  0x60   : > { %1059 = vst [vmem:[%s5687_s27 + $0x430] sm:$0xff] %v1058_v6  ;;  %v1062_v8 = vld [vmem:[%s5679_s26 + $0x880] sm:$0xff]  ;;  %v1064_v9 = vld [vmem:[%s5679_s26 + $0x890] sm:$0xff]  ;;  %1061 = vst [vmem:[%s5687_s27 + $0x438] sm:$0xff] %v1060_v7 }
  0x61   : > { %1063 = vst [vmem:[%s5687_s27 + $0x440] sm:$0xff] %v1062_v8  ;;  %1065 = vst [vmem:[%s5687_s27 + $0x448] sm:$0xff] %v1064_v9  ;;  %v1066_v10 = vld [vmem:[%s5679_s26 + $0x8a0] sm:$0xff]  ;;  %v1068_v11 = vld [vmem:[%s5679_s26 + $0x8b0] sm:$0xff] }
  0x62   : > { %v1070_v12 = vld [vmem:[%s5679_s26 + $0x8c0] sm:$0xff]  ;;  %1067 = vst [vmem:[%s5687_s27 + $0x450] sm:$0xff] %v1066_v10  ;;  %1069 = vst [vmem:[%s5687_s27 + $0x458] sm:$0xff] %v1068_v11  ;;  %v1072_v13 = vld [vmem:[%s5679_s26 + $0x8d0] sm:$0xff] }
  0x63   : > { %1071 = vst [vmem:[%s5687_s27 + $0x460] sm:$0xff] %v1070_v12  ;;  %v1074_v14 = vld [vmem:[%s5679_s26 + $0x8e0] sm:$0xff]  ;;  %v1076_v15 = vld [vmem:[%s5679_s26 + $0x8f0] sm:$0xff]  ;;  %1073 = vst [vmem:[%s5687_s27 + $0x468] sm:$0xff] %v1072_v13 }
  0x64   : > { %1075 = vst [vmem:[%s5687_s27 + $0x470] sm:$0xff] %v1074_v14  ;;  %1077 = vst [vmem:[%s5687_s27 + $0x478] sm:$0xff] %v1076_v15  ;;  %v1078_v16 = vld [vmem:[%s5679_s26 + $0x900] sm:$0xff]  ;;  %v1080_v17 = vld [vmem:[%s5679_s26 + $0x910] sm:$0xff] }
  0x65   : > { %v1082_v18 = vld [vmem:[%s5679_s26 + $0x920] sm:$0xff]  ;;  %1079 = vst [vmem:[%s5687_s27 + $0x480] sm:$0xff] %v1078_v16  ;;  %1081 = vst [vmem:[%s5687_s27 + $0x488] sm:$0xff] %v1080_v17  ;;  %v1084_v19 = vld [vmem:[%s5679_s26 + $0x930] sm:$0xff] }
  0x66   : > { %1083 = vst [vmem:[%s5687_s27 + $0x490] sm:$0xff] %v1082_v18  ;;  %v1086_v20 = vld [vmem:[%s5679_s26 + $0x940] sm:$0xff]  ;;  %v1088_v21 = vld [vmem:[%s5679_s26 + $0x950] sm:$0xff]  ;;  %1085 = vst [vmem:[%s5687_s27 + $0x498] sm:$0xff] %v1084_v19 }
  0x67   : > { %1087 = vst [vmem:[%s5687_s27 + $0x4a0] sm:$0xff] %v1086_v20  ;;  %1089 = vst [vmem:[%s5687_s27 + $0x4a8] sm:$0xff] %v1088_v21  ;;  %v1090_v22 = vld [vmem:[%s5679_s26 + $0x960] sm:$0xff]  ;;  %v1092_v23 = vld [vmem:[%s5679_s26 + $0x970] sm:$0xff] }
  0x68   : > { %v1094_v24 = vld [vmem:[%s5679_s26 + $0x980] sm:$0xff]  ;;  %1091 = vst [vmem:[%s5687_s27 + $0x4b0] sm:$0xff] %v1090_v22  ;;  %1093 = vst [vmem:[%s5687_s27 + $0x4b8] sm:$0xff] %v1092_v23  ;;  %v1096_v25 = vld [vmem:[%s5679_s26 + $0x990] sm:$0xff] }
  0x69   : > { %1095 = vst [vmem:[%s5687_s27 + $0x4c0] sm:$0xff] %v1094_v24  ;;  %v1098_v26 = vld [vmem:[%s5679_s26 + $0x9a0] sm:$0xff]  ;;  %v1100_v27 = vld [vmem:[%s5679_s26 + $0x9b0] sm:$0xff]  ;;  %1097 = vst [vmem:[%s5687_s27 + $0x4c8] sm:$0xff] %v1096_v25 }
  0x6a   : > { %1099 = vst [vmem:[%s5687_s27 + $0x4d0] sm:$0xff] %v1098_v26  ;;  %1101 = vst [vmem:[%s5687_s27 + $0x4d8] sm:$0xff] %v1100_v27  ;;  %v1102_v28 = vld [vmem:[%s5679_s26 + $0x9c0] sm:$0xff]  ;;  %v1104_v29 = vld [vmem:[%s5679_s26 + $0x9d0] sm:$0xff] }
  0x6b   : > { %v1106_v30 = vld [vmem:[%s5679_s26 + $0x9e0] sm:$0xff]  ;;  %1103 = vst [vmem:[%s5687_s27 + $0x4e0] sm:$0xff] %v1102_v28  ;;  %1105 = vst [vmem:[%s5687_s27 + $0x4e8] sm:$0xff] %v1104_v29  ;;  %v1108_v31 = vld [vmem:[%s5679_s26 + $0x9f0] sm:$0xff] }
  0x6c   : > { %1107 = vst [vmem:[%s5687_s27 + $0x4f0] sm:$0xff] %v1106_v30  ;;  %v1110_v32 = vld [vmem:[%s5679_s26 + $0xa00] sm:$0xff]  ;;  %v1112_v33 = vld [vmem:[%s5679_s26 + $0xa10] sm:$0xff]  ;;  %1109 = vst [vmem:[%s5687_s27 + $0x4f8] sm:$0xff] %v1108_v31 }
  0x6d   : > { %1111 = vst [vmem:[%s5687_s27 + $0x500] sm:$0xff] %v1110_v32  ;;  %1113 = vst [vmem:[%s5687_s27 + $0x508] sm:$0xff] %v1112_v33  ;;  %v1114_v34 = vld [vmem:[%s5679_s26 + $0xa20] sm:$0xff]  ;;  %v1116_v35 = vld [vmem:[%s5679_s26 + $0xa30] sm:$0xff] }
  0x6e   : > { %v1118_v36 = vld [vmem:[%s5679_s26 + $0xa40] sm:$0xff]  ;;  %1115 = vst [vmem:[%s5687_s27 + $0x510] sm:$0xff] %v1114_v34  ;;  %1117 = vst [vmem:[%s5687_s27 + $0x518] sm:$0xff] %v1116_v35  ;;  %v1120_v37 = vld [vmem:[%s5679_s26 + $0xa50] sm:$0xff] }
  0x6f   : > { %1119 = vst [vmem:[%s5687_s27 + $0x520] sm:$0xff] %v1118_v36  ;;  %v1122_v38 = vld [vmem:[%s5679_s26 + $0xa60] sm:$0xff]  ;;  %v1124_v39 = vld [vmem:[%s5679_s26 + $0xa70] sm:$0xff]  ;;  %1121 = vst [vmem:[%s5687_s27 + $0x528] sm:$0xff] %v1120_v37 }
  0x70   : > { %1123 = vst [vmem:[%s5687_s27 + $0x530] sm:$0xff] %v1122_v38  ;;  %1125 = vst [vmem:[%s5687_s27 + $0x538] sm:$0xff] %v1124_v39  ;;  %v1126_v40 = vld [vmem:[%s5679_s26 + $0xa80] sm:$0xff]  ;;  %v1128_v41 = vld [vmem:[%s5679_s26 + $0xa90] sm:$0xff] }
  0x71   : > { %v1130_v42 = vld [vmem:[%s5679_s26 + $0xaa0] sm:$0xff]  ;;  %1127 = vst [vmem:[%s5687_s27 + $0x540] sm:$0xff] %v1126_v40  ;;  %1129 = vst [vmem:[%s5687_s27 + $0x548] sm:$0xff] %v1128_v41  ;;  %v1132_v43 = vld [vmem:[%s5679_s26 + $0xab0] sm:$0xff] }
  0x72   : > { %1131 = vst [vmem:[%s5687_s27 + $0x550] sm:$0xff] %v1130_v42  ;;  %v1134_v44 = vld [vmem:[%s5679_s26 + $0xac0] sm:$0xff]  ;;  %v1136_v45 = vld [vmem:[%s5679_s26 + $0xad0] sm:$0xff]  ;;  %1133 = vst [vmem:[%s5687_s27 + $0x558] sm:$0xff] %v1132_v43 }
  0x73   : > { %1135 = vst [vmem:[%s5687_s27 + $0x560] sm:$0xff] %v1134_v44  ;;  %1137 = vst [vmem:[%s5687_s27 + $0x568] sm:$0xff] %v1136_v45  ;;  %v1138_v46 = vld [vmem:[%s5679_s26 + $0xae0] sm:$0xff]  ;;  %v1140_v47 = vld [vmem:[%s5679_s26 + $0xaf0] sm:$0xff] }
  0x74   : > { %v1142_v48 = vld [vmem:[%s5679_s26 + $0xb00] sm:$0xff]  ;;  %1139 = vst [vmem:[%s5687_s27 + $0x570] sm:$0xff] %v1138_v46  ;;  %1141 = vst [vmem:[%s5687_s27 + $0x578] sm:$0xff] %v1140_v47  ;;  %v1144_v49 = vld [vmem:[%s5679_s26 + $0xb10] sm:$0xff] }
  0x75   : > { %1143 = vst [vmem:[%s5687_s27 + $0x580] sm:$0xff] %v1142_v48  ;;  %v1146_v50 = vld [vmem:[%s5679_s26 + $0xb20] sm:$0xff]  ;;  %v1148_v51 = vld [vmem:[%s5679_s26 + $0xb30] sm:$0xff]  ;;  %1145 = vst [vmem:[%s5687_s27 + $0x588] sm:$0xff] %v1144_v49 }
  0x76   : > { %1147 = vst [vmem:[%s5687_s27 + $0x590] sm:$0xff] %v1146_v50  ;;  %1149 = vst [vmem:[%s5687_s27 + $0x598] sm:$0xff] %v1148_v51  ;;  %v1150_v52 = vld [vmem:[%s5679_s26 + $0xb40] sm:$0xff]  ;;  %v1152_v53 = vld [vmem:[%s5679_s26 + $0xb50] sm:$0xff] }
  0x77   : > { %v1154_v54 = vld [vmem:[%s5679_s26 + $0xb60] sm:$0xff]  ;;  %1151 = vst [vmem:[%s5687_s27 + $0x5a0] sm:$0xff] %v1150_v52  ;;  %1153 = vst [vmem:[%s5687_s27 + $0x5a8] sm:$0xff] %v1152_v53  ;;  %v1156_v55 = vld [vmem:[%s5679_s26 + $0xb70] sm:$0xff] }
  0x78   : > { %1155 = vst [vmem:[%s5687_s27 + $0x5b0] sm:$0xff] %v1154_v54  ;;  %v1158_v56 = vld [vmem:[%s5679_s26 + $0xb80] sm:$0xff]  ;;  %v1160_v57 = vld [vmem:[%s5679_s26 + $0xb90] sm:$0xff]  ;;  %1157 = vst [vmem:[%s5687_s27 + $0x5b8] sm:$0xff] %v1156_v55 }
  0x79   : > { %1159 = vst [vmem:[%s5687_s27 + $0x5c0] sm:$0xff] %v1158_v56  ;;  %1161 = vst [vmem:[%s5687_s27 + $0x5c8] sm:$0xff] %v1160_v57  ;;  %v1162_v58 = vld [vmem:[%s5679_s26 + $0xba0] sm:$0xff]  ;;  %v1164_v59 = vld [vmem:[%s5679_s26 + $0xbb0] sm:$0xff] }
  0x7a   : > { %v1166_v60 = vld [vmem:[%s5679_s26 + $0xbc0] sm:$0xff]  ;;  %1163 = vst [vmem:[%s5687_s27 + $0x5d0] sm:$0xff] %v1162_v58  ;;  %1165 = vst [vmem:[%s5687_s27 + $0x5d8] sm:$0xff] %v1164_v59  ;;  %v1168_v61 = vld [vmem:[%s5679_s26 + $0xbd0] sm:$0xff] }
  0x7b   : > { %1167 = vst [vmem:[%s5687_s27 + $0x5e0] sm:$0xff] %v1166_v60  ;;  %v1170_v62 = vld [vmem:[%s5679_s26 + $0xbe0] sm:$0xff]  ;;  %v1172_v63 = vld [vmem:[%s5679_s26 + $0xbf0] sm:$0xff]  ;;  %1169 = vst [vmem:[%s5687_s27 + $0x5e8] sm:$0xff] %v1168_v61 }
  0x7c   : > { %1171 = vst [vmem:[%s5687_s27 + $0x5f0] sm:$0xff] %v1170_v62  ;;  %1173 = vst [vmem:[%s5687_s27 + $0x5f8] sm:$0xff] %v1172_v63  ;;  %v1174_v0 = vld [vmem:[%s5679_s26 + $0xc00] sm:$0xff]  ;;  %v1176_v1 = vld [vmem:[%s5679_s26 + $0xc10] sm:$0xff] }
  0x7d   : > { %v1178_v2 = vld [vmem:[%s5679_s26 + $0xc20] sm:$0xff]  ;;  %1175 = vst [vmem:[%s5687_s27 + $0x600] sm:$0xff] %v1174_v0  ;;  %1177 = vst [vmem:[%s5687_s27 + $0x608] sm:$0xff] %v1176_v1  ;;  %v1180_v3 = vld [vmem:[%s5679_s26 + $0xc30] sm:$0xff] }
  0x7e   : > { %1179 = vst [vmem:[%s5687_s27 + $0x610] sm:$0xff] %v1178_v2  ;;  %v1182_v4 = vld [vmem:[%s5679_s26 + $0xc40] sm:$0xff]  ;;  %v1184_v5 = vld [vmem:[%s5679_s26 + $0xc50] sm:$0xff]  ;;  %1181 = vst [vmem:[%s5687_s27 + $0x618] sm:$0xff] %v1180_v3 }
  0x7f   : > { %1183 = vst [vmem:[%s5687_s27 + $0x620] sm:$0xff] %v1182_v4  ;;  %1185 = vst [vmem:[%s5687_s27 + $0x628] sm:$0xff] %v1184_v5  ;;  %v1186_v6 = vld [vmem:[%s5679_s26 + $0xc60] sm:$0xff]  ;;  %v1188_v7 = vld [vmem:[%s5679_s26 + $0xc70] sm:$0xff] }
  0x80   : > { %v1190_v8 = vld [vmem:[%s5679_s26 + $0xc80] sm:$0xff]  ;;  %1187 = vst [vmem:[%s5687_s27 + $0x630] sm:$0xff] %v1186_v6  ;;  %1189 = vst [vmem:[%s5687_s27 + $0x638] sm:$0xff] %v1188_v7  ;;  %v1192_v9 = vld [vmem:[%s5679_s26 + $0xc90] sm:$0xff] }
  0x81   : > { %1191 = vst [vmem:[%s5687_s27 + $0x640] sm:$0xff] %v1190_v8  ;;  %v1194_v10 = vld [vmem:[%s5679_s26 + $0xca0] sm:$0xff]  ;;  %v1196_v11 = vld [vmem:[%s5679_s26 + $0xcb0] sm:$0xff]  ;;  %1193 = vst [vmem:[%s5687_s27 + $0x648] sm:$0xff] %v1192_v9 }
  0x82   : > { %1195 = vst [vmem:[%s5687_s27 + $0x650] sm:$0xff] %v1194_v10  ;;  %1197 = vst [vmem:[%s5687_s27 + $0x658] sm:$0xff] %v1196_v11  ;;  %v1198_v12 = vld [vmem:[%s5679_s26 + $0xcc0] sm:$0xff]  ;;  %v1200_v13 = vld [vmem:[%s5679_s26 + $0xcd0] sm:$0xff] }
  0x83   : > { %v1202_v14 = vld [vmem:[%s5679_s26 + $0xce0] sm:$0xff]  ;;  %1199 = vst [vmem:[%s5687_s27 + $0x660] sm:$0xff] %v1198_v12  ;;  %1201 = vst [vmem:[%s5687_s27 + $0x668] sm:$0xff] %v1200_v13  ;;  %v1204_v15 = vld [vmem:[%s5679_s26 + $0xcf0] sm:$0xff] }
  0x84   : > { %1203 = vst [vmem:[%s5687_s27 + $0x670] sm:$0xff] %v1202_v14  ;;  %v1206_v16 = vld [vmem:[%s5679_s26 + $0xd00] sm:$0xff]  ;;  %v1208_v17 = vld [vmem:[%s5679_s26 + $0xd10] sm:$0xff]  ;;  %1205 = vst [vmem:[%s5687_s27 + $0x678] sm:$0xff] %v1204_v15 }
  0x85   : > { %1207 = vst [vmem:[%s5687_s27 + $0x680] sm:$0xff] %v1206_v16  ;;  %1209 = vst [vmem:[%s5687_s27 + $0x688] sm:$0xff] %v1208_v17  ;;  %v1210_v18 = vld [vmem:[%s5679_s26 + $0xd20] sm:$0xff]  ;;  %v1212_v19 = vld [vmem:[%s5679_s26 + $0xd30] sm:$0xff] }
  0x86   : > { %v1214_v20 = vld [vmem:[%s5679_s26 + $0xd40] sm:$0xff]  ;;  %1211 = vst [vmem:[%s5687_s27 + $0x690] sm:$0xff] %v1210_v18  ;;  %1213 = vst [vmem:[%s5687_s27 + $0x698] sm:$0xff] %v1212_v19  ;;  %v1216_v21 = vld [vmem:[%s5679_s26 + $0xd50] sm:$0xff] }
  0x87   : > { %1215 = vst [vmem:[%s5687_s27 + $0x6a0] sm:$0xff] %v1214_v20  ;;  %v1218_v22 = vld [vmem:[%s5679_s26 + $0xd60] sm:$0xff]  ;;  %v1220_v23 = vld [vmem:[%s5679_s26 + $0xd70] sm:$0xff]  ;;  %1217 = vst [vmem:[%s5687_s27 + $0x6a8] sm:$0xff] %v1216_v21 }
  0x88   : > { %1219 = vst [vmem:[%s5687_s27 + $0x6b0] sm:$0xff] %v1218_v22  ;;  %1221 = vst [vmem:[%s5687_s27 + $0x6b8] sm:$0xff] %v1220_v23  ;;  %v1222_v24 = vld [vmem:[%s5679_s26 + $0xd80] sm:$0xff]  ;;  %v1224_v25 = vld [vmem:[%s5679_s26 + $0xd90] sm:$0xff] }
  0x89   : > { %v1226_v26 = vld [vmem:[%s5679_s26 + $0xda0] sm:$0xff]  ;;  %1223 = vst [vmem:[%s5687_s27 + $0x6c0] sm:$0xff] %v1222_v24  ;;  %1225 = vst [vmem:[%s5687_s27 + $0x6c8] sm:$0xff] %v1224_v25  ;;  %v1228_v27 = vld [vmem:[%s5679_s26 + $0xdb0] sm:$0xff] }
  0x8a   : > { %1227 = vst [vmem:[%s5687_s27 + $0x6d0] sm:$0xff] %v1226_v26  ;;  %v1230_v28 = vld [vmem:[%s5679_s26 + $0xdc0] sm:$0xff]  ;;  %v1232_v29 = vld [vmem:[%s5679_s26 + $0xdd0] sm:$0xff]  ;;  %1229 = vst [vmem:[%s5687_s27 + $0x6d8] sm:$0xff] %v1228_v27 }
  0x8b   : > { %1231 = vst [vmem:[%s5687_s27 + $0x6e0] sm:$0xff] %v1230_v28  ;;  %1233 = vst [vmem:[%s5687_s27 + $0x6e8] sm:$0xff] %v1232_v29  ;;  %v1234_v30 = vld [vmem:[%s5679_s26 + $0xde0] sm:$0xff]  ;;  %v1236_v31 = vld [vmem:[%s5679_s26 + $0xdf0] sm:$0xff] }
  0x8c   : > { %v1238_v32 = vld [vmem:[%s5679_s26 + $0xe00] sm:$0xff]  ;;  %1235 = vst [vmem:[%s5687_s27 + $0x6f0] sm:$0xff] %v1234_v30  ;;  %1237 = vst [vmem:[%s5687_s27 + $0x6f8] sm:$0xff] %v1236_v31  ;;  %v1240_v33 = vld [vmem:[%s5679_s26 + $0xe10] sm:$0xff] }
  0x8d   : > { %1239 = vst [vmem:[%s5687_s27 + $0x700] sm:$0xff] %v1238_v32  ;;  %v1242_v34 = vld [vmem:[%s5679_s26 + $0xe20] sm:$0xff]  ;;  %v1244_v35 = vld [vmem:[%s5679_s26 + $0xe30] sm:$0xff]  ;;  %1241 = vst [vmem:[%s5687_s27 + $0x708] sm:$0xff] %v1240_v33 }
  0x8e   : > { %1243 = vst [vmem:[%s5687_s27 + $0x710] sm:$0xff] %v1242_v34  ;;  %1245 = vst [vmem:[%s5687_s27 + $0x718] sm:$0xff] %v1244_v35  ;;  %v1246_v36 = vld [vmem:[%s5679_s26 + $0xe40] sm:$0xff]  ;;  %v1248_v37 = vld [vmem:[%s5679_s26 + $0xe50] sm:$0xff] }
  0x8f   : > { %v1250_v38 = vld [vmem:[%s5679_s26 + $0xe60] sm:$0xff]  ;;  %1247 = vst [vmem:[%s5687_s27 + $0x720] sm:$0xff] %v1246_v36  ;;  %1249 = vst [vmem:[%s5687_s27 + $0x728] sm:$0xff] %v1248_v37  ;;  %v1252_v39 = vld [vmem:[%s5679_s26 + $0xe70] sm:$0xff] }
  0x90   : > { %1251 = vst [vmem:[%s5687_s27 + $0x730] sm:$0xff] %v1250_v38  ;;  %v1254_v40 = vld [vmem:[%s5679_s26 + $0xe80] sm:$0xff]  ;;  %v1256_v41 = vld [vmem:[%s5679_s26 + $0xe90] sm:$0xff]  ;;  %1253 = vst [vmem:[%s5687_s27 + $0x738] sm:$0xff] %v1252_v39 }
  0x91   : > { %1255 = vst [vmem:[%s5687_s27 + $0x740] sm:$0xff] %v1254_v40  ;;  %1257 = vst [vmem:[%s5687_s27 + $0x748] sm:$0xff] %v1256_v41  ;;  %v1258_v42 = vld [vmem:[%s5679_s26 + $0xea0] sm:$0xff]  ;;  %v1260_v43 = vld [vmem:[%s5679_s26 + $0xeb0] sm:$0xff] }
  0x92   : > { %v1262_v44 = vld [vmem:[%s5679_s26 + $0xec0] sm:$0xff]  ;;  %1259 = vst [vmem:[%s5687_s27 + $0x750] sm:$0xff] %v1258_v42  ;;  %1261 = vst [vmem:[%s5687_s27 + $0x758] sm:$0xff] %v1260_v43  ;;  %v1264_v45 = vld [vmem:[%s5679_s26 + $0xed0] sm:$0xff] }
  0x93   : > { %1263 = vst [vmem:[%s5687_s27 + $0x760] sm:$0xff] %v1262_v44  ;;  %v1266_v46 = vld [vmem:[%s5679_s26 + $0xee0] sm:$0xff]  ;;  %v1268_v47 = vld [vmem:[%s5679_s26 + $0xef0] sm:$0xff]  ;;  %1265 = vst [vmem:[%s5687_s27 + $0x768] sm:$0xff] %v1264_v45 }
  0x94   : > { %1267 = vst [vmem:[%s5687_s27 + $0x770] sm:$0xff] %v1266_v46  ;;  %1269 = vst [vmem:[%s5687_s27 + $0x778] sm:$0xff] %v1268_v47  ;;  %v1270_v48 = vld [vmem:[%s5679_s26 + $0xf00] sm:$0xff]  ;;  %v1272_v49 = vld [vmem:[%s5679_s26 + $0xf10] sm:$0xff] }
  0x95   : > { %v1274_v50 = vld [vmem:[%s5679_s26 + $0xf20] sm:$0xff]  ;;  %1271 = vst [vmem:[%s5687_s27 + $0x780] sm:$0xff] %v1270_v48  ;;  %1273 = vst [vmem:[%s5687_s27 + $0x788] sm:$0xff] %v1272_v49  ;;  %v1276_v51 = vld [vmem:[%s5679_s26 + $0xf30] sm:$0xff] }
  0x96   : > { %1275 = vst [vmem:[%s5687_s27 + $0x790] sm:$0xff] %v1274_v50  ;;  %v1278_v52 = vld [vmem:[%s5679_s26 + $0xf40] sm:$0xff]  ;;  %v1280_v53 = vld [vmem:[%s5679_s26 + $0xf50] sm:$0xff]  ;;  %1277 = vst [vmem:[%s5687_s27 + $0x798] sm:$0xff] %v1276_v51 }
  0x97   : > { %1279 = vst [vmem:[%s5687_s27 + $0x7a0] sm:$0xff] %v1278_v52  ;;  %1281 = vst [vmem:[%s5687_s27 + $0x7a8] sm:$0xff] %v1280_v53  ;;  %v1282_v54 = vld [vmem:[%s5679_s26 + $0xf60] sm:$0xff]  ;;  %v1284_v55 = vld [vmem:[%s5679_s26 + $0xf70] sm:$0xff] }
  0x98   : > { %v1286_v56 = vld [vmem:[%s5679_s26 + $0xf80] sm:$0xff]  ;;  %1283 = vst [vmem:[%s5687_s27 + $0x7b0] sm:$0xff] %v1282_v54  ;;  %1285 = vst [vmem:[%s5687_s27 + $0x7b8] sm:$0xff] %v1284_v55  ;;  %v1288_v57 = vld [vmem:[%s5679_s26 + $0xf90] sm:$0xff] }
  0x99   : > { %1287 = vst [vmem:[%s5687_s27 + $0x7c0] sm:$0xff] %v1286_v56  ;;  %v1290_v58 = vld [vmem:[%s5679_s26 + $0xfa0] sm:$0xff]  ;;  %v1292_v59 = vld [vmem:[%s5679_s26 + $0xfb0] sm:$0xff]  ;;  %1289 = vst [vmem:[%s5687_s27 + $0x7c8] sm:$0xff] %v1288_v57 }
  0x9a   : > { %1291 = vst [vmem:[%s5687_s27 + $0x7d0] sm:$0xff] %v1290_v58  ;;  %1293 = vst [vmem:[%s5687_s27 + $0x7d8] sm:$0xff] %v1292_v59  ;;  %v1294_v60 = vld [vmem:[%s5679_s26 + $0xfc0] sm:$0xff]  ;;  %v1296_v61 = vld [vmem:[%s5679_s26 + $0xfd0] sm:$0xff] }
  0x9b   : > { %v1298_v62 = vld [vmem:[%s5679_s26 + $0xfe0] sm:$0xff]  ;;  %1295 = vst [vmem:[%s5687_s27 + $0x7e0] sm:$0xff] %v1294_v60  ;;  %1297 = vst [vmem:[%s5687_s27 + $0x7e8] sm:$0xff] %v1296_v61  ;;  %v1300_v63 = vld [vmem:[%s5679_s26 + $0xff0] sm:$0xff] }
  0x9c   : > { %1299 = vst [vmem:[%s5687_s27 + $0x7f0] sm:$0xff] %v1298_v62  ;;  %v1302_v0 = vld [vmem:[%s5679_s26 + $0x1000] sm:$0xff]  ;;  %v1304_v1 = vld [vmem:[%s5679_s26 + $0x1010] sm:$0xff]  ;;  %1301 = vst [vmem:[%s5687_s27 + $0x7f8] sm:$0xff] %v1300_v63 }
  0x9d   : > { %1303 = vst [vmem:[%s5687_s27 + $0x800] sm:$0xff] %v1302_v0  ;;  %1305 = vst [vmem:[%s5687_s27 + $0x808] sm:$0xff] %v1304_v1  ;;  %v1306_v2 = vld [vmem:[%s5679_s26 + $0x1020] sm:$0xff]  ;;  %v1308_v3 = vld [vmem:[%s5679_s26 + $0x1030] sm:$0xff] }
  0x9e   : > { %v1310_v4 = vld [vmem:[%s5679_s26 + $0x1040] sm:$0xff]  ;;  %1307 = vst [vmem:[%s5687_s27 + $0x810] sm:$0xff] %v1306_v2  ;;  %1309 = vst [vmem:[%s5687_s27 + $0x818] sm:$0xff] %v1308_v3  ;;  %v1312_v5 = vld [vmem:[%s5679_s26 + $0x1050] sm:$0xff] }
  0x9f   : > { %1311 = vst [vmem:[%s5687_s27 + $0x820] sm:$0xff] %v1310_v4  ;;  %v1314_v6 = vld [vmem:[%s5679_s26 + $0x1060] sm:$0xff]  ;;  %v1316_v7 = vld [vmem:[%s5679_s26 + $0x1070] sm:$0xff]  ;;  %1313 = vst [vmem:[%s5687_s27 + $0x828] sm:$0xff] %v1312_v5 }
  0xa0   : > { %1315 = vst [vmem:[%s5687_s27 + $0x830] sm:$0xff] %v1314_v6  ;;  %1317 = vst [vmem:[%s5687_s27 + $0x838] sm:$0xff] %v1316_v7  ;;  %v1318_v8 = vld [vmem:[%s5679_s26 + $0x1080] sm:$0xff]  ;;  %v1320_v9 = vld [vmem:[%s5679_s26 + $0x1090] sm:$0xff] }
  0xa1   : > { %v1322_v10 = vld [vmem:[%s5679_s26 + $0x10a0] sm:$0xff]  ;;  %1319 = vst [vmem:[%s5687_s27 + $0x840] sm:$0xff] %v1318_v8  ;;  %1321 = vst [vmem:[%s5687_s27 + $0x848] sm:$0xff] %v1320_v9  ;;  %v1324_v11 = vld [vmem:[%s5679_s26 + $0x10b0] sm:$0xff] }
  0xa2   : > { %1323 = vst [vmem:[%s5687_s27 + $0x850] sm:$0xff] %v1322_v10  ;;  %v1326_v12 = vld [vmem:[%s5679_s26 + $0x10c0] sm:$0xff]  ;;  %v1328_v13 = vld [vmem:[%s5679_s26 + $0x10d0] sm:$0xff]  ;;  %1325 = vst [vmem:[%s5687_s27 + $0x858] sm:$0xff] %v1324_v11 }
  0xa3   : > { %1327 = vst [vmem:[%s5687_s27 + $0x860] sm:$0xff] %v1326_v12  ;;  %1329 = vst [vmem:[%s5687_s27 + $0x868] sm:$0xff] %v1328_v13  ;;  %v1330_v14 = vld [vmem:[%s5679_s26 + $0x10e0] sm:$0xff]  ;;  %v1332_v15 = vld [vmem:[%s5679_s26 + $0x10f0] sm:$0xff] }
  0xa4   : > { %v1334_v16 = vld [vmem:[%s5679_s26 + $0x1100] sm:$0xff]  ;;  %1331 = vst [vmem:[%s5687_s27 + $0x870] sm:$0xff] %v1330_v14  ;;  %1333 = vst [vmem:[%s5687_s27 + $0x878] sm:$0xff] %v1332_v15  ;;  %v1336_v17 = vld [vmem:[%s5679_s26 + $0x1110] sm:$0xff] }
  0xa5   : > { %1335 = vst [vmem:[%s5687_s27 + $0x880] sm:$0xff] %v1334_v16  ;;  %v1338_v18 = vld [vmem:[%s5679_s26 + $0x1120] sm:$0xff]  ;;  %v1340_v19 = vld [vmem:[%s5679_s26 + $0x1130] sm:$0xff]  ;;  %1337 = vst [vmem:[%s5687_s27 + $0x888] sm:$0xff] %v1336_v17 }
  0xa6   : > { %1339 = vst [vmem:[%s5687_s27 + $0x890] sm:$0xff] %v1338_v18  ;;  %1341 = vst [vmem:[%s5687_s27 + $0x898] sm:$0xff] %v1340_v19  ;;  %v1342_v20 = vld [vmem:[%s5679_s26 + $0x1140] sm:$0xff]  ;;  %v1344_v21 = vld [vmem:[%s5679_s26 + $0x1150] sm:$0xff] }
  0xa7   : > { %v1346_v22 = vld [vmem:[%s5679_s26 + $0x1160] sm:$0xff]  ;;  %1343 = vst [vmem:[%s5687_s27 + $0x8a0] sm:$0xff] %v1342_v20  ;;  %1345 = vst [vmem:[%s5687_s27 + $0x8a8] sm:$0xff] %v1344_v21  ;;  %v1348_v23 = vld [vmem:[%s5679_s26 + $0x1170] sm:$0xff] }
  0xa8   : > { %1347 = vst [vmem:[%s5687_s27 + $0x8b0] sm:$0xff] %v1346_v22  ;;  %v1350_v24 = vld [vmem:[%s5679_s26 + $0x1180] sm:$0xff]  ;;  %v1352_v25 = vld [vmem:[%s5679_s26 + $0x1190] sm:$0xff]  ;;  %1349 = vst [vmem:[%s5687_s27 + $0x8b8] sm:$0xff] %v1348_v23 }
  0xa9   : > { %1351 = vst [vmem:[%s5687_s27 + $0x8c0] sm:$0xff] %v1350_v24  ;;  %1353 = vst [vmem:[%s5687_s27 + $0x8c8] sm:$0xff] %v1352_v25  ;;  %v1354_v26 = vld [vmem:[%s5679_s26 + $0x11a0] sm:$0xff]  ;;  %v1356_v27 = vld [vmem:[%s5679_s26 + $0x11b0] sm:$0xff] }
  0xaa   : > { %v1358_v28 = vld [vmem:[%s5679_s26 + $0x11c0] sm:$0xff]  ;;  %1355 = vst [vmem:[%s5687_s27 + $0x8d0] sm:$0xff] %v1354_v26  ;;  %1357 = vst [vmem:[%s5687_s27 + $0x8d8] sm:$0xff] %v1356_v27  ;;  %v1360_v29 = vld [vmem:[%s5679_s26 + $0x11d0] sm:$0xff] }
  0xab   : > { %1359 = vst [vmem:[%s5687_s27 + $0x8e0] sm:$0xff] %v1358_v28  ;;  %v1362_v30 = vld [vmem:[%s5679_s26 + $0x11e0] sm:$0xff]  ;;  %v1364_v31 = vld [vmem:[%s5679_s26 + $0x11f0] sm:$0xff]  ;;  %1361 = vst [vmem:[%s5687_s27 + $0x8e8] sm:$0xff] %v1360_v29 }
  0xac   : > { %1363 = vst [vmem:[%s5687_s27 + $0x8f0] sm:$0xff] %v1362_v30  ;;  %1365 = vst [vmem:[%s5687_s27 + $0x8f8] sm:$0xff] %v1364_v31 }
  0xad PF: > { %p4265_p11 = scmp.ge.s32.totalorder %s5565_s23, 1  ;;  %p1378_p12 = scmp.lt.s32.totalorder %s5565_s23, 5 }
  0xaf   : > { %p1379_p13 = pnand %p4265_p11, %p1378_p12 }
  0xb0   : > { %s1385_s28 = sand.u32 (!%p1379_p13), 1, %s5541_s17   ;;  %p1418_p0 = scmp.lt.s32.totalorder (!%p1379_p13), %s5549_s19, 1  ;;  %vm1521_vm0 = vsmask.f32 (!%p1379_p13), 7424  ;;  %vm2035_vm1 = vcmask (!%p1379_p13), 1046528  }
  0xb1   : > { %1382 = sbr.rel (%p1379_p13) target bundleno = 737 (0x2e1), region = 70 }
  0xb2   : > { %s4957_s29 = smul.u32 (!%p1379_p13), 2304, %s1385_s28 }
  0xb4   : > { %s6262_s30 = scalar_lea.vmem (!%p1379_p13), [#allocation2], %s4957_s29 }
  0xb5   : > { %v5034_v32 = vld [vmem:[%s6262_s30 + $0x104] ss:$8 sps:$4 sm:$0xff] (!%p1379_p13)   ;;  %v5038_v34 = vld [vmem:[%s6262_s30 + $0x100] ss:$8 sps:$4 sm:$0xff] (!%p1379_p13)   ;;  %v5040_v36 = vld [vmem:[%s6262_s30 + $0x114] ss:$8 sps:$4 sm:$0xff] (!%p1379_p13)  }
  0xb6   : > { %v5036_v33 = vld [vmem:[%s6262_s30 + $0x404] ss:$8 sps:$4 sm:$0xff] (!%p1379_p13)   ;;  %1726 = vmatprep.subr.bf16.mxu1 (!%p1379_p13), %v5034_v32  ;;  %v5039_v35 = vld [vmem:[%s6262_s30 + $0x400] ss:$8 sps:$4 sm:$0xff] (!%p1379_p13)   ;;  %v5042_v37 = vld [vmem:[%s6262_s30 + $0x414] ss:$8 sps:$4 sm:$0xff] (!%p1379_p13)  }
  0xb7   : > { %2812 = vmatprep.subr.bf16.mxu0 (!%p1379_p13), %v5036_v33  ;;  %1727 = vmatpush1.bf16.msra.mxu1 (!%p1379_p13), %v5038_v34  ;;  %v5044_v38 = vld [vmem:[%s6262_s30 + $0x110] ss:$8 sps:$4 sm:$0xff] (!%p1379_p13)   ;;  %v5046_v40 = vld [vmem:[%s6262_s30 + $0x124] ss:$8 sps:$4 sm:$0xff] (!%p1379_p13)   ;;  %v5050_v42 = vld [vmem:[%s6262_s30 + $0x120] ss:$8 sps:$4 sm:$0xff] (!%p1379_p13)  }
  0xb8   : > { %2813 = vmatpush1.bf16.msra.mxu0 %v5039_v35  ;;  %1728 = vmatprep.subr.bf16.mxu1 %v5040_v36  ;;  %v5045_v39 = vld [vmem:[%s6262_s30 + $0x410] ss:$8 sps:$4 sm:$0xff]   ;;  %v5048_v41 = vld [vmem:[%s6262_s30 + $0x424] ss:$8 sps:$4 sm:$0xff]   ;;  %v5051_v43 = vld [vmem:[%s6262_s30 + $0x420] ss:$8 sps:$4 sm:$0xff]  }
  0xb9   : > { %2814 = vmatprep.subr.bf16.mxu0 %v5042_v37  ;;  %v5052_v44 = vld [vmem:[%s6262_s30 + $0x134] ss:$8 sps:$4 sm:$0xff]   ;;  %v5056_v46 = vld [vmem:[%s6262_s30 + $0x130] ss:$8 sps:$4 sm:$0xff]   ;;  %v5058_v48 = vld [vmem:[%s6262_s30 + $0x144] ss:$8 sps:$4 sm:$0xff]  }
  0xba   : > { %v5054_v45 = vld [vmem:[%s6262_s30 + $0x434] ss:$8 sps:$4 sm:$0xff]   ;;  %v5057_v47 = vld [vmem:[%s6262_s30 + $0x430] ss:$8 sps:$4 sm:$0xff]   ;;  %v5060_v49 = vld [vmem:[%s6262_s30 + $0x444] ss:$8 sps:$4 sm:$0xff]  }
  0xbb   : > { %1729 = vmatpush1.bf16.msra.mxu1 %v5044_v38  ;;  %v5062_v50 = vld [vmem:[%s6262_s30 + $0x140] ss:$8 sps:$4 sm:$0xff]   ;;  %v5064_v52 = vld [vmem:[%s6262_s30 + $0x154] ss:$8 sps:$4 sm:$0xff]   ;;  %v5068_v54 = vld [vmem:[%s6262_s30 + $0x150] ss:$8 sps:$4 sm:$0xff]  }
  0xbc   : > { %2815 = vmatpush1.bf16.msra.mxu0 %v5045_v39  ;;  %1730 = vmatprep.subr.bf16.mxu1 %v5046_v40  ;;  %v5063_v51 = vld [vmem:[%s6262_s30 + $0x440] ss:$8 sps:$4 sm:$0xff]   ;;  %v5066_v53 = vld [vmem:[%s6262_s30 + $0x454] ss:$8 sps:$4 sm:$0xff]   ;;  %v5069_v55 = vld [vmem:[%s6262_s30 + $0x450] ss:$8 sps:$4 sm:$0xff]  }
  0xbd   : > { %2816 = vmatprep.subr.bf16.mxu0 %v5048_v41  ;;  %v5070_v56 = vld [vmem:[%s6262_s30 + $0x164] ss:$8 sps:$4 sm:$0xff]   ;;  %v5074_v58 = vld [vmem:[%s6262_s30 + $0x160] ss:$8 sps:$4 sm:$0xff]   ;;  %v5076_v60 = vld [vmem:[%s6262_s30 + $0x174] ss:$8 sps:$4 sm:$0xff]  }
  0xbe   : > { %v5072_v57 = vld [vmem:[%s6262_s30 + $0x464] ss:$8 sps:$4 sm:$0xff]   ;;  %v5075_v59 = vld [vmem:[%s6262_s30 + $0x460] ss:$8 sps:$4 sm:$0xff]   ;;  %v5078_v61 = vld [vmem:[%s6262_s30 + $0x474] ss:$8 sps:$4 sm:$0xff]  }
  0xbf   : > { %1731 = vmatpush1.bf16.msra.mxu1 %v5050_v42  ;;  %v5080_v62 = vld [vmem:[%s6262_s30 + $0x170] ss:$8 sps:$4 sm:$0xff]   ;;  %v5082_v0 = vld [vmem:[%s6262_s30 + $0x184] ss:$8 sps:$4 sm:$0xff]   ;;  %v5086_v2 = vld [vmem:[%s6262_s30 + $0x180] ss:$8 sps:$4 sm:$0xff]  }
  0xc0   : > { %2817 = vmatpush1.bf16.msra.mxu0 %v5051_v43  ;;  %1732 = vmatprep.subr.bf16.mxu1 %v5052_v44  ;;  %v5081_v63 = vld [vmem:[%s6262_s30 + $0x470] ss:$8 sps:$4 sm:$0xff]   ;;  %v5084_v1 = vld [vmem:[%s6262_s30 + $0x484] ss:$8 sps:$4 sm:$0xff]   ;;  %v5087_v3 = vld [vmem:[%s6262_s30 + $0x480] ss:$8 sps:$4 sm:$0xff]  }
  0xc1   : > { %2818 = vmatprep.subr.bf16.mxu0 %v5054_v45  ;;  %s1419_s17 = scalar_select %p1418_p0, %s5549_s19, 1  ;;  %v5088_v4 = vld [vmem:[%s6262_s30 + $0x194] ss:$8 sps:$4 sm:$0xff]   ;;  %v5092_v6 = vld [vmem:[%s6262_s30 + $0x190] ss:$8 sps:$4 sm:$0xff]  }
  0xc2   : > { %v5090_v5 = vld [vmem:[%s6262_s30 + $0x494] ss:$8 sps:$4 sm:$0xff]   ;;  %v5093_v7 = vld [vmem:[%s6262_s30 + $0x490] ss:$8 sps:$4 sm:$0xff]   ;;  %v5094_v8 = vld [vmem:[%s6262_s30 + $0x1a4] ss:$8 sps:$4 sm:$0xff]  }
  0xc3   : > { %1733 = vmatpush1.bf16.msra.mxu1 %v5056_v46  ;;  %s4958_s5 = smul.u32 72, %s1419_s17  ;;  %v5096_v9 = vld [vmem:[%s6262_s30 + $0x4a4] ss:$8 sps:$4 sm:$0xff]   ;;  %v5098_v10 = vld [vmem:[%s6262_s30 + $0x1a0] ss:$8 sps:$4 sm:$0xff]   ;;  %s4851_s13 = sshll.u32 (%p5661_p9), %s5549_s19, 4 }
  0xc4   : > { %2819 = vmatpush1.bf16.msra.mxu0 %v5057_v47  ;;  %1734 = vmatprep.subr.bf16.mxu1 %v5058_v48  ;;  %v5099_v11 = vld [vmem:[%s6262_s30 + $0x4a0] ss:$8 sps:$4 sm:$0xff]   ;;  %v5100_v12 = vld [vmem:[%s6262_s30 + $0x1b4] ss:$8 sps:$4 sm:$0xff]   ;;  %v5104_v14 = vld [vmem:[%s6262_s30 + $0x1b0] ss:$8 sps:$4 sm:$0xff]  }
  0xc5   : > { %2820 = vmatprep.subr.bf16.mxu0 %v5060_v49  ;;  %s6313_s11 = scalar_lea.vmem %s6804_s0, %s4958_s5  ;;  %v5102_v13 = vld [vmem:[%s6262_s30 + $0x4b4] ss:$8 sps:$4 sm:$0xff]   ;;  %v5105_v15 = vld [vmem:[%s6262_s30 + $0x4b0] ss:$8 sps:$4 sm:$0xff]   ;;  %v5106_v20 = vld [vmem:[%s6262_s30 + $0x1c4] ss:$8 sps:$4 sm:$0xff]  }
  0xc6   : > { %v1430_v16 = vld [vmem:[%s6313_s11] sm:$0xff]  ;;  %v6321_v17 = vld [vmem:[%s6313_s11 + $0x8] sm:$0xff]  ;;  %v1432_v18 = vld [vmem:[%s6313_s11 + $0x10] sm:$0xff] }
  0xc7   : > { %1735 = vmatpush1.bf16.msra.mxu1 %v5062_v50  ;;  %v6325_v19 = vld [vmem:[%s6313_s11 + $0x18] sm:$0xff]  ;;  %v6329_v21 = vcombine.high %v1430_v16, %v6321_v17  ;;  %v5108_v23 = vld [vmem:[%s6262_s30 + $0x4c4] ss:$8 sps:$4 sm:$0xff]   ;;  %v5110_v24 = vld [vmem:[%s6262_s30 + $0x1c0] ss:$8 sps:$4 sm:$0xff]   ;;  %v6345_v31 = vcombine.low %v1430_v16, %v6321_v17 }
  0xc8   : > { %2821 = vmatpush1.bf16.msra.mxu0 %v5063_v51  ;;  %1736 = vmatprep.subr.bf16.mxu1 %v5064_v52  ;;  %v6332_v22 = vcombine.high %v1432_v18, %v6325_v19  ;;  %v6340_v28 = vld [vmem:[%s6313_s11 + $0x24] ss:$8 sps:$4 sm:$0xff]   ;;  %v5111_v30 = vld [vmem:[%s6262_s30 + $0x4c0] ss:$8 sps:$4 sm:$0xff]   ;;  %v5112_v32 = vld [vmem:[%s6262_s30 + $0x1d4] ss:$8 sps:$4 sm:$0xff]   ;;  %v6350_v36 = vcombine.low %v1432_v18, %v6325_v19 }
  0xc9   : > { %2822 = vmatprep.subr.bf16.mxu0 %v5066_v53  ;;  %v1535_v25 = vshrl.u32 %v6329_v21, 16  ;;  %v1537_v26 = vshll.u32 %v6329_v21, 16  ;;  %v2628_v35 = vshll.u32 %v6340_v28, 16  ;;  %v5114_v37 = vld [vmem:[%s6262_s30 + $0x4d4] ss:$8 sps:$4 sm:$0xff]   ;;  %v1525_v45 = vshll.u32 %v6345_v31, 16 }
  0xca   : > { %v1542_v27 = vshll.u32 %v6332_v22, 16  ;;  %v2621_v29 = vshrl.u32 %v6332_v22, 16  ;;  %v5116_v38 = vld [vmem:[%s6262_s30 + $0x1d0] ss:$8 sps:$4 sm:$0xff]   ;;  %v1530_v46 = vshll.u32 %v6350_v36, 16  ;;  %v1523_v52 = vshrl.u32 %v6345_v31, 16 }
  0xcb   : > { %1737 = vmatpush1.bf16.msra.mxu1 %v5068_v54  ;;  %v1539_v33 = vrot.slane %v1537_v26, 1  ;;  %v6356_v41 = vrot.slane %v2628_v35, 1  ;;  %v5117_v42 = vld [vmem:[%s6262_s30 + $0x4d0] ss:$8 sps:$4 sm:$0xff]   ;;  %v6366_v47 = vld [vmem:[%s6313_s11 + $0x20] ss:$8 sps:$4 sm:$0xff]  }
  0xcc   : > { %2823 = vmatpush1.bf16.msra.mxu0 %v5069_v55  ;;  %1738 = vmatprep.subr.bf16.mxu1 %v5070_v56  ;;  %v1544_v34 = vrot.slane %v1542_v27, 1  ;;  %v5118_v48 = vld [vmem:[%s6262_s30 + $0x1e4] ss:$8 sps:$4 sm:$0xff]   ;;  %v5122_v50 = vld [vmem:[%s6262_s30 + $0x1e0] ss:$8 sps:$4 sm:$0xff]   ;;  %v1527_v53 = vrot.slane %v1525_v45, 1 }
  0xcd   : > { %2824 = vmatprep.subr.bf16.mxu0 %v5072_v57  ;;  %v1540_v39 = vor.u32 %v1539_v33, %v1535_v25  ;;  %v5120_v49 = vld [vmem:[%s6262_s30 + $0x4e4] ss:$8 sps:$4 sm:$0xff]   ;;  %v5123_v51 = vld [vmem:[%s6262_s30 + $0x4e0] ss:$8 sps:$4 sm:$0xff]   ;;  %v1532_v54 = vrot.slane %v1530_v46, 1  ;;  %v2609_v55 = vshrl.u32 %v6350_v36, 16 }
  0xce   : > { %v6354_v40 = vor.u32 %v2621_v29, %v1544_v34  ;;  %v2616_v56 = vshll.u32 %v6366_v47, 16  ;;  %v5124_v57 = vld [vmem:[%s6262_s30 + $0x1f4] ss:$8 sps:$4 sm:$0xff]   ;;  %v5155_v16 = vld [vmem:[%s6262_s30 + $0x30] ss:$8 sps:$4 sm:$0xff]  }
  0xcf   : > { %1739 = vmatpush1.bf16.msra.mxu1 %v5074_v58  ;;  %v1545_v43 = vsel %vm1521_vm0, %v1540_v39, %v1544_v34  ;;  %v5126_v58 = vld [vmem:[%s6262_s30 + $0x4f4] ss:$8 sps:$4 sm:$0xff]   ;;  %v5158_v18 = vld [vmem:[%s6262_s30 + $0x530] ss:$8 sps:$4 sm:$0xff]   ;;  %v5164_v25 = vld [vmem:[%s6262_s30 + $0x540] ss:$8 sps:$4 sm:$0xff]  }
  0xd0   : > { %2825 = vmatpush1.bf16.msra.mxu0 %v5075_v59  ;;  %1740 = vmatprep.subr.bf16.mxu1 %v5076_v60  ;;  %v2631_v44 = vsel %vm1521_vm0, %v6354_v40, %v6356_v41  ;;  %v5128_v59 = vld [vmem:[%s6262_s30 + $0x1f0] ss:$8 sps:$4 sm:$0xff]   ;;  %v5169_v26 = vld [vmem:[%s6262_s30 + $0x54] ss:$8 sps:$4 sm:$0xff]   ;;  %v1466_v33 = vld [vmem:[%s6313_s11 + $0x20] sm:$0x11] }
  0xd1   : > { %2826 = vmatprep.subr.bf16.mxu0 %v5078_v61  ;;  %1758 = vmatprep.mubr.bf16.mxu1 %v1545_v43  ;;  %v5129_v60 = vld [vmem:[%s6262_s30 + $0x4f0] ss:$8 sps:$4 sm:$0xff]   ;;  %v1528_v61 = vor.u32 %v1527_v53, %v1523_v52  ;;  %v5172_v27 = vld [vmem:[%s6262_s30 + $0x554] ss:$8 sps:$4 sm:$0xff]   ;;  %v2632_v34 = vshrl.u32 %v6366_v47, 16  ;;  %v6418_v39 = vcombine.low %v1466_v33, %v1466_v33 }
  0xd2   : > { %2844 = vmatprep.mubr.bf16.mxu0 %v2631_v44  ;;  %v5167_v29 = vld [vmem:[%s6262_s30 + $0x50] ss:$8 sps:$4 sm:$0xff]   ;;  %v5175_v35 = vld [vmem:[%s6262_s30 + $0x64] ss:$8 sps:$4 sm:$0xff]   ;;  %v5173_v43 = vld [vmem:[%s6262_s30 + $0x60] ss:$8 sps:$4 sm:$0xff]  }
  0xd3   : > { %1741 = vmatpush1.bf16.msra.mxu1 %v5080_v62  ;;  %v6379_v62 = vor.u32 %v2609_v55, %v1532_v54  ;;  %v5176_v44 = vld [vmem:[%s6262_s30 + $0x560] ss:$8 sps:$4 sm:$0xff]   ;;  %v5184_v53 = vld [vmem:[%s6262_s30 + $0x574] ss:$8 sps:$4 sm:$0xff]  }
  0xd4   : > { %2827 = vmatpush1.bf16.msra.mxu0 %v5081_v63  ;;  %1742 = vmatprep.subr.bf16.mxu1 %v5082_v0  ;;  %v6381_v63 = vrot.slane %v2616_v56, 1  ;;  %v5134_v0 = vld [vmem:[%s6262_s30 + $0x4] ss:$8 sps:$4 sm:$0xff]  }
  0xd5   : > { %2828 = vmatprep.subr.bf16.mxu0 %v5084_v1  ;;  %v5139_v1 = vld [vmem:[%s6262_s30 + $0x504] ss:$8 sps:$4 sm:$0xff]  }
  0xd6   : > { %v2634_v52 = vor.u32 %v2632_v34, %v6381_v63  ;;  %v5224_v34 = vld [vmem:[%s6262_s30 + $0xe4] ss:$8 sps:$4 sm:$0xff]  }
  0xd7   : > { %1743 = vmatpush1.bf16.msra.mxu1 %v5086_v2  ;;  %v5132_v2 = vld [vmem:[%s6262_s30] ss:$8 sps:$4 sm:$0xff]  }
  0xd8   : > { %2829 = vmatpush1.bf16.msra.mxu0 %v5087_v3  ;;  %1744 = vmatprep.subr.bf16.mxu1 %v5088_v4  ;;  %v5137_v3 = vld [vmem:[%s6262_s30 + $0x500] ss:$8 sps:$4 sm:$0xff]   ;;  %v1533_v4 = vsel %vm1521_vm0, %v1528_v61, %v1532_v54  ;;  %v5182_v61 = vld [vmem:[%s6262_s30 + $0x570] ss:$8 sps:$4 sm:$0xff]  }
  0xd9   : > { %2830 = vmatprep.subr.bf16.mxu0 %v5090_v5  ;;  %v2619_v5 = vsel %vm1521_vm0, %v6379_v62, %v6381_v63  ;;  %v5187_v63 = vld [vmem:[%s6262_s30 + $0x84] ss:$8 sps:$4 sm:$0xff]  }
  0xdb   : > { %1745 = vmatpush1.bf16.msra.mxu1 %v5092_v6  ;;  %v5145_v6 = vld [vmem:[%s6262_s30 + $0x14] ss:$8 sps:$4 sm:$0xff]  }
  0xdc   : > { %2831 = vmatpush1.bf16.msra.mxu0 %v5093_v7  ;;  %1746 = vmatprep.subr.bf16.mxu1 %v5094_v8  ;;  %v5148_v7 = vld [vmem:[%s6262_s30 + $0x514] ss:$8 sps:$4 sm:$0xff]   ;;  %v5143_v8 = vld [vmem:[%s6262_s30 + $0x10] ss:$8 sps:$4 sm:$0xff]  }
  0xdd   : > { %2832 = vmatprep.subr.bf16.mxu0 %v5096_v9  ;;  %v5146_v9 = vld [vmem:[%s6262_s30 + $0x510] ss:$8 sps:$4 sm:$0xff]  }
  0xdf   : > { %1747 = vmatpush1.bf16.msra.mxu1 %v5098_v10  ;;  %v5151_v10 = vld [vmem:[%s6262_s30 + $0x24] ss:$8 sps:$4 sm:$0xff]  }
  0xe0   : > { %2833 = vmatpush1.bf16.msra.mxu0 %v5099_v11  ;;  %1748 = vmatprep.subr.bf16.mxu1 %v5100_v12  ;;  %v5154_v11 = vld [vmem:[%s6262_s30 + $0x524] ss:$8 sps:$4 sm:$0xff]   ;;  %v5149_v12 = vld [vmem:[%s6262_s30 + $0x20] ss:$8 sps:$4 sm:$0xff]  }
  0xe1   : > { %2834 = vmatprep.subr.bf16.mxu0 %v5102_v13  ;;  %v5152_v13 = vld [vmem:[%s6262_s30 + $0x520] ss:$8 sps:$4 sm:$0xff]  }
  0xe3   : > { %1749 = vmatpush1.bf16.msra.mxu1 %v5104_v14  ;;  %v5157_v14 = vld [vmem:[%s6262_s30 + $0x34] ss:$8 sps:$4 sm:$0xff]  }
  0xe4   : > { %2835 = vmatpush1.bf16.msra.mxu0 %v5105_v15  ;;  %1750 = vmatprep.subr.bf16.mxu1 %v5106_v20  ;;  %v5160_v15 = vld [vmem:[%s6262_s30 + $0x534] ss:$8 sps:$4 sm:$0xff]   ;;  %v5163_v20 = vld [vmem:[%s6262_s30 + $0x44] ss:$8 sps:$4 sm:$0xff]  }
  0xe5   : > { %2836 = vmatprep.subr.bf16.mxu0 %v5108_v23  ;;  %v5166_v23 = vld [vmem:[%s6262_s30 + $0x544] ss:$8 sps:$4 sm:$0xff]  }
  0xe7   : > { %1751 = vmatpush1.bf16.msra.mxu1 %v5110_v24  ;;  %v5161_v24 = vld [vmem:[%s6262_s30 + $0x40] ss:$8 sps:$4 sm:$0xff]  }
  0xe8   : > { %2837 = vmatpush1.bf16.msra.mxu0 %v5111_v30  ;;  %1752 = vmatprep.subr.bf16.mxu1 %v5112_v32  ;;  %v2640_v30 = vshrl.u32 %v6340_v28, 16  ;;  %v5170_v32 = vld [vmem:[%s6262_s30 + $0x550] ss:$8 sps:$4 sm:$0xff]  }
  0xe9   : > { %2838 = vmatprep.subr.bf16.mxu0 %v5114_v37  ;;  %v5178_v37 = vld [vmem:[%s6262_s30 + $0x564] ss:$8 sps:$4 sm:$0xff]  }
  0xeb   : > { %1753 = vmatpush1.bf16.msra.mxu1 %v5116_v38  ;;  %v6416_v38 = vcombine.high %v1466_v33, %v1466_v33  ;;  %v5218_v33 = vld [vmem:[%s6262_s30 + $0x5d0] ss:$8 sps:$4 sm:$0xff]  }
  0xec   : > { %2839 = vmatpush1.bf16.msra.mxu0 %v5117_v42  ;;  %1754 = vmatprep.subr.bf16.mxu1 %v5118_v48  ;;  %v2553_v42 = vld [vmem:[%s6313_s11 + $0x30] sm:$0x11]  ;;  %v1550_v48 = vshll.u32 %v6418_v39, 16 }
  0xed   : > { %2840 = vmatprep.subr.bf16.mxu0 %v5120_v49  ;;  %v1558_v45 = vshll.u32 %v6416_v38, 16  ;;  %v6424_v46 = vcombine.high %v2553_v42, %v2553_v42  ;;  %v6427_v49 = vcombine.low %v2553_v42, %v2553_v42  ;;  %v5226_v42 = vld [vmem:[%s6262_s30 + $0x5e0] ss:$8 sps:$4 sm:$0xff]  }
  0xee   : > { %v1552_v56 = vrot.slane %v1550_v48, 1  ;;  %v5231_v48 = vld [vmem:[%s6262_s30 + $0xf0] ss:$8 sps:$4 sm:$0xff]  }
  0xef   : > { %1755 = vmatpush1.bf16.msra.mxu1 %v5122_v50  ;;  %v5181_v50 = vld [vmem:[%s6262_s30 + $0x74] ss:$8 sps:$4 sm:$0xff]   ;;  %v1560_v54 = vrot.slane %v1558_v45, 1  ;;  %v2644_v55 = vshll.u32 %v6424_v46, 16 }
  0xf0   : > { %2841 = vmatpush1.bf16.msra.mxu0 %v5123_v51  ;;  %1756 = vmatprep.subr.bf16.mxu1 %v5124_v57  ;;  %v2642_v51 = vor.u32 %v2640_v30, %v6356_v41  ;;  %v2636_v57 = vshll.u32 %v6427_v49, 16  ;;  %v5220_v30 = vld [vmem:[%s6262_s30 + $0x5d4] ss:$8 sps:$4 sm:$0xff]  }
  0xf1   : > { %2842 = vmatprep.subr.bf16.mxu0 %v5126_v58  ;;  %v5179_v58 = vld [vmem:[%s6262_s30 + $0x70] ss:$8 sps:$4 sm:$0xff]   ;;  %v5236_v45 = vld [vmem:[%s6262_s30 + $0x5f4] ss:$8 sps:$4 sm:$0xff]  }
  0xf2   : > { %v2638_v41 = vrot.slane %v2636_v57, 1  ;;  %v5247_v57 = vld [vmem:[%s6262_s30 + $0x214] ss:$8 sps:$4 sm:$0xff]  }
  0xf3   : > { %1757 = vmatpush1.bf16.msra.mxu1 %v5128_v59  ;;  %v1561_v59 = vsel %vm1521_vm0, %v6354_v40, %v1560_v54  ;;  %v5244_v54 = vld [vmem:[%s6262_s30 + $0x604] ss:$8 sps:$4 sm:$0xff]  }
  0xf4   : > { %2843 = vmatpush1.bf16.msra.mxu0 %v5129_v60  ;;  %1943 = vmatprep.subr.bf16.mxu1 %v5134_v0  ;;  %v2646_v60 = vrot.slane %v2644_v55, 1  ;;  %v1553_v0 = vsel %vm1521_vm0, %v6379_v62, %v1552_v56  ;;  %v2639_v40 = vsel %vm1521_vm0, %v2634_v52, %v2638_v41  ;;  %v2916_v62 = vrot.slane %v6340_v28, 1  ;;  %v5239_v52 = vld [vmem:[%s6262_s30 + $0x204] ss:$8 sps:$4 sm:$0xff]   ;;  %v5237_v55 = vld [vmem:[%s6262_s30 + $0x200] ss:$8 sps:$4 sm:$0xff]  }
  0xf5   : > { %3086 = vmatprep.subr.bf16.mxu0 %v5139_v1  ;;  %v6443_v1 = vld [vmem:[%s6313_s11 + $0x10] sm:$0xee]  ;;  %v5242_v56 = vld [vmem:[%s6262_s30 + $0x600] ss:$8 sps:$4 sm:$0xff]   ;;  %v5253_v41 = vld [vmem:[%s6262_s30 + $0x224] ss:$8 sps:$4 sm:$0xff]  }
  0xf6   : > { %1759 = vmatmul.mubr.bf16.vlgmr.msra.gmra.mrb[0].mxu1 %v1533_v4  ;;  %v4608_v4 = vcombine.high %v6443_v1, %v6325_v19 }
  0xf7   : > { %2845 = vmatmul.mubr.bf16.vlgmr.msra.gmra.mrb[0].mxu0 %v2619_v5  ;;  %1944 = vmatpush1.bf16.msra.mxu1 %v5132_v2  ;;  %v5190_v2 = vld [vmem:[%s6262_s30 + $0x584] ss:$8 sps:$4 sm:$0xff]   ;;  %v5185_v5 = vld [vmem:[%s6262_s30 + $0x80] ss:$8 sps:$4 sm:$0xff]  }
  0xf8   : > { %3087 = vmatpush1.bf16.msra.mxu0 %v5137_v3  ;;  %1945 = vmatprep.subr.bf16.mxu1 %v5145_v6  ;;  %v2647_v3 = vsel %vm1521_vm0, %v2642_v51, %v2646_v60  ;;  %v5188_v6 = vld [vmem:[%s6262_s30 + $0x580] ss:$8 sps:$4 sm:$0xff]   ;;  %v5234_v51 = vld [vmem:[%s6262_s30 + $0x5f0] ss:$8 sps:$4 sm:$0xff]  }
  0xf9   : > { %3088 = vmatprep.subr.bf16.mxu0 %v5148_v7  ;;  %1768 = vmatprep.mubr.bf16.mxu1 %v1561_v59  ;;  %v5193_v7 = vld [vmem:[%s6262_s30 + $0x94] ss:$8 sps:$4 sm:$0xff]   ;;  %v5245_v59 = vld [vmem:[%s6262_s30 + $0x210] ss:$8 sps:$4 sm:$0xff]  }
  0xfa   : > { %2854 = vmatprep.mubr.bf16.mxu0 %v2647_v3  ;;  %v5248_v60 = vld [vmem:[%s6262_s30 + $0x610] ss:$8 sps:$4 sm:$0xff]   ;;  %v2040_v3 = vrot.slane %v6332_v22, 1 }
  0xfb   : > { %1946 = vmatpush1.bf16.msra.mxu1 %v5143_v8  ;;  %v2915_v8 = vrot.slane %v4608_v4, 1  ;;  %v5262_v4 = vld [vmem:[%s6262_s30 + $0x634] ss:$8 sps:$4 sm:$0xff]  }
  0xfc   : > { %3089 = vmatpush1.bf16.msra.mxu0 %v5146_v9  ;;  %1947 = vmatprep.subr.bf16.mxu1 %v5151_v10  ;;  %v5196_v9 = vld [vmem:[%s6262_s30 + $0x594] ss:$8 sps:$4 sm:$0xff]  }
  0xfd   : > { %3090 = vmatprep.subr.bf16.mxu0 %v5154_v11  ;;  %v2917_v10 = vsel %vm2035_vm1, %v2915_v8, %v2916_v62  ;;  %v5191_v11 = vld [vmem:[%s6262_s30 + $0x90] ss:$8 sps:$4 sm:$0xff]   ;;  %v5268_v8 = vld [vmem:[%s6262_s30 + $0x644] ss:$8 sps:$4 sm:$0xff]  }
  0xfe   : > { %1769 = vmatmul.mubr.bf16.gmra.mrb[4].mxu1 %v1553_v0  ;;  %v5251_v0 = vld [vmem:[%s6262_s30 + $0x220] ss:$8 sps:$4 sm:$0xff]  }
  0xff   : > { %1948 = vmatpush1.bf16.msra.mxu1 %v5149_v12  ;;  %2855 = vmatmul.mubr.bf16.gmra.mrb[4].mxu0 %v2639_v40  ;;  %v5194_v12 = vld [vmem:[%s6262_s30 + $0x590] ss:$8 sps:$4 sm:$0xff]  }
 0x100   : > { %3091 = vmatpush1.bf16.msra.mxu0 %v5152_v13  ;;  %1949 = vmatprep.subr.bf16.mxu1 %v5157_v14  ;;  %v5199_v13 = vld [vmem:[%s6262_s30 + $0xa4] ss:$8 sps:$4 sm:$0xff]  }
 0x101   : > { %3092 = vmatprep.subr.bf16.mxu0 %v5160_v15  ;;  %1975 = vmatprep.mubr.bf16.mxu1 %v6329_v21  ;;  %v5202_v14 = vld [vmem:[%s6262_s30 + $0x5a4] ss:$8 sps:$4 sm:$0xff]   ;;  %v5197_v15 = vld [vmem:[%s6262_s30 + $0xa0] ss:$8 sps:$4 sm:$0xff]  }
 0x102   : > { %3118 = vmatprep.mubr.bf16.mxu0 %v2917_v10  ;;  %v5200_v21 = vld [vmem:[%s6262_s30 + $0x5a0] ss:$8 sps:$4 sm:$0xff]  }
 0x103   : > { %1950 = vmatpush1.bf16.msra.mxu1 %v5155_v16  ;;  %v5205_v16 = vld [vmem:[%s6262_s30 + $0xb4] ss:$8 sps:$4 sm:$0xff]   ;;  %v5266_v10 = vld [vmem:[%s6262_s30 + $0x640] ss:$8 sps:$4 sm:$0xff]  }
 0x104   : > { %3093 = vmatpush1.bf16.msra.mxu0 %v5158_v18  ;;  %1951 = vmatprep.subr.bf16.mxu1 %v5163_v20  ;;  %v5208_v18 = vld [vmem:[%s6262_s30 + $0x5b4] ss:$8 sps:$4 sm:$0xff]   ;;  %v5203_v20 = vld [vmem:[%s6262_s30 + $0xb0] ss:$8 sps:$4 sm:$0xff]  }
 0x105   : > { %3094 = vmatprep.subr.bf16.mxu0 %v5166_v23  ;;  %v5206_v23 = vld [vmem:[%s6262_s30 + $0x5b0] ss:$8 sps:$4 sm:$0xff]  }
 0x107   : > { %1952 = vmatpush1.bf16.msra.mxu1 %v5161_v24  ;;  %v5211_v24 = vld [vmem:[%s6262_s30 + $0xc4] ss:$8 sps:$4 sm:$0xff]  }
 0x108   : > { %3095 = vmatpush1.bf16.msra.mxu0 %v5164_v25  ;;  %1953 = vmatprep.subr.bf16.mxu1 %v5169_v26  ;;  %v5214_v25 = vld [vmem:[%s6262_s30 + $0x5c4] ss:$8 sps:$4 sm:$0xff]   ;;  %v5209_v26 = vld [vmem:[%s6262_s30 + $0xc0] ss:$8 sps:$4 sm:$0xff]  }
 0x109   : > { %3096 = vmatprep.subr.bf16.mxu0 %v5172_v27  ;;  %v5212_v27 = vld [vmem:[%s6262_s30 + $0x5c0] ss:$8 sps:$4 sm:$0xff]  }
 0x10b   : > { %1954 = vmatpush1.bf16.msra.mxu1 %v5167_v29  ;;  %v5217_v29 = vld [vmem:[%s6262_s30 + $0xd4] ss:$8 sps:$4 sm:$0xff]  }
 0x10c   : > { %3097 = vmatpush1.bf16.msra.mxu0 %v5170_v32  ;;  %1955 = vmatprep.subr.bf16.mxu1 %v5175_v35  ;;  %v5215_v32 = vld [vmem:[%s6262_s30 + $0xd0] ss:$8 sps:$4 sm:$0xff]   ;;  %v5228_v35 = vld [vmem:[%s6262_s30 + $0x5e4] ss:$8 sps:$4 sm:$0xff]  }
 0x10d   : > { %3098 = vmatprep.subr.bf16.mxu0 %v5178_v37  ;;  %v5222_v37 = vld [vmem:[%s6262_s30 + $0xe0] ss:$8 sps:$4 sm:$0xff]  }
 0x10f   : > { %1956 = vmatpush1.bf16.msra.mxu1 %v5173_v43  ;;  %v5233_v43 = vld [vmem:[%s6262_s30 + $0xf4] ss:$8 sps:$4 sm:$0xff]  }
 0x110   : > { %3099 = vmatpush1.bf16.msra.mxu0 %v5176_v44  ;;  %1957 = vmatprep.subr.bf16.mxu1 %v5181_v50  ;;  %v4607_v44 = vcombine.low %v6443_v1, %v6325_v19  ;;  %v2913_v50 = vrot.slane %v6366_v47, 1  ;;  %v2920_v19 = vrot.slane %v6424_v46, 1  ;;  %v5254_v1 = vld [vmem:[%s6262_s30 + $0x620] ss:$8 sps:$4 sm:$0xff]  }
 0x111   : > { %3100 = vmatprep.subr.bf16.mxu0 %v5184_v53 }
 0x112   : > { %v2912_v53 = vrot.slane %v4607_v44, 1  ;;  %v2921_v46 = vsel %vm2035_vm1, %v2916_v62, %v2920_v19  ;;  %v5307_v44 = vld [vmem:[%s6262_s30 + $0x2b4] ss:$8 sps:$4 sm:$0xff]  }
 0x113   : > { %1958 = vmatpush1.bf16.msra.mxu1 %v5179_v58  ;;  %v5250_v58 = vld [vmem:[%s6262_s30 + $0x614] ss:$8 sps:$4 sm:$0xff]  }
 0x114   : > { %3101 = vmatpush1.bf16.msra.mxu0 %v5182_v61  ;;  %1959 = vmatprep.subr.bf16.mxu1 %v5187_v63  ;;  %v2914_v47 = vsel %vm2035_vm1, %v2912_v53, %v2913_v50  ;;  %v2918_v61 = vrot.slane %v6427_v49, 1  ;;  %v5256_v63 = vld [vmem:[%s6262_s30 + $0x624] ss:$8 sps:$4 sm:$0xff]   ;;  %v5259_v49 = vld [vmem:[%s6262_s30 + $0x234] ss:$8 sps:$4 sm:$0xff]  }
 0x115   : > { %3102 = vmatprep.subr.bf16.mxu0 %v5190_v2  ;;  %v5311_v53 = vld [vmem:[%s6262_s30 + $0x2c0] ss:$8 sps:$4 sm:$0xff]   ;;  %v5322_v19 = vld [vmem:[%s6262_s30 + $0x6d4] ss:$8 sps:$4 sm:$0xff]  }
 0x116   : > { %v2919_v40 = vsel %vm2035_vm1, %v2913_v50, %v2918_v61  ;;  %v5308_v50 = vld [vmem:[%s6262_s30 + $0x6b0] ss:$8 sps:$4 sm:$0xff]  }
 0x117   : > { %1960 = vmatpush1.bf16.msra.mxu1 %v5185_v5  ;;  %v5257_v5 = vld [vmem:[%s6262_s30 + $0x230] ss:$8 sps:$4 sm:$0xff]  }
 0x118   : > { %3103 = vmatpush1.bf16.msra.mxu0 %v5188_v6  ;;  %1961 = vmatprep.subr.bf16.mxu1 %v5193_v7  ;;  %v5260_v6 = vld [vmem:[%s6262_s30 + $0x630] ss:$8 sps:$4 sm:$0xff]   ;;  %v5265_v7 = vld [vmem:[%s6262_s30 + $0x244] ss:$8 sps:$4 sm:$0xff]  }
 0x119   : > { %3104 = vmatprep.subr.bf16.mxu0 %v5196_v9  ;;  %v5263_v9 = vld [vmem:[%s6262_s30 + $0x240] ss:$8 sps:$4 sm:$0xff]  }
 0x11b   : > { %1962 = vmatpush1.bf16.msra.mxu1 %v5191_v11  ;;  %v5271_v11 = vld [vmem:[%s6262_s30 + $0x254] ss:$8 sps:$4 sm:$0xff]  }
 0x11c   : > { %3105 = vmatpush1.bf16.msra.mxu0 %v5194_v12  ;;  %1963 = vmatprep.subr.bf16.mxu1 %v5199_v13  ;;  %v5274_v12 = vld [vmem:[%s6262_s30 + $0x654] ss:$8 sps:$4 sm:$0xff]   ;;  %v5269_v13 = vld [vmem:[%s6262_s30 + $0x250] ss:$8 sps:$4 sm:$0xff]  }
 0x11d   : > { %3106 = vmatprep.subr.bf16.mxu0 %v5202_v14  ;;  %v5272_v14 = vld [vmem:[%s6262_s30 + $0x650] ss:$8 sps:$4 sm:$0xff]  }
 0x11f   : > { %1964 = vmatpush1.bf16.msra.mxu1 %v5197_v15  ;;  %v5280_v15 = vld [vmem:[%s6262_s30 + $0x664] ss:$8 sps:$4 sm:$0xff]  }
 0x120   : > { %3107 = vmatpush1.bf16.msra.mxu0 %v5200_v21  ;;  %1965 = vmatprep.subr.bf16.mxu1 %v5205_v16  ;;  %v5275_v21 = vld [vmem:[%s6262_s30 + $0x260] ss:$8 sps:$4 sm:$0xff]  }
 0x121   : > { %3108 = vmatprep.subr.bf16.mxu0 %v5208_v18  ;;  %v5278_v16 = vld [vmem:[%s6262_s30 + $0x660] ss:$8 sps:$4 sm:$0xff]   ;;  %v5283_v18 = vld [vmem:[%s6262_s30 + $0x274] ss:$8 sps:$4 sm:$0xff]  }
 0x123   : > { %1966 = vmatpush1.bf16.msra.mxu1 %v5203_v20  ;;  %v5286_v20 = vld [vmem:[%s6262_s30 + $0x674] ss:$8 sps:$4 sm:$0xff]  }
 0x124   : > { %3109 = vmatpush1.bf16.msra.mxu0 %v5206_v23  ;;  %1967 = vmatprep.subr.bf16.mxu1 %v5211_v24  ;;  %v5281_v23 = vld [vmem:[%s6262_s30 + $0x270] ss:$8 sps:$4 sm:$0xff]  }
 0x125   : > { %3110 = vmatprep.subr.bf16.mxu0 %v5214_v25  ;;  %v5284_v24 = vld [vmem:[%s6262_s30 + $0x670] ss:$8 sps:$4 sm:$0xff]   ;;  %v5289_v25 = vld [vmem:[%s6262_s30 + $0x284] ss:$8 sps:$4 sm:$0xff]  }
 0x127   : > { %1968 = vmatpush1.bf16.msra.mxu1 %v5209_v26  ;;  %v5292_v26 = vld [vmem:[%s6262_s30 + $0x684] ss:$8 sps:$4 sm:$0xff]  }
 0x128   : > { %3111 = vmatpush1.bf16.msra.mxu0 %v5212_v27  ;;  %1969 = vmatprep.subr.bf16.mxu1 %v5217_v29  ;;  %v5287_v27 = vld [vmem:[%s6262_s30 + $0x280] ss:$8 sps:$4 sm:$0xff]  }
 0x129   : > { %3112 = vmatprep.subr.bf16.mxu0 %v5220_v30  ;;  %v5290_v29 = vld [vmem:[%s6262_s30 + $0x680] ss:$8 sps:$4 sm:$0xff]   ;;  %v5295_v30 = vld [vmem:[%s6262_s30 + $0x294] ss:$8 sps:$4 sm:$0xff]  }
 0x12b   : > { %1970 = vmatpush1.bf16.msra.mxu1 %v5215_v32  ;;  %v5298_v32 = vld [vmem:[%s6262_s30 + $0x694] ss:$8 sps:$4 sm:$0xff]  }
 0x12c   : > { %3113 = vmatpush1.bf16.msra.mxu0 %v5218_v33  ;;  %1971 = vmatprep.subr.bf16.mxu1 %v5224_v34  ;;  %v5293_v33 = vld [vmem:[%s6262_s30 + $0x290] ss:$8 sps:$4 sm:$0xff]  }
 0x12d   : > { %3114 = vmatprep.subr.bf16.mxu0 %v5228_v35  ;;  %v5296_v34 = vld [vmem:[%s6262_s30 + $0x690] ss:$8 sps:$4 sm:$0xff]   ;;  %v5301_v35 = vld [vmem:[%s6262_s30 + $0x2a4] ss:$8 sps:$4 sm:$0xff]  }
 0x12f   : > { %1972 = vmatpush1.bf16.msra.mxu1 %v5222_v37  ;;  %v5304_v37 = vld [vmem:[%s6262_s30 + $0x6a4] ss:$8 sps:$4 sm:$0xff]  }
 0x130   : > { %3115 = vmatpush1.bf16.msra.mxu0 %v5226_v42  ;;  %1973 = vmatprep.subr.bf16.mxu1 %v5233_v43  ;;  %v5299_v42 = vld [vmem:[%s6262_s30 + $0x2a0] ss:$8 sps:$4 sm:$0xff]  }
 0x131   : > { %3116 = vmatprep.subr.bf16.mxu0 %v5236_v45  ;;  %v5302_v43 = vld [vmem:[%s6262_s30 + $0x6a0] ss:$8 sps:$4 sm:$0xff]   ;;  %v5310_v45 = vld [vmem:[%s6262_s30 + $0x6b4] ss:$8 sps:$4 sm:$0xff]  }
 0x133   : > { %1974 = vmatpush1.bf16.msra.mxu1 %v5231_v48  ;;  %v5305_v48 = vld [vmem:[%s6262_s30 + $0x2b0] ss:$8 sps:$4 sm:$0xff]  }
 0x134   : > { %3117 = vmatpush1.bf16.msra.mxu0 %v5234_v51  ;;  %2210 = vmatprep.subr.bf16.mxu1 %v5239_v52  ;;  %v5313_v51 = vld [vmem:[%s6262_s30 + $0x2c4] ss:$8 sps:$4 sm:$0xff]  }
 0x135   : > { %3364 = vmatprep.subr.bf16.mxu0 %v5244_v54  ;;  %v5316_v52 = vld [vmem:[%s6262_s30 + $0x6c4] ss:$8 sps:$4 sm:$0xff]   ;;  %v5314_v54 = vld [vmem:[%s6262_s30 + $0x6c0] ss:$8 sps:$4 sm:$0xff]  }
 0x136   : > { %1976 = vmatmul.mubr.bf16.vlgmr.msra.gmra.mrb[0].mxu1 %v6345_v31  ;;  %v6507_v31 = vld [vmem:[%s6313_s11] sm:$0xee] }
 0x137   : > { %3119 = vmatmul.mubr.bf16.vlgmr.msra.gmra.mrb[0].mxu0 %v2914_v47  ;;  %2211 = vmatpush1.bf16.msra.mxu1 %v5237_v55  ;;  %v4404_v2 = vcombine.high %v6507_v31, %v6321_v17  ;;  %v5319_v55 = vld [vmem:[%s6262_s30 + $0x2d4] ss:$8 sps:$4 sm:$0xff]   ;;  %v5320_v47 = vld [vmem:[%s6262_s30 + $0x6d0] ss:$8 sps:$4 sm:$0xff]  }
 0x138   : > { %3365 = vmatpush1.bf16.msra.mxu0 %v5242_v56  ;;  %2212 = vmatprep.subr.bf16.mxu1 %v5247_v57  ;;  %v5317_v56 = vld [vmem:[%s6262_s30 + $0x2d0] ss:$8 sps:$4 sm:$0xff]   ;;  %v5325_v57 = vld [vmem:[%s6262_s30 + $0x2e4] ss:$8 sps:$4 sm:$0xff]  }
 0x139   : > { %3366 = vmatprep.subr.bf16.mxu0 %v5250_v58  ;;  %1985 = vmatprep.mubr.bf16.mxu1 %v6332_v22  ;;  %v2039_v62 = vrot.slane %v4404_v2, 1  ;;  %v5328_v58 = vld [vmem:[%s6262_s30 + $0x6e4] ss:$8 sps:$4 sm:$0xff]   ;;  %v5329_v2 = vld [vmem:[%s6262_s30 + $0x2f0] ss:$8 sps:$4 sm:$0xff]  }
 0x13a   : > { %3128 = vmatprep.mubr.bf16.mxu0 %v2921_v46  ;;  %v5326_v46 = vld [vmem:[%s6262_s30 + $0x6e0] ss:$8 sps:$4 sm:$0xff]   ;;  %v6610_v22 = vld [vmem:[%s6313_s11 + $0x30] ss:$8 sps:$4 sm:$0xff]  }
 0x13b   : > { %2213 = vmatpush1.bf16.msra.mxu1 %v5245_v59  ;;  %v2041_v17 = vsel %vm2035_vm1, %v2039_v62, %v2040_v3  ;;  %v5323_v59 = vld [vmem:[%s6262_s30 + $0x2e0] ss:$8 sps:$4 sm:$0xff]   ;;  %v5339_v62 = vld [vmem:[%s6262_s30 + $0x304] ss:$8 sps:$4 sm:$0xff]  }
 0x13c   : > { %3367 = vmatpush1.bf16.msra.mxu0 %v5248_v60  ;;  %2214 = vmatprep.subr.bf16.mxu1 %v5253_v41  ;;  %v6569_v60 = vld [vmem:[%s6313_s11 + $0x20] sm:$0xff]  ;;  %v5493_v41 = vld [vmem:[%s6313_s11 + $0x8] sm:$0xff] }
 0x13d   : > { %3368 = vmatprep.subr.bf16.mxu0 %v5256_v63  ;;  %v4403_v61 = vcombine.low %v6507_v31, %v5493_v41  ;;  %v6574_v63 = vld [vmem:[%s6313_s11 + $0x28] sm:$0xff]  ;;  %v5332_v31 = vld [vmem:[%s6262_s30 + $0x6f0] ss:$8 sps:$4 sm:$0xff]  }
 0x13e   : > { %1986 = vmatmul.mubr.bf16.gmra.mrb[4].mxu1 %v6350_v36  ;;  %v5370_v41 = vld [vmem:[%s6262_s30 + $0x750] ss:$8 sps:$4 sm:$0xff]  }
 0x13f   : > { %3129 = vmatmul.mubr.bf16.gmra.mrb[4].mxu0 %v2919_v40  ;;  %2215 = vmatpush1.bf16.msra.mxu1 %v5251_v0  ;;  %v5331_v0 = vld [vmem:[%s6262_s30 + $0x2f4] ss:$8 sps:$4 sm:$0xff]   ;;  %v6582_v40 = vcombine.high %v6569_v60, %v6574_v63 }
 0x140   : > { %3369 = vmatpush1.bf16.msra.mxu0 %v5254_v1  ;;  %2216 = vmatprep.subr.bf16.mxu1 %v5259_v49  ;;  %v5334_v1 = vld [vmem:[%s6262_s30 + $0x6f4] ss:$8 sps:$4 sm:$0xff]   ;;  %v2037_v49 = vrot.slane %v6350_v36, 1 }
 0x141   : > { %3370 = vmatprep.subr.bf16.mxu0 %v5262_v4  ;;  %2242 = vmatprep.mubr.bf16.mxu1 %v2041_v17  ;;  %v2036_v4 = vrot.slane %v4403_v61, 1  ;;  %v2044_v17 = vrot.slane %v6416_v38, 1  ;;  %v3499_v36 = vshll.u32 %v6582_v40, 16  ;;  %v5494_v38 = vld [vmem:[%s6313_s11 + $0x20] ss:$8 sps:$4 sm:$0xff]  }
 0x142   : > { %3396 = vmatprep.mubr.bf16.mxu0 %v6340_v28  ;;  %v5277_v28 = vld [vmem:[%s6262_s30 + $0x264] ss:$8 sps:$4 sm:$0xff]  }
 0x143   : > { %2217 = vmatpush1.bf16.msra.mxu1 %v5257_v5  ;;  %v5342_v5 = vld [vmem:[%s6262_s30 + $0x704] ss:$8 sps:$4 sm:$0xff]  }
 0x144   : > { %3371 = vmatpush1.bf16.msra.mxu0 %v5260_v6  ;;  %2218 = vmatprep.subr.bf16.mxu1 %v5265_v7  ;;  %v5337_v6 = vld [vmem:[%s6262_s30 + $0x300] ss:$8 sps:$4 sm:$0xff]   ;;  %v5375_v61 = vld [vmem:[%s6262_s30 + $0x364] ss:$8 sps:$4 sm:$0xff]  }
 0x145   : > { %3372 = vmatprep.subr.bf16.mxu0 %v5268_v8  ;;  %v5340_v7 = vld [vmem:[%s6262_s30 + $0x700] ss:$8 sps:$4 sm:$0xff]   ;;  %v2038_v8 = vsel %vm2035_vm1, %v2036_v4, %v2037_v49  ;;  %v5379_v4 = vld [vmem:[%s6262_s30 + $0x370] ss:$8 sps:$4 sm:$0xff]  }
 0x147   : > { %2219 = vmatpush1.bf16.msra.mxu1 %v5263_v9  ;;  %v5345_v9 = vld [vmem:[%s6262_s30 + $0x314] ss:$8 sps:$4 sm:$0xff]  }
 0x148   : > { %3373 = vmatpush1.bf16.msra.mxu0 %v5266_v10  ;;  %2220 = vmatprep.subr.bf16.mxu1 %v5271_v11  ;;  %v5348_v10 = vld [vmem:[%s6262_s30 + $0x714] ss:$8 sps:$4 sm:$0xff]  }
 0x149   : > { %3374 = vmatprep.subr.bf16.mxu0 %v5274_v12  ;;  %v6595_v11 = vld [vmem:[%s6313_s11 + $0x34] ss:$8 sps:$4 sm:$0xff]   ;;  %v2042_v12 = vrot.slane %v6418_v39, 1  ;;  %v5351_v39 = vld [vmem:[%s6262_s30 + $0x324] ss:$8 sps:$4 sm:$0xff]  }
 0x14b   : > { %2221 = vmatpush1.bf16.msra.mxu1 %v5269_v13  ;;  %v2045_v13 = vsel %vm2035_vm1, %v2040_v3, %v2044_v17  ;;  %v5385_v17 = vld [vmem:[%s6262_s30 + $0x380] ss:$8 sps:$4 sm:$0xff]  }
 0x14c   : > { %3375 = vmatpush1.bf16.msra.mxu0 %v5272_v14  ;;  %2222 = vmatprep.subr.bf16.mxu1 %v5277_v28  ;;  %v3497_v14 = vshrl.u32 %v6582_v40, 16  ;;  %v3501_v28 = vrot.slane %v3499_v36, 1  ;;  %v5388_v36 = vld [vmem:[%s6262_s30 + $0x780] ss:$8 sps:$4 sm:$0xff]  }
 0x14d   : > { %3376 = vmatprep.subr.bf16.mxu0 %v5280_v15  ;;  %v3504_v15 = vshll.u32 %v6595_v11, 16 }
 0x14e   : > { %v3502_v3 = vor.u32 %v3501_v28, %v3497_v14  ;;  %v5400_v14 = vld [vmem:[%s6262_s30 + $0x7a0] ss:$8 sps:$4 sm:$0xff]   ;;  %v5405_v28 = vld [vmem:[%s6262_s30 + $0x3b4] ss:$8 sps:$4 sm:$0xff]  }
 0x14f   : > { %2223 = vmatpush1.bf16.msra.mxu1 %v5275_v21  ;;  %v5343_v21 = vld [vmem:[%s6262_s30 + $0x310] ss:$8 sps:$4 sm:$0xff]  }
 0x150   : > { %3377 = vmatpush1.bf16.msra.mxu0 %v5278_v16  ;;  %2224 = vmatprep.subr.bf16.mxu1 %v5283_v18  ;;  %v5346_v16 = vld [vmem:[%s6262_s30 + $0x710] ss:$8 sps:$4 sm:$0xff]   ;;  %v5354_v18 = vld [vmem:[%s6262_s30 + $0x724] ss:$8 sps:$4 sm:$0xff]  }
 0x151   : > { %3378 = vmatprep.subr.bf16.mxu0 %v5286_v20  ;;  %v6612_v20 = vrot.slane %v3504_v15, 1  ;;  %v5408_v15 = vld [vmem:[%s6262_s30 + $0x7b4] ss:$8 sps:$4 sm:$0xff]  }
 0x153   : > { %2225 = vmatpush1.bf16.msra.mxu1 %v5281_v23  ;;  %v5567_v23 = vmov 0  }
 0x154   : > { %3379 = vmatpush1.bf16.msra.mxu0 %v5284_v24  ;;  %2226 = vmatprep.subr.bf16.mxu1 %v5289_v25  ;;  %v5349_v24 = vld [vmem:[%s6262_s30 + $0x320] ss:$8 sps:$4 sm:$0xff]  }
 0x155   : > { %3380 = vmatprep.subr.bf16.mxu0 %v5292_v26  ;;  %5033 = vset.pattern.permute.xlu1 %v5567_v23  ;;  %v5352_v25 = vld [vmem:[%s6262_s30 + $0x720] ss:$8 sps:$4 sm:$0xff]   ;;  %v2043_v26 = vsel %vm2035_vm1, %v2037_v49, %v2042_v12  ;;  %v5381_v49 = vld [vmem:[%s6262_s30 + $0x374] ss:$8 sps:$4 sm:$0xff]   ;;  %v5399_v12 = vld [vmem:[%s6262_s30 + $0x3a4] ss:$8 sps:$4 sm:$0xff]  }
 0x156   : > { %5032 = vset.pattern.permute.xlu0 %v5567_v23  ;;  %v5412_v23 = vld [vmem:[%s6262_s30 + $0x7c0] ss:$8 sps:$4 sm:$0xff]  }
 0x157   : > { %2227 = vmatpush1.bf16.msra.mxu1 %v5287_v27  ;;  %v5357_v27 = vld [vmem:[%s6262_s30 + $0x334] ss:$8 sps:$4 sm:$0xff]  }
 0x158   : > { %3381 = vmatpush1.bf16.msra.mxu0 %v5290_v29  ;;  %2228 = vmatprep.subr.bf16.mxu1 %v5295_v30  ;;  %v5360_v29 = vld [vmem:[%s6262_s30 + $0x734] ss:$8 sps:$4 sm:$0xff]  }
 0x159   : > { %3382 = vmatprep.subr.bf16.mxu0 %v5298_v32  ;;  %v5438_v30 = vld [vmem:[%s6313_s11 + $0x14] ss:$8 sps:$4 sm:$0xff]   ;;  %v5355_v32 = vld [vmem:[%s6262_s30 + $0x330] ss:$8 sps:$4 sm:$0xff]  }
 0x15b   : > { %2229 = vmatpush1.bf16.msra.mxu1 %v5293_v33  ;;  %v3507_v33 = vsel %vm1521_vm0, %v3502_v3, %v6612_v20  ;;  %v5409_v3 = vld [vmem:[%s6262_s30 + $0x3c0] ss:$8 sps:$4 sm:$0xff]  }
 0x15c   : > { %3383 = vmatpush1.bf16.msra.mxu0 %v5296_v34  ;;  %2230 = vmatprep.subr.bf16.mxu1 %v5301_v35  ;;  %v3749_v34 = vld [vmem:[%s6313_s11 + $0x20] sm:$0xee]  ;;  %v5358_v35 = vld [vmem:[%s6262_s30 + $0x730] ss:$8 sps:$4 sm:$0xff]  }
 0x15d   : > { %3384 = vmatprep.subr.bf16.mxu0 %v5304_v37  ;;  %v4811_v37 = vcombine.low %v3749_v34, %v6574_v63 }
 0x15f   : > { %2231 = vmatpush1.bf16.msra.mxu1 %v5299_v42  ;;  %v4812_v42 = vcombine.high %v3749_v34, %v6574_v63  ;;  %v5429_v34 = vld [vmem:[%s6262_s30 + $0x7e4] ss:$8 sps:$4 sm:$0xff]  }
 0x160   : > { %3385 = vmatpush1.bf16.msra.mxu0 %v5302_v43  ;;  %2232 = vmatprep.subr.bf16.mxu1 %v5307_v44  ;;  %v3792_v43 = vrot.slane %v6595_v11, 1  ;;  %v3789_v44 = vrot.slane %v6610_v22, 1 }
 0x161   : > { %3386 = vmatprep.subr.bf16.mxu0 %v5310_v45  ;;  %v4053_v45 = vld [vmem:[%s6807_s3 + $0x10] sm:$0xff] }
 0x162   : > { %4067 = vperm.xlu1 %5033, %v4053_v45   ;;  %v3492_v45 = vshll.u32 %v6610_v22, 16 }
 0x163   : > { %2233 = vmatpush1.bf16.msra.mxu1 %v5305_v48  ;;  %v4051_v48 = vld [vmem:[%s6807_s3] sm:$0xff] }
 0x164   : > { %3387 = vmatpush1.bf16.msra.mxu0 %v5308_v50  ;;  %2234 = vmatprep.subr.bf16.mxu1 %v5313_v51  ;;  %v5363_v50 = vld [vmem:[%s6262_s30 + $0x344] ss:$8 sps:$4 sm:$0xff]  }
 0x165   : > { %3388 = vmatprep.subr.bf16.mxu0 %v5316_v52  ;;  %v5366_v51 = vld [vmem:[%s6262_s30 + $0x744] ss:$8 sps:$4 sm:$0xff]   ;;  %v3788_v52 = vrot.slane %v4811_v37, 1  ;;  %4057 = vperm.xlu0 %5032, %v4051_v48   ;;  %v5432_v48 = vld [vmem:[%s6262_s30 + $0x3f4] ss:$8 sps:$4 sm:$0xff]  }
 0x167   : > { %2235 = vmatpush1.bf16.msra.mxu1 %v5311_v53  ;;  %v3791_v53 = vrot.slane %v4812_v42, 1 }
 0x168   : > { %3389 = vmatpush1.bf16.msra.mxu0 %v5314_v54  ;;  %2236 = vmatprep.subr.bf16.mxu1 %v5319_v55  ;;  %v5361_v54 = vld [vmem:[%s6262_s30 + $0x340] ss:$8 sps:$4 sm:$0xff]  }
 0x169   : > { %3390 = vmatprep.subr.bf16.mxu0 %v5322_v19  ;;  %v5364_v55 = vld [vmem:[%s6262_s30 + $0x740] ss:$8 sps:$4 sm:$0xff]   ;;  %v6643_v19 = vsel %vm2035_vm1, %v3791_v53, %v3792_v43  ;;  %v5430_v53 = vld [vmem:[%s6262_s30 + $0x3f0] ss:$8 sps:$4 sm:$0xff]  }
 0x16b   : > { %2237 = vmatpush1.bf16.msra.mxu1 %v5317_v56  ;;  %v6648_v56 = vsel %vm2035_vm1, %v3788_v52, %v3789_v44 }
 0x16c   : > { %3391 = vmatpush1.bf16.msra.mxu0 %v5320_v47  ;;  %2238 = vmatprep.subr.bf16.mxu1 %v5325_v57  ;;  %v4054_v47 = vld [vmem:[%s6807_s3 + $0x18] sm:$0xff]  ;;  %v4052_v57 = vld [vmem:[%s6807_s3 + $0x8] sm:$0xff] }
 0x16d   : > { %3392 = vmatprep.subr.bf16.mxu0 %v5328_v58  ;;  %v5369_v58 = vld [vmem:[%s6262_s30 + $0x354] ss:$8 sps:$4 sm:$0xff]   ;;  %4072 = vperm.xlu1 %5033, %v4054_v47   ;;  %v3494_v47 = vrot.slane %v3492_v45, 1 }
 0x16e   : > { %4062 = vperm.xlu0 %5032, %v4052_v57  }
 0x16f   : > { %2239 = vmatpush1.bf16.msra.mxu1 %v5323_v59  ;;  %v5372_v59 = vld [vmem:[%s6262_s30 + $0x754] ss:$8 sps:$4 sm:$0xff]  }
 0x170   : > { %3393 = vmatpush1.bf16.msra.mxu0 %v5326_v46  ;;  %2240 = vmatprep.subr.bf16.mxu1 %v5331_v0  ;;  %v5367_v46 = vld [vmem:[%s6262_s30 + $0x350] ss:$8 sps:$4 sm:$0xff]   ;;  %v5378_v0 = vld [vmem:[%s6262_s30 + $0x764] ss:$8 sps:$4 sm:$0xff]  }
 0x171   : > { %3394 = vmatprep.subr.bf16.mxu0 %v5334_v1  ;;  %v5373_v1 = vld [vmem:[%s6262_s30 + $0x360] ss:$8 sps:$4 sm:$0xff]  }
 0x173   : > { %2241 = vmatpush1.bf16.msra.mxu1 %v5329_v2  ;;  %v5376_v2 = vld [vmem:[%s6262_s30 + $0x760] ss:$8 sps:$4 sm:$0xff]  }
 0x174   : > { %3395 = vmatpush1.bf16.msra.mxu0 %v5332_v31  ;;  %2488 = vmatprep.subr.bf16.mxu1 %v5339_v62  ;;  %v5384_v31 = vld [vmem:[%s6262_s30 + $0x774] ss:$8 sps:$4 sm:$0xff]   ;;  %v5382_v62 = vld [vmem:[%s6262_s30 + $0x770] ss:$8 sps:$4 sm:$0xff]  }
 0x175   : > { %3688 = vmatprep.subr.bf16.mxu0 %v5342_v5  ;;  %v5387_v5 = vld [vmem:[%s6262_s30 + $0x384] ss:$8 sps:$4 sm:$0xff]  }
 0x176   : > { %2243 = vmatmul.mubr.bf16.vlgmr.msra.gmra.mrb[0].mxu1 %v2038_v8  ;;  %v5396_v8 = vld [vmem:[%s6262_s30 + $0x794] ss:$8 sps:$4 sm:$0xff]  }
 0x177   : > { %3397 = vmatmul.mubr.bf16.vlgmr.msra.gmra.mrb[0].mxu0 %v5494_v38  ;;  %2489 = vmatpush1.bf16.msra.mxu1 %v5337_v6  ;;  %v5390_v6 = vld [vmem:[%s6262_s30 + $0x784] ss:$8 sps:$4 sm:$0xff]  }
 0x178   : > { %3689 = vmatpush1.bf16.msra.mxu0 %v5340_v7  ;;  %2490 = vmatprep.subr.bf16.mxu1 %v5345_v9  ;;  %v5393_v7 = vld [vmem:[%s6262_s30 + $0x394] ss:$8 sps:$4 sm:$0xff]   ;;  %v5391_v9 = vld [vmem:[%s6262_s30 + $0x390] ss:$8 sps:$4 sm:$0xff]   ;;  %v5402_v38 = vld [vmem:[%s6262_s30 + $0x7a4] ss:$8 sps:$4 sm:$0xff]  }
 0x179   : > { %3690 = vmatprep.subr.bf16.mxu0 %v5348_v10  ;;  %2252 = vmatprep.mubr.bf16.mxu1 %v2045_v13  ;;  %v5394_v10 = vld [vmem:[%s6262_s30 + $0x790] ss:$8 sps:$4 sm:$0xff]   ;;  %v5397_v13 = vld [vmem:[%s6262_s30 + $0x3a0] ss:$8 sps:$4 sm:$0xff]  }
 0x17a   : > { %3406 = vmatprep.mubr.bf16.mxu0 %v6595_v11 }
 0x17b   : > { %2491 = vmatpush1.bf16.msra.mxu1 %v5343_v21  ;;  %v5403_v21 = vld [vmem:[%s6262_s30 + $0x3b0] ss:$8 sps:$4 sm:$0xff]  }
 0x17c   : > { %3691 = vmatpush1.bf16.msra.mxu0 %v5346_v16  ;;  %2492 = vmatprep.subr.bf16.mxu1 %v5351_v39  ;;  %v5406_v16 = vld [vmem:[%s6262_s30 + $0x7b0] ss:$8 sps:$4 sm:$0xff]   ;;  %v5411_v39 = vld [vmem:[%s6262_s30 + $0x3c4] ss:$8 sps:$4 sm:$0xff]  }
 0x17d   : > { %3692 = vmatprep.subr.bf16.mxu0 %v5354_v18  ;;  %v5414_v18 = vld [vmem:[%s6262_s30 + $0x7c4] ss:$8 sps:$4 sm:$0xff]  }
 0x17e   : > { %2253 = vmatmul.mubr.bf16.gmra.mrb[4].mxu1 %v2043_v26  ;;  %v5420_v26 = vld [vmem:[%s6262_s30 + $0x7d4] ss:$8 sps:$4 sm:$0xff]  }
 0x17f   : > { %3407 = vmatmul.mubr.bf16.gmra.mrb[4].mxu0 %v6610_v22  ;;  %2493 = vmatpush1.bf16.msra.mxu1 %v5349_v24  ;;  %v6690_v24 = vcombine.low %v6569_v60, %v6574_v63  ;;  %v5423_v60 = vld [vmem:[%s6262_s30 + $0x3e0] ss:$8 sps:$4 sm:$0xff]  }
 0x180   : > { %3693 = vmatpush1.bf16.msra.mxu0 %v5352_v25  ;;  %2494 = vmatprep.subr.bf16.mxu1 %v5357_v27  ;;  %v5417_v25 = vld [vmem:[%s6262_s30 + $0x3d4] ss:$8 sps:$4 sm:$0xff]   ;;  %v5415_v27 = vld [vmem:[%s6262_s30 + $0x3d0] ss:$8 sps:$4 sm:$0xff]  }
 0x181   : > { %3694 = vmatprep.subr.bf16.mxu0 %v5360_v29  ;;  %2520 = vmatprep.mubr.bf16.mxu1 %v5438_v30  ;;  %v5418_v29 = vld [vmem:[%s6262_s30 + $0x7d0] ss:$8 sps:$4 sm:$0xff]   ;;  %v3487_v30 = vshll.u32 %v6690_v24, 16  ;;  %v3485_v37 = vshrl.u32 %v6690_v24, 16 }
 0x182   : > { %3720 = vmatprep.mubr.bf16.mxu0 %v3507_v33  ;;  %v5425_v33 = vld [vmem:[%s6262_s30 + $0x3e4] ss:$8 sps:$4 sm:$0xff]  }
 0x183   : > { %2495 = vmatpush1.bf16.msra.mxu1 %v5355_v32  ;;  %v3429_v32 = vld [vmem:[%s6313_s11 + $0x40] sm:$0x11]  ;;  %v3489_v42 = vrot.slane %v3487_v30, 1  ;;  %v5490_v30 = vld [vmem:[%s6262_s30 + $0x8f4] ss:$8 sps:$4 sm:$0xff]  }
 0x184   : > { %3695 = vmatpush1.bf16.msra.mxu0 %v5358_v35  ;;  %2496 = vmatprep.subr.bf16.mxu1 %v5363_v50  ;;  %v4746_v63 = vcombine.high %v3429_v32, %v3429_v32  ;;  %v5427_v35 = vld [vmem:[%s6262_s30 + $0x7e0] ss:$8 sps:$4 sm:$0xff]   ;;  %v5435_v50 = vld [vmem:[%s6262_s30 + $0x7f4] ss:$8 sps:$4 sm:$0xff]   ;;  %v6709_v57 = vcombine.low %v3429_v32, %v3429_v32  ;;  %v5488_v32 = vld [vmem:[%s6262_s30 + $0x8f0] ss:$8 sps:$4 sm:$0xff]  }
 0x185   : > { %3696 = vmatprep.subr.bf16.mxu0 %v5366_v51  ;;  %v3516_v51 = vshrl.u32 %v6595_v11, 16  ;;  %v5460_v11 = vld [vmem:[%s6262_s30 + $0x854] ss:$8 sps:$4 sm:$0xff]  }
 0x186   : > { %v3520_v52 = vshll.u32 %v4746_v63, 16 }
 0x187   : > { %2497 = vmatpush1.bf16.msra.mxu1 %v5361_v54  ;;  %v5433_v54 = vld [vmem:[%s6262_s30 + $0x7f0] ss:$8 sps:$4 sm:$0xff]  }
 0x188   : > { %3697 = vmatpush1.bf16.msra.mxu0 %v5364_v55  ;;  %2498 = vmatprep.subr.bf16.mxu1 %v5369_v58  ;;  %v3490_v55 = vor.u32 %v3489_v42, %v3485_v37  ;;  %v5443_v58 = vld [vmem:[%s6262_s30 + $0x804] ss:$8 sps:$4 sm:$0xff]  }
 0x189   : > { %3698 = vmatprep.subr.bf16.mxu0 %v5372_v59  ;;  %v5436_v59 = vld [vmem:[%s6313_s11 + $0x10] ss:$8 sps:$4 sm:$0xff]  }
 0x18b   : > { %2499 = vmatpush1.bf16.msra.mxu1 %v5367_v46  ;;  %v3518_v46 = vor.u32 %v3516_v51, %v6612_v20 }
 0x18c   : > { %3699 = vmatpush1.bf16.msra.mxu0 %v5370_v41  ;;  %2500 = vmatprep.subr.bf16.mxu1 %v5375_v61  ;;  %v3522_v41 = vrot.slane %v3520_v52, 1  ;;  %v3495_v61 = vsel %vm1521_vm0, %v3490_v55, %v3494_v47 }
 0x18d   : > { %3700 = vmatprep.subr.bf16.mxu0 %v5378_v0  ;;  %v5441_v0 = vld [vmem:[%s6262_s30 + $0x800] ss:$8 sps:$4 sm:$0xff]  }
 0x18e   : > { %v3523_v20 = vsel %vm1521_vm0, %v3518_v46, %v3522_v41 }
 0x18f   : > { %2501 = vmatpush1.bf16.msra.mxu1 %v5373_v1  ;;  %v3508_v1 = vshrl.u32 %v6610_v22, 16 }
 0x190   : > { %3701 = vmatpush1.bf16.msra.mxu0 %v5376_v2  ;;  %2502 = vmatprep.subr.bf16.mxu1 %v5381_v49  ;;  %v3512_v2 = vshll.u32 %v6709_v57, 16  ;;  %v5446_v49 = vld [vmem:[%s6262_s30 + $0x814] ss:$8 sps:$4 sm:$0xff]  }
 0x191   : > { %3702 = vmatprep.subr.bf16.mxu0 %v5384_v31  ;;  %v5444_v31 = vld [vmem:[%s6262_s30 + $0x810] ss:$8 sps:$4 sm:$0xff]  }
 0x193   : > { %2503 = vmatpush1.bf16.msra.mxu1 %v5379_v4  ;;  %v3510_v4 = vor.u32 %v3508_v1, %v3494_v47 }
 0x194   : > { %3703 = vmatpush1.bf16.msra.mxu0 %v5382_v62  ;;  %2504 = vmatprep.subr.bf16.mxu1 %v5387_v5  ;;  %v3514_v62 = vrot.slane %v3512_v2, 1  ;;  %v5451_v5 = vld [vmem:[%s6262_s30 + $0x824] ss:$8 sps:$4 sm:$0xff]  }
 0x195   : > { %3704 = vmatprep.subr.bf16.mxu0 %v5390_v6  ;;  %v3796_v6 = vrot.slane %v4746_v63, 1 }
 0x197   : > { %2505 = vmatpush1.bf16.msra.mxu1 %v5385_v17  ;;  %v3515_v17 = vsel %vm1521_vm0, %v3510_v4, %v3514_v62 }
 0x198   : > { %3705 = vmatpush1.bf16.msra.mxu0 %v5388_v36  ;;  %2506 = vmatprep.subr.bf16.mxu1 %v5393_v7  ;;  %v5449_v36 = vld [vmem:[%s6262_s30 + $0x820] ss:$8 sps:$4 sm:$0xff]   ;;  %v5454_v7 = vld [vmem:[%s6262_s30 + $0x834] ss:$8 sps:$4 sm:$0xff]  }
 0x199   : > { %3706 = vmatprep.subr.bf16.mxu0 %v5396_v8  ;;  %v5452_v8 = vld [vmem:[%s6262_s30 + $0x830] ss:$8 sps:$4 sm:$0xff]  }
 0x19b   : > { %2507 = vmatpush1.bf16.msra.mxu1 %v5391_v9  ;;  %v5457_v9 = vld [vmem:[%s6262_s30 + $0x844] ss:$8 sps:$4 sm:$0xff]  }
 0x19c   : > { %3707 = vmatpush1.bf16.msra.mxu0 %v5394_v10  ;;  %2508 = vmatprep.subr.bf16.mxu1 %v5399_v12  ;;  %v5455_v10 = vld [vmem:[%s6262_s30 + $0x840] ss:$8 sps:$4 sm:$0xff]   ;;  %v5463_v12 = vld [vmem:[%s6262_s30 + $0x864] ss:$8 sps:$4 sm:$0xff]  }
 0x19d   : > { %3708 = vmatprep.subr.bf16.mxu0 %v5402_v38  ;;  %v5466_v38 = vld [vmem:[%s6262_s30 + $0x874] ss:$8 sps:$4 sm:$0xff]  }
 0x19f   : > { %2509 = vmatpush1.bf16.msra.mxu1 %v5397_v13  ;;  %v5464_v13 = vld [vmem:[%s6262_s30 + $0x870] ss:$8 sps:$4 sm:$0xff]  }
 0x1a0   : > { %3709 = vmatpush1.bf16.msra.mxu0 %v5400_v14  ;;  %2510 = vmatprep.subr.bf16.mxu1 %v5405_v28  ;;  %v5469_v14 = vld [vmem:[%s6262_s30 + $0x884] ss:$8 sps:$4 sm:$0xff]   ;;  %v5467_v28 = vld [vmem:[%s6262_s30 + $0x880] ss:$8 sps:$4 sm:$0xff]  }
 0x1a1   : > { %3710 = vmatprep.subr.bf16.mxu0 %v5408_v15  ;;  %v5472_v15 = vld [vmem:[%s6262_s30 + $0x894] ss:$8 sps:$4 sm:$0xff]  }
 0x1a3   : > { %2511 = vmatpush1.bf16.msra.mxu1 %v5403_v21  ;;  %v5470_v21 = vld [vmem:[%s6262_s30 + $0x890] ss:$8 sps:$4 sm:$0xff]  }
 0x1a4   : > { %3711 = vmatpush1.bf16.msra.mxu0 %v5406_v16  ;;  %2512 = vmatprep.subr.bf16.mxu1 %v5411_v39  ;;  %v5475_v16 = vld [vmem:[%s6262_s30 + $0x8a4] ss:$8 sps:$4 sm:$0xff]   ;;  %v5473_v39 = vld [vmem:[%s6262_s30 + $0x8a0] ss:$8 sps:$4 sm:$0xff]  }
 0x1a5   : > { %3712 = vmatprep.subr.bf16.mxu0 %v5414_v18  ;;  %v5478_v18 = vld [vmem:[%s6262_s30 + $0x8b4] ss:$8 sps:$4 sm:$0xff]  }
 0x1a7   : > { %2513 = vmatpush1.bf16.msra.mxu1 %v5409_v3  ;;  %v5476_v3 = vld [vmem:[%s6262_s30 + $0x8b0] ss:$8 sps:$4 sm:$0xff]  }
 0x1a8   : > { %3713 = vmatpush1.bf16.msra.mxu0 %v5412_v23  ;;  %2514 = vmatprep.subr.bf16.mxu1 %v5417_v25  ;;  %v5481_v23 = vld [vmem:[%s6262_s30 + $0x8c4] ss:$8 sps:$4 sm:$0xff]   ;;  %v5484_v25 = vld [vmem:[%s6262_s30 + $0x8d4] ss:$8 sps:$4 sm:$0xff]  }
 0x1a9   : > { %3714 = vmatprep.subr.bf16.mxu0 %v5420_v26  ;;  %v5482_v26 = vld [vmem:[%s6262_s30 + $0x8d0] ss:$8 sps:$4 sm:$0xff]  }
 0x1ab   : > { %2515 = vmatpush1.bf16.msra.mxu1 %v5415_v27  ;;  %v5487_v27 = vld [vmem:[%s6262_s30 + $0x8e4] ss:$8 sps:$4 sm:$0xff]  }
 0x1ac   : > { %3715 = vmatpush1.bf16.msra.mxu0 %v5418_v29  ;;  %2516 = vmatprep.subr.bf16.mxu1 %v5425_v33  ;;  %v5485_v29 = vld [vmem:[%s6262_s30 + $0x8e0] ss:$8 sps:$4 sm:$0xff]   ;;  %v3794_v33 = vrot.slane %v6709_v57, 1 }
 0x1ad   : > { %3716 = vmatprep.subr.bf16.mxu0 %v5429_v34 }
 0x1ae   : > { %v3795_v34 = vsel %vm2035_vm1, %v3789_v44, %v3794_v33 }
 0x1af   : > { %2517 = vmatpush1.bf16.msra.mxu1 %v5423_v60 }
 0x1b0   : > { %3717 = vmatpush1.bf16.msra.mxu0 %v5427_v35  ;;  %2518 = vmatprep.subr.bf16.mxu1 %v5432_v48 }
 0x1b1   : > { %3718 = vmatprep.subr.bf16.mxu0 %v5435_v50 }
 0x1b3   : > { %2519 = vmatpush1.bf16.msra.mxu1 %v5430_v53 }
 0x1b4   : > { %3719 = vmatpush1.bf16.msra.mxu0 %v5433_v54  ;;  %4860 = vmatprep.subr.bf16.mxu1 %v5443_v58 }
 0x1b5   : > { %3962 = vmatprep.subr.bf16.mxu0 %v5443_v58 }
 0x1b6   : > { %2521 = vmatmul.mubr.bf16.vlgmr.msra.gmra.mrb[0].mxu1 %v5436_v59 }
 0x1b7   : > { %3721 = vmatmul.mubr.bf16.vlgmr.msra.gmra.mrb[0].mxu0 %v3495_v61  ;;  %4876 = vmatpush1.bf16.msra.mxu1 %v5441_v0 }
 0x1b8   : > { %3963 = vmatpush1.bf16.msra.mxu0 %v5441_v0  ;;  %4861 = vmatprep.subr.bf16.mxu1 %v5446_v49 }
 0x1b9   : > { %3964 = vmatprep.subr.bf16.mxu0 %v5446_v49  ;;  %2530 = vmatprep.mubr.bf16.mxu1 %v6582_v40  ;;  %v3797_v40 = vsel %vm2035_vm1, %v3792_v43, %v3796_v6  ;;  %v5458_v43 = vld [vmem:[%s6262_s30 + $0x850] ss:$8 sps:$4 sm:$0xff]  }
 0x1ba   : > { %3730 = vmatprep.mubr.bf16.mxu0 %v3523_v20 }
 0x1bb   : > { %4877 = vmatpush1.bf16.msra.mxu1 %v5444_v31 }
 0x1bc   : > { %3965 = vmatpush1.bf16.msra.mxu0 %v5444_v31  ;;  %4862 = vmatprep.subr.bf16.mxu1 %v5451_v5 }
 0x1bd   : > { %3966 = vmatprep.subr.bf16.mxu0 %v5451_v5 }
 0x1be   : > { %2531 = vmatmul.mubr.bf16.gmra.mrb[4].mxu1 %v6690_v24  ;;  %v5479_v24 = vld [vmem:[%s6262_s30 + $0x8c0] ss:$8 sps:$4 sm:$0xff]  }
 0x1bf   : > { %3731 = vmatmul.mubr.bf16.gmra.mrb[4].mxu0 %v3515_v17  ;;  %4878 = vmatpush1.bf16.msra.mxu1 %v5449_v36 }
 0x1c0   : > { %3967 = vmatpush1.bf16.msra.mxu0 %v5449_v36  ;;  %4863 = vmatprep.subr.bf16.mxu1 %v5454_v7 }
 0x1c1   : > { %3968 = vmatprep.subr.bf16.mxu0 %v5454_v7  ;;  %3994 = vmatprep.mubr.bf16.mxu0 %v6643_v19  ;;  %v5461_v19 = vld [vmem:[%s6262_s30 + $0x860] ss:$8 sps:$4 sm:$0xff]   ;;  %s6762_s30 = sshll.u32 %s5553_s20, 1  ;;  %s1415_s20 = sand.u32 1, %s5533_s15  }
 0x1c2   : > { %4004 = vmatprep.mubr.bf16.mxu1 %v3797_v40  ;;  %p1425_p1 = scmp.lt.s32.totalorder %s6762_s30, 3  ;;  %s4266_s12 = sshll.u32 %s1415_s20, 5 }
 0x1c3   : > { %4879 = vmatpush1.bf16.msra.mxu1 %v5452_v8  ;;  %s1417_s15 = scalar_lea.vmem [#allocation3], %s4266_s12  ;;  %s4120_s14 = sadd.s32 (%p5661_p9), %s4851_s13, %s6762_s30 }
 0x1c4   : > { %3969 = vmatpush1.bf16.msra.mxu0 %v5452_v8  ;;  %4864 = vmatprep.subr.bf16.mxu1 %v5457_v9  ;;  %s1426_s5 = scalar_select %p1425_p1, %s6762_s30, 3 }
 0x1c5   : > { %3970 = vmatprep.subr.bf16.mxu0 %v5457_v9  ;;  %s4852_s26 = sshll.u32 (%p5661_p9), %s4120_s14, 2 }
 0x1c6   : > { %s1427_s11 = scalar_lea.vmem %s6806_s2, %s1426_s5  ;;  %s4122_s29 = scalar_lea.vmem (%p5661_p9), %s6808_s4, %s4852_s26 }
 0x1c7   : > { %4880 = vmatpush1.bf16.msra.mxu1 %v5455_v10  ;;  %v4023_v59 = vld [vmem:[%s1427_s11] sm:$0x3] }
 0x1c8   : > { %3971 = vmatpush1.bf16.msra.mxu0 %v5455_v10  ;;  %4865 = vmatprep.subr.bf16.mxu1 %v5460_v11 }
 0x1c9   : > { %3972 = vmatprep.subr.bf16.mxu0 %v5460_v11 }
 0x1cb   : > { %4881 = vmatpush1.bf16.msra.mxu1 %v5458_v43 }
 0x1cc   : > { %3973 = vmatpush1.bf16.msra.mxu0 %v5458_v43  ;;  %4866 = vmatprep.subr.bf16.mxu1 %v5463_v12 }
 0x1cd   : > { %3974 = vmatprep.subr.bf16.mxu0 %v5463_v12 }
 0x1cf   : > { %4882 = vmatpush1.bf16.msra.mxu1 %v5461_v19 }
 0x1d0   : > { %3975 = vmatpush1.bf16.msra.mxu0 %v5461_v19  ;;  %4867 = vmatprep.subr.bf16.mxu1 %v5466_v38 }
 0x1d1   : > { %3976 = vmatprep.subr.bf16.mxu0 %v5466_v38 }
 0x1d3   : > { %4883 = vmatpush1.bf16.msra.mxu1 %v5464_v13 }
 0x1d4   : > { %3977 = vmatpush1.bf16.msra.mxu0 %v5464_v13  ;;  %4868 = vmatprep.subr.bf16.mxu1 %v5469_v14 }
 0x1d5   : > { %3978 = vmatprep.subr.bf16.mxu0 %v5469_v14 }
 0x1d7   : > { %4884 = vmatpush1.bf16.msra.mxu1 %v5467_v28 }
 0x1d8   : > { %3979 = vmatpush1.bf16.msra.mxu0 %v5467_v28  ;;  %4869 = vmatprep.subr.bf16.mxu1 %v5472_v15 }
 0x1d9   : > { %3980 = vmatprep.subr.bf16.mxu0 %v5472_v15 }
 0x1db   : > { %4885 = vmatpush1.bf16.msra.mxu1 %v5470_v21 }
 0x1dc   : > { %3981 = vmatpush1.bf16.msra.mxu0 %v5470_v21  ;;  %4870 = vmatprep.subr.bf16.mxu1 %v5475_v16 }
 0x1dd   : > { %3982 = vmatprep.subr.bf16.mxu0 %v5475_v16 }
 0x1df   : > { %4886 = vmatpush1.bf16.msra.mxu1 %v5473_v39 }
 0x1e0   : > { %3983 = vmatpush1.bf16.msra.mxu0 %v5473_v39  ;;  %4871 = vmatprep.subr.bf16.mxu1 %v5478_v18 }
 0x1e1   : > { %3984 = vmatprep.subr.bf16.mxu0 %v5478_v18  ;;  %v4068_v61 = vpop.permute.xlu1 %4067 }
 0x1e3   : > { %4887 = vmatpush1.bf16.msra.mxu1 %v5476_v3 }
 0x1e4   : > { %3985 = vmatpush1.bf16.msra.mxu0 %v5476_v3  ;;  %4872 = vmatprep.subr.bf16.mxu1 %v5481_v23  ;;  %v4058_v0 = vpop.permute.xlu0 %4057 }
 0x1e5   : > { %3986 = vmatprep.subr.bf16.mxu0 %v5481_v23 }
 0x1e7   : > { %4888 = vmatpush1.bf16.msra.mxu1 %v5479_v24 }
 0x1e8   : > { %3987 = vmatpush1.bf16.msra.mxu0 %v5479_v24  ;;  %4873 = vmatprep.subr.bf16.mxu1 %v5484_v25 }
 0x1e9   : > { %3988 = vmatprep.subr.bf16.mxu0 %v5484_v25 }
 0x1eb   : > { %4889 = vmatpush1.bf16.msra.mxu1 %v5482_v26 }
 0x1ec   : > { %3989 = vmatpush1.bf16.msra.mxu0 %v5482_v26  ;;  %4874 = vmatprep.subr.bf16.mxu1 %v5487_v27 }
 0x1ed   : > { %3990 = vmatprep.subr.bf16.mxu0 %v5487_v27 }
 0x1ef   : > { %4890 = vmatpush1.bf16.msra.mxu1 %v5485_v29 }
 0x1f0   : > { %3991 = vmatpush1.bf16.msra.mxu0 %v5485_v29  ;;  %4875 = vmatprep.subr.bf16.mxu1 %v5490_v30  ;;  %v4073_v29 = vpop.permute.xlu1 %4072 }
 0x1f1   : > { %3992 = vmatprep.subr.bf16.mxu0 %v5490_v30 }
 0x1f3   : > { %4891 = vmatpush1.bf16.msra.mxu1 %v5488_v32 }
 0x1f4   : > { %3993 = vmatpush1.bf16.msra.mxu0 %v5488_v32  ;;  %v4063_v32 = vpop.permute.xlu0 %4062 }
 0x1f6   : > { %4005 = vmatmul.mubr.bf16.vlgmr.msra.gmra.mrb[8].mxu1 %v3795_v34 }
 0x1f7   : > { %3995 = vmatmul.mubr.bf16.vlgmr.msra.gmra.mrb[0].mxu0 %v6648_v56  ;;  %v4025_v56 = vlaneseq }
 0x1f9   : > { %v4026_v57 = vshrl.u32 %v4025_v56, 7 }
 0x1fb   : > { %v4027_v58 = vsub.s32 0, %v4026_v57  ;;  %v4031_v46 = vsub.s32 1, %v4026_v57 }
 0x1fd   : > { %v4028_v41 = vrot.slane %v4023_v59, %v4027_v58  ;;  %v4032_v49 = vrot.slane %v4023_v59, %v4031_v46 }
 0x289   : > { %v2522_v60 = vpop.f32.mrb[0].mxu1 }
 0x28a   : > { %v2524_v63 = vpop.f32.mrb[1].mxu1 }
 0x28b   : > { %v2526_v35 = vpop.f32.mrb[2].mxu1 }
 0x28c   : > { %v2528_v37 = vpop.f32.mrb[3].mxu1 }
 0x291   : > { %v2532_v42 = vpop.f32.mrb[4].mxu1 }
 0x292   : > { %v3732_v45 = vpop.f32.mrb[4].mxu0  ;;  %v2534_v50 = vpop.f32.mrb[5].mxu1 }
 0x293   : > { %v4896_v48 = vadd.f32 %v3732_v45, %v2532_v42  ;;  %v3734_v51 = vpop.f32.mrb[5].mxu0  ;;  %v2536_v53 = vpop.f32.mrb[6].mxu1 }
 0x294   : > { %v4898_v52 = vadd.f32 %v3734_v51, %v2534_v50  ;;  %v3736_v54 = vpop.f32.mrb[6].mxu0  ;;  %v2538_v22 = vpop.f32.mrb[7].mxu1 }
 0x295   : > { %v4900_v55 = vadd.f32 %v3736_v54, %v2536_v53  ;;  %v3738_v47 = vpop.f32.mrb[7].mxu0 }
 0x296   : > { %v4902_v44 = vadd.f32 %v3738_v47, %v2538_v22 }
 0x2c9   : > { %v4006_v2 = vpop.f32.mrb[8].mxu1 }
 0x2ca   : > { %v3996_v1 = vpop.f32.mrb[0].mxu0  ;;  %v4897_v31 = vadd.f32 %v4896_v48, %v4006_v2  ;;  %v4008_v62 = vpop.f32.mrb[9].mxu1 }
 0x2cb   : > { %v4892_v20 = vadd.f32 %v3996_v1, %v2522_v60  ;;  %v3998_v4 = vpop.f32.mrb[1].mxu0  ;;  %v4899_v6 = vadd.f32 %v4898_v52, %v4008_v62  ;;  %v4010_v36 = vpop.f32.mrb[10].mxu1 }
 0x2cc   : > { %v4893_v5 = vadd.f32 %v3998_v4, %v2524_v63  ;;  %v4000_v17 = vpop.f32.mrb[2].mxu0  ;;  %v4039_v40 = vadd.f32 %v4897_v31, %v4028_v41  ;;  %v4901_v9 = vadd.f32 %v4900_v55, %v4010_v36  ;;  %v4012_v11 = vpop.f32.mrb[11].mxu1 }
 0x2cd   : > { %v4035_v7 = vadd.f32 %v4892_v20, %v4028_v41  ;;  %v4894_v8 = vadd.f32 %v4000_v17, %v2526_v35  ;;  %v4002_v10 = vpop.f32.mrb[3].mxu0  ;;  %v4040_v12 = vadd.f32 %v4899_v6, %v4032_v49  ;;  %v4903_v38 = vadd.f32 %v4902_v44, %v4012_v11 }
 0x2ce   : > { %v4036_v43 = vadd.f32 %v4893_v5, %v4032_v49  ;;  %v4895_v19 = vadd.f32 %v4002_v10, %v2528_v37  ;;  %v4047_v14 = vmax.f32 %v4039_v40, 0.0  ;;  %v4041_v15 = vadd.f32 %v4901_v9, %v4028_v41 }
 0x2cf   : > { %v4043_v13 = vmax.f32 %v4035_v7, 0.0  ;;  %v4037_v28 = vadd.f32 %v4894_v8, %v4028_v41  ;;  %v4048_v16 = vmax.f32 %v4040_v12, 0.0  ;;  %v4042_v18 = vadd.f32 %v4903_v38, %v4032_v49 }
 0x2d0   : > { %v4044_v21 = vmax.f32 %v4036_v43, 0.0  ;;  %v4038_v39 = vadd.f32 %v4895_v19, %v4032_v49  ;;  %v4079_v3 = vmul.f32 %v4068_v61, %v4047_v14  ;;  %v4049_v24 = vmax.f32 %v4041_v15, 0.0 }
 0x2d1   : > { %v4075_v23 = vmul.f32 %v4058_v0, %v4043_v13  ;;  %v4045_v25 = vmax.f32 %v4037_v28, 0.0  ;;  %v4080_v27 = vmul.f32 %v4068_v61, %v4048_v16  ;;  %v4050_v30 = vmax.f32 %v4042_v18, 0.0 }
 0x2d2   : > { %v4076_v26 = vmul.f32 %v4058_v0, %v4044_v21  ;;  %v4046_v33 = vmax.f32 %v4038_v39, 0.0  ;;  %v4081_v34 = vmul.f32 %v4073_v29, %v4049_v24  ;;  %4117 = sbr.rel (!%p5661_p9) target bundleno = 737 (0x2e1), region = 78 }
 0x2d3   : > { %v4077_v60 = vmul.f32 %v4063_v32, %v4045_v25  ;;  %v4858_v35 = vpack.c.bf16 %v4080_v27, %v4079_v3  ;;  %v4082_v37 = vmul.f32 %v4073_v29, %v4050_v30 }
 0x2d4   : > { %v4856_v63 = vpack.c.bf16 %v4076_v26, %v4075_v23  ;;  %v4078_v42 = vmul.f32 %v4063_v32, %v4046_v33 }
 0x2d5   : > { %v4859_v45 = vpack.c.bf16 %v4082_v37, %v4081_v34  ;;  %4109 = vst [vmem:[%s1417_s15 + $0x10] sm:$0xff] %v4858_v35 }
 0x2d6   : > { %4107 = vst [vmem:[%s1417_s15] sm:$0xff] %v4856_v63  ;;  %v4857_v48 = vpack.c.bf16 %v4078_v42, %v4077_v60 }
 0x2d7   : > { %4110 = vst [vmem:[%s1417_s15 + $0x18] sm:$0xff] %v4859_v45 }
 0x2d8   : > { %4108 = vst [vmem:[%s1417_s15 + $0x8] sm:$0xff] %v4857_v48 }
 0x2dc   : > { %v4160_v52 = vld [vmem:[%s1417_s15 + $0x10] sm:$0xff] }
 0x2dd   : > { %v4156_v50 = vld [vmem:[%s1417_s15] sm:$0xff]  ;;  %4161 = vst [vmem:[%s4122_s29 + $0x20] sm:$0xff] %v4160_v52 }
 0x2de   : > { %v4162_v53 = vld [vmem:[%s1417_s15 + $0x18] sm:$0xff]  ;;  %4157 = vst [vmem:[%s4122_s29] sm:$0xff] %v4156_v50 }
 0x2df   : > { %v4158_v51 = vld [vmem:[%s1417_s15 + $0x8] sm:$0xff]  ;;  %4163 = vst [vmem:[%s4122_s29 + $0x30] sm:$0xff] %v4162_v53 }
 0x2e0   : > { %4159 = vst [vmem:[%s4122_s29 + $0x10] sm:$0xff] %v4158_v51 }
 0x2e1 PF: > { %s14_s23 = sadd.s32 1, %s5565_s23   ;;  %s6811_s15 = smov %s5537_s16 }
 0x2e2   : > { %p11_p2 = scmp.ge.s32.totalorder %s14_s23, 6   ;;  %s6812_s16 = smov %s5669_s9 }
 0x2e3   : > { %s6813_s17 = smov %s5545_s18  ;;  %s6814_s18 = smov %s5666_s8 }
 0x2e4   : > { %s6815_s19 = smov %s5557_s21  ;;  %s6816_s20 = smov %s5561_s22 }
 0x2e5   : > { %s6817_s21 = smov %s6820_s24  ;;  %s6818_s22 = smov %s6824_s25 }
 0x2e6   :  { %13 = sbr.rel (!%p11_p2) target bundleno = 5 (0x5), region = 161 }

</bundles_post_ra>
